<compile_context>
chip_gen: v7x
topology: tpu7x:2x2x1
jax: 0.10.0
libtpu: 0.0.40
codegen_flags: <defaults>
</compile_context>

<pallas_src>
import functools

import jax
import jax.numpy as jnp
from jax.experimental import pallas as pl
from jax.experimental.pallas import tpu as pltpu

LANE = 128  # lane width / output-channel padding granularity


def _round_up(v, m):
    return (v + m - 1) // m * m


# ---------------------------------------------------------------------------
# Fused conv kernel:
#   (optional relu on input) -> kxk conv (+bias) -> (optional 2x2 avg-pool)
#   -> (optional residual add), all on one NHWC image block in VMEM.
# ---------------------------------------------------------------------------
def _fused_conv_kernel(*refs, k, pre_relu, pool, has_res):
    if has_res:
        x_ref, w_ref, b_ref, r_ref, o_ref = refs
    else:
        x_ref, w_ref, b_ref, o_ref = refs
        r_ref = None

    _, hp, wp, cin = x_ref.shape            # padded input block
    ho, wo = hp - k + 1, wp - k + 1         # conv output spatial dims

    x = x_ref[0]                            # (Hp, Wp, Cin)  bf16
    if pre_relu:
        x = jnp.maximum(x, 0.0)             # relu(pad(x)) == pad(relu(x))
    w = w_ref[...]                          # (k*k, Cin, tco) bf16

    # In-VMEM im2col: accumulate the k*k taps with MXU dots (f32 accumulator).
    acc = None
    for dy in range(k):
        for dx in range(k):
            patch = x[dy:dy + ho, dx:dx + wo, :].reshape(ho * wo, cin)
            part = jnp.dot(patch, w[dy * k + dx],
                           preferred_element_type=jnp.float32)
            acc = part if acc is None else acc + part

    y = acc + b_ref[...]                    # (ho*wo, tco) f32  (+ bias)

    if pool:                                # fused 2x2 average pool
        c = y.shape[-1]
        y = y.reshape(ho * (wo // 2), 2, c)         # pair along W
        y = y[:, 0, :] + y[:, 1, :]
        y = y.reshape(ho // 2, 2, wo // 2, c)       # pair along H
        y = (y[:, 0, :, :] + y[:, 1, :, :]) * 0.25
        y = y.reshape((ho // 2) * (wo // 2), c)

    if has_res:                             # fused residual add
        y = y + r_ref[0].astype(jnp.float32)

    o_ref[0] = y.astype(o_ref.dtype)


def conv_block(x, w, b, *, ksize, pad, pre_relu=False, pool=False,
               residual=None, out_dtype=jnp.bfloat16):
    """One fused conv over an NHWC activation.

    x        : (N, H, W, Cin)       bf16
    w        : (k*k, Cin, Cop)      bf16  (Cop = out channels padded to 128*n)
    b        : (1, Cop)             f32
    residual : (N, rows_out, Cop)   bf16 or None (added after optional pool)
    returns  : (N, rows_out, Cop)   out_dtype
    """
    N, H, W, Cin = x.shape
    kk, cin_w, Cop = w.shape
    assert kk == ksize * ksize and cin_w == Cin and Cop % LANE == 0

    xp = jnp.pad(x, ((0, 0), (pad, pad), (pad, pad), (0, 0)))
    Hp, Wp = H + 2 * pad, W + 2 * pad
    Ho, Wo = Hp - ksize + 1, Wp - ksize + 1
    if pool:
        assert Ho % 2 == 0 and Wo % 2 == 0
        rows_out = (Ho // 2) * (Wo // 2)
    else:
        rows_out = Ho * Wo

    co_tile = LANE                          # lane-dense output tiles
    n_co = Cop // co_tile

    # TODO(synk): for production channel counts where (k*k*Cin, Cop) weight or
    # the full padded image block no longer fit VMEM, add a Cin-chunk reduction
    # grid axis ("arbitrary") with a VMEM f32 accumulator + pl.when
    # init/finalize, and an H-row tiling with halo DMA; demo-scale blocks fit
    # a single K block comfortably.

    kern = functools.partial(_fused_conv_kernel, k=ksize, pre_relu=pre_relu,
                             pool=pool, has_res=residual is not None)

    in_specs = [
        pl.BlockSpec((1, Hp, Wp, Cin), lambda n, j: (n, 0, 0, 0)),
        pl.BlockSpec((kk, Cin, co_tile), lambda n, j: (0, 0, j)),
        pl.BlockSpec((1, co_tile), lambda n, j: (0, j)),
    ]
    args = [xp, w, b]
    if residual is not None:
        assert residual.shape == (N, rows_out, Cop)
        in_specs.append(pl.BlockSpec((1, rows_out, co_tile),
                                     lambda n, j: (n, 0, j)))
        args.append(residual)

    return pl.pallas_call(
        kern,
        out_shape=jax.ShapeDtypeStruct((N, rows_out, Cop), out_dtype),
        grid=(N, n_co),
        in_specs=in_specs,
        out_specs=pl.BlockSpec((1, rows_out, co_tile), lambda n, j: (n, 0, j)),
        compiler_params=pltpu.CompilerParams(
            dimension_semantics=("parallel", "parallel"),
            # explicit, generation-safe budget (raise/re-derive for big tiles)
            vmem_limit_bytes=32 * 1024 * 1024),
    )(*args)


# ---------------------------------------------------------------------------
# Weight preparation (layout + channel padding + bf16 cast) -- JAX glue
# ---------------------------------------------------------------------------
def _prep_conv(p, cin_pad, cout_pad):
    """(Cout,Cin,k,k) f32 -> (k*k, cin_pad, cout_pad) bf16, bias -> (1, cout_pad) f32."""
    w, b = p['w'], p['b']
    cout, cin, k, _ = w.shape
    wt = jnp.transpose(w, (2, 3, 1, 0)).reshape(k * k, cin, cout)
    wt = jnp.pad(wt, ((0, 0), (0, cin_pad - cin), (0, cout_pad - cout)))
    bp = jnp.pad(b, (0, cout_pad - cout)).reshape(1, cout_pad).astype(jnp.float32)
    return wt.astype(jnp.bfloat16), bp


# ---------------------------------------------------------------------------
# ResBlock.forward  (NCHW in / NCHW out, PyTorch semantics)
# ---------------------------------------------------------------------------
@functools.partial(jax.jit, static_argnames=("downsample",))
def res_block_forward(params, x, *, downsample=False):
    N, Cin, H, W = x.shape
    Cout = params['conv1']['w'].shape[0]
    cop = _round_up(Cout, LANE)
    learnable_sc = (Cin != Cout) or downsample
    assert learnable_sc == ('c_sc' in params)

    x_nhwc = jnp.transpose(x, (0, 2, 3, 1)).astype(jnp.bfloat16)  # one transpose in

    w1, b1 = _prep_conv(params['conv1'], Cin, cop)
    w2, b2 = _prep_conv(params['conv2'], cop, cop)

    # residual path, first conv:  h1 = conv1(relu(x))
    h1 = conv_block(x_nhwc, w1, b1, ksize=3, pad=1, pre_relu=True)
    h1 = h1.reshape(N, H, W, cop)

    # shortcut path
    if learnable_sc:
        wsc, bsc = _prep_conv(params['c_sc'], Cin, cop)
        sc = conv_block(x_nhwc, wsc, bsc, ksize=1, pad=0, pool=downsample)
    else:                                   # identity shortcut (Cin == Cout)
        sc = jnp.pad(x_nhwc, ((0, 0), (0, 0), (0, 0), (0, cop - Cin)))
        sc = sc.reshape(N, H * W, cop)

    # residual second conv + (pool) + residual add, all fused in one kernel
    out = conv_block(h1, w2, b2, ksize=3, pad=1, pre_relu=True,
                     pool=downsample, residual=sc, out_dtype=jnp.float32)

    Ho, Wo = (H // 2, W // 2) if downsample else (H, W)
    out = out.reshape(N, Ho, Wo, cop)[..., :Cout]
    return jnp.transpose(out, (0, 3, 1, 2))   # one transpose out, NCHW f32


# ---------------------------------------------------------------------------
# Deterministic parameter init (spectral norm as parameter preprocessing)
# ---------------------------------------------------------------------------
def spectral_normalize(w, key, eps=1e-4):
    w_mat = w.reshape(w.shape[0], -1)
    u = jax.random.normal(key, (w_mat.shape[0],), jnp.float32)
    u = u / (jnp.linalg.norm(u) + 1e-12)
    v = w_mat.T @ u
    v = v / (jnp.linalg.norm(v) + eps)
    u = w_mat @ v
    u = u / (jnp.linalg.norm(u) + eps)
    sigma = jnp.dot(u, w_mat @ v)
    return w / sigma


def init_sn_conv(key, in_ch, out_ch, k, eps=1e-4):
    kw, kb, ku = jax.random.split(key, 3)
    w = jax.random.normal(kw, (out_ch, in_ch, k, k), jnp.float32) / float((in_ch * k * k) ** 0.5)
    b = jax.random.normal(kb, (out_ch,), jnp.float32) * 0.01
    return {'w': spectral_normalize(w, ku, eps), 'b': b}


def init_res_block(key, in_ch, out_ch, downsample):
    k1, k2, k3 = jax.random.split(key, 3)
    p = {'conv1': init_sn_conv(k1, in_ch, out_ch, 3),
         'conv2': init_sn_conv(k2, out_ch, out_ch, 3)}
    if in_ch != out_ch or downsample:
        p['c_sc'] = init_sn_conv(k3, in_ch, out_ch, 1)
    return p


# ---------------------------------------------------------------------------
# Pure-JAX reference (for a loose numerical sanity check)
# ---------------------------------------------------------------------------
def _conv_ref(x, w, b, pad):
    y = jax.lax.conv_general_dilated(
        x, w, window_strides=(1, 1), padding=[(pad, pad), (pad, pad)],
        dimension_numbers=('NCHW', 'OIHW', 'NCHW'))
    return y + b[None, :, None, None]


def _pool_ref(x):
    return jax.lax.reduce_window(x, 0.0, jax.lax.add,
                                 (1, 1, 2, 2), (1, 1, 2, 2), 'VALID') * 0.25


def res_block_ref(params, x, downsample):
    h = _conv_ref(jax.nn.relu(x), params['conv1']['w'], params['conv1']['b'], 1)
    h = _conv_ref(jax.nn.relu(h), params['conv2']['w'], params['conv2']['b'], 1)
    if downsample:
        h = _pool_ref(h)
    sc = x
    if 'c_sc' in params:
        sc = _conv_ref(x, params['c_sc']['w'], params['c_sc']['b'], 0)
        if downsample:
            sc = _pool_ref(sc)
    return h + sc


# ---------------------------------------------------------------------------
# Main
# ---------------------------------------------------------------------------
if __name__ == "__main__":
    key = jax.random.PRNGKey(0)
    kp1, kp2, kx = jax.random.split(key, 3)

    N, H, W = 2, 16, 16
    in_ch, out_ch = 64, 96      # out_ch not a multiple of 128 -> exercises lane padding

    p1 = init_res_block(kp1, in_ch, out_ch, downsample=True)     # learnable sc + pool
    p2 = init_res_block(kp2, out_ch, out_ch, downsample=False)   # identity shortcut

    x = jax.random.normal(kx, (N, in_ch, H, W), jnp.float32)

    y1 = res_block_forward(p1, x, downsample=True)
    y2 = res_block_forward(p2, y1, downsample=False)
    jax.block_until_ready(y2)

    assert y1.shape == (N, out_ch, H // 2, W // 2)
    assert y2.shape == (N, out_ch, H // 2, W // 2)

    # loose end-to-end check vs pure-JAX reference (kernel uses bf16 MXU inputs)
    r1 = res_block_ref(p1, x, True)
    r2 = res_block_ref(p2, r1, False)
    err = float(jnp.max(jnp.abs(y2 - r2)) / (jnp.max(jnp.abs(r2)) + 1e-6))
    assert err < 0.1, f"mismatch vs reference: rel-max-err={err:.4f}"

    print("KERNEL_OK")
</pallas_src>

<mosaic_0001>
module attributes {stable_mosaic.version = 11 : i64} {
  func.func @_fused_conv_kernel(%arg0: i32, %arg1: i32, %arg2: memref<1x18x18x64xbf16, #tpu.memory_space<vmem>>, %arg3: memref<9x64x128xbf16, #tpu.memory_space<vmem>>, %arg4: memref<1x128xf32, #tpu.memory_space<vmem>>, %arg5: memref<1x256x128xbf16, #tpu.memory_space<vmem>>) attributes {dimension_semantics = [#tpu.dimension_semantics<parallel>, #tpu.dimension_semantics<parallel>], iteration_bounds = array<i64: 2, 1>, scalar_prefetch = 0 : i64, scratch_operands = 0 : i64, tpu.core_type = #tpu.core_type<tc>, window_params = [{transform_indices = @transform_0, window_bounds = array<i64: 1, 18, 18, 64>}, {transform_indices = @transform_1, window_bounds = array<i64: 9, 64, 128>}, {transform_indices = @transform_2, window_bounds = array<i64: 1, 128>}, {transform_indices = @transform_3, window_bounds = array<i64: 1, 256, 128>}]} {
    %c0 = arith.constant 0 : index
    %c0_0 = arith.constant 0 : index
    %c0_1 = arith.constant 0 : index
    %c0_2 = arith.constant 0 : index
    %0 = vector.load %arg2[%c0, %c0_0, %c0_1, %c0_2] : memref<1x18x18x64xbf16, #tpu.memory_space<vmem>>, vector<1x18x18x64xbf16>
    %1 = vector.shape_cast %0 : vector<1x18x18x64xbf16> to vector<18x18x64xbf16>
    %cst = arith.constant 0.000000e+00 : bf16
    %2 = vector.broadcast %cst : bf16 to vector<18x18x64xbf16>
    %3 = arith.maximumf %1, %2 : vector<18x18x64xbf16>
    %c0_3 = arith.constant 0 : index
    %c0_4 = arith.constant 0 : index
    %c0_5 = arith.constant 0 : index
    %4 = vector.load %arg3[%c0_3, %c0_4, %c0_5] : memref<9x64x128xbf16, #tpu.memory_space<vmem>>, vector<9x64x128xbf16>
    %5 = vector.extract_strided_slice %3 {offsets = [0, 0, 0], sizes = [16, 16, 64], strides = [1, 1, 1]} : vector<18x18x64xbf16> to vector<16x16x64xbf16>
    %6 = vector.shape_cast %5 : vector<16x16x64xbf16> to vector<256x64xbf16>
    %7 = vector.extract_strided_slice %4 {offsets = [0, 0, 0], sizes = [1, 64, 128], strides = [1, 1, 1]} : vector<9x64x128xbf16> to vector<1x64x128xbf16>
    %8 = vector.shape_cast %7 : vector<1x64x128xbf16> to vector<64x128xbf16>
    %cst_6 = arith.constant dense<0.000000e+00> : vector<256x128xf32>
    %9 = tpu.matmul %6, %8, %cst_6 {dimension_numbers = #tpu.dot_dimension_numbers<[1], [0], [0], [1], [0, 0, 1, 1], [], []>} : vector<256x64xbf16>, vector<64x128xbf16>, vector<256x128xf32> -> vector<256x128xf32>
    %10 = vector.extract_strided_slice %3 {offsets = [0, 1, 0], sizes = [16, 16, 64], strides = [1, 1, 1]} : vector<18x18x64xbf16> to vector<16x16x64xbf16>
    %11 = vector.shape_cast %10 : vector<16x16x64xbf16> to vector<256x64xbf16>
    %12 = vector.extract_strided_slice %4 {offsets = [1, 0, 0], sizes = [1, 64, 128], strides = [1, 1, 1]} : vector<9x64x128xbf16> to vector<1x64x128xbf16>
    %13 = vector.shape_cast %12 : vector<1x64x128xbf16> to vector<64x128xbf16>
    %cst_7 = arith.constant dense<0.000000e+00> : vector<256x128xf32>
    %14 = tpu.matmul %11, %13, %cst_7 {dimension_numbers = #tpu.dot_dimension_numbers<[1], [0], [0], [1], [0, 0, 1, 1], [], []>} : vector<256x64xbf16>, vector<64x128xbf16>, vector<256x128xf32> -> vector<256x128xf32>
    %15 = arith.addf %9, %14 : vector<256x128xf32>
    %16 = vector.extract_strided_slice %3 {offsets = [0, 2, 0], sizes = [16, 16, 64], strides = [1, 1, 1]} : vector<18x18x64xbf16> to vector<16x16x64xbf16>
    %17 = vector.shape_cast %16 : vector<16x16x64xbf16> to vector<256x64xbf16>
    %18 = vector.extract_strided_slice %4 {offsets = [2, 0, 0], sizes = [1, 64, 128], strides = [1, 1, 1]} : vector<9x64x128xbf16> to vector<1x64x128xbf16>
    %19 = vector.shape_cast %18 : vector<1x64x128xbf16> to vector<64x128xbf16>
    %cst_8 = arith.constant dense<0.000000e+00> : vector<256x128xf32>
    %20 = tpu.matmul %17, %19, %cst_8 {dimension_numbers = #tpu.dot_dimension_numbers<[1], [0], [0], [1], [0, 0, 1, 1], [], []>} : vector<256x64xbf16>, vector<64x128xbf16>, vector<256x128xf32> -> vector<256x128xf32>
    %21 = arith.addf %15, %20 : vector<256x128xf32>
    %22 = vector.extract_strided_slice %3 {offsets = [1, 0, 0], sizes = [16, 16, 64], strides = [1, 1, 1]} : vector<18x18x64xbf16> to vector<16x16x64xbf16>
    %23 = vector.shape_cast %22 : vector<16x16x64xbf16> to vector<256x64xbf16>
    %24 = vector.extract_strided_slice %4 {offsets = [3, 0, 0], sizes = [1, 64, 128], strides = [1, 1, 1]} : vector<9x64x128xbf16> to vector<1x64x128xbf16>
    %25 = vector.shape_cast %24 : vector<1x64x128xbf16> to vector<64x128xbf16>
    %cst_9 = arith.constant dense<0.000000e+00> : vector<256x128xf32>
    %26 = tpu.matmul %23, %25, %cst_9 {dimension_numbers = #tpu.dot_dimension_numbers<[1], [0], [0], [1], [0, 0, 1, 1], [], []>} : vector<256x64xbf16>, vector<64x128xbf16>, vector<256x128xf32> -> vector<256x128xf32>
    %27 = arith.addf %21, %26 : vector<256x128xf32>
    %28 = vector.extract_strided_slice %3 {offsets = [1, 1, 0], sizes = [16, 16, 64], strides = [1, 1, 1]} : vector<18x18x64xbf16> to vector<16x16x64xbf16>
    %29 = vector.shape_cast %28 : vector<16x16x64xbf16> to vector<256x64xbf16>
    %30 = vector.extract_strided_slice %4 {offsets = [4, 0, 0], sizes = [1, 64, 128], strides = [1, 1, 1]} : vector<9x64x128xbf16> to vector<1x64x128xbf16>
    %31 = vector.shape_cast %30 : vector<1x64x128xbf16> to vector<64x128xbf16>
    %cst_10 = arith.constant dense<0.000000e+00> : vector<256x128xf32>
    %32 = tpu.matmul %29, %31, %cst_10 {dimension_numbers = #tpu.dot_dimension_numbers<[1], [0], [0], [1], [0, 0, 1, 1], [], []>} : vector<256x64xbf16>, vector<64x128xbf16>, vector<256x128xf32> -> vector<256x128xf32>
    %33 = arith.addf %27, %32 : vector<256x128xf32>
    %34 = vector.extract_strided_slice %3 {offsets = [1, 2, 0], sizes = [16, 16, 64], strides = [1, 1, 1]} : vector<18x18x64xbf16> to vector<16x16x64xbf16>
    %35 = vector.shape_cast %34 : vector<16x16x64xbf16> to vector<256x64xbf16>
    %36 = vector.extract_strided_slice %4 {offsets = [5, 0, 0], sizes = [1, 64, 128], strides = [1, 1, 1]} : vector<9x64x128xbf16> to vector<1x64x128xbf16>
    %37 = vector.shape_cast %36 : vector<1x64x128xbf16> to vector<64x128xbf16>
    %cst_11 = arith.constant dense<0.000000e+00> : vector<256x128xf32>
    %38 = tpu.matmul %35, %37, %cst_11 {dimension_numbers = #tpu.dot_dimension_numbers<[1], [0], [0], [1], [0, 0, 1, 1], [], []>} : vector<256x64xbf16>, vector<64x128xbf16>, vector<256x128xf32> -> vector<256x128xf32>
    %39 = arith.addf %33, %38 : vector<256x128xf32>
    %40 = vector.extract_strided_slice %3 {offsets = [2, 0, 0], sizes = [16, 16, 64], strides = [1, 1, 1]} : vector<18x18x64xbf16> to vector<16x16x64xbf16>
    %41 = vector.shape_cast %40 : vector<16x16x64xbf16> to vector<256x64xbf16>
    %42 = vector.extract_strided_slice %4 {offsets = [6, 0, 0], sizes = [1, 64, 128], strides = [1, 1, 1]} : vector<9x64x128xbf16> to vector<1x64x128xbf16>
    %43 = vector.shape_cast %42 : vector<1x64x128xbf16> to vector<64x128xbf16>
    %cst_12 = arith.constant dense<0.000000e+00> : vector<256x128xf32>
    %44 = tpu.matmul %41, %43, %cst_12 {dimension_numbers = #tpu.dot_dimension_numbers<[1], [0], [0], [1], [0, 0, 1, 1], [], []>} : vector<256x64xbf16>, vector<64x128xbf16>, vector<256x128xf32> -> vector<256x128xf32>
    %45 = arith.addf %39, %44 : vector<256x128xf32>
    %46 = vector.extract_strided_slice %3 {offsets = [2, 1, 0], sizes = [16, 16, 64], strides = [1, 1, 1]} : vector<18x18x64xbf16> to vector<16x16x64xbf16>
    %47 = vector.shape_cast %46 : vector<16x16x64xbf16> to vector<256x64xbf16>
    %48 = vector.extract_strided_slice %4 {offsets = [7, 0, 0], sizes = [1, 64, 128], strides = [1, 1, 1]} : vector<9x64x128xbf16> to vector<1x64x128xbf16>
    %49 = vector.shape_cast %48 : vector<1x64x128xbf16> to vector<64x128xbf16>
    %cst_13 = arith.constant dense<0.000000e+00> : vector<256x128xf32>
    %50 = tpu.matmul %47, %49, %cst_13 {dimension_numbers = #tpu.dot_dimension_numbers<[1], [0], [0], [1], [0, 0, 1, 1], [], []>} : vector<256x64xbf16>, vector<64x128xbf16>, vector<256x128xf32> -> vector<256x128xf32>
    %51 = arith.addf %45, %50 : vector<256x128xf32>
    %52 = vector.extract_strided_slice %3 {offsets = [2, 2, 0], sizes = [16, 16, 64], strides = [1, 1, 1]} : vector<18x18x64xbf16> to vector<16x16x64xbf16>
    %53 = vector.shape_cast %52 : vector<16x16x64xbf16> to vector<256x64xbf16>
    %54 = vector.extract_strided_slice %4 {offsets = [8, 0, 0], sizes = [1, 64, 128], strides = [1, 1, 1]} : vector<9x64x128xbf16> to vector<1x64x128xbf16>
    %55 = vector.shape_cast %54 : vector<1x64x128xbf16> to vector<64x128xbf16>
    %cst_14 = arith.constant dense<0.000000e+00> : vector<256x128xf32>
    %56 = tpu.matmul %53, %55, %cst_14 {dimension_numbers = #tpu.dot_dimension_numbers<[1], [0], [0], [1], [0, 0, 1, 1], [], []>} : vector<256x64xbf16>, vector<64x128xbf16>, vector<256x128xf32> -> vector<256x128xf32>
    %57 = arith.addf %51, %56 : vector<256x128xf32>
    %c0_15 = arith.constant 0 : index
    %c0_16 = arith.constant 0 : index
    %58 = vector.load %arg4[%c0_15, %c0_16] : memref<1x128xf32, #tpu.memory_space<vmem>>, vector<1x128xf32>
    %59 = vector.broadcast %58 : vector<1x128xf32> to vector<256x128xf32>
    %60 = arith.addf %57, %59 : vector<256x128xf32>
    %61 = arith.truncf %60 : vector<256x128xf32> to vector<256x128xbf16>
    %c0_17 = arith.constant 0 : index
    %c0_18 = arith.constant 0 : index
    %c0_19 = arith.constant 0 : index
    %62 = vector.load %arg5[%c0_17, %c0_18, %c0_19] : memref<1x256x128xbf16, #tpu.memory_space<vmem>>, vector<1x256x128xbf16>
    %63 = vector.shape_cast %62 : vector<1x256x128xbf16> to vector<256x128xbf16>
    %64 = vector.shape_cast %61 : vector<256x128xbf16> to vector<1x256x128xbf16>
    tpu.vector_store %arg5[%c0_17, %c0_18, %c0_19], %64 {strides = array<i32>} : memref<1x256x128xbf16, #tpu.memory_space<vmem>>, vector<1x256x128xbf16>,
    return
  }
  func.func @transform_0(%arg0: i32, %arg1: i32) -> (i32, i32, i32, i32) {
    %c0_i32 = arith.constant 0 : i32
    %c0_i32_0 = arith.constant 0 : i32
    %c0_i32_1 = arith.constant 0 : i32
    %c0_i32_2 = arith.constant 0 : i32
    return %arg0, %c0_i32, %c0_i32_0, %c0_i32_1 : i32, i32, i32, i32
  }
  func.func @transform_1(%arg0: i32, %arg1: i32) -> (i32, i32, i32) {
    %c0_i32 = arith.constant 0 : i32
    %c0_i32_0 = arith.constant 0 : i32
    %c0_i32_1 = arith.constant 0 : i32
    return %c0_i32, %c0_i32_0, %arg1 : i32, i32, i32
  }
  func.func @transform_2(%arg0: i32, %arg1: i32) -> (i32, i32) {
    %c0_i32 = arith.constant 0 : i32
    %c0_i32_0 = arith.constant 0 : i32
    return %c0_i32, %arg1 : i32, i32
  }
  func.func @transform_3(%arg0: i32, %arg1: i32) -> (i32, i32, i32) {
    %c0_i32 = arith.constant 0 : i32
    %c0_i32_0 = arith.constant 0 : i32
    return %arg0, %c0_i32, %arg1 : i32, i32, i32
  }
}

module attributes {stable_mosaic.version = 11 : i64} {
  func.func @_fused_conv_kernel(%arg0: i32, %arg1: i32, %arg2: memref<1x16x16x64xbf16, #tpu.memory_space<vmem>>, %arg3: memref<1x64x128xbf16, #tpu.memory_space<vmem>>, %arg4: memref<1x128xf32, #tpu.memory_space<vmem>>, %arg5: memref<1x64x128xbf16, #tpu.memory_space<vmem>>) attributes {dimension_semantics = [#tpu.dimension_semantics<parallel>, #tpu.dimension_semantics<parallel>], iteration_bounds = array<i64: 2, 1>, scalar_prefetch = 0 : i64, scratch_operands = 0 : i64, tpu.core_type = #tpu.core_type<tc>, window_params = [{transform_indices = @transform_0, window_bounds = array<i64: 1, 16, 16, 64>}, {transform_indices = @transform_1, window_bounds = array<i64: 1, 64, 128>}, {transform_indices = @transform_2, window_bounds = array<i64: 1, 128>}, {transform_indices = @transform_3, window_bounds = array<i64: 1, 64, 128>}]} {
    %c0 = arith.constant 0 : index
    %c0_0 = arith.constant 0 : index
    %c0_1 = arith.constant 0 : index
    %c0_2 = arith.constant 0 : index
    %0 = vector.load %arg2[%c0, %c0_0, %c0_1, %c0_2] : memref<1x16x16x64xbf16, #tpu.memory_space<vmem>>, vector<1x16x16x64xbf16>
    %1 = vector.shape_cast %0 : vector<1x16x16x64xbf16> to vector<16x16x64xbf16>
    %c0_3 = arith.constant 0 : index
    %c0_4 = arith.constant 0 : index
    %c0_5 = arith.constant 0 : index
    %2 = vector.load %arg3[%c0_3, %c0_4, %c0_5] : memref<1x64x128xbf16, #tpu.memory_space<vmem>>, vector<1x64x128xbf16>
    %3 = vector.shape_cast %1 : vector<16x16x64xbf16> to vector<256x64xbf16>
    %4 = vector.shape_cast %2 : vector<1x64x128xbf16> to vector<64x128xbf16>
    %cst = arith.constant dense<0.000000e+00> : vector<256x128xf32>
    %5 = tpu.matmul %3, %4, %cst {dimension_numbers = #tpu.dot_dimension_numbers<[1], [0], [0], [1], [0, 0, 1, 1], [], []>} : vector<256x64xbf16>, vector<64x128xbf16>, vector<256x128xf32> -> vector<256x128xf32>
    %c0_6 = arith.constant 0 : index
    %c0_7 = arith.constant 0 : index
    %6 = vector.load %arg4[%c0_6, %c0_7] : memref<1x128xf32, #tpu.memory_space<vmem>>, vector<1x128xf32>
    %7 = vector.broadcast %6 : vector<1x128xf32> to vector<256x128xf32>
    %8 = arith.addf %5, %7 : vector<256x128xf32>
    %9 = vector.shape_cast %8 : vector<256x128xf32> to vector<128x2x128xf32>
    %10 = vector.extract_strided_slice %9 {offsets = [0, 0, 0], sizes = [128, 1, 128], strides = [1, 1, 1]} : vector<128x2x128xf32> to vector<128x1x128xf32>
    %11 = vector.shape_cast %10 : vector<128x1x128xf32> to vector<128x128xf32>
    %12 = vector.extract_strided_slice %9 {offsets = [0, 1, 0], sizes = [128, 1, 128], strides = [1, 1, 1]} : vector<128x2x128xf32> to vector<128x1x128xf32>
    %13 = vector.shape_cast %12 : vector<128x1x128xf32> to vector<128x128xf32>
    %14 = arith.addf %11, %13 : vector<128x128xf32>
    %15 = vector.shape_cast %14 : vector<128x128xf32> to vector<8x2x8x128xf32>
    %16 = vector.extract_strided_slice %15 {offsets = [0, 0, 0, 0], sizes = [8, 1, 8, 128], strides = [1, 1, 1, 1]} : vector<8x2x8x128xf32> to vector<8x1x8x128xf32>
    %17 = vector.shape_cast %16 : vector<8x1x8x128xf32> to vector<8x8x128xf32>
    %18 = vector.extract_strided_slice %15 {offsets = [0, 1, 0, 0], sizes = [8, 1, 8, 128], strides = [1, 1, 1, 1]} : vector<8x2x8x128xf32> to vector<8x1x8x128xf32>
    %19 = vector.shape_cast %18 : vector<8x1x8x128xf32> to vector<8x8x128xf32>
    %20 = arith.addf %17, %19 : vector<8x8x128xf32>
    %cst_8 = arith.constant 2.500000e-01 : f32
    %21 = vector.broadcast %cst_8 : f32 to vector<8x8x128xf32>
    %22 = arith.mulf %20, %21 : vector<8x8x128xf32>
    %23 = vector.shape_cast %22 : vector<8x8x128xf32> to vector<64x128xf32>
    %24 = arith.truncf %23 : vector<64x128xf32> to vector<64x128xbf16>
    %c0_9 = arith.constant 0 : index
    %c0_10 = arith.constant 0 : index
    %c0_11 = arith.constant 0 : index
    %25 = vector.load %arg5[%c0_9, %c0_10, %c0_11] : memref<1x64x128xbf16, #tpu.memory_space<vmem>>, vector<1x64x128xbf16>
    %26 = vector.shape_cast %25 : vector<1x64x128xbf16> to vector<64x128xbf16>
    %27 = vector.shape_cast %24 : vector<64x128xbf16> to vector<1x64x128xbf16>
    tpu.vector_store %arg5[%c0_9, %c0_10, %c0_11], %27 {strides = array<i32>} : memref<1x64x128xbf16, #tpu.memory_space<vmem>>, vector<1x64x128xbf16>,
    return
  }
  func.func @transform_0(%arg0: i32, %arg1: i32) -> (i32, i32, i32, i32) {
    %c0_i32 = arith.constant 0 : i32
    %c0_i32_0 = arith.constant 0 : i32
    %c0_i32_1 = arith.constant 0 : i32
    %c0_i32_2 = arith.constant 0 : i32
    return %arg0, %c0_i32, %c0_i32_0, %c0_i32_1 : i32, i32, i32, i32
  }
  func.func @transform_1(%arg0: i32, %arg1: i32) -> (i32, i32, i32) {
    %c0_i32 = arith.constant 0 : i32
    %c0_i32_0 = arith.constant 0 : i32
    %c0_i32_1 = arith.constant 0 : i32
    return %c0_i32, %c0_i32_0, %arg1 : i32, i32, i32
  }
  func.func @transform_2(%arg0: i32, %arg1: i32) -> (i32, i32) {
    %c0_i32 = arith.constant 0 : i32
    %c0_i32_0 = arith.constant 0 : i32
    return %c0_i32, %arg1 : i32, i32
  }
  func.func @transform_3(%arg0: i32, %arg1: i32) -> (i32, i32, i32) {
    %c0_i32 = arith.constant 0 : i32
    %c0_i32_0 = arith.constant 0 : i32
    return %arg0, %c0_i32, %arg1 : i32, i32, i32
  }
}

module attributes {stable_mosaic.version = 11 : i64} {
  func.func @_fused_conv_kernel(%arg0: i32, %arg1: i32, %arg2: memref<1x18x18x128xbf16, #tpu.memory_space<vmem>>, %arg3: memref<9x128x128xbf16, #tpu.memory_space<vmem>>, %arg4: memref<1x128xf32, #tpu.memory_space<vmem>>, %arg5: memref<1x64x128xbf16, #tpu.memory_space<vmem>>, %arg6: memref<1x64x128xf32, #tpu.memory_space<vmem>>) attributes {dimension_semantics = [#tpu.dimension_semantics<parallel>, #tpu.dimension_semantics<parallel>], iteration_bounds = array<i64: 2, 1>, scalar_prefetch = 0 : i64, scratch_operands = 0 : i64, tpu.core_type = #tpu.core_type<tc>, window_params = [{transform_indices = @transform_0, window_bounds = array<i64: 1, 18, 18, 128>}, {transform_indices = @transform_1, window_bounds = array<i64: 9, 128, 128>}, {transform_indices = @transform_2, window_bounds = array<i64: 1, 128>}, {transform_indices = @transform_3, window_bounds = array<i64: 1, 64, 128>}, {transform_indices = @transform_4, window_bounds = array<i64: 1, 64, 128>}]} {
    %c0 = arith.constant 0 : index
    %c0_0 = arith.constant 0 : index
    %c0_1 = arith.constant 0 : index
    %c0_2 = arith.constant 0 : index
    %0 = vector.load %arg2[%c0, %c0_0, %c0_1, %c0_2] : memref<1x18x18x128xbf16, #tpu.memory_space<vmem>>, vector<1x18x18x128xbf16>
    %1 = vector.shape_cast %0 : vector<1x18x18x128xbf16> to vector<18x18x128xbf16>
    %cst = arith.constant 0.000000e+00 : bf16
    %2 = vector.broadcast %cst : bf16 to vector<18x18x128xbf16>
    %3 = arith.maximumf %1, %2 : vector<18x18x128xbf16>
    %c0_3 = arith.constant 0 : index
    %c0_4 = arith.constant 0 : index
    %c0_5 = arith.constant 0 : index
    %4 = vector.load %arg3[%c0_3, %c0_4, %c0_5] : memref<9x128x128xbf16, #tpu.memory_space<vmem>>, vector<9x128x128xbf16>
    %5 = vector.extract_strided_slice %3 {offsets = [0, 0, 0], sizes = [16, 16, 128], strides = [1, 1, 1]} : vector<18x18x128xbf16> to vector<16x16x128xbf16>
    %6 = vector.shape_cast %5 : vector<16x16x128xbf16> to vector<256x128xbf16>
    %7 = vector.extract_strided_slice %4 {offsets = [0, 0, 0], sizes = [1, 128, 128], strides = [1, 1, 1]} : vector<9x128x128xbf16> to vector<1x128x128xbf16>
    %8 = vector.shape_cast %7 : vector<1x128x128xbf16> to vector<128x128xbf16>
    %cst_6 = arith.constant dense<0.000000e+00> : vector<256x128xf32>
    %9 = tpu.matmul %6, %8, %cst_6 {dimension_numbers = #tpu.dot_dimension_numbers<[1], [0], [0], [1], [0, 0, 1, 1], [], []>} : vector<256x128xbf16>, vector<128x128xbf16>, vector<256x128xf32> -> vector<256x128xf32>
    %10 = vector.extract_strided_slice %3 {offsets = [0, 1, 0], sizes = [16, 16, 128], strides = [1, 1, 1]} : vector<18x18x128xbf16> to vector<16x16x128xbf16>
    %11 = vector.shape_cast %10 : vector<16x16x128xbf16> to vector<256x128xbf16>
    %12 = vector.extract_strided_slice %4 {offsets = [1, 0, 0], sizes = [1, 128, 128], strides = [1, 1, 1]} : vector<9x128x128xbf16> to vector<1x128x128xbf16>
    %13 = vector.shape_cast %12 : vector<1x128x128xbf16> to vector<128x128xbf16>
    %cst_7 = arith.constant dense<0.000000e+00> : vector<256x128xf32>
    %14 = tpu.matmul %11, %13, %cst_7 {dimension_numbers = #tpu.dot_dimension_numbers<[1], [0], [0], [1], [0, 0, 1, 1], [], []>} : vector<256x128xbf16>, vector<128x128xbf16>, vector<256x128xf32> -> vector<256x128xf32>
    %15 = arith.addf %9, %14 : vector<256x128xf32>
    %16 = vector.extract_strided_slice %3 {offsets = [0, 2, 0], sizes = [16, 16, 128], strides = [1, 1, 1]} : vector<18x18x128xbf16> to vector<16x16x128xbf16>
    %17 = vector.shape_cast %16 : vector<16x16x128xbf16> to vector<256x128xbf16>
    %18 = vector.extract_strided_slice %4 {offsets = [2, 0, 0], sizes = [1, 128, 128], strides = [1, 1, 1]} : vector<9x128x128xbf16> to vector<1x128x128xbf16>
    %19 = vector.shape_cast %18 : vector<1x128x128xbf16> to vector<128x128xbf16>
    %cst_8 = arith.constant dense<0.000000e+00> : vector<256x128xf32>
    %20 = tpu.matmul %17, %19, %cst_8 {dimension_numbers = #tpu.dot_dimension_numbers<[1], [0], [0], [1], [0, 0, 1, 1], [], []>} : vector<256x128xbf16>, vector<128x128xbf16>, vector<256x128xf32> -> vector<256x128xf32>
    %21 = arith.addf %15, %20 : vector<256x128xf32>
    %22 = vector.extract_strided_slice %3 {offsets = [1, 0, 0], sizes = [16, 16, 128], strides = [1, 1, 1]} : vector<18x18x128xbf16> to vector<16x16x128xbf16>
    %23 = vector.shape_cast %22 : vector<16x16x128xbf16> to vector<256x128xbf16>
    %24 = vector.extract_strided_slice %4 {offsets = [3, 0, 0], sizes = [1, 128, 128], strides = [1, 1, 1]} : vector<9x128x128xbf16> to vector<1x128x128xbf16>
    %25 = vector.shape_cast %24 : vector<1x128x128xbf16> to vector<128x128xbf16>
    %cst_9 = arith.constant dense<0.000000e+00> : vector<256x128xf32>
    %26 = tpu.matmul %23, %25, %cst_9 {dimension_numbers = #tpu.dot_dimension_numbers<[1], [0], [0], [1], [0, 0, 1, 1], [], []>} : vector<256x128xbf16>, vector<128x128xbf16>, vector<256x128xf32> -> vector<256x128xf32>
    %27 = arith.addf %21, %26 : vector<256x128xf32>
    %28 = vector.extract_strided_slice %3 {offsets = [1, 1, 0], sizes = [16, 16, 128], strides = [1, 1, 1]} : vector<18x18x128xbf16> to vector<16x16x128xbf16>
    %29 = vector.shape_cast %28 : vector<16x16x128xbf16> to vector<256x128xbf16>
    %30 = vector.extract_strided_slice %4 {offsets = [4, 0, 0], sizes = [1, 128, 128], strides = [1, 1, 1]} : vector<9x128x128xbf16> to vector<1x128x128xbf16>
    %31 = vector.shape_cast %30 : vector<1x128x128xbf16> to vector<128x128xbf16>
    %cst_10 = arith.constant dense<0.000000e+00> : vector<256x128xf32>
    %32 = tpu.matmul %29, %31, %cst_10 {dimension_numbers = #tpu.dot_dimension_numbers<[1], [0], [0], [1], [0, 0, 1, 1], [], []>} : vector<256x128xbf16>, vector<128x128xbf16>, vector<256x128xf32> -> vector<256x128xf32>
    %33 = arith.addf %27, %32 : vector<256x128xf32>
    %34 = vector.extract_strided_slice %3 {offsets = [1, 2, 0], sizes = [16, 16, 128], strides = [1, 1, 1]} : vector<18x18x128xbf16> to vector<16x16x128xbf16>
    %35 = vector.shape_cast %34 : vector<16x16x128xbf16> to vector<256x128xbf16>
    %36 = vector.extract_strided_slice %4 {offsets = [5, 0, 0], sizes = [1, 128, 128], strides = [1, 1, 1]} : vector<9x128x128xbf16> to vector<1x128x128xbf16>
    %37 = vector.shape_cast %36 : vector<1x128x128xbf16> to vector<128x128xbf16>
    %cst_11 = arith.constant dense<0.000000e+00> : vector<256x128xf32>
    %38 = tpu.matmul %35, %37, %cst_11 {dimension_numbers = #tpu.dot_dimension_numbers<[1], [0], [0], [1], [0, 0, 1, 1], [], []>} : vector<256x128xbf16>, vector<128x128xbf16>, vector<256x128xf32> -> vector<256x128xf32>
    %39 = arith.addf %33, %38 : vector<256x128xf32>
    %40 = vector.extract_strided_slice %3 {offsets = [2, 0, 0], sizes = [16, 16, 128], strides = [1, 1, 1]} : vector<18x18x128xbf16> to vector<16x16x128xbf16>
    %41 = vector.shape_cast %40 : vector<16x16x128xbf16> to vector<256x128xbf16>
    %42 = vector.extract_strided_slice %4 {offsets = [6, 0, 0], sizes = [1, 128, 128], strides = [1, 1, 1]} : vector<9x128x128xbf16> to vector<1x128x128xbf16>
    %43 = vector.shape_cast %42 : vector<1x128x128xbf16> to vector<128x128xbf16>
    %cst_12 = arith.constant dense<0.000000e+00> : vector<256x128xf32>
    %44 = tpu.matmul %41, %43, %cst_12 {dimension_numbers = #tpu.dot_dimension_numbers<[1], [0], [0], [1], [0, 0, 1, 1], [], []>} : vector<256x128xbf16>, vector<128x128xbf16>, vector<256x128xf32> -> vector<256x128xf32>
    %45 = arith.addf %39, %44 : vector<256x128xf32>
    %46 = vector.extract_strided_slice %3 {offsets = [2, 1, 0], sizes = [16, 16, 128], strides = [1, 1, 1]} : vector<18x18x128xbf16> to vector<16x16x128xbf16>
    %47 = vector.shape_cast %46 : vector<16x16x128xbf16> to vector<256x128xbf16>
    %48 = vector.extract_strided_slice %4 {offsets = [7, 0, 0], sizes = [1, 128, 128], strides = [1, 1, 1]} : vector<9x128x128xbf16> to vector<1x128x128xbf16>
    %49 = vector.shape_cast %48 : vector<1x128x128xbf16> to vector<128x128xbf16>
    %cst_13 = arith.constant dense<0.000000e+00> : vector<256x128xf32>
    %50 = tpu.matmul %47, %49, %cst_13 {dimension_numbers = #tpu.dot_dimension_numbers<[1], [0], [0], [1], [0, 0, 1, 1], [], []>} : vector<256x128xbf16>, vector<128x128xbf16>, vector<256x128xf32> -> vector<256x128xf32>
    %51 = arith.addf %45, %50 : vector<256x128xf32>
    %52 = vector.extract_strided_slice %3 {offsets = [2, 2, 0], sizes = [16, 16, 128], strides = [1, 1, 1]} : vector<18x18x128xbf16> to vector<16x16x128xbf16>
    %53 = vector.shape_cast %52 : vector<16x16x128xbf16> to vector<256x128xbf16>
    %54 = vector.extract_strided_slice %4 {offsets = [8, 0, 0], sizes = [1, 128, 128], strides = [1, 1, 1]} : vector<9x128x128xbf16> to vector<1x128x128xbf16>
    %55 = vector.shape_cast %54 : vector<1x128x128xbf16> to vector<128x128xbf16>
    %cst_14 = arith.constant dense<0.000000e+00> : vector<256x128xf32>
    %56 = tpu.matmul %53, %55, %cst_14 {dimension_numbers = #tpu.dot_dimension_numbers<[1], [0], [0], [1], [0, 0, 1, 1], [], []>} : vector<256x128xbf16>, vector<128x128xbf16>, vector<256x128xf32> -> vector<256x128xf32>
    %57 = arith.addf %51, %56 : vector<256x128xf32>
    %c0_15 = arith.constant 0 : index
    %c0_16 = arith.constant 0 : index
    %58 = vector.load %arg4[%c0_15, %c0_16] : memref<1x128xf32, #tpu.memory_space<vmem>>, vector<1x128xf32>
    %59 = vector.broadcast %58 : vector<1x128xf32> to vector<256x128xf32>
    %60 = arith.addf %57, %59 : vector<256x128xf32>
    %61 = vector.shape_cast %60 : vector<256x128xf32> to vector<128x2x128xf32>
    %62 = vector.extract_strided_slice %61 {offsets = [0, 0, 0], sizes = [128, 1, 128], strides = [1, 1, 1]} : vector<128x2x128xf32> to vector<128x1x128xf32>
    %63 = vector.shape_cast %62 : vector<128x1x128xf32> to vector<128x128xf32>
    %64 = vector.extract_strided_slice %61 {offsets = [0, 1, 0], sizes = [128, 1, 128], strides = [1, 1, 1]} : vector<128x2x128xf32> to vector<128x1x128xf32>
    %65 = vector.shape_cast %64 : vector<128x1x128xf32> to vector<128x128xf32>
    %66 = arith.addf %63, %65 : vector<128x128xf32>
    %67 = vector.shape_cast %66 : vector<128x128xf32> to vector<8x2x8x128xf32>
    %68 = vector.extract_strided_slice %67 {offsets = [0, 0, 0, 0], sizes = [8, 1, 8, 128], strides = [1, 1, 1, 1]} : vector<8x2x8x128xf32> to vector<8x1x8x128xf32>
    %69 = vector.shape_cast %68 : vector<8x1x8x128xf32> to vector<8x8x128xf32>
    %70 = vector.extract_strided_slice %67 {offsets = [0, 1, 0, 0], sizes = [8, 1, 8, 128], strides = [1, 1, 1, 1]} : vector<8x2x8x128xf32> to vector<8x1x8x128xf32>
    %71 = vector.shape_cast %70 : vector<8x1x8x128xf32> to vector<8x8x128xf32>
    %72 = arith.addf %69, %71 : vector<8x8x128xf32>
    %cst_17 = arith.constant 2.500000e-01 : f32
    %73 = vector.broadcast %cst_17 : f32 to vector<8x8x128xf32>
    %74 = arith.mulf %72, %73 : vector<8x8x128xf32>
    %75 = vector.shape_cast %74 : vector<8x8x128xf32> to vector<64x128xf32>
    %c0_18 = arith.constant 0 : index
    %c0_19 = arith.constant 0 : index
    %c0_20 = arith.constant 0 : index
    %76 = vector.load %arg5[%c0_18, %c0_19, %c0_20] : memref<1x64x128xbf16, #tpu.memory_space<vmem>>, vector<1x64x128xbf16>
    %77 = vector.shape_cast %76 : vector<1x64x128xbf16> to vector<64x128xbf16>
    %78 = arith.extf %77 : vector<64x128xbf16> to vector<64x128xf32>
    %79 = arith.addf %75, %78 : vector<64x128xf32>
    %c0_21 = arith.constant 0 : index
    %c0_22 = arith.constant 0 : index
    %c0_23 = arith.constant 0 : index
    %80 = vector.load %arg6[%c0_21, %c0_22, %c0_23] : memref<1x64x128xf32, #tpu.memory_space<vmem>>, vector<1x64x128xf32>
    %81 = vector.shape_cast %80 : vector<1x64x128xf32> to vector<64x128xf32>
    %82 = vector.shape_cast %79 : vector<64x128xf32> to vector<1x64x128xf32>
    tpu.vector_store %arg6[%c0_21, %c0_22, %c0_23], %82 {strides = array<i32>} : memref<1x64x128xf32, #tpu.memory_space<vmem>>, vector<1x64x128xf32>,
    return
  }
  func.func @transform_0(%arg0: i32, %arg1: i32) -> (i32, i32, i32, i32) {
    %c0_i32 = arith.constant 0 : i32
    %c0_i32_0 = arith.constant 0 : i32
    %c0_i32_1 = arith.constant 0 : i32
    %c0_i32_2 = arith.constant 0 : i32
    return %arg0, %c0_i32, %c0_i32_0, %c0_i32_1 : i32, i32, i32, i32
  }
  func.func @transform_1(%arg0: i32, %arg1: i32) -> (i32, i32, i32) {
    %c0_i32 = arith.constant 0 : i32
    %c0_i32_0 = arith.constant 0 : i32
    %c0_i32_1 = arith.constant 0 : i32
    return %c0_i32, %c0_i32_0, %arg1 : i32, i32, i32
  }
  func.func @transform_2(%arg0: i32, %arg1: i32) -> (i32, i32) {
    %c0_i32 = arith.constant 0 : i32
    %c0_i32_0 = arith.constant 0 : i32
    return %c0_i32, %arg1 : i32, i32
  }
  func.func @transform_3(%arg0: i32, %arg1: i32) -> (i32, i32, i32) {
    %c0_i32 = arith.constant 0 : i32
    %c0_i32_0 = arith.constant 0 : i32
    return %arg0, %c0_i32, %arg1 : i32, i32, i32
  }
  func.func @transform_4(%arg0: i32, %arg1: i32) -> (i32, i32, i32) {
    %c0_i32 = arith.constant 0 : i32
    %c0_i32_0 = arith.constant 0 : i32
    return %arg0, %c0_i32, %arg1 : i32, i32, i32
  }
}

</mosaic_0001>

<bundles_post_ra>
// kernel: res_block_forward.4
= control target key start
LH: loop header
LB: loop body
LE: loop exit
PB: predicated region body
PF: predicated region fallthrough
CT: control target
= control target key end

     0   :  { %s2963_s12 = smov 0   ;;  %s2965_s13 = smov 0   ;;  %s3366_s0 = inlined_call_operand.vmem [shape: bf16[2,16,16,64], index: 0, kind: input, shape index: {}]   ;;  %s3367_s1 = inlined_call_operand.vmem [shape: bf16[1,64,128], index: 1, kind: input, shape index: {}]   ;;  %s3368_s2 = inlined_call_operand.vmem [shape: f32[1,128], index: 2, kind: input, shape index: {}]   ;;  %s3369_s3 = inlined_call_operand.vmem [shape: bf16[2,64,128], index: 3, kind: output, shape index: {}]  }
   0x1   :  { %s2967_s14 = smov 0  }
   0x2 LB: > { %s25_s15 = sadd.s32 1, %s2936_s13  ;;  %p2502_p0 = scmp.ge.s32.totalorder %s2940_s14, 1  ;;  %s2940_s14 = sphi %s2967_s14, %s13_s14   ;;  %s2936_s13 = sphi %s2965_s13, %s3371_s13   ;;  %s2932_s12 = sphi %s2963_s12, %s3370_s12  }
   0x3   : > { %p27_p1 = scmp.ge.s32.totalorder %s25_s15, 2  ;;  %p168_p2 = scmp.lt.s32.totalorder %s2940_s14, 3 }
   0x5   : > { %s3373_s15 = smov (%p27_p1, %s25_s15), 0  ;;  %p169_p3 = pnand %p2502_p0, %p168_p2 }
   0x6   : > { %v2897_v0 = vld [vmem:[%s3367_s1] sm:$0xff] (!%p169_p3)   ;;  %p202_p4 = scmp.lt.s32.totalorder (!%p169_p3), %s2932_s12, 1  ;;  %v2898_v1 = vld [vmem:[%s3367_s1 + $0x8] sm:$0xff] (!%p169_p3)   ;;  %v2899_v2 = vld [vmem:[%s3367_s1 + $0x10] sm:$0xff] (!%p169_p3)   ;;  %vm374_vm0 = vcmask (!%p169_p3), 523264   ;;  %v620_v22 = vlaneseq (!%p169_p3)  ;;  %vm2249_vm1 = vcmask (!%p169_p3), 1041409  }
   0x7   : > { %172 = sbr.rel (%p169_p3) target bundleno = 448 (0x1c0), region = 32  ;;  %2824 = vmatprep.subr.bf16.mxu0 (!%p169_p3), %v2897_v0  ;;  %2864 = vmatprep.subr.bf16.mxu1 (!%p169_p3), %v2897_v0  ;;  %v2900_v5 = vld [vmem:[%s3367_s1 + $0x18] sm:$0xff] (!%p169_p3)   ;;  %v2942_v20 = vmov (!%p169_p3), 1983009808   ;;  %v3036_v25 = vld [vmem:[%s3368_s2] ss:$0 sm:$0xff] (!%p169_p3) }
   0x8   : > { %2825 = vmatpush3.bf16.msra.mxu0 (!%p169_p3), %v2897_v0  ;;  %2868 = vmatpush3.bf16.msra.mxu1 (!%p169_p3), %v2897_v0  ;;  %v618_v21 = vunpack.c.l.s4 (!%p169_p3), %v2942_v20  ;;  %v621_v24 = vshrl.u32 (!%p169_p3), %v620_v22, 7  ;;  %vm2252_vm2 = vcmask (!%p169_p3), 1042434   ;;  %vm2255_vm3 = vcmask (!%p169_p3), 1043459  }
   0x9   : > { %2826 = vmatprep.subr.bf16.mxu0 (!%p169_p3), %v2898_v1  ;;  %2865 = vmatprep.subr.bf16.mxu1 (!%p169_p3), %v2898_v1  ;;  %vm2258_vm4 = vcmask (!%p169_p3), 1044484   ;;  %vm2261_vm5 = vcmask (!%p169_p3), 1045509   ;;  %vm2264_vm6 = vcmask (!%p169_p3), 1046534   ;;  %vm2267_vm7 = vcmask (!%p169_p3), 1047559  }
   0xa   : > { %v619_v23 = vunpack.c.0.s8 (!%p169_p3), %v618_v21 }
   0xc   : > { %2827 = vmatpush3.bf16.msra.mxu0 (!%p169_p3), %v2898_v1  ;;  %2869 = vmatpush3.bf16.msra.mxu1 (!%p169_p3), %v2898_v1  ;;  %v3038_v26 = vsub.s32 (!%p169_p3), %v619_v23, %v621_v24 }
   0xd   : > { %2828 = vmatprep.subr.bf16.mxu0 (!%p169_p3), %v2899_v2  ;;  %2866 = vmatprep.subr.bf16.mxu1 (!%p169_p3), %v2899_v2 }
   0xe   : > { %s3375_s12 = smov (!%p202_p4, %s2932_s12), 1 }
   0xf   : > { %s2738_s22 = sshll.u32 %s3375_s12, 7  ;;  %s2739_s30 = sshll.u32 %s3375_s12, 5 }
  0x10   : > { %s2996_s25 = scalar_lea.vmem %s3366_s0, %s2738_s22  ;;  %2829 = vmatpush3.bf16.msra.mxu0 %v2899_v2  ;;  %2870 = vmatpush3.bf16.msra.mxu1 %v2899_v2  ;;  %s3147_s6 = scalar_lea.vmem %s3369_s3, %s2739_s30 }
  0x11   : > { %v2901_v3 = vld [vmem:[%s2996_s25] sm:$0xff]   ;;  %2830 = vmatprep.subr.bf16.mxu0 %v2900_v5  ;;  %2867 = vmatprep.subr.bf16.mxu1 %v2900_v5  ;;  %v2903_v6 = vld [vmem:[%s2996_s25 + $0x8] sm:$0xff]   ;;  %v2905_v8 = vld [vmem:[%s2996_s25 + $0x10] sm:$0xff]  }
  0x12   : > { %v2902_v4 = vld [vmem:[%s2996_s25 + $0x40] sm:$0xff]   ;;  %2832 = vmatprep.mubr.msk.bf16.mxu0 %vm374_vm0, %v2901_v3  ;;  %v2904_v7 = vld [vmem:[%s2996_s25 + $0x48] sm:$0xff]   ;;  %v2906_v9 = vld [vmem:[%s2996_s25 + $0x50] sm:$0xff]  }
  0x13   : > { %2848 = vmatprep.mubr.msk.bf16.mxu1 %vm374_vm0, %v2902_v4  ;;  %v2907_v10 = vld [vmem:[%s2996_s25 + $0x18] sm:$0xff]   ;;  %v2909_v12 = vld [vmem:[%s2996_s25 + $0x20] sm:$0xff]   ;;  %v2911_v14 = vld [vmem:[%s2996_s25 + $0x28] sm:$0xff]  }
  0x14   : > { %2831 = vmatpush3.bf16.msra.mxu0 %v2900_v5  ;;  %2871 = vmatpush3.bf16.msra.mxu1 %v2900_v5  ;;  %v2908_v11 = vld [vmem:[%s2996_s25 + $0x58] sm:$0xff]   ;;  %v2910_v13 = vld [vmem:[%s2996_s25 + $0x60] sm:$0xff]   ;;  %v2912_v15 = vld [vmem:[%s2996_s25 + $0x68] sm:$0xff]  }
  0x15   : > { %v2913_v16 = vld [vmem:[%s2996_s25 + $0x30] sm:$0xff]   ;;  %v2915_v18 = vld [vmem:[%s2996_s25 + $0x38] sm:$0xff]  }
  0x16   : > { %v2914_v17 = vld [vmem:[%s2996_s25 + $0x70] sm:$0xff]   ;;  %v2916_v19 = vld [vmem:[%s2996_s25 + $0x78] sm:$0xff]  }
  0x17   : > { %2833 = vmatmul.mubr.msk.bf16.vlgmr.msra.gmra.mrb[0].mxu0 %vm374_vm0, %v2903_v6  ;;  %2849 = vmatmul.mubr.msk.bf16.vlgmr.msra.gmra.mrb[0].mxu1 %vm374_vm0, %v2904_v7 }
  0x18   : > { %2836 = vmatprep.mubr.msk.bf16.mxu0 %vm374_vm0, %v2905_v8  ;;  %2852 = vmatprep.mubr.msk.bf16.mxu1 %vm374_vm0, %v2906_v9 }
  0x1f   : > { %2837 = vmatmul.mubr.msk.bf16.gmra.mrb[4].mxu0 %vm374_vm0, %v2907_v10  ;;  %2853 = vmatmul.mubr.msk.bf16.gmra.mrb[4].mxu1 %vm374_vm0, %v2908_v11 }
  0x20   : > { %2840 = vmatprep.mubr.msk.bf16.mxu0 %vm374_vm0, %v2909_v12  ;;  %2856 = vmatprep.mubr.msk.bf16.mxu1 %vm374_vm0, %v2910_v13 }
  0x27   : > { %2841 = vmatmul.mubr.msk.bf16.gmra.mrb[8].mxu0 %vm374_vm0, %v2911_v14  ;;  %2857 = vmatmul.mubr.msk.bf16.gmra.mrb[8].mxu1 %vm374_vm0, %v2912_v15 }
  0x28   : > { %2844 = vmatprep.mubr.msk.bf16.mxu0 %vm374_vm0, %v2913_v16  ;;  %2860 = vmatprep.mubr.msk.bf16.mxu1 %vm374_vm0, %v2914_v17 }
  0x2f   : > { %2845 = vmatmul.mubr.msk.bf16.gmra.mrb[12].mxu0 %vm374_vm0, %v2915_v18  ;;  %2861 = vmatmul.mubr.msk.bf16.gmra.mrb[12].mxu1 %vm374_vm0, %v2916_v19 }
  0xea   : > { %v2834_v27 = vpop.f32.mrb[0].mxu0  ;;  %v2850_v28 = vpop.f32.mrb[0].mxu1 }
  0xeb   : > { %v466_v29 = vadd.f32 %v2834_v27, %v3036_v25  ;;  %v530_v30 = vadd.f32 %v2850_v28, %v3036_v25  ;;  %v457_v31 = vpop.f32.mrb[1].mxu0  ;;  %v521_v32 = vpop.f32.mrb[1].mxu1 }
  0xec   : > { %v458_v33 = vadd.f32 %v3036_v25, %v457_v31  ;;  %v522_v34 = vadd.f32 %v3036_v25, %v521_v32  ;;  %v3044_v35 = vpop.f32.mrb[2].mxu0  ;;  %v3046_v36 = vpop.f32.mrb[2].mxu1 }
  0xed   : > { %v650_v37 = vcombine.high %v466_v29, %v466_v29  ;;  %v657_v38 = vrot.slane %v466_v29, %v3038_v26  ;;  %v922_v39 = vcombine.high %v530_v30, %v530_v30  ;;  %v929_v40 = vrot.slane %v530_v30, %v3038_v26  ;;  %v3050_v41 = vpop.f32.mrb[3].mxu0  ;;  %v3052_v42 = vpop.f32.mrb[3].mxu1 }
  0xee   : > { %v616_v43 = vcombine.high %v458_v33, %v458_v33  ;;  %v623_v44 = vrot.slane %v458_v33, %v3038_v26  ;;  %v888_v45 = vcombine.high %v522_v34, %v522_v34  ;;  %v895_v46 = vrot.slane %v522_v34, %v3038_v26 }
  0xef   : > { %v664_v47 = vrot.slane %v650_v37, %v3038_v26  ;;  %v665_v48 = vcombine.high %v657_v38, %v657_v38  ;;  %v2552_v49 = vrot.slane %v657_v38, 9  ;;  %v936_v50 = vrot.slane %v922_v39, %v3038_v26 }
  0xf0   : > { %v937_v51 = vcombine.high %v929_v40, %v929_v40  ;;  %v2616_v52 = vrot.slane %v929_v40, 9  ;;  %v630_v53 = vrot.slane %v616_v43, %v3038_v26  ;;  %v631_v54 = vcombine.high %v623_v44, %v623_v44 }
  0xf1   : > { %v666_v55 = vcombine.high %v664_v47, %v664_v47  ;;  %v2553_v56 = vrot.slane %v665_v48, 9  ;;  %v2554_v57 = vrot.slane %v664_v47, 9  ;;  %v1680_v58 = vadd.f32 %v2552_v49, %v657_v38 }
  0xf2   : > { %v938_v59 = vcombine.high %v936_v50, %v936_v50  ;;  %v2617_v60 = vrot.slane %v937_v51, 9  ;;  %v2618_v61 = vrot.slane %v936_v50, 9  ;;  %v1744_v62 = vadd.f32 %v2616_v52, %v929_v40  ;;  %v3059_v63 = vpop.f32.mrb[4].mxu0  ;;  %v3061_v0 = vpop.f32.mrb[4].mxu1 }
  0xf3   : > { %v2555_v1 = vrot.slane %v666_v55, 9  ;;  %v1681_v2 = vadd.f32 %v2553_v56, %v665_v48  ;;  %v1682_v3 = vadd.f32 %v2554_v57, %v664_v47  ;;  %v632_v4 = vcombine.high %v630_v53, %v630_v53  ;;  %v3063_v5 = vpop.f32.mrb[5].mxu0  ;;  %v3065_v6 = vpop.f32.mrb[5].mxu1 }
  0xf4   : > { %v2619_v7 = vrot.slane %v938_v59, 9  ;;  %v1745_v8 = vadd.f32 %v2617_v60, %v937_v51  ;;  %v1746_v9 = vadd.f32 %v2618_v61, %v936_v50  ;;  %v2544_v10 = vrot.slane %v623_v44, 9  ;;  %v3067_v11 = vpop.f32.mrb[6].mxu0  ;;  %v3069_v12 = vpop.f32.mrb[6].mxu1 }
  0xf5   : > { %v1683_v13 = vadd.f32 %v2555_v1, %v666_v55  ;;  %v2545_v14 = vrot.slane %v631_v54, 9  ;;  %v2546_v15 = vrot.slane %v630_v53, 9  ;;  %v2547_v16 = vrot.slane %v632_v4, 9  ;;  %v3071_v17 = vpop.f32.mrb[7].mxu0  ;;  %v3073_v18 = vpop.f32.mrb[7].mxu1 }
  0xf6   : > { %v1747_v19 = vadd.f32 %v2619_v7, %v938_v59  ;;  %v1672_v20 = vadd.f32 %v2544_v10, %v623_v44  ;;  %v902_v21 = vrot.slane %v888_v45, %v3038_v26  ;;  %v903_v22 = vcombine.high %v895_v46, %v895_v46 }
  0xf7   : > { %v1673_v23 = vadd.f32 %v2545_v14, %v631_v54  ;;  %v1674_v24 = vadd.f32 %v2546_v15, %v630_v53  ;;  %v1675_v27 = vadd.f32 %v2547_v16, %v632_v4  ;;  %v2608_v28 = vrot.slane %v895_v46, 9 }
  0xf8   : > { %v1800_v29 = vadd.f32 %v1680_v58, %v1672_v20  ;;  %v904_v30 = vcombine.high %v902_v21, %v902_v21  ;;  %v2609_v31 = vrot.slane %v903_v22, 9  ;;  %v2610_v32 = vrot.slane %v902_v21, 9 }
  0xf9   : > { %v1801_v33 = vadd.f32 %v1681_v2, %v1673_v23  ;;  %v1802_v34 = vadd.f32 %v1682_v3, %v1674_v24  ;;  %v1803_v37 = vadd.f32 %v1683_v13, %v1675_v27  ;;  %v1736_v38 = vadd.f32 %v2608_v28, %v895_v46 }
  0xfa   : > { %v1864_v39 = vmul.f32 0.25, %v1800_v29  ;;  %v2611_v40 = vrot.slane %v904_v30, 9  ;;  %v1737_v43 = vadd.f32 %v2609_v31, %v903_v22  ;;  %v1738_v44 = vadd.f32 %v2610_v32, %v902_v21  ;;  %v3076_v45 = vpop.f32.mrb[8].mxu0  ;;  %v3078_v47 = vpop.f32.mrb[8].mxu1 }
  0xfb   : > { %v1865_v48 = vmul.f32 0.25, %v1801_v33  ;;  %v1866_v49 = vmul.f32 0.25, %v1802_v34  ;;  %v1867_v50 = vmul.f32 0.25, %v1803_v37  ;;  %v1832_v51 = vadd.f32 %v1744_v62, %v1736_v38  ;;  %v3080_v52 = vpop.f32.mrb[9].mxu0  ;;  %v3082_v53 = vpop.f32.mrb[9].mxu1 }
  0xfc   : > { %v2740_v54 = vpack.c.bf16 %v1864_v39, %v1864_v39  ;;  %v1739_v55 = vadd.f32 %v2611_v40, %v904_v30  ;;  %v1833_v56 = vadd.f32 %v1745_v8, %v1737_v43  ;;  %v1834_v46 = vadd.f32 %v1746_v9, %v1738_v44  ;;  %v3084_v57 = vpop.f32.mrb[10].mxu0  ;;  %v3086_v58 = vpop.f32.mrb[10].mxu1 }
  0xfd   : > { %v2741_v59 = vpack.c.bf16 %v1865_v48, %v1865_v48  ;;  %v2742_v60 = vpack.c.bf16 %v1866_v49, %v1866_v49  ;;  %v2743_v61 = vpack.c.bf16 %v1867_v50, %v1867_v50  ;;  %v1896_v1 = vmul.f32 0.25, %v1832_v51  ;;  %v3088_v2 = vpop.f32.mrb[11].mxu0  ;;  %v3090_v3 = vpop.f32.mrb[11].mxu1 }
  0xfe   : > { %v2184_v62 = vunpack.c.l.b16 %v2740_v54  ;;  %v1835_v4 = vadd.f32 %v1747_v19, %v1739_v55  ;;  %v1897_v7 = vmul.f32 0.25, %v1833_v56  ;;  %v1898_v10 = vmul.f32 0.25, %v1834_v46 }
  0xff   : > { %v2185_v13 = vunpack.c.l.b16 %v2741_v59  ;;  %v2186_v14 = vunpack.c.l.b16 %v2742_v60  ;;  %v2187_v8 = vunpack.c.l.b16 %v2743_v61  ;;  %v2772_v9 = vpack.c.bf16 %v1896_v1, %v1896_v1 }
 0x100   : > { %v1899_v15 = vmul.f32 0.25, %v1835_v4  ;;  %v2773_v16 = vpack.c.bf16 %v1897_v7, %v1897_v7  ;;  %v2774_v20 = vpack.c.bf16 %v1898_v10, %v1898_v10  ;;  %v469_v21 = vadd.f32 %v3044_v35, %v3036_v25 }
 0x101   : > { %v2248_v22 = vrot.slane %v2185_v13, 7  ;;  %v2251_v23 = vrot.slane %v2186_v14, 6  ;;  %v2254_v24 = vrot.slane %v2187_v8, 5  ;;  %v2216_v27 = vunpack.c.l.b16 %v2772_v9 }
 0x102   : > { %v2775_v28 = vpack.c.bf16 %v1899_v15, %v1899_v15  ;;  %v2217_v29 = vunpack.c.l.b16 %v2773_v16  ;;  %v2218_v19 = vunpack.c.l.b16 %v2774_v20  ;;  %v667_v30 = vcombine.high %v469_v21, %v469_v21  ;;  %v3094_v31 = vpop.f32.mrb[12].mxu0  ;;  %v3096_v32 = vpop.f32.mrb[12].mxu1 }
 0x103   : > { %v2250_v33 = vsel %vm2249_vm1, %v2248_v22, %v2184_v62  ;;  %v674_v34 = vrot.slane %v469_v21, %v3038_v26  ;;  %v533_v35 = vadd.f32 %v3046_v36, %v3036_v25  ;;  %v461_v37 = vadd.f32 %v3036_v25, %v3050_v41  ;;  %v3110_v4 = vpop.f32.mrb[13].mxu0  ;;  %v3112_v7 = vpop.f32.mrb[13].mxu1 }
 0x104   : > { %v2253_v38 = vsel %vm2252_vm2, %v2251_v23, %v2250_v33  ;;  %v2219_v39 = vunpack.c.l.b16 %v2775_v28  ;;  %v2311_v40 = vrot.slane %v2217_v29, 7  ;;  %v2313_v43 = vrot.slane %v2218_v19, 6 }
 0x105   : > { %v681_v44 = vrot.slane %v667_v30, %v3038_v26  ;;  %v682_v48 = vcombine.high %v674_v34, %v674_v34  ;;  %v2556_v49 = vrot.slane %v674_v34, 9  ;;  %v939_v50 = vcombine.high %v533_v35, %v533_v35 }
 0x106   : > { %v2312_v51 = vsel %vm2249_vm1, %v2311_v40, %v2216_v27  ;;  %v2315_v54 = vrot.slane %v2219_v39, 5  ;;  %v946_v55 = vrot.slane %v533_v35, %v3038_v26  ;;  %v633_v56 = vcombine.high %v461_v37, %v461_v37 }
 0x107   : > { %v2314_v36 = vsel %vm2252_vm2, %v2313_v43, %v2312_v51  ;;  %v683_v46 = vcombine.high %v681_v44, %v681_v44  ;;  %v2557_v41 = vrot.slane %v682_v48, 9  ;;  %v2558_v59 = vrot.slane %v681_v44, 9 }
 0x108   : > { %v1684_v60 = vadd.f32 %v2556_v49, %v674_v34  ;;  %v953_v61 = vrot.slane %v939_v50, %v3038_v26  ;;  %v954_v1 = vcombine.high %v946_v55, %v946_v55  ;;  %v2620_v62 = vrot.slane %v946_v55, 9 }
 0x109   : > { %v2559_v10 = vrot.slane %v683_v46, 9  ;;  %v1685_v13 = vadd.f32 %v2557_v41, %v682_v48  ;;  %v1686_v14 = vadd.f32 %v2558_v59, %v681_v44  ;;  %v640_v8 = vrot.slane %v461_v37, %v3038_v26  ;;  %v3124_v48 = vpop.f32.mrb[14].mxu0 }
 0x10a   : > { %v955_v9 = vcombine.high %v953_v61, %v953_v61  ;;  %v2621_v15 = vrot.slane %v954_v1, 9  ;;  %v2622_v16 = vrot.slane %v953_v61, 9  ;;  %v1748_v20 = vadd.f32 %v2620_v62, %v946_v55 }
 0x10b   : > { %v1687_v21 = vadd.f32 %v2559_v10, %v683_v46  ;;  %v647_v22 = vrot.slane %v633_v56, %v3038_v26  ;;  %v648_v23 = vcombine.high %v640_v8, %v640_v8  ;;  %v2548_v27 = vrot.slane %v640_v8, 9 }
 0x10c   : > { %v2623_v28 = vrot.slane %v955_v9, 9  ;;  %v1749_v29 = vadd.f32 %v2621_v15, %v954_v1  ;;  %v1750_v19 = vadd.f32 %v2622_v16, %v953_v61  ;;  %v2256_v30 = vsel %vm2255_vm3, %v2254_v24, %v2253_v38 }
 0x10d   : > { %v649_v33 = vcombine.high %v647_v22, %v647_v22  ;;  %v2549_v34 = vrot.slane %v648_v23, 9  ;;  %v2550_v35 = vrot.slane %v647_v22, 9  ;;  %v1676_v39 = vadd.f32 %v2548_v27, %v640_v8 }
 0x10e   : > { %v1751_v40 = vadd.f32 %v2623_v28, %v955_v9  ;;  %v525_v37 = vadd.f32 %v3036_v25, %v3052_v42  ;;  %v3120_v43 = vsel %vm2255_vm3, %v2315_v54, %v2314_v36  ;;  %v482_v44 = vadd.f32 %v3059_v63, %v3036_v25 }
 0x10f   : > { %v2551_v49 = vrot.slane %v649_v33, 9  ;;  %v1677_v50 = vadd.f32 %v2549_v34, %v648_v23  ;;  %v1678_v24 = vadd.f32 %v2550_v35, %v647_v22  ;;  %v1804_v38 = vadd.f32 %v1684_v60, %v1676_v39 }
 0x110   : > { %v905_v51 = vcombine.high %v525_v37, %v525_v37  ;;  %v912_v55 = vrot.slane %v525_v37, %v3038_v26  ;;  %v718_v56 = vcombine.high %v482_v44, %v482_v44  ;;  %v3128_v46 = vrot.slane %v482_v44, %v3038_v26 }
 0x111   : > { %v1679_v42 = vadd.f32 %v2551_v49, %v649_v33  ;;  %v1805_v54 = vadd.f32 %v1685_v13, %v1677_v50  ;;  %v1806_v36 = vadd.f32 %v1686_v14, %v1678_v24  ;;  %v1868_v41 = vmul.f32 0.25, %v1804_v38 }
 0x112   : > { %v919_v63 = vrot.slane %v905_v51, %v3038_v26  ;;  %v920_v59 = vcombine.high %v912_v55, %v912_v55  ;;  %v2612_v61 = vrot.slane %v912_v55, 9  ;;  %v3132_v60 = vrot.slane %v718_v56, %v3038_v26 }
 0x113   : > { %v1807_v1 = vadd.f32 %v1687_v21, %v1679_v42  ;;  %v1869_v62 = vmul.f32 0.25, %v1805_v54  ;;  %v1870_v10 = vmul.f32 0.25, %v1806_v36  ;;  %v2744_v8 = vpack.c.bf16 %v1868_v41, %v1868_v41 }
 0x114   : > { %v921_v9 = vcombine.high %v919_v63, %v919_v63  ;;  %v2613_v15 = vrot.slane %v920_v59, 9  ;;  %v2614_v16 = vrot.slane %v919_v63, 9  ;;  %v1740_v22 = vadd.f32 %v2612_v61, %v912_v55 }
 0x115   : > { %v1871_v13 = vmul.f32 0.25, %v1807_v1  ;;  %v2745_v14 = vpack.c.bf16 %v1869_v62, %v1869_v62  ;;  %v2746_v23 = vpack.c.bf16 %v1870_v10, %v1870_v10  ;;  %v2188_v27 = vunpack.c.l.b16 %v2744_v8 }
 0x116   : > { %v2615_v28 = vrot.slane %v921_v9, 9  ;;  %v1741_v33 = vadd.f32 %v2613_v15, %v920_v59  ;;  %v1742_v34 = vadd.f32 %v2614_v16, %v919_v63  ;;  %v1836_v35 = vadd.f32 %v1748_v20, %v1740_v22  ;;  %v3136_v63 = vpop.f32.mrb[14].mxu1 }
 0x117   : > { %v2747_v39 = vpack.c.bf16 %v1871_v13, %v1871_v13  ;;  %v2189_v37 = vunpack.c.l.b16 %v2745_v14  ;;  %v2190_v44 = vunpack.c.l.b16 %v2746_v23  ;;  %v2257_v21 = vrot.slane %v2188_v27, 4 }
 0x118   : > { %v1743_v49 = vadd.f32 %v2615_v28, %v921_v9  ;;  %v1837_v50 = vadd.f32 %v1749_v29, %v1741_v33  ;;  %v1838_v24 = vadd.f32 %v1750_v19, %v1742_v34  ;;  %v1900_v38 = vmul.f32 0.25, %v1836_v35 }
 0x119   : > { %v2191_v51 = vunpack.c.l.b16 %v2747_v39  ;;  %v2259_v55 = vsel %vm2258_vm4, %v2257_v21, %v2256_v30  ;;  %v2260_v56 = vrot.slane %v2189_v37, 3  ;;  %v2263_v42 = vrot.slane %v2190_v44, 2  ;;  %v3154_v44 = vpop.f32.mrb[15].mxu0 }
 0x11a   : > { %v1839_v54 = vadd.f32 %v1751_v40, %v1743_v49  ;;  %v1901_v36 = vmul.f32 0.25, %v1837_v50  ;;  %v1902_v41 = vmul.f32 0.25, %v1838_v24  ;;  %v2776_v59 = vpack.c.bf16 %v1900_v38, %v1900_v38 }
 0x11b   : > { %v2262_v20 = vsel %vm2261_vm5, %v2260_v56, %v2259_v55  ;;  %v2266_v61 = vrot.slane %v2191_v51, 1  ;;  %v733_v29 = vcombine.high %v3128_v46, %v3128_v46  ;;  %v734_v19 = vcombine.high %v3132_v60, %v3132_v60  ;;  %v3166_v56 = vpop.f32.mrb[15].mxu1 }
 0x11c   : > { %v2265_v30 = vsel %vm2264_vm6, %v2263_v42, %v2262_v20  ;;  %v1903_v1 = vmul.f32 0.25, %v1839_v54  ;;  %v2777_v62 = vpack.c.bf16 %v1901_v36, %v1901_v36  ;;  %v2778_v10 = vpack.c.bf16 %v1902_v41, %v1902_v41 }
 0x11d   : > { %v2268_v40 = vsel %vm2267_vm7, %v2266_v61, %v2265_v30  ;;  %v2220_v8 = vunpack.c.l.b16 %v2776_v59  ;;  %v2568_v9 = vrot.slane %v3128_v46, 9  ;;  %v2569_v15 = vrot.slane %v733_v29, 9 }
 0x11e   : > { %v2367_v16 = vpack.c.b16 %v2268_v40, %v2268_v40  ;;  %v2779_v22 = vpack.c.bf16 %v1903_v1, %v1903_v1  ;;  %v2221_v13 = vunpack.c.l.b16 %v2777_v62  ;;  %v2222_v14 = vunpack.c.l.b16 %v2778_v10 }
 0x11f   : > { %v2317_v23 = vrot.slane %v2220_v8, 4  ;;  %v2570_v27 = vrot.slane %v3132_v60, 9  ;;  %v2571_v28 = vrot.slane %v734_v19, 9  ;;  %v1696_v33 = vadd.f32 %v2568_v9, %v3128_v46 }
 0x120   : > { %2383 = vst [vmem:[%s3147_s6] sm:$0xf] %v2367_v16  ;;  %v2223_v34 = vunpack.c.l.b16 %v2779_v22  ;;  %v2319_v35 = vrot.slane %v2221_v13, 3  ;;  %v2321_v39 = vrot.slane %v2222_v14, 2  ;;  %v1697_v37 = vadd.f32 %v2569_v15, %v733_v29 }
 0x121   : > { %v2318_v21 = vsel %vm2258_vm4, %v2317_v23, %v3120_v43  ;;  %v1698_v49 = vadd.f32 %v2570_v27, %v3132_v60  ;;  %v1699_v50 = vadd.f32 %v2571_v28, %v734_v19  ;;  %v546_v24 = vadd.f32 %v3061_v0, %v3036_v25 }
 0x122   : > { %v2320_v38 = vsel %vm2261_vm5, %v2319_v35, %v2318_v21  ;;  %v2323_v51 = vrot.slane %v2223_v34, 1  ;;  %v474_v46 = vadd.f32 %v3036_v25, %v3063_v5  ;;  %v538_v55 = vadd.f32 %v3036_v25, %v3065_v6 }
 0x123   : > { %v2322_v42 = vsel %vm2264_vm6, %v2321_v39, %v2320_v38  ;;  %v990_v43 = vcombine.high %v546_v24, %v546_v24  ;;  %v997_v60 = vrot.slane %v546_v24, %v3038_v26  ;;  %v3172_v0 = vadd.f32 %v3067_v11, %v3036_v25 }
 0x124   : > { %v2324_v54 = vsel %vm2267_vm7, %v2323_v51, %v2322_v42  ;;  %v684_v36 = vcombine.high %v474_v46, %v474_v46  ;;  %v691_v5 = vrot.slane %v474_v46, %v3038_v26  ;;  %v956_v41 = vcombine.high %v538_v55, %v538_v55 }
 0x125   : > { %v2371_v59 = vpack.c.b16 %v2324_v54, %v2324_v54  ;;  %v1004_v6 = vrot.slane %v990_v43, %v3038_v26  ;;  %v1005_v20 = vcombine.high %v997_v60, %v997_v60  ;;  %v2632_v61 = vrot.slane %v997_v60, 9 }
 0x126   : > { %v698_v29 = vrot.slane %v684_v36, %v3038_v26  ;;  %v699_v19 = vcombine.high %v691_v5, %v691_v5  ;;  %v2560_v30 = vrot.slane %v691_v5, 9  ;;  %v963_v1 = vrot.slane %v538_v55, %v3038_v26 }
 0x127   : > { %2387 = vst [vmem:[%s3147_s6 + $0x10] sm:$0xf] %v2371_v59  ;;  %v1006_v11 = vcombine.high %v1004_v6, %v1004_v6  ;;  %v2633_v62 = vrot.slane %v1005_v20, 9  ;;  %v2634_v10 = vrot.slane %v1004_v6, 9  ;;  %v1760_v40 = vadd.f32 %v2632_v61, %v997_v60 }
 0x128   : > { %v700_v8 = vcombine.high %v698_v29, %v698_v29  ;;  %v2561_v9 = vrot.slane %v699_v19, 9  ;;  %v2562_v15 = vrot.slane %v698_v29, 9  ;;  %v1688_v16 = vadd.f32 %v2560_v30, %v691_v5 }
 0x129   : > { %v2635_v22 = vrot.slane %v1006_v11, 9  ;;  %v1761_v13 = vadd.f32 %v2633_v62, %v1005_v20  ;;  %v1762_v14 = vadd.f32 %v2634_v10, %v1004_v6  ;;  %v970_v23 = vrot.slane %v956_v41, %v3038_v26 }
 0x12a   : > { %v2563_v27 = vrot.slane %v700_v8, 9  ;;  %v1689_v28 = vadd.f32 %v2561_v9, %v699_v19  ;;  %v1690_v34 = vadd.f32 %v2562_v15, %v698_v29  ;;  %v1808_v35 = vadd.f32 %v1696_v33, %v1688_v16 }
 0x12b   : > { %v1763_v39 = vadd.f32 %v2635_v22, %v1006_v11  ;;  %v971_v21 = vcombine.high %v963_v1, %v963_v1  ;;  %v972_v24 = vcombine.high %v970_v23, %v970_v23  ;;  %v2624_v38 = vrot.slane %v963_v1, 9 }
 0x12c   : > { %v1691_v51 = vadd.f32 %v2563_v27, %v700_v8  ;;  %v1809_v46 = vadd.f32 %v1697_v37, %v1689_v28  ;;  %v1810_v55 = vadd.f32 %v1698_v49, %v1690_v34  ;;  %v1872_v42 = vmul.f32 0.25, %v1808_v35 }
 0x12d   : > { %v2625_v43 = vrot.slane %v971_v21, 9  ;;  %v2626_v60 = vrot.slane %v970_v23, 9  ;;  %v2627_v54 = vrot.slane %v972_v24, 9  ;;  %v1752_v36 = vadd.f32 %v2624_v38, %v963_v1 }
 0x12e   : > { %v1811_v5 = vadd.f32 %v1699_v50, %v1691_v51  ;;  %v1873_v59 = vmul.f32 0.25, %v1809_v46  ;;  %v1874_v6 = vmul.f32 0.25, %v1810_v55  ;;  %v2748_v41 = vpack.c.bf16 %v1872_v42, %v1872_v42 }
 0x12f   : > { %v1753_v20 = vadd.f32 %v2625_v43, %v971_v21  ;;  %v1754_v61 = vadd.f32 %v2626_v60, %v970_v23  ;;  %v1755_v29 = vadd.f32 %v2627_v54, %v972_v24  ;;  %v1840_v33 = vadd.f32 %v1760_v40, %v1752_v36 }
 0x130   : > { %v1875_v19 = vmul.f32 0.25, %v1811_v5  ;;  %v2749_v30 = vpack.c.bf16 %v1873_v59, %v1873_v59  ;;  %v2750_v11 = vpack.c.bf16 %v1874_v6, %v1874_v6  ;;  %v2192_v62 = vunpack.c.l.b16 %v2748_v41 }
 0x131   : > { %v1841_v10 = vadd.f32 %v1761_v13, %v1753_v20  ;;  %v1842_v37 = vadd.f32 %v1762_v14, %v1754_v61  ;;  %v1843_v49 = vadd.f32 %v1763_v39, %v1755_v29  ;;  %v1904_v8 = vmul.f32 0.25, %v1840_v33 }
 0x132   : > { %v2751_v9 = vpack.c.bf16 %v1875_v19, %v1875_v19  ;;  %v2193_v15 = vunpack.c.l.b16 %v2749_v30  ;;  %v2194_v16 = vunpack.c.l.b16 %v2750_v11  ;;  %v735_v50 = vcombine.high %v3172_v0, %v3172_v0 }
 0x133   : > { %v1905_v1 = vmul.f32 0.25, %v1841_v10  ;;  %v1906_v22 = vmul.f32 0.25, %v1842_v37  ;;  %v1907_v27 = vmul.f32 0.25, %v1843_v49  ;;  %v2780_v23 = vpack.c.bf16 %v1904_v8, %v1904_v8 }
 0x134   : > { %v2195_v28 = vunpack.c.l.b16 %v2751_v9  ;;  %v2269_v40 = vrot.slane %v2193_v15, 7  ;;  %v2271_v34 = vrot.slane %v2194_v16, 6  ;;  %v742_v35 = vrot.slane %v3172_v0, %v3038_v26 }
 0x135   : > { %v2781_v13 = vpack.c.bf16 %v1905_v1, %v1905_v1  ;;  %v2782_v14 = vpack.c.bf16 %v1906_v22, %v1906_v22  ;;  %v2783_v39 = vpack.c.bf16 %v1907_v27, %v1907_v27  ;;  %v2224_v21 = vunpack.c.l.b16 %v2780_v23 }
 0x136   : > { %v2270_v24 = vsel %vm2249_vm1, %v2269_v40, %v2192_v62  ;;  %v2273_v38 = vrot.slane %v2195_v28, 5  ;;  %v749_v51 = vrot.slane %v735_v50, %v3038_v26  ;;  %v750_v46 = vcombine.high %v742_v35, %v742_v35 }
 0x137   : > { %v2272_v55 = vsel %vm2252_vm2, %v2271_v34, %v2270_v24  ;;  %v2225_v42 = vunpack.c.l.b16 %v2781_v13  ;;  %v2226_v43 = vunpack.c.l.b16 %v2782_v14  ;;  %v2227_v60 = vunpack.c.l.b16 %v2783_v39 }
 0x138   : > { %v751_v54 = vcombine.high %v749_v51, %v749_v51  ;;  %v2572_v36 = vrot.slane %v742_v35, 9  ;;  %v2573_v5 = vrot.slane %v750_v46, 9  ;;  %v2574_v59 = vrot.slane %v749_v51, 9 }
 0x139   : > { %v2325_v0 = vrot.slane %v2225_v42, 7  ;;  %v2327_v6 = vrot.slane %v2226_v43, 6  ;;  %v2329_v41 = vrot.slane %v2227_v60, 5  ;;  %v549_v20 = vadd.f32 %v3069_v12, %v3036_v25 }
 0x13a   : > { %v2575_v61 = vrot.slane %v751_v54, 9  ;;  %v1700_v29 = vadd.f32 %v2572_v36, %v742_v35  ;;  %v1701_v33 = vadd.f32 %v2573_v5, %v750_v46  ;;  %v1702_v19 = vadd.f32 %v2574_v59, %v749_v51 }
 0x13b   : > { %v2326_v30 = vsel %vm2249_vm1, %v2325_v0, %v2224_v21  ;;  %v1007_v11 = vcombine.high %v549_v20, %v549_v20  ;;  %v1014_v62 = vrot.slane %v549_v20, %v3038_v26  ;;  %v477_v10 = vadd.f32 %v3036_v25, %v3071_v17 }
 0x13c   : > { %v2328_v37 = vsel %vm2252_vm2, %v2327_v6, %v2326_v30  ;;  %v1703_v49 = vadd.f32 %v2575_v61, %v751_v54  ;;  %v3196_v8 = vsel %vm2255_vm3, %v2273_v38, %v2272_v55  ;;  %v541_v12 = vadd.f32 %v3036_v25, %v3073_v18 }
 0x13d   : > { %v1021_v9 = vrot.slane %v1007_v11, %v3038_v26  ;;  %v1022_v15 = vcombine.high %v1014_v62, %v1014_v62  ;;  %v2636_v16 = vrot.slane %v1014_v62, 9  ;;  %v701_v50 = vcombine.high %v477_v10, %v477_v10 }
 0x13e   : > { %v708_v1 = vrot.slane %v477_v10, %v3038_v26  ;;  %v973_v22 = vcombine.high %v541_v12, %v541_v12  ;;  %v980_v27 = vrot.slane %v541_v12, %v3038_v26  ;;  %v3204_v17 = vsel %vm2255_vm3, %v2329_v41, %v2328_v37 }
 0x13f   : > { %v1023_v23 = vcombine.high %v1021_v9, %v1021_v9  ;;  %v2637_v28 = vrot.slane %v1022_v15, 9  ;;  %v2638_v40 = vrot.slane %v1021_v9, 9  ;;  %v1764_v34 = vadd.f32 %v2636_v16, %v1014_v62 }
 0x140   : > { %v715_v35 = vrot.slane %v701_v50, %v3038_v26  ;;  %v716_v18 = vcombine.high %v708_v1, %v708_v1  ;;  %v2564_v13 = vrot.slane %v708_v1, 9  ;;  %v987_v14 = vrot.slane %v973_v22, %v3038_v26 }
 0x141   : > { %v2639_v39 = vrot.slane %v1023_v23, 9  ;;  %v1765_v21 = vadd.f32 %v2637_v28, %v1022_v15  ;;  %v1766_v24 = vadd.f32 %v2638_v40, %v1021_v9  ;;  %v988_v38 = vcombine.high %v980_v27, %v980_v27 }
 0x142   : > { %v717_v51 = vcombine.high %v715_v35, %v715_v35  ;;  %v2565_v46 = vrot.slane %v716_v18, 9  ;;  %v2566_v55 = vrot.slane %v715_v35, 9  ;;  %v1692_v42 = vadd.f32 %v2564_v13, %v708_v1 }
 0x143   : > { %v1767_v43 = vadd.f32 %v2639_v39, %v1023_v23  ;;  %v989_v60 = vcombine.high %v987_v14, %v987_v14  ;;  %v2628_v54 = vrot.slane %v980_v27, 9  ;;  %v2629_v36 = vrot.slane %v988_v38, 9 }
 0x144   : > { %v2567_v5 = vrot.slane %v717_v51, 9  ;;  %v1693_v59 = vadd.f32 %v2565_v46, %v716_v18  ;;  %v1694_v0 = vadd.f32 %v2566_v55, %v715_v35  ;;  %v1812_v6 = vadd.f32 %v1700_v29, %v1692_v42 }
 0x145   : > { %v2630_v41 = vrot.slane %v987_v14, 9  ;;  %v2631_v20 = vrot.slane %v989_v60, 9  ;;  %v1756_v61 = vadd.f32 %v2628_v54, %v980_v27  ;;  %v1757_v30 = vadd.f32 %v2629_v36, %v988_v38 }
 0x146   : > { %v1695_v11 = vadd.f32 %v2567_v5, %v717_v51  ;;  %v1813_v62 = vadd.f32 %v1701_v33, %v1693_v59  ;;  %v1814_v10 = vadd.f32 %v1702_v19, %v1694_v0  ;;  %v1876_v37 = vmul.f32 0.25, %v1812_v6 }
 0x147   : > { %v1758_v12 = vadd.f32 %v2630_v41, %v987_v14  ;;  %v1759_v9 = vadd.f32 %v2631_v20, %v989_v60  ;;  %v1844_v15 = vadd.f32 %v1764_v34, %v1756_v61  ;;  %v1845_v16 = vadd.f32 %v1765_v21, %v1757_v30 }
 0x148   : > { %v1815_v50 = vadd.f32 %v1703_v49, %v1695_v11  ;;  %v1877_v1 = vmul.f32 0.25, %v1813_v62  ;;  %v1878_v22 = vmul.f32 0.25, %v1814_v10  ;;  %v2752_v23 = vpack.c.bf16 %v1876_v37, %v1876_v37 }
 0x149   : > { %v1846_v28 = vadd.f32 %v1766_v24, %v1758_v12  ;;  %v1847_v40 = vadd.f32 %v1767_v43, %v1759_v9  ;;  %v1908_v35 = vmul.f32 0.25, %v1844_v15  ;;  %v1909_v29 = vmul.f32 0.25, %v1845_v16 }
 0x14a   : > { %v1879_v18 = vmul.f32 0.25, %v1815_v50  ;;  %v2753_v13 = vpack.c.bf16 %v1877_v1, %v1877_v1  ;;  %v2754_v27 = vpack.c.bf16 %v1878_v22, %v1878_v22  ;;  %v2196_v39 = vunpack.c.l.b16 %v2752_v23 }
 0x14b   : > { %v1910_v38 = vmul.f32 0.25, %v1846_v28  ;;  %v1911_v33 = vmul.f32 0.25, %v1847_v40  ;;  %v2784_v19 = vpack.c.bf16 %v1908_v35, %v1908_v35  ;;  %v2785_v51 = vpack.c.bf16 %v1909_v29, %v1909_v29 }
 0x14c   : > { %v2755_v14 = vpack.c.bf16 %v1879_v18, %v1879_v18  ;;  %v2197_v46 = vunpack.c.l.b16 %v2753_v13  ;;  %v2198_v34 = vunpack.c.l.b16 %v2754_v27  ;;  %v2275_v21 = vrot.slane %v2196_v39, 4 }
 0x14d   : > { %v2786_v49 = vpack.c.bf16 %v1910_v38, %v1910_v38  ;;  %v2787_v55 = vpack.c.bf16 %v1911_v33, %v1911_v33  ;;  %v2228_v42 = vunpack.c.l.b16 %v2784_v19  ;;  %v2229_v60 = vunpack.c.l.b16 %v2785_v51 }
 0x14e   : > { %v2199_v24 = vunpack.c.l.b16 %v2755_v14  ;;  %v2276_v43 = vsel %vm2258_vm4, %v2275_v21, %v3196_v8  ;;  %v2277_v54 = vrot.slane %v2197_v46, 3  ;;  %v2279_v36 = vrot.slane %v2198_v34, 2 }
 0x14f   : > { %v2230_v5 = vunpack.c.l.b16 %v2786_v49  ;;  %v2231_v59 = vunpack.c.l.b16 %v2787_v55  ;;  %v2331_v0 = vrot.slane %v2228_v42, 4  ;;  %v2333_v6 = vrot.slane %v2229_v60, 3 }
 0x150   : > { %v2278_v41 = vsel %vm2261_vm5, %v2277_v54, %v2276_v43  ;;  %v2281_v20 = vrot.slane %v2199_v24, 1  ;;  %v498_v61 = vadd.f32 %v3076_v45, %v3036_v25  ;;  %v562_v30 = vadd.f32 %v3078_v47, %v3036_v25 }
 0x151   : > { %v2280_v11 = vsel %vm2264_vm6, %v2279_v36, %v2278_v41  ;;  %v2332_v8 = vsel %vm2258_vm4, %v2331_v0, %v3204_v17  ;;  %v2335_v62 = vrot.slane %v2230_v5, 2  ;;  %v2337_v10 = vrot.slane %v2231_v59, 1 }
 0x152   : > { %v2282_v37 = vsel %vm2267_vm7, %v2281_v20, %v2280_v11  ;;  %v2334_v12 = vsel %vm2261_vm5, %v2333_v6, %v2332_v8  ;;  %v786_v9 = vcombine.high %v498_v61, %v498_v61  ;;  %v793_v15 = vrot.slane %v498_v61, %v3038_v26 }
 0x153   : > { %v2368_v16 = vpack.c.b16 %v2282_v37, %v2282_v37  ;;  %v2336_v45 = vsel %vm2264_vm6, %v2335_v62, %v2334_v12  ;;  %v1058_v47 = vcombine.high %v562_v30, %v562_v30  ;;  %v1065_v50 = vrot.slane %v562_v30, %v3038_v26 }
 0x154   : > { %v2338_v1 = vsel %vm2267_vm7, %v2337_v10, %v2336_v45  ;;  %v800_v17 = vrot.slane %v786_v9, %v3038_v26  ;;  %v801_v22 = vcombine.high %v793_v15, %v793_v15  ;;  %v2584_v23 = vrot.slane %v793_v15, 9 }
 0x155   : > { %2384 = vst [vmem:[%s3147_s6 + $0x4] sm:$0xf] %v2368_v16  ;;  %v2372_v28 = vpack.c.b16 %v2338_v1, %v2338_v1  ;;  %v1072_v40 = vrot.slane %v1058_v47, %v3038_v26  ;;  %v1073_v35 = vcombine.high %v1065_v50, %v1065_v50  ;;  %v2648_v29 = vrot.slane %v1065_v50, 9 }
 0x156   : > { %v802_v18 = vcombine.high %v800_v17, %v800_v17  ;;  %v2585_v13 = vrot.slane %v801_v22, 9  ;;  %v2586_v27 = vrot.slane %v800_v17, 9  ;;  %v1712_v39 = vadd.f32 %v2584_v23, %v793_v15 }
 0x157   : > { %2388 = vst [vmem:[%s3147_s6 + $0x14] sm:$0xf] %v2372_v28  ;;  %v1074_v38 = vcombine.high %v1072_v40, %v1072_v40  ;;  %v2649_v33 = vrot.slane %v1073_v35, 9  ;;  %v2650_v19 = vrot.slane %v1072_v40, 9  ;;  %v1776_v51 = vadd.f32 %v2648_v29, %v1065_v50 }
 0x158   : > { %v2587_v14 = vrot.slane %v802_v18, 9  ;;  %v1713_v46 = vadd.f32 %v2585_v13, %v801_v22  ;;  %v1714_v34 = vadd.f32 %v2586_v27, %v800_v17  ;;  %v490_v21 = vadd.f32 %v3036_v25, %v3080_v52 }
 0x159   : > { %v2651_v49 = vrot.slane %v1074_v38, 9  ;;  %v1777_v55 = vadd.f32 %v2649_v33, %v1073_v35  ;;  %v1778_v42 = vadd.f32 %v2650_v19, %v1072_v40  ;;  %v554_v60 = vadd.f32 %v3036_v25, %v3082_v53 }
 0x15a   : > { %v1715_v24 = vadd.f32 %v2587_v14, %v802_v18  ;;  %v752_v43 = vcombine.high %v490_v21, %v490_v21  ;;  %v759_v54 = vrot.slane %v490_v21, %v3038_v26  ;;  %v501_v36 = vadd.f32 %v3084_v57, %v3036_v25 }
 0x15b   : > { %v1779_v5 = vadd.f32 %v2651_v49, %v1074_v38  ;;  %v1024_v59 = vcombine.high %v554_v60, %v554_v60  ;;  %v1031_v0 = vrot.slane %v554_v60, %v3038_v26  ;;  %v3238_v52 = vadd.f32 %v3086_v58, %v3036_v25 }
 0x15c   : > { %v766_v6 = vrot.slane %v752_v43, %v3038_v26  ;;  %v767_v41 = vcombine.high %v759_v54, %v759_v54  ;;  %v2576_v20 = vrot.slane %v759_v54, 9  ;;  %v803_v53 = vcombine.high %v501_v36, %v501_v36 }
 0x15d   : > { %v1038_v61 = vrot.slane %v1024_v59, %v3038_v26  ;;  %v1039_v30 = vcombine.high %v1031_v0, %v1031_v0  ;;  %v2640_v11 = vrot.slane %v1031_v0, 9  ;;  %v3243_v8 = vrot.slane %v501_v36, %v3038_v26 }
 0x15e   : > { %v768_v57 = vcombine.high %v766_v6, %v766_v6  ;;  %v2577_v62 = vrot.slane %v767_v41, 9  ;;  %v2578_v10 = vrot.slane %v766_v6, 9  ;;  %v1704_v37 = vadd.f32 %v2576_v20, %v759_v54 }
 0x15f   : > { %v1040_v12 = vcombine.high %v1038_v61, %v1038_v61  ;;  %v2641_v9 = vrot.slane %v1039_v30, 9  ;;  %v2642_v25 = vrot.slane %v1038_v61, 9  ;;  %v1768_v58 = vadd.f32 %v2640_v11, %v1031_v0 }
 0x160   : > { %v2579_v15 = vrot.slane %v768_v57, 9  ;;  %v1705_v16 = vadd.f32 %v2577_v62, %v767_v41  ;;  %v1706_v45 = vadd.f32 %v2578_v10, %v766_v6  ;;  %v1816_v47 = vadd.f32 %v1712_v39, %v1704_v37 }
 0x161   : > { %v2643_v50 = vrot.slane %v1040_v12, 9  ;;  %v1769_v1 = vadd.f32 %v2641_v9, %v1039_v30  ;;  %v1770_v17 = vadd.f32 %v2642_v25, %v1038_v61  ;;  %v1848_v22 = vadd.f32 %v1776_v51, %v1768_v58 }
 0x162   : > { %v1707_v23 = vadd.f32 %v2579_v15, %v768_v57  ;;  %v1817_v28 = vadd.f32 %v1713_v46, %v1705_v16  ;;  %v1818_v40 = vadd.f32 %v1714_v34, %v1706_v45  ;;  %v1880_v35 = vmul.f32 0.25, %v1816_v47 }
 0x163   : > { %v1771_v29 = vadd.f32 %v2643_v50, %v1040_v12  ;;  %v1849_v18 = vadd.f32 %v1777_v55, %v1769_v1  ;;  %v1850_v13 = vadd.f32 %v1778_v42, %v1770_v17  ;;  %v1912_v27 = vmul.f32 0.25, %v1848_v22 }
 0x164   : > { %v1819_v38 = vadd.f32 %v1715_v24, %v1707_v23  ;;  %v1881_v33 = vmul.f32 0.25, %v1817_v28  ;;  %v1882_v19 = vmul.f32 0.25, %v1818_v40  ;;  %v2756_v14 = vpack.c.bf16 %v1880_v35, %v1880_v35 }
 0x165   : > { %v1851_v21 = vadd.f32 %v1779_v5, %v1771_v29  ;;  %v1913_v49 = vmul.f32 0.25, %v1849_v18  ;;  %v1914_v60 = vmul.f32 0.25, %v1850_v13  ;;  %v2788_v39 = vpack.c.bf16 %v1912_v27, %v1912_v27  ;;  %v3261_v29 = vld [vmem:[%s3368_s2] ss:$0 sm:$0xff] }
 0x166   : > { %v1883_v43 = vmul.f32 0.25, %v1819_v38  ;;  %v2757_v54 = vpack.c.bf16 %v1881_v33, %v1881_v33  ;;  %v2758_v36 = vpack.c.bf16 %v1882_v19, %v1882_v19  ;;  %v2200_v51 = vunpack.c.l.b16 %v2756_v14 }
 0x167   : > { %v1915_v59 = vmul.f32 0.25, %v1851_v21  ;;  %v2789_v46 = vpack.c.bf16 %v1913_v49, %v1913_v49  ;;  %v2790_v34 = vpack.c.bf16 %v1914_v60, %v1914_v60  ;;  %v2232_v0 = vunpack.c.l.b16 %v2788_v39 }
 0x168   : > { %v2759_v6 = vpack.c.bf16 %v1883_v43, %v1883_v43  ;;  %v2201_v55 = vunpack.c.l.b16 %v2757_v54  ;;  %v2202_v42 = vunpack.c.l.b16 %v2758_v36  ;;  %v817_v24 = vrot.slane %v803_v53, %v3038_v26 }
 0x169   : > { %v2791_v41 = vpack.c.bf16 %v1915_v59, %v1915_v59  ;;  %v2233_v20 = vunpack.c.l.b16 %v2789_v46  ;;  %v2234_v61 = vunpack.c.l.b16 %v2790_v34  ;;  %v818_v5 = vcombine.high %v3243_v8, %v3243_v8 }
 0x16a   : > { %v2203_v30 = vunpack.c.l.b16 %v2759_v6  ;;  %v2283_v11 = vrot.slane %v2201_v55, 7  ;;  %v2285_v57 = vrot.slane %v2202_v42, 6  ;;  %v819_v62 = vcombine.high %v817_v24, %v817_v24 }
 0x16b   : > { %v2235_v10 = vunpack.c.l.b16 %v2791_v41  ;;  %v2339_v37 = vrot.slane %v2233_v20, 7  ;;  %v2341_v12 = vrot.slane %v2234_v61, 6  ;;  %v2588_v9 = vrot.slane %v3243_v8, 9 }
 0x16c   : > { %v2284_v25 = vsel %vm2249_vm1, %v2283_v11, %v2200_v51  ;;  %v2287_v58 = vrot.slane %v2203_v30, 5  ;;  %v2589_v15 = vrot.slane %v818_v5, 9  ;;  %v2590_v53 = vrot.slane %v817_v24, 9 }
 0x16d   : > { %v2286_v16 = vsel %vm2252_vm2, %v2285_v57, %v2284_v25  ;;  %v2340_v45 = vsel %vm2249_vm1, %v2339_v37, %v2232_v0  ;;  %v2343_v47 = vrot.slane %v2235_v10, 5  ;;  %v2591_v50 = vrot.slane %v819_v62, 9 }
 0x16e   : > { %v2342_v1 = vsel %vm2252_vm2, %v2341_v12, %v2340_v45  ;;  %v1716_v17 = vadd.f32 %v2588_v9, %v3243_v8  ;;  %v1717_v22 = vadd.f32 %v2589_v15, %v818_v5  ;;  %v1718_v23 = vadd.f32 %v2590_v53, %v817_v24 }
 0x16f   : > { %v1719_v28 = vadd.f32 %v2591_v50, %v819_v62  ;;  %v1075_v40 = vcombine.high %v3238_v52, %v3238_v52  ;;  %v1082_v35 = vrot.slane %v3238_v52, %v3038_v26  ;;  %v493_v18 = vadd.f32 %v3261_v29, %v3088_v2 }
 0x170   : > { %v3266_v13 = vsel %vm2255_vm3, %v2287_v58, %v2286_v16  ;;  %v557_v8 = vadd.f32 %v3261_v29, %v3090_v3  ;;  %v3271_v27 = vsel %vm2255_vm3, %v2343_v47, %v2342_v1  ;;  %v3275_v52 = vadd.f32 %v3261_v29, %v3094_v31 }
 0x171   : > { %v1089_v38 = vrot.slane %v1075_v40, %v3038_v26  ;;  %v1090_v33 = vcombine.high %v1082_v35, %v1082_v35  ;;  %v2652_v19 = vrot.slane %v1082_v35, 9  ;;  %v769_v14 = vcombine.high %v493_v18, %v493_v18 }
 0x172   : > { %v776_v2 = vrot.slane %v493_v18, %v3038_v26  ;;  %v1041_v21 = vcombine.high %v557_v8, %v557_v8  ;;  %v1048_v49 = vrot.slane %v557_v8, %v3038_v26  ;;  %v854_v3 = vcombine.high %v3275_v52, %v3275_v52 }
 0x173   : > { %v1091_v60 = vcombine.high %v1089_v38, %v1089_v38  ;;  %v2653_v39 = vrot.slane %v1090_v33, 9  ;;  %v2654_v43 = vrot.slane %v1089_v38, 9  ;;  %v1780_v54 = vadd.f32 %v2652_v19, %v1082_v35 }
 0x174   : > { %v783_v31 = vrot.slane %v769_v14, %v3038_v26  ;;  %v784_v36 = vcombine.high %v776_v2, %v776_v2  ;;  %v2580_v51 = vrot.slane %v776_v2, 9  ;;  %v1055_v59 = vrot.slane %v1041_v21, %v3038_v26 }
 0x175   : > { %v2655_v46 = vrot.slane %v1091_v60, 9  ;;  %v1781_v34 = vadd.f32 %v2653_v39, %v1090_v33  ;;  %v1782_v0 = vadd.f32 %v2654_v43, %v1089_v38  ;;  %v1056_v6 = vcombine.high %v1048_v49, %v1048_v49 }
 0x176   : > { %v785_v55 = vcombine.high %v783_v31, %v783_v31  ;;  %v2581_v42 = vrot.slane %v784_v36, 9  ;;  %v2582_v24 = vrot.slane %v783_v31, 9  ;;  %v1708_v41 = vadd.f32 %v2580_v51, %v776_v2 }
 0x177   : > { %v1783_v20 = vadd.f32 %v2655_v46, %v1091_v60  ;;  %v1057_v61 = vcombine.high %v1055_v59, %v1055_v59  ;;  %v2644_v5 = vrot.slane %v1048_v49, 9  ;;  %v2645_v30 = vrot.slane %v1056_v6, 9 }
 0x178   : > { %v2583_v11 = vrot.slane %v785_v55, 9  ;;  %v1709_v57 = vadd.f32 %v2581_v42, %v784_v36  ;;  %v1710_v62 = vadd.f32 %v2582_v24, %v783_v31  ;;  %v1820_v10 = vadd.f32 %v1716_v17, %v1708_v41 }
 0x179   : > { %v2646_v37 = vrot.slane %v1055_v59, 9  ;;  %v2647_v12 = vrot.slane %v1057_v61, 9  ;;  %v1772_v9 = vadd.f32 %v2644_v5, %v1048_v49  ;;  %v1773_v25 = vadd.f32 %v2645_v30, %v1056_v6 }
 0x17a   : > { %v1711_v58 = vadd.f32 %v2583_v11, %v785_v55  ;;  %v1821_v15 = vadd.f32 %v1717_v22, %v1709_v57  ;;  %v1822_v53 = vadd.f32 %v1718_v23, %v1710_v62  ;;  %v1884_v16 = vmul.f32 0.25, %v1820_v10 }
 0x17b   : > { %v1774_v45 = vadd.f32 %v2646_v37, %v1055_v59  ;;  %v1775_v47 = vadd.f32 %v2647_v12, %v1057_v61  ;;  %v1852_v50 = vadd.f32 %v1780_v54, %v1772_v9  ;;  %v1853_v1 = vadd.f32 %v1781_v34, %v1773_v25 }
 0x17c   : > { %v1823_v40 = vadd.f32 %v1719_v28, %v1711_v58  ;;  %v1885_v35 = vmul.f32 0.25, %v1821_v15  ;;  %v1886_v18 = vmul.f32 0.25, %v1822_v53  ;;  %v2760_v8 = vpack.c.bf16 %v1884_v16, %v1884_v16 }
 0x17d   : > { %v1854_v38 = vadd.f32 %v1782_v0, %v1774_v45  ;;  %v1855_v33 = vadd.f32 %v1783_v20, %v1775_v47  ;;  %v1916_v19 = vmul.f32 0.25, %v1852_v50  ;;  %v1917_v17 = vmul.f32 0.25, %v1853_v1 }
 0x17e   : > { %v1887_v14 = vmul.f32 0.25, %v1823_v40  ;;  %v2761_v2 = vpack.c.bf16 %v1885_v35, %v1885_v35  ;;  %v2762_v21 = vpack.c.bf16 %v1886_v18, %v1886_v18  ;;  %v2204_v49 = vunpack.c.l.b16 %v2760_v8 }
 0x17f   : > { %v1918_v60 = vmul.f32 0.25, %v1854_v38  ;;  %v1919_v22 = vmul.f32 0.25, %v1855_v33  ;;  %v2792_v23 = vpack.c.bf16 %v1916_v19, %v1916_v19  ;;  %v2793_v39 = vpack.c.bf16 %v1917_v17, %v1917_v17 }
 0x180   : > { %v2763_v43 = vpack.c.bf16 %v1887_v14, %v1887_v14  ;;  %v2205_v31 = vunpack.c.l.b16 %v2761_v2  ;;  %v2206_v54 = vunpack.c.l.b16 %v2762_v21  ;;  %v2289_v36 = vrot.slane %v2204_v49, 4 }
 0x181   : > { %v2794_v28 = vpack.c.bf16 %v1918_v60, %v1918_v60  ;;  %v2795_v51 = vpack.c.bf16 %v1919_v22, %v1919_v22  ;;  %v2236_v59 = vunpack.c.l.b16 %v2792_v23  ;;  %v2237_v46 = vunpack.c.l.b16 %v2793_v39 }
 0x182   : > { %v2207_v34 = vunpack.c.l.b16 %v2763_v43  ;;  %v2290_v0 = vsel %vm2258_vm4, %v2289_v36, %v3266_v13  ;;  %v2291_v6 = vrot.slane %v2205_v31, 3  ;;  %v2293_v55 = vrot.slane %v2206_v54, 2 }
 0x183   : > { %v2238_v42 = vunpack.c.l.b16 %v2794_v28  ;;  %v2239_v24 = vunpack.c.l.b16 %v2795_v51  ;;  %v2345_v41 = vrot.slane %v2236_v59, 4  ;;  %v2347_v20 = vrot.slane %v2237_v46, 3 }
 0x184   : > { %v2292_v61 = vsel %vm2261_vm5, %v2291_v6, %v2290_v0  ;;  %v2295_v5 = vrot.slane %v2207_v34, 1  ;;  %v861_v30 = vrot.slane %v3275_v52, %v3038_v26  ;;  %v868_v11 = vrot.slane %v854_v3, %v3038_v26 }
 0x185   : > { %v2294_v57 = vsel %vm2264_vm6, %v2293_v55, %v2292_v61  ;;  %v2346_v13 = vsel %vm2258_vm4, %v2345_v41, %v3271_v27  ;;  %v2349_v62 = vrot.slane %v2238_v42, 2  ;;  %v2351_v10 = vrot.slane %v2239_v24, 1 }
 0x186   : > { %v2296_v37 = vsel %vm2267_vm7, %v2295_v5, %v2294_v57  ;;  %v2348_v12 = vsel %vm2261_vm5, %v2347_v20, %v2346_v13  ;;  %v869_v9 = vcombine.high %v861_v30, %v861_v30  ;;  %v870_v25 = vcombine.high %v868_v11, %v868_v11 }
 0x187   : > { %v2369_v58 = vpack.c.b16 %v2296_v37, %v2296_v37  ;;  %v2350_v15 = vsel %vm2264_vm6, %v2349_v62, %v2348_v12  ;;  %v2600_v52 = vrot.slane %v861_v30, 9  ;;  %v2602_v3 = vrot.slane %v868_v11, 9 }
 0x188   : > { %v2352_v53 = vsel %vm2267_vm7, %v2351_v10, %v2350_v15  ;;  %v2601_v16 = vrot.slane %v869_v9, 9  ;;  %v2603_v45 = vrot.slane %v870_v25, 9  ;;  %v578_v27 = vadd.f32 %v3261_v29, %v3096_v32 }
 0x189   : > { %2385 = vst [vmem:[%s3147_s6 + $0x8] sm:$0xf] %v2369_v58  ;;  %v2373_v47 = vpack.c.b16 %v2352_v53, %v2352_v53  ;;  %v1728_v50 = vadd.f32 %v2600_v52, %v861_v30  ;;  %v506_v1 = vadd.f32 %v3261_v29, %v3110_v4  ;;  %v1730_v35 = vadd.f32 %v2602_v3, %v868_v11 }
 0x18a   : > { %v1729_v40 = vadd.f32 %v2601_v16, %v869_v9  ;;  %v1126_v18 = vcombine.high %v578_v27, %v578_v27  ;;  %v1133_v8 = vrot.slane %v578_v27, %v3038_v26  ;;  %v1731_v38 = vadd.f32 %v2603_v45, %v870_v25 }
 0x18b   : > { %2389 = vst [vmem:[%s3147_s6 + $0x18] sm:$0xf] %v2373_v47  ;;  %v820_v33 = vcombine.high %v506_v1, %v506_v1  ;;  %v827_v19 = vrot.slane %v506_v1, %v3038_v26  ;;  %v570_v17 = vadd.f32 %v3261_v29, %v3112_v7  ;;  %v3313_v4 = vadd.f32 %v3261_v29, %v3124_v48 }
 0x18c   : > { %v1140_v32 = vrot.slane %v1126_v18, %v3038_v26  ;;  %v1141_v14 = vcombine.high %v1133_v8, %v1133_v8  ;;  %v2664_v2 = vrot.slane %v1133_v8, 9 }
 0x18d   : > { %v834_v21 = vrot.slane %v820_v33, %v3038_v26  ;;  %v835_v49 = vcombine.high %v827_v19, %v827_v19  ;;  %v2592_v60 = vrot.slane %v827_v19, 9  ;;  %v1092_v22 = vcombine.high %v570_v17, %v570_v17 }
 0x18e   : > { %v1142_v23 = vcombine.high %v1140_v32, %v1140_v32  ;;  %v2665_v39 = vrot.slane %v1141_v14, 9  ;;  %v2666_v43 = vrot.slane %v1140_v32, 9  ;;  %v1792_v31 = vadd.f32 %v2664_v2, %v1133_v8 }
 0x18f   : > { %v836_v54 = vcombine.high %v834_v21, %v834_v21  ;;  %v2593_v36 = vrot.slane %v835_v49, 9  ;;  %v2594_v7 = vrot.slane %v834_v21, 9  ;;  %v1720_v28 = vadd.f32 %v2592_v60, %v827_v19 }
 0x190   : > { %v2667_v51 = vrot.slane %v1142_v23, 9  ;;  %v1793_v59 = vadd.f32 %v2665_v39, %v1141_v14  ;;  %v1794_v46 = vadd.f32 %v2666_v43, %v1140_v32  ;;  %v1099_v34 = vrot.slane %v570_v17, %v3038_v26 }
 0x191   : > { %v2595_v48 = vrot.slane %v836_v54, 9  ;;  %v1721_v0 = vadd.f32 %v2593_v36, %v835_v49  ;;  %v1722_v6 = vadd.f32 %v2594_v7, %v834_v21  ;;  %v1824_v55 = vadd.f32 %v1728_v50, %v1720_v28 }
 0x192   : > { %v1795_v42 = vadd.f32 %v2667_v51, %v1142_v23  ;;  %v1106_v24 = vrot.slane %v1092_v22, %v3038_v26  ;;  %v1107_v41 = vcombine.high %v1099_v34, %v1099_v34  ;;  %v2656_v20 = vrot.slane %v1099_v34, 9 }
 0x193   : > { %v1723_v61 = vadd.f32 %v2595_v48, %v836_v54  ;;  %v1825_v5 = vadd.f32 %v1729_v40, %v1721_v0  ;;  %v1826_v30 = vadd.f32 %v1730_v35, %v1722_v6  ;;  %v1888_v11 = vmul.f32 0.25, %v1824_v55 }
 0x194   : > { %v1108_v57 = vcombine.high %v1106_v24, %v1106_v24  ;;  %v2657_v13 = vrot.slane %v1107_v41, 9  ;;  %v2658_v62 = vrot.slane %v1106_v24, 9  ;;  %v1784_v10 = vadd.f32 %v2656_v20, %v1099_v34 }
 0x195   : > { %v1827_v37 = vadd.f32 %v1731_v38, %v1723_v61  ;;  %v1889_v12 = vmul.f32 0.25, %v1825_v5  ;;  %v1890_v9 = vmul.f32 0.25, %v1826_v30  ;;  %v2764_v25 = vpack.c.bf16 %v1888_v11, %v1888_v11 }
 0x196   : > { %v2659_v58 = vrot.slane %v1108_v57, 9  ;;  %v1785_v15 = vadd.f32 %v2657_v13, %v1107_v41  ;;  %v1786_v52 = vadd.f32 %v2658_v62, %v1106_v24  ;;  %v1856_v3 = vadd.f32 %v1792_v31, %v1784_v10 }
 0x197   : > { %v1891_v53 = vmul.f32 0.25, %v1827_v37  ;;  %v2765_v16 = vpack.c.bf16 %v1889_v12, %v1889_v12  ;;  %v2766_v45 = vpack.c.bf16 %v1890_v9, %v1890_v9  ;;  %v2208_v27 = vunpack.c.l.b16 %v2764_v25 }
 0x198   : > { %v1787_v47 = vadd.f32 %v2659_v58, %v1108_v57  ;;  %v1857_v50 = vadd.f32 %v1793_v59, %v1785_v15  ;;  %v1858_v1 = vadd.f32 %v1794_v46, %v1786_v52  ;;  %v1920_v40 = vmul.f32 0.25, %v1856_v3 }
 0x199   : > { %v2767_v35 = vpack.c.bf16 %v1891_v53, %v1891_v53  ;;  %v2209_v18 = vunpack.c.l.b16 %v2765_v16  ;;  %v2210_v8 = vunpack.c.l.b16 %v2766_v45  ;;  %v871_v38 = vcombine.high %v3313_v4, %v3313_v4 }
 0x19a   : > { %v1859_v33 = vadd.f32 %v1795_v42, %v1787_v47  ;;  %v1921_v19 = vmul.f32 0.25, %v1857_v50  ;;  %v1922_v17 = vmul.f32 0.25, %v1858_v1  ;;  %v2796_v32 = vpack.c.bf16 %v1920_v40, %v1920_v40 }
 0x19b   : > { %v2211_v14 = vunpack.c.l.b16 %v2767_v35  ;;  %v2297_v2 = vrot.slane %v2209_v18, 7  ;;  %v2299_v21 = vrot.slane %v2210_v8, 6  ;;  %v878_v49 = vrot.slane %v3313_v4, %v3038_v26 }
 0x19c   : > { %v1923_v60 = vmul.f32 0.25, %v1859_v33  ;;  %v2797_v22 = vpack.c.bf16 %v1921_v19, %v1921_v19  ;;  %v2798_v23 = vpack.c.bf16 %v1922_v17, %v1922_v17  ;;  %v581_v39 = vadd.f32 %v3261_v29, %v3136_v63 }
 0x19d   : > { %v2298_v43 = vsel %vm2249_vm1, %v2297_v2, %v2208_v27  ;;  %v2240_v31 = vunpack.c.l.b16 %v2796_v32  ;;  %v885_v54 = vrot.slane %v871_v38, %v3038_v26  ;;  %v886_v36 = vcombine.high %v878_v49, %v878_v49 }
 0x19e   : > { %v2300_v7 = vsel %vm2252_vm2, %v2299_v21, %v2298_v43  ;;  %v2799_v28 = vpack.c.bf16 %v1923_v60, %v1923_v60  ;;  %v2241_v51 = vunpack.c.l.b16 %v2797_v22  ;;  %v2242_v59 = vunpack.c.l.b16 %v2798_v23 }
 0x19f   : > { %v2301_v46 = vrot.slane %v2211_v14, 5  ;;  %v887_v34 = vcombine.high %v885_v54, %v885_v54  ;;  %v2604_v4 = vrot.slane %v878_v49, 9  ;;  %v2605_v48 = vrot.slane %v886_v36, 9 }
 0x1a0   : > { %v2243_v0 = vunpack.c.l.b16 %v2799_v28  ;;  %v2353_v6 = vrot.slane %v2241_v51, 7  ;;  %v2355_v55 = vrot.slane %v2242_v59, 6  ;;  %v1143_v42 = vcombine.high %v581_v39, %v581_v39 }
 0x1a1   : > { %v2606_v63 = vrot.slane %v885_v54, 9  ;;  %v2607_v24 = vrot.slane %v887_v34, 9  ;;  %v1732_v41 = vadd.f32 %v2604_v4, %v878_v49  ;;  %v1150_v5 = vrot.slane %v581_v39, %v3038_v26 }
 0x1a2   : > { %v2354_v20 = vsel %vm2249_vm1, %v2353_v6, %v2240_v31  ;;  %v2357_v61 = vrot.slane %v2243_v0, 5  ;;  %v1157_v30 = vrot.slane %v1143_v42, %v3038_v26  ;;  %v1733_v57 = vadd.f32 %v2605_v48, %v886_v36 }
 0x1a3   : > { %v2356_v11 = vsel %vm2252_vm2, %v2355_v55, %v2354_v20  ;;  %v509_v13 = vadd.f32 %v3261_v29, %v3154_v44  ;;  %v3334_v62 = vsel %vm2255_vm3, %v2301_v46, %v2300_v7  ;;  %v1158_v10 = vcombine.high %v1150_v5, %v1150_v5 }
 0x1a4   : > { %v1159_v37 = vcombine.high %v1157_v30, %v1157_v30  ;;  %v2668_v12 = vrot.slane %v1150_v5, 9  ;;  %v2670_v9 = vrot.slane %v1157_v30, 9  ;;  %v573_v15 = vadd.f32 %v3261_v29, %v3166_v56 }
 0x1a5   : > { %v837_v25 = vcombine.high %v509_v13, %v509_v13  ;;  %v844_v58 = vrot.slane %v509_v13, %v3038_v26  ;;  %v3340_v52 = vsel %vm2255_vm3, %v2357_v61, %v2356_v11  ;;  %v1734_v3 = vadd.f32 %v2606_v63, %v885_v54 }
 0x1a6   : > { %v1735_v53 = vadd.f32 %v2607_v24, %v887_v34  ;;  %v2669_v16 = vrot.slane %v1158_v10, 9  ;;  %v2671_v44 = vrot.slane %v1159_v37, 9  ;;  %v1109_v50 = vcombine.high %v573_v15, %v573_v15 }
 0x1a7   : > { %v851_v45 = vrot.slane %v837_v25, %v3038_v26  ;;  %v852_v27 = vcombine.high %v844_v58, %v844_v58  ;;  %v2596_v47 = vrot.slane %v844_v58, 9  ;;  %v1796_v1 = vadd.f32 %v2668_v12, %v1150_v5 }
 0x1a8   : > { %v1797_v40 = vadd.f32 %v2669_v16, %v1158_v10  ;;  %v1798_v35 = vadd.f32 %v2670_v9, %v1157_v30  ;;  %v1116_v18 = vrot.slane %v573_v15, %v3038_v26  ;;  %v1799_v33 = vadd.f32 %v2671_v44, %v1159_v37 }
 0x1a9   : > { %v853_v8 = vcombine.high %v851_v45, %v851_v45  ;;  %v2597_v38 = vrot.slane %v852_v27, 9  ;;  %v2598_v56 = vrot.slane %v851_v45, 9  ;;  %v1724_v29 = vadd.f32 %v2596_v47, %v844_v58 }
 0x1aa   : > { %v1123_v19 = vrot.slane %v1109_v50, %v3038_v26  ;;  %v1124_v17 = vcombine.high %v1116_v18, %v1116_v18  ;;  %v2660_v32 = vrot.slane %v1116_v18, 9 }
 0x1ab   : > { %v2599_v14 = vrot.slane %v853_v8, 9  ;;  %v1725_v2 = vadd.f32 %v2597_v38, %v852_v27  ;;  %v1726_v21 = vadd.f32 %v2598_v56, %v851_v45  ;;  %v1828_v49 = vadd.f32 %v1732_v41, %v1724_v29 }
 0x1ac   : > { %v1125_v60 = vcombine.high %v1123_v19, %v1123_v19  ;;  %v2661_v22 = vrot.slane %v1124_v17, 9  ;;  %v2662_v23 = vrot.slane %v1123_v19, 9  ;;  %v1788_v39 = vadd.f32 %v2660_v32, %v1116_v18 }
 0x1ad   : > { %v1727_v43 = vadd.f32 %v2599_v14, %v853_v8  ;;  %v1829_v31 = vadd.f32 %v1733_v57, %v1725_v2  ;;  %v1830_v54 = vadd.f32 %v1734_v3, %v1726_v21  ;;  %v1892_v36 = vmul.f32 0.25, %v1828_v49 }
 0x1ae   : > { %v2663_v7 = vrot.slane %v1125_v60, 9  ;;  %v1789_v28 = vadd.f32 %v2661_v22, %v1124_v17  ;;  %v1790_v51 = vadd.f32 %v2662_v23, %v1123_v19  ;;  %v1860_v59 = vadd.f32 %v1796_v1, %v1788_v39 }
 0x1af   : > { %v1831_v46 = vadd.f32 %v1735_v53, %v1727_v43  ;;  %v1893_v26 = vmul.f32 0.25, %v1829_v31  ;;  %v1894_v34 = vmul.f32 0.25, %v1830_v54  ;;  %v2768_v4 = vpack.c.bf16 %v1892_v36, %v1892_v36 }
 0x1b0   : > { %v1791_v48 = vadd.f32 %v2663_v7, %v1125_v60  ;;  %v1861_v0 = vadd.f32 %v1797_v40, %v1789_v28  ;;  %v1862_v6 = vadd.f32 %v1798_v35, %v1790_v51  ;;  %v1924_v55 = vmul.f32 0.25, %v1860_v59 }
 0x1b1   : > { %v1895_v42 = vmul.f32 0.25, %v1831_v46  ;;  %v2769_v63 = vpack.c.bf16 %v1893_v26, %v1893_v26  ;;  %v2770_v24 = vpack.c.bf16 %v1894_v34, %v1894_v34  ;;  %v2212_v41 = vunpack.c.l.b16 %v2768_v4 }
 0x1b2   : > { %v1863_v20 = vadd.f32 %v1799_v33, %v1791_v48  ;;  %v1925_v61 = vmul.f32 0.25, %v1861_v0  ;;  %v1926_v5 = vmul.f32 0.25, %v1862_v6  ;;  %v2800_v30 = vpack.c.bf16 %v1924_v55, %v1924_v55 }
 0x1b3   : > { %v2771_v11 = vpack.c.bf16 %v1895_v42, %v1895_v42  ;;  %v2213_v57 = vunpack.c.l.b16 %v2769_v63  ;;  %v2214_v13 = vunpack.c.l.b16 %v2770_v24  ;;  %v2303_v10 = vrot.slane %v2212_v41, 4 }
 0x1b4   : > { %v1927_v37 = vmul.f32 0.25, %v1863_v20  ;;  %v2801_v12 = vpack.c.bf16 %v1925_v61, %v1925_v61  ;;  %v2802_v9 = vpack.c.bf16 %v1926_v5, %v1926_v5  ;;  %v2244_v25 = vunpack.c.l.b16 %v2800_v30 }
 0x1b5   : > { %v2215_v58 = vunpack.c.l.b16 %v2771_v11  ;;  %v2304_v15 = vsel %vm2258_vm4, %v2303_v10, %v3334_v62  ;;  %v2305_v3 = vrot.slane %v2213_v57, 3  ;;  %v2307_v53 = vrot.slane %v2214_v13, 2 }
 0x1b6   : > { %v2803_v16 = vpack.c.bf16 %v1927_v37, %v1927_v37  ;;  %v2245_v44 = vunpack.c.l.b16 %v2801_v12  ;;  %v2246_v45 = vunpack.c.l.b16 %v2802_v9  ;;  %v2359_v27 = vrot.slane %v2244_v25, 4 }
 0x1b7   : > { %v2306_v47 = vsel %vm2261_vm5, %v2305_v3, %v2304_v15  ;;  %v2309_v50 = vrot.slane %v2215_v58, 1 }
 0x1b8   : > { %v2308_v1 = vsel %vm2264_vm6, %v2307_v53, %v2306_v47  ;;  %v2247_v40 = vunpack.c.l.b16 %v2803_v16  ;;  %v2360_v35 = vsel %vm2258_vm4, %v2359_v27, %v3340_v52  ;;  %v2361_v18 = vrot.slane %v2245_v44, 3 }
 0x1b9   : > { %v2310_v62 = vsel %vm2267_vm7, %v2309_v50, %v2308_v1  ;;  %v2363_v8 = vrot.slane %v2246_v45, 2 }
 0x1ba   : > { %v2370_v38 = vpack.c.b16 %v2310_v62, %v2310_v62  ;;  %v2362_v56 = vsel %vm2261_vm5, %v2361_v18, %v2360_v35  ;;  %v2365_v29 = vrot.slane %v2247_v40, 1 }
 0x1bb   : > { %v2364_v33 = vsel %vm2264_vm6, %v2363_v8, %v2362_v56 }
 0x1bc   : > { %2386 = vst [vmem:[%s3147_s6 + $0xc] sm:$0xf] %v2370_v38  ;;  %v2366_v19 = vsel %vm2267_vm7, %v2365_v29, %v2364_v33 }
 0x1bd   : > { %v2374_v17 = vpack.c.b16 %v2366_v19, %v2366_v19 }
 0x1bf   : > { %2390 = vst [vmem:[%s3147_s6 + $0x1c] sm:$0xf] %v2374_v17 }
 0x1c0 PF: > { %s13_s14 = sadd.s32 1, %s2940_s14   ;;  %s3370_s12 = smov %s2936_s13 }
 0x1c1   : > { %p10_p5 = scmp.ge.s32.totalorder %s13_s14, 4   ;;  %s3371_s13 = smov %s3373_s15 }
 0x1c3   :  { %12 = sbr.rel (!%p10_p5) target bundleno = 2 (0x2), region = 68 }

// kernel: res_block_forward.3
= control target key start
LH: loop header
LB: loop body
LE: loop exit
PB: predicated region body
PF: predicated region fallthrough
CT: control target
= control target key end

     0   :  { %s4879_s12 = smov 0   ;;  %s4881_s13 = smov 0   ;;  %s6043_s0 = inlined_call_operand.vmem [shape: bf16[2,18,18,64], index: 0, kind: input, shape index: {}]   ;;  %s6044_s1 = inlined_call_operand.vmem [shape: bf16[9,64,128], index: 1, kind: input, shape index: {}]   ;;  %s6045_s2 = inlined_call_operand.vmem [shape: f32[1,128], index: 2, kind: input, shape index: {}]   ;;  %s6046_s3 = inlined_call_operand.vmem [shape: bf16[2,256,128], index: 3, kind: output, shape index: {}]  }
   0x1   :  { %s4883_s14 = smov 0  }
   0x2 LB: > { %s25_s15 = sadd.s32 1, %s4852_s13  ;;  %p3545_p0 = scmp.ge.s32.totalorder %s4856_s14, 1  ;;  %s4856_s14 = sphi %s4883_s14, %s13_s14   ;;  %s4852_s13 = sphi %s4881_s13, %s6129_s13   ;;  %s4848_s12 = sphi %s4879_s12, %s6128_s12  }
   0x3   : > { %p27_p1 = scmp.ge.s32.totalorder %s25_s15, 2  ;;  %p168_p2 = scmp.lt.s32.totalorder %s4856_s14, 3 }
   0x5   : > { %s6131_s15 = smov (%p27_p1, %s25_s15), 0  ;;  %p169_p3 = pnand %p3545_p0, %p168_p2 }
   0x7   : > { %172 = sbr.rel (%p169_p3) target bundleno = 567 (0x237), region = 32 }
   0xe   : > { %v4794_v0 = vld [vmem:[%s6044_s1 + $0x20] sm:$0xff]   ;;  %p202_p4 = scmp.lt.s32.totalorder %s4848_s12, 1  ;;  %v4796_v2 = vld [vmem:[%s6044_s1 + $0x28] sm:$0xff]   ;;  %v4798_v4 = vld [vmem:[%s6044_s1 + $0x30] sm:$0xff]   ;;  %v6048_v11 = vmov 0   ;;  %vm862_vm2 = vcmask 523264  }
   0xf   : > { %v4795_v1 = vld [vmem:[%s6044_s1 + $0x80] sm:$0xff]   ;;  %4144 = vmatprep.subr.bf16.mxu1 %v4794_v0  ;;  %v4797_v3 = vld [vmem:[%s6044_s1 + $0x88] sm:$0xff]   ;;  %v4799_v5 = vld [vmem:[%s6044_s1 + $0x90] sm:$0xff]   ;;  %vm403_vm0 = vsmask.f32 3328  ;;  %vm1401_vm4 = vcmask 1042432  }
  0x10   : > { %s6133_s12 = smov (!%p202_p4, %s4848_s12), 1  ;;  %4304 = vmatprep.subr.bf16.mxu0 %v4795_v1  ;;  %4145 = vmatpush3.bf16.msra.mxu1 %v4794_v0  ;;  %v4800_v6 = vld [vmem:[%s6044_s1 + $0x38] sm:$0xff]   ;;  %vm404_vm1 = vsmask.f32 7440  ;;  %v4944_v15 = vld [vmem:[%s6044_s1] sm:$0xff]   ;;  %vm1402_vm5 = vcmask 1046532  }
  0x11   : > { %4305 = vmatpush3.bf16.msra.mxu0 %v4795_v1  ;;  %4146 = vmatprep.subr.bf16.mxu1 %v4796_v2  ;;  %s4768_s26 = smul.u32 216, %s6133_s12  ;;  %v4801_v7 = vld [vmem:[%s6044_s1 + $0x98] sm:$0xff]   ;;  %v4963_v26 = vld [vmem:[%s6044_s1 + $0xa0] sm:$0xff]   ;;  %vm4976_vm3 = vmor %vm403_vm0, %vm404_vm1  ;;  %s3836_s8 = sshll.u32 %s6133_s12, 7 }
  0x12   : > { %4306 = vmatprep.subr.bf16.mxu0 %v4797_v3  ;;  %vm5203_vm6 = vmor %vm1401_vm4, %vm1402_vm5  ;;  %s5987_s11 = scalar_lea.vmem %s6046_s3, %s3836_s8 }
  0x13   : > { %s4924_s6 = scalar_lea.vmem %s6043_s0, %s4768_s26 }
  0x14   : > { %4147 = vmatpush3.bf16.msra.mxu1 %v4796_v2  ;;  %v223_v8 = vld [vmem:[%s4924_s6] sm:$0xf]  ;;  %v224_v9 = vld [vmem:[%s4924_s6 + $0x4] sm:$0xf]  ;;  %v225_v10 = vld [vmem:[%s4924_s6 + $0x8] sm:$0x1] }
  0x15   : > { %4307 = vmatpush3.bf16.msra.mxu0 %v4797_v3  ;;  %4148 = vmatprep.subr.bf16.mxu1 %v4798_v4  ;;  %v4933_v12 = vmax.bf16 %v6048_v11, %v223_v8  ;;  %v4936_v13 = vmax.bf16 %v6048_v11, %v224_v9  ;;  %v4939_v14 = vmax.bf16 %v6048_v11, %v225_v10  ;;  %v226_v16 = vld [vmem:[%s4924_s6 + $0xc] sm:$0xf]  ;;  %v227_v21 = vld [vmem:[%s4924_s6 + $0x10] sm:$0xf]  ;;  %v228_v23 = vld [vmem:[%s4924_s6 + $0x14] sm:$0x1] }
  0x16   : > { %4308 = vmatprep.subr.bf16.mxu0 %v4799_v5  ;;  %v4955_v24 = vmax.bf16 %v6048_v11, %v226_v16  ;;  %v4958_v25 = vmax.bf16 %v6048_v11, %v227_v21  ;;  %v4966_v32 = vmax.bf16 %v6048_v11, %v228_v23  ;;  %v229_v39 = vld [vmem:[%s4924_s6 + $0x18] sm:$0xf]  ;;  %v230_v40 = vld [vmem:[%s4924_s6 + $0x1c] sm:$0xf]  ;;  %v231_v46 = vld [vmem:[%s4924_s6 + $0x20] sm:$0x1] }
  0x17   : > { %6080 = vst [vmem:[#allocation2_spill] sm:$0xff] %v4939_v14  ;;  %v407_v17 = vshrl.u32 %v4933_v12, 16  ;;  %v410_v18 = vshll.u32 %v4933_v12, 16  ;;  %v416_v19 = vshll.u32 %v4936_v13, 16  ;;  %v420_v20 = vshrl.u32 %v4936_v13, 16 }
  0x18   : > { %4149 = vmatpush3.bf16.msra.mxu1 %v4798_v4  ;;  %v426_v22 = vshll.u32 %v4939_v14, 16  ;;  %v431_v33 = vshrl.u32 %v4955_v24, 16  ;;  %v434_v34 = vshll.u32 %v4955_v24, 16  ;;  %v440_v37 = vshll.u32 %v4958_v25, 16  ;;  %v232_v59 = vld [vmem:[%s4924_s6 + $0x24] sm:$0xf] }
  0x19   : > { %4309 = vmatpush3.bf16.msra.mxu0 %v4799_v5  ;;  %4150 = vmatprep.subr.bf16.mxu1 %v4800_v6  ;;  %v409_v27 = vrot.slane %v407_v17, 4  ;;  %v412_v28 = vrot.slane %v410_v18, 5  ;;  %v418_v29 = vrot.slane %v416_v19, 5  ;;  %v422_v30 = vrot.slane %v420_v20, 4  ;;  %v233_v60 = vld [vmem:[%s4924_s6 + $0x28] sm:$0xf] }
  0x1a   : > { %4310 = vmatprep.subr.bf16.mxu0 %v4801_v7  ;;  %v428_v31 = vrot.slane %v426_v22, 5  ;;  %v444_v38 = vshrl.u32 %v4958_v25, 16  ;;  %v433_v42 = vrot.slane %v431_v33, 4  ;;  %v436_v43 = vrot.slane %v434_v34, 5  ;;  %v234_v1 = vld [vmem:[%s4924_s6 + $0x2c] sm:$0x1] }
  0x1b   : > { %v413_v35 = vor.u32 %v412_v28, %v409_v27  ;;  %v423_v36 = vor.u32 %v422_v30, %v418_v29  ;;  %v450_v44 = vshll.u32 %v4966_v32, 16  ;;  %v1416_v45 = vrot.slane %v4966_v32, 5  ;;  %v235_v2 = vld [vmem:[%s4924_s6 + $0x30] sm:$0xf]  ;;  %v236_v3 = vld [vmem:[%s4924_s6 + $0x34] sm:$0xf] }
  0x1c   : > { %4151 = vmatpush3.bf16.msra.mxu1 %v4800_v6  ;;  %v442_v49 = vrot.slane %v440_v37, 5  ;;  %v446_v50 = vrot.slane %v444_v38, 4  ;;  %v437_v51 = vor.u32 %v436_v43, %v433_v42  ;;  %v4986_v53 = vmax.bf16 %v6048_v11, %v229_v39  ;;  %v237_v28 = vld [vmem:[%s4924_s6 + $0x38] sm:$0x1] }
  0x1d   : > { %4311 = vmatpush3.bf16.msra.mxu0 %v4801_v7  ;;  %4184 = vmatprep.subr.bf16.mxu1 %v4944_v15  ;;  %v414_v47 = vrot.slane %v413_v35, 4  ;;  %v424_v48 = vrot.slane %v423_v36, 4  ;;  %v452_v52 = vrot.slane %v450_v44, 5  ;;  %v4989_v54 = vmax.bf16 %v6048_v11, %v230_v40 }
  0x1e   : > { %4344 = vmatprep.subr.bf16.mxu0 %v4963_v26  ;;  %v447_v57 = vor.u32 %v446_v50, %v442_v49  ;;  %v4996_v58 = vmax.bf16 %v6048_v11, %v231_v46  ;;  %v438_v62 = vrot.slane %v437_v51, 4  ;;  %v455_v63 = vshrl.u32 %v4986_v53, 16 }
  0x1f   : > { %v419_v55 = vsel %vm4976_vm3, %v414_v47, %v418_v29  ;;  %v429_v56 = vsel %vm4976_vm3, %v424_v48, %v428_v31  ;;  %v458_v0 = vshll.u32 %v4986_v53, 16  ;;  %v464_v5 = vshll.u32 %v4989_v54, 16  ;;  %v4805_v29 = vld [vmem:[%s6044_s1 + $0x8] sm:$0xff]  }
  0x20   : > { %v3549_v61 = vcombine.low %v419_v55, %v429_v56  ;;  %v448_v4 = vrot.slane %v447_v57, 4  ;;  %v468_v6 = vshrl.u32 %v4989_v54, 16  ;;  %v474_v7 = vshll.u32 %v4996_v58, 16  ;;  %v239_v56 = vld [vmem:[%s4924_s6 + $0x40] sm:$0xf]  ;;  %v4808_v57 = vld [vmem:[%s6044_s1 + $0x10] sm:$0xff]  }
  0x21   : > { %v443_v8 = vsel %vm4976_vm3, %v438_v62, %v442_v49  ;;  %v457_v9 = vrot.slane %v455_v63, 4  ;;  %v460_v10 = vrot.slane %v458_v0, 5  ;;  %v466_v18 = vrot.slane %v464_v5, 5  ;;  %v4804_v49 = vld [vmem:[%s6044_s1 + $0xa8] sm:$0xff]  }
  0x22   : > { %4152 = vmatprep.mubr.msk.bf16.mxu1 %vm862_vm2, %v3549_v61  ;;  %v453_v17 = vsel %vm4976_vm3, %v448_v4, %v452_v52  ;;  %v470_v19 = vrot.slane %v468_v6, 4  ;;  %v476_v20 = vrot.slane %v474_v7, 5  ;;  %v5015_v23 = vmax.bf16 %v6048_v11, %v232_v59 }
  0x23   : > { %v3550_v21 = vcombine.low %v443_v8, %v453_v17  ;;  %v461_v22 = vor.u32 %v460_v10, %v457_v9  ;;  %v5018_v27 = vmax.bf16 %v6048_v11, %v233_v60  ;;  %v5025_v31 = vmax.bf16 %v6048_v11, %v234_v1  ;;  %v4810_v8 = vld [vmem:[%s6044_s1 + $0x18] sm:$0xff]  }
  0x24   : > { %v471_v30 = vor.u32 %v470_v19, %v466_v18  ;;  %v5028_v33 = vmax.bf16 %v6048_v11, %v235_v2  ;;  %v5031_v34 = vmax.bf16 %v6048_v11, %v236_v3  ;;  %v479_v36 = vshrl.u32 %v5015_v23, 16  ;;  %v240_v3 = vld [vmem:[%s4924_s6 + $0x44] sm:$0x1]  ;;  %v241_v19 = vld [vmem:[%s4924_s6 + $0x48] sm:$0xf] }
  0x25   : > { %4312 = vmatprep.mubr.msk.bf16.mxu0 %vm862_vm2, %v3550_v21  ;;  %4153 = vmatmul.mubr.msk.bf16.vlgmr.msra.gmra.mrb[0].mxu1 %vm862_vm2, %v3550_v21  ;;  %v462_v35 = vrot.slane %v461_v22, 4  ;;  %v482_v37 = vshll.u32 %v5015_v23, 16  ;;  %v488_v38 = vshll.u32 %v5018_v27, 16  ;;  %v492_v40 = vshrl.u32 %v5018_v27, 16 }
  0x26   : > { %4185 = vmatpush3.bf16.msra.mxu1 %v4944_v15  ;;  %v472_v39 = vrot.slane %v471_v30, 4  ;;  %v498_v42 = vshll.u32 %v5025_v31, 16  ;;  %v5042_v43 = vmax.bf16 %v6048_v11, %v237_v28  ;;  %v481_v46 = vrot.slane %v479_v36, 4  ;;  %v238_v15 = vld [vmem:[%s4924_s6 + $0x3c] sm:$0xf] }
  0x27   : > { %v467_v44 = vsel %vm4976_vm3, %v462_v35, %v466_v18  ;;  %v484_v47 = vrot.slane %v482_v37, 5  ;;  %v490_v48 = vrot.slane %v488_v38, 5  ;;  %4186 = vmatprep.subr.bf16.mxu1 %v4805_v29  ;;  %v494_v51 = vrot.slane %v492_v40, 4 }
  0x28   : > { %v477_v50 = vsel %vm4976_vm3, %v472_v39, %v476_v20  ;;  %v500_v52 = vrot.slane %v498_v42, 5  ;;  %v503_v55 = vshrl.u32 %v5028_v33, 16  ;;  %v506_v61 = vshll.u32 %v5028_v33, 16  ;;  %v242_v20 = vld [vmem:[%s4924_s6 + $0x4c] sm:$0xf] }
  0x29   : > { %v5057_v59 = vcombine.low %v467_v44, %v477_v50  ;;  %v485_v60 = vor.u32 %v484_v47, %v481_v46  ;;  %v512_v62 = vshll.u32 %v5031_v34, 16  ;;  %v495_v63 = vor.u32 %v494_v51, %v490_v48  ;;  %v243_v44 = vld [vmem:[%s4924_s6 + $0x50] sm:$0x1]  ;;  %v5100_v46 = vld [vmem:[%s6044_s1 + $0x40] sm:$0xff]  }
  0x2a   : > { %v505_v0 = vrot.slane %v503_v55, 4  ;;  %v516_v1 = vshrl.u32 %v5031_v34, 16  ;;  %v522_v2 = vshll.u32 %v5042_v43, 16  ;;  %4187 = vmatpush3.bf16.msra.mxu1 %v4805_v29  ;;  %v508_v5 = vrot.slane %v506_v61, 5  ;;  %v4806_v29 = vld [vmem:[%s6044_s1 + $0xb0] sm:$0xff]  }
  0x2b   : > { %6083 = vst [vmem:[#allocation3_spill] sm:$0xff] %v5057_v59  ;;  %4313 = vmatmul.mubr.msk.bf16.vlgmr.msra.gmra.mrb[0].mxu0 %vm862_vm2, %v5057_v59  ;;  %4156 = vmatprep.mubr.msk.bf16.mxu1 %vm862_vm2, %v5057_v59  ;;  %v486_v4 = vrot.slane %v485_v60, 4  ;;  %v514_v6 = vrot.slane %v512_v62, 5  ;;  %v5069_v7 = vmax.bf16 %v6048_v11, %v238_v15  ;;  %v496_v9 = vrot.slane %v495_v63, 4  ;;  %v244_v62 = vld [vmem:[%s4924_s6 + $0x54] sm:$0xf] }
  0x2c   : > { %4345 = vmatpush3.bf16.msra.mxu0 %v4963_v26  ;;  %v518_v10 = vrot.slane %v516_v1, 4  ;;  %v524_v17 = vrot.slane %v522_v2, 5  ;;  %v5076_v18 = vmax.bf16 %v6048_v11, %v239_v56  ;;  %4188 = vmatprep.subr.bf16.mxu1 %v4808_v57  ;;  %v509_v22 = vor.u32 %v508_v5, %v505_v0  ;;  %v4807_v63 = vld [vmem:[%s6044_s1 + $0xb8] sm:$0xff]  }
  0x2d   : > { %v491_v21 = vsel %vm4976_vm3, %v486_v4, %v490_v48  ;;  %4346 = vmatprep.subr.bf16.mxu0 %v4804_v49  ;;  %v5083_v28 = vmax.bf16 %v6048_v11, %v240_v3  ;;  %v527_v26 = vshrl.u32 %v5069_v7, 16  ;;  %v501_v30 = vsel %vm4976_vm3, %v496_v9, %v500_v52  ;;  %v245_v4 = vld [vmem:[%s4924_s6 + $0x58] sm:$0xf] }
  0x2e   : > { %v519_v35 = vor.u32 %v518_v10, %v514_v6  ;;  %v530_v36 = vshll.u32 %v5069_v7, 16  ;;  %v536_v37 = vshll.u32 %v5076_v18, 16  ;;  %4189 = vmatpush3.bf16.msra.mxu1 %v4808_v57  ;;  %v5093_v38 = vcombine.low %v491_v21, %v501_v30 }
  0x2f   : > { %v510_v39 = vrot.slane %v509_v22, 4  ;;  %v529_v40 = vrot.slane %v527_v26, 4  ;;  %v540_v42 = vshrl.u32 %v5076_v18, 16  ;;  %4190 = vmatprep.subr.bf16.mxu1 %v4810_v8  ;;  %v546_v50 = vshll.u32 %v5083_v28, 16  ;;  %v5144_v22 = vld [vmem:[%s6044_s1 + $0xc0] sm:$0xff]  }
  0x30   : > { %6084 = vst [vmem:[#allocation4_spill] sm:$0xff] %v5093_v38  ;;  %v520_v47 = vrot.slane %v519_v35, 4  ;;  %4347 = vmatpush3.bf16.msra.mxu0 %v4804_v49  ;;  %v532_v48 = vrot.slane %v530_v36, 5  ;;  %v538_v15 = vrot.slane %v536_v37, 5  ;;  %4316 = vmatprep.mubr.msk.bf16.mxu0 %vm862_vm2, %v5093_v38  ;;  %v5110_v55 = vmax.bf16 %v6048_v11, %v241_v19  ;;  %v247_v36 = vld [vmem:[%s4924_s6 + $0x60] sm:$0xf] }
  0x31   : > { %4157 = vmatmul.mubr.msk.bf16.gmra.mrb[4].mxu1 %vm862_vm2, %v5093_v38  ;;  %v515_v51 = vsel %vm4976_vm3, %v510_v39, %v514_v6  ;;  %v542_v52 = vrot.slane %v540_v42, 4  ;;  %v5113_v49 = vmax.bf16 %v6048_v11, %v242_v20  ;;  %v548_v60 = vrot.slane %v546_v50, 5  ;;  %4348 = vmatprep.subr.bf16.mxu0 %v4806_v29 }
  0x32   : > { %v525_v56 = vsel %vm4976_vm3, %v520_v47, %v524_v17  ;;  %v533_v57 = vor.u32 %v532_v48, %v529_v40  ;;  %v5118_v61 = vmax.bf16 %v6048_v11, %v243_v44  ;;  %4191 = vmatpush3.bf16.msra.mxu1 %v4810_v8  ;;  %v551_v2 = vshrl.u32 %v5110_v55, 16  ;;  %v246_v8 = vld [vmem:[%s4924_s6 + $0x5c] sm:$0x1]  ;;  %v248_v44 = vld [vmem:[%s4924_s6 + $0x64] sm:$0xf] }
  0x33   : > { %v5124_v0 = vcombine.low %v515_v51, %v525_v56  ;;  %v543_v1 = vor.u32 %v542_v52, %v538_v15  ;;  %v554_v3 = vshll.u32 %v5110_v55, 16  ;;  %4224 = vmatprep.subr.bf16.mxu1 %v5100_v46  ;;  %v560_v6 = vshll.u32 %v5113_v49, 16 }
  0x34   : > { %v534_v5 = vrot.slane %v533_v57, 4  ;;  %v564_v9 = vshrl.u32 %v5113_v49, 16  ;;  %v570_v10 = vshll.u32 %v5118_v61, 16  ;;  %4349 = vmatpush3.bf16.msra.mxu0 %v4806_v29  ;;  %v553_v19 = vrot.slane %v551_v2, 4 }
  0x35   : > { %6085 = vst [vmem:[#allocation5_spill] sm:$0xff] %v5124_v0  ;;  %4317 = vmatmul.mubr.msk.bf16.gmra.mrb[4].mxu0 %vm862_vm2, %v5124_v0  ;;  %4160 = vmatprep.mubr.msk.bf16.mxu1 %vm862_vm2, %v5124_v0  ;;  %v544_v17 = vrot.slane %v543_v1, 4  ;;  %v556_v20 = vrot.slane %v554_v3, 5  ;;  %v5139_v21 = vmax.bf16 %v6048_v11, %v244_v62  ;;  %v562_v29 = vrot.slane %v560_v6, 5 }
  0x36   : > { %v539_v26 = vsel %vm4976_vm3, %v534_v5, %v538_v15  ;;  %v566_v30 = vrot.slane %v564_v9, 4  ;;  %v572_v35 = vrot.slane %v570_v10, 5  ;;  %4350 = vmatprep.subr.bf16.mxu0 %v4807_v63  ;;  %v5152_v40 = vmax.bf16 %v6048_v11, %v245_v4 }
  0x37   : > { %6086 = vst [vmem:[#allocation6_spill] sm:$0xff] %v5139_v21  ;;  %v549_v37 = vsel %vm4976_vm3, %v544_v17, %v548_v60  ;;  %v557_v39 = vor.u32 %v556_v20, %v553_v19  ;;  %v5155_v42 = vmax.bf16 %v6048_v11, %v246_v8  ;;  %v575_v15 = vshrl.u32 %v5139_v21, 16  ;;  %v249_v60 = vld [vmem:[%s4924_s6 + $0x68] sm:$0x1] }
  0x38   : > { %v5158_v47 = vcombine.low %v539_v26, %v549_v37  ;;  %v567_v48 = vor.u32 %v566_v30, %v562_v29  ;;  %v578_v50 = vshll.u32 %v5139_v21, 16  ;;  %4351 = vmatpush3.bf16.msra.mxu0 %v4807_v63  ;;  %v584_v52 = vshll.u32 %v5152_v40, 16  ;;  %v250_v30 = vld [vmem:[%s4924_s6 + $0x6c] sm:$0xf] }
  0x39   : > { %v558_v51 = vrot.slane %v557_v39, 4  ;;  %v588_v56 = vshrl.u32 %v5152_v40, 16  ;;  %v594_v57 = vshll.u32 %v5155_v42, 16  ;;  %4384 = vmatprep.subr.bf16.mxu0 %v5144_v22  ;;  %v577_v1 = vrot.slane %v575_v15, 4 }
  0x3a   : > { %6087 = vst [vmem:[#allocation7_spill] sm:$0xff] %v5158_v47  ;;  %4320 = vmatprep.mubr.msk.bf16.mxu0 %vm862_vm2, %v5158_v47  ;;  %4161 = vmatmul.mubr.msk.bf16.gmra.mrb[8].mxu1 %vm862_vm2, %v5158_v47  ;;  %v568_v62 = vrot.slane %v567_v48, 4  ;;  %v580_v63 = vrot.slane %v578_v50, 5  ;;  %v5172_v2 = vmax.bf16 %v6048_v11, %v247_v36  ;;  %v586_v4 = vrot.slane %v584_v52, 5  ;;  %v251_v36 = vld [vmem:[%s4924_s6 + $0x70] sm:$0xf] }
  0x3b   : > { %v563_v3 = vsel %vm4976_vm3, %v558_v51, %v562_v29  ;;  %v590_v5 = vrot.slane %v588_v56, 4  ;;  %v596_v6 = vrot.slane %v594_v57, 5  ;;  %v5179_v8 = vmax.bf16 %v6048_v11, %v248_v44  ;;  %v252_v48 = vld [vmem:[%s4924_s6 + $0x74] sm:$0x1] }
  0x3c   : > { %v573_v9 = vsel %vm4976_vm3, %v568_v62, %v572_v35  ;;  %v581_v10 = vor.u32 %v580_v63, %v577_v1  ;;  %v5182_v17 = vmax.bf16 %v6048_v11, %v249_v60  ;;  %v599_v26 = vshrl.u32 %v5172_v2, 16 }
  0x3d   : > { %v5184_v19 = vcombine.low %v563_v3, %v573_v9  ;;  %v591_v20 = vor.u32 %v590_v5, %v586_v4  ;;  %v602_v29 = vshll.u32 %v5172_v2, 16  ;;  %v608_v39 = vshll.u32 %v5179_v8, 16 }
  0x3e   : > { %v582_v37 = vrot.slane %v581_v10, 4  ;;  %v612_v35 = vshrl.u32 %v5179_v8, 16  ;;  %v618_v44 = vshll.u32 %v5182_v17, 16  ;;  %v601_v50 = vrot.slane %v599_v26, 4 }
  0x3f   : > { %6088 = vst [vmem:[#allocation8_spill] sm:$0xff] %v5184_v19  ;;  %4321 = vmatmul.mubr.msk.bf16.gmra.mrb[8].mxu0 %vm862_vm2, %v5184_v19  ;;  %4164 = vmatprep.mubr.msk.bf16.mxu1 %vm862_vm2, %v5184_v19  ;;  %v592_v15 = vrot.slane %v591_v20, 4  ;;  %v604_v51 = vrot.slane %v602_v29, 5  ;;  %v3622_v52 = vrot.slane %v4955_v24, 9  ;;  %v610_v57 = vrot.slane %v608_v39, 5 }
  0x40   : > { %v587_v56 = vsel %vm4976_vm3, %v582_v37, %v586_v4  ;;  %v614_v60 = vrot.slane %v612_v35, 4  ;;  %v620_v62 = vrot.slane %v618_v44, 5  ;;  %v1413_v5 = vrot.slane %v4958_v25, 5 }
  0x41   : > { %v597_v63 = vsel %vm4976_vm3, %v592_v15, %v596_v6  ;;  %v605_v3 = vor.u32 %v604_v51, %v601_v50  ;;  %v5211_v9 = vmax.bf16 %v6048_v11, %v250_v30  ;;  %v5216_v20 = vmax.bf16 %v6048_v11, %v251_v36 }
  0x42   : > { %v5213_v4 = vcombine.low %v587_v56, %v597_v63  ;;  %v615_v10 = vor.u32 %v614_v60, %v610_v57  ;;  %v5219_v26 = vmax.bf16 %v6048_v11, %v252_v48  ;;  %v1414_v6 = vsel %vm5203_vm6, %v3622_v52, %v1413_v5  ;;  %v253_v48 = vld [vmem:[%s4924_s6 + $0x78] sm:$0xf]  ;;  %v254_v56 = vld [vmem:[%s4924_s6 + $0x7c] sm:$0xf]  ;;  %v255_v60 = vld [vmem:[%s4924_s6 + $0x80] sm:$0x1] }
  0x43   : > { %v606_v29 = vrot.slane %v605_v3, 4  ;;  %v1415_v37 = vrot.slane %v1413_v5, 4  ;;  %v623_v39 = vshrl.u32 %v5211_v9, 16  ;;  %v626_v36 = vshll.u32 %v5211_v9, 16 }
  0x44   : > { %6091 = vst [vmem:[#allocation9_spill] sm:$0xff] %v5213_v4  ;;  %4324 = vmatprep.mubr.msk.bf16.mxu0 %vm862_vm2, %v5213_v4  ;;  %4165 = vmatmul.mubr.msk.bf16.gmra.mrb[12].mxu1 %vm862_vm2, %v5213_v4  ;;  %v616_v30 = vrot.slane %v615_v10, 4  ;;  %v632_v35 = vshll.u32 %v5216_v20, 16  ;;  %v636_v44 = vshrl.u32 %v5216_v20, 16  ;;  %v642_v52 = vshll.u32 %v5219_v26, 16 }
  0x45   : > { %v611_v15 = vsel %vm4976_vm3, %v606_v29, %v610_v57  ;;  %v1417_v50 = vsel %vm5203_vm6, %v1415_v37, %v1416_v45  ;;  %v625_v51 = vrot.slane %v623_v39, 4  ;;  %v628_v5 = vrot.slane %v626_v36, 5 }
  0x46   : > { %v621_v63 = vsel %vm4976_vm3, %v616_v30, %v620_v62  ;;  %v5243_v3 = vcombine.low %v1414_v6, %v1417_v50  ;;  %v634_v10 = vrot.slane %v632_v35, 5  ;;  %v638_v57 = vrot.slane %v636_v44, 4  ;;  %v256_v50 = vld [vmem:[%s4924_s6 + $0x84] sm:$0xf] }
  0x47   : > { %v5245_v16 = vcombine.low %v611_v15, %v621_v63  ;;  %v644_v29 = vrot.slane %v642_v52, 5  ;;  %v3623_v32 = vrot.slane %v4986_v53, 9  ;;  %v629_v45 = vor.u32 %v628_v5, %v625_v51  ;;  %v257_v63 = vld [vmem:[%s4924_s6 + $0x88] sm:$0xf]  ;;  %v258_v5 = vld [vmem:[%s4924_s6 + $0x8c] sm:$0x1] }
  0x48   : > { %6092 = vst [vmem:[#allocation10_spill] sm:$0xff] %v5243_v3  ;;  %v1420_v37 = vrot.slane %v4989_v54, 5  ;;  %v5250_v39 = vmax.bf16 %v6048_v11, %v253_v48  ;;  %v5253_v4 = vmax.bf16 %v6048_v11, %v254_v56  ;;  %v639_v62 = vor.u32 %v638_v57, %v634_v10 }
  0x49   : > { %6093 = vst [vmem:[#allocation11_spill] sm:$0xff] %v5245_v16  ;;  %4325 = vmatmul.mubr.msk.bf16.gmra.mrb[12].mxu0 %vm862_vm2, %v5245_v16  ;;  %4168 = vmatprep.mubr.msk.bf16.mxu1 %vm862_vm2, %v5245_v16  ;;  %v5260_v6 = vmax.bf16 %v6048_v11, %v255_v60  ;;  %v3624_v30 = vrot.slane %v5015_v23, 9  ;;  %v1427_v36 = vrot.slane %v5018_v27, 5  ;;  %v630_v35 = vrot.slane %v629_v45, 4 }
  0x4a   : > { %4352 = vmatprep.mubr.msk.bf16.mxu0 %vm862_vm2, %v5243_v3  ;;  %v1421_v44 = vsel %vm5203_vm6, %v3623_v32, %v1420_v37  ;;  %v1422_v48 = vrot.slane %v1420_v37, 4  ;;  %v647_v15 = vshrl.u32 %v5250_v39, 16  ;;  %v640_v51 = vrot.slane %v639_v62, 4 }
  0x4b   : > { %v650_v52 = vshll.u32 %v5250_v39, 16  ;;  %v656_v56 = vshll.u32 %v5253_v4, 16  ;;  %v660_v60 = vshrl.u32 %v5253_v4, 16  ;;  %v635_v57 = vsel %vm4976_vm3, %v630_v35, %v634_v10 }
  0x4c   : > { %v6094_v45 = vrot.slane %v4996_v58, 5  ;;  %v649_v37 = vrot.slane %v647_v15, 4  ;;  %v666_v11 = vshll.u32 %v5260_v6, 16  ;;  %v645_v62 = vsel %vm4976_vm3, %v640_v51, %v644_v29  ;;  %v4811_v29 = vld [vmem:[%s6044_s1 + $0xc8] sm:$0xff]   ;;  %v259_v51 = vld [vmem:[%s4924_s6 + $0x90] sm:$0xf] }
  0x4d   : > { %v652_v19 = vrot.slane %v650_v52, 5  ;;  %v658_v47 = vrot.slane %v656_v56, 5  ;;  %v5286_v0 = vcombine.low %v635_v57, %v645_v62  ;;  %v662_v38 = vrot.slane %v660_v60, 4  ;;  %v260_v62 = vld [vmem:[%s4924_s6 + $0x94] sm:$0xf] }
  0x4e   : > { %v1424_v32 = vsel %vm5203_vm6, %v1422_v48, %v6094_v45  ;;  %v668_v59 = vrot.slane %v666_v11, 5  ;;  %v1428_v58 = vsel %vm5203_vm6, %v3624_v30, %v1427_v36  ;;  %v1429_v35 = vrot.slane %v1427_v36, 4 }
  0x4f   : > { %v5284_v16 = vcombine.low %v1421_v44, %v1424_v32  ;;  %6096 = vst [vmem:[#allocation13_spill] sm:$0xff] %v5286_v0  ;;  %v653_v10 = vor.u32 %v652_v19, %v649_v37  ;;  %v1430_v48 = vrot.slane %v5025_v31, 5  ;;  %v6097_v15 = vmov 0   ;;  %4169 = vmatmul.mubr.msk.bf16.gmra.mrb[16].mxu1 %vm862_vm2, %v5286_v0 }
  0x50   : > { %v5292_v45 = vmax.bf16 %v6097_v15, %v256_v50  ;;  %v663_v44 = vor.u32 %v662_v38, %v658_v47  ;;  %v5300_v11 = vmax.bf16 %v6097_v15, %v257_v63  ;;  %v5303_v30 = vmax.bf16 %v6097_v15, %v258_v5 }
  0x51   : > { %6095 = vst [vmem:[#allocation12_spill] sm:$0xff] %v5284_v16  ;;  %v3625_v19 = vrot.slane %v5028_v33, 9  ;;  %4353 = vmatmul.mubr.msk.bf16.vlgmr.msra.gmra.mrb[0].mxu0 %vm862_vm2, %v5284_v16  ;;  %v654_v31 = vrot.slane %v653_v10, 4  ;;  %v1431_v36 = vsel %vm5203_vm6, %v1429_v35, %v1430_v48  ;;  %v261_v48 = vld [vmem:[%s4924_s6 + $0x98] sm:$0x1] }
  0x52   : > { %v671_v50 = vshrl.u32 %v5292_v45, 16  ;;  %v674_v38 = vshll.u32 %v5292_v45, 16  ;;  %4385 = vmatpush3.bf16.msra.mxu0 %v5144_v22  ;;  %v664_v52 = vrot.slane %v663_v44, 4  ;;  %v5314_v56 = vcombine.low %v1428_v58, %v1431_v36  ;;  %v4813_v22 = vld [vmem:[%s6044_s1 + $0xd0] sm:$0xff]  }
  0x53   : > { %v680_v60 = vshll.u32 %v5300_v11, 16  ;;  %v684_v63 = vshrl.u32 %v5300_v11, 16  ;;  %v659_v5 = vsel %vm4976_vm3, %v654_v31, %v658_v47  ;;  %v690_v37 = vshll.u32 %v5303_v30, 16  ;;  %4386 = vmatprep.subr.bf16.mxu0 %v4811_v29 }
  0x54   : > { %6098 = vst [vmem:[#allocation14_spill] sm:$0xff] %v5314_v56  ;;  %v673_v57 = vrot.slane %v671_v50, 4  ;;  %v676_v32 = vrot.slane %v674_v38, 5  ;;  %v669_v58 = vsel %vm4976_vm3, %v664_v52, %v668_v59  ;;  %4356 = vmatprep.mubr.msk.bf16.mxu0 %vm862_vm2, %v5314_v56  ;;  %v1434_v47 = vrot.slane %v5031_v34, 5  ;;  %v4815_v52 = vld [vmem:[%s6044_s1 + $0xd8] sm:$0xff]  }
  0x55   : > { %v682_v10 = vrot.slane %v680_v60, 5  ;;  %v686_v35 = vrot.slane %v684_v63, 4  ;;  %v5331_v44 = vcombine.low %v659_v5, %v669_v58  ;;  %v692_v36 = vrot.slane %v690_v37, 5 }
  0x56   : > { %v677_v31 = vor.u32 %v676_v32, %v673_v57  ;;  %v1437_v50 = vrot.slane %v5042_v43, 5  ;;  %v1435_v0 = vsel %vm5203_vm6, %v3625_v19, %v1434_v47  ;;  %v1436_v16 = vrot.slane %v1434_v47, 4  ;;  %4387 = vmatpush3.bf16.msra.mxu0 %v4811_v29 }
  0x57   : > { %6099 = vst [vmem:[#allocation15_spill] sm:$0xff] %v5331_v44  ;;  %v687_v38 = vor.u32 %v686_v35, %v682_v10  ;;  %v5337_v59 = vmax.bf16 %v6097_v15, %v259_v51  ;;  %4172 = vmatprep.mubr.msk.bf16.mxu1 %vm862_vm2, %v5331_v44  ;;  %v5345_v43 = vmax.bf16 %v6097_v15, %v260_v62  ;;  %v3626_v19 = vrot.slane %v5069_v7, 9  ;;  %v262_v35 = vld [vmem:[%s4924_s6 + $0x9c] sm:$0xf] }
  0x58   : > { %v678_v60 = vrot.slane %v677_v31, 4  ;;  %v5348_v63 = vmax.bf16 %v6097_v15, %v261_v48  ;;  %4388 = vmatprep.subr.bf16.mxu0 %v4813_v22  ;;  %v1438_v51 = vsel %vm5203_vm6, %v1436_v16, %v1437_v50  ;;  %v263_v50 = vld [vmem:[%s4924_s6 + $0xa0] sm:$0xf] }
  0x59   : > { %v688_v29 = vrot.slane %v687_v38, 4  ;;  %v695_v5 = vshrl.u32 %v5337_v59, 16  ;;  %v698_v57 = vshll.u32 %v5337_v59, 16  ;;  %v5357_v37 = vcombine.low %v1435_v0, %v1438_v51  ;;  %v264_v51 = vld [vmem:[%s4924_s6 + $0xa4] sm:$0x1] }
  0x5a   : > { %v683_v32 = vsel %vm4976_vm3, %v678_v60, %v682_v10  ;;  %v704_v62 = vshll.u32 %v5345_v43, 16  ;;  %v708_v58 = vshrl.u32 %v5345_v43, 16  ;;  %v714_v31 = vshll.u32 %v5348_v63, 16  ;;  %4389 = vmatpush3.bf16.msra.mxu0 %v4813_v22 }
  0x5b   : > { %6100 = vst [vmem:[#allocation16_spill] sm:$0xff] %v5357_v37  ;;  %v693_v47 = vsel %vm4976_vm3, %v688_v29, %v692_v36  ;;  %v697_v48 = vrot.slane %v695_v5, 4  ;;  %v700_v16 = vrot.slane %v698_v57, 5  ;;  %4357 = vmatmul.mubr.msk.bf16.gmra.mrb[4].mxu0 %vm862_vm2, %v5357_v37  ;;  %v1441_v60 = vrot.slane %v5076_v18, 5  ;;  %4390 = vmatprep.subr.bf16.mxu0 %v4815_v52  ;;  %v5375_v36 = vld [vmem:[%s6044_s1 + $0xe0] sm:$0xff]  }
  0x5c   : > { %v5366_v38 = vcombine.low %v683_v32, %v693_v47  ;;  %v706_v0 = vrot.slane %v704_v62, 5  ;;  %v710_v10 = vrot.slane %v708_v58, 4  ;;  %6102 = vst [vmem:[#allocation18_spill] sm:$0xff] %v5375_v36  ;;  %v716_v5 = vrot.slane %v714_v31, 5  ;;  %v266_v37 = vld [vmem:[%s4924_s6 + $0xac] sm:$0xf] }
  0x5d   : > { %v701_v29 = vor.u32 %v700_v16, %v697_v48  ;;  %v1444_v22 = vrot.slane %v5083_v28, 5  ;;  %v5379_v57 = vmax.bf16 %v6097_v15, %v262_v35  ;;  %v1442_v62 = vsel %vm5203_vm6, %v3626_v19, %v1441_v60 }
  0x5e   : > { %6101 = vst [vmem:[#allocation17_spill] sm:$0xff] %v5366_v38  ;;  %4173 = vmatmul.mubr.msk.bf16.gmra.mrb[20].mxu1 %vm862_vm2, %v5366_v38  ;;  %v711_v32 = vor.u32 %v710_v10, %v706_v0  ;;  %v1443_v58 = vrot.slane %v1441_v60, 4  ;;  %v5386_v47 = vmax.bf16 %v6097_v15, %v263_v50  ;;  %v5389_v48 = vmax.bf16 %v6097_v15, %v264_v51  ;;  %v265_v38 = vld [vmem:[%s4924_s6 + $0xa8] sm:$0xf] }
  0x5f   : > { %v702_v44 = vrot.slane %v701_v29, 4  ;;  %v719_v28 = vshrl.u32 %v5379_v57, 16  ;;  %v722_v35 = vshll.u32 %v5379_v57, 16  ;;  %4391 = vmatpush3.bf16.msra.mxu0 %v4815_v52 }
  0x60   : > { %v712_v16 = vrot.slane %v711_v32, 4  ;;  %v1445_v31 = vsel %vm5203_vm6, %v1443_v58, %v1444_v22  ;;  %v728_v19 = vshll.u32 %v5386_v47, 16  ;;  %v732_v10 = vshrl.u32 %v5386_v47, 16  ;;  %4424 = vmatprep.subr.bf16.mxu0 %v5375_v36 }
  0x61   : > { %v707_v50 = vsel %vm4976_vm3, %v702_v44, %v706_v0  ;;  %v5400_v60 = vcombine.low %v1442_v62, %v1445_v31  ;;  %v721_v51 = vrot.slane %v719_v28, 4  ;;  %v724_v29 = vrot.slane %v722_v35, 5  ;;  %v267_v62 = vld [vmem:[%s4924_s6 + $0xb0] sm:$0x1] }
  0x62   : > { %v717_v52 = vsel %vm4976_vm3, %v712_v16, %v716_v5  ;;  %v730_v32 = vrot.slane %v728_v19, 5  ;;  %v734_v22 = vrot.slane %v732_v10, 4  ;;  %v738_v58 = vshll.u32 %v5389_v48, 16 }
  0x63   : > { %6103 = vst [vmem:[#allocation19_spill] sm:$0xff] %v5400_v60  ;;  %v5407_v56 = vcombine.low %v707_v50, %v717_v52  ;;  %4360 = vmatprep.mubr.msk.bf16.mxu0 %vm862_vm2, %v5400_v60  ;;  %v725_v3 = vor.u32 %v724_v29, %v721_v51  ;;  %v3627_v44 = vrot.slane %v5110_v55, 9  ;;  %v1448_v0 = vrot.slane %v5113_v49, 5 }
  0x64   : > { %v735_v28 = vor.u32 %v734_v22, %v730_v32  ;;  %v740_v35 = vrot.slane %v738_v58, 5  ;;  %v1451_v5 = vrot.slane %v5118_v61, 5  ;;  %v5416_v16 = vmax.bf16 %v6097_v15, %v265_v38 }
  0x65   : > { %6104 = vst [vmem:[#allocation20_spill] sm:$0xff] %v5407_v56  ;;  %4176 = vmatprep.mubr.msk.bf16.mxu1 %vm862_vm2, %v5407_v56  ;;  %v726_v31 = vrot.slane %v725_v3, 4  ;;  %v1449_v19 = vsel %vm5203_vm6, %v3627_v44, %v1448_v0  ;;  %v1450_v10 = vrot.slane %v1448_v0, 4  ;;  %v5423_v50 = vmax.bf16 %v6097_v15, %v266_v37  ;;  %v269_v56 = vld [vmem:[%s4924_s6 + $0xb8] sm:$0xf] }
  0x66   : > { %v736_v51 = vrot.slane %v735_v28, 4  ;;  %v5426_v29 = vmax.bf16 %v6097_v15, %v267_v62  ;;  %v743_v61 = vshrl.u32 %v5416_v16, 16  ;;  %v746_v38 = vshll.u32 %v5416_v16, 16  ;;  %v268_v28 = vld [vmem:[%s4924_s6 + $0xb4] sm:$0xf] }
  0x67   : > { %v731_v3 = vsel %vm4976_vm3, %v726_v31, %v730_v32  ;;  %v1452_v52 = vsel %vm5203_vm6, %v1450_v10, %v1451_v5  ;;  %v752_v22 = vshll.u32 %v5423_v50, 16  ;;  %v756_v37 = vshrl.u32 %v5423_v50, 16  ;;  %v270_v5 = vld [vmem:[%s4924_s6 + $0xbc] sm:$0x1] }
  0x68   : > { %v741_v58 = vsel %vm4976_vm3, %v736_v51, %v740_v35  ;;  %v5438_v44 = vcombine.low %v1449_v19, %v1452_v52  ;;  %v745_v0 = vrot.slane %v743_v61, 4  ;;  %v748_v62 = vrot.slane %v746_v38, 5 }
  0x69   : > { %v5442_v60 = vcombine.low %v731_v3, %v741_v58  ;;  %v754_v14 = vrot.slane %v752_v22, 5  ;;  %v758_v32 = vrot.slane %v756_v37, 4  ;;  %v762_v31 = vshll.u32 %v5426_v29, 16 }
  0x6a   : > { %6105 = vst [vmem:[#allocation21_spill] sm:$0xff] %v5438_v44  ;;  %4361 = vmatmul.mubr.msk.bf16.gmra.mrb[8].mxu0 %vm862_vm2, %v5438_v44  ;;  %v749_v10 = vor.u32 %v748_v62, %v745_v0  ;;  %v3628_v36 = vrot.slane %v5139_v21, 9  ;;  %v1455_v35 = vrot.slane %v5152_v40, 5  ;;  %v1458_v19 = vrot.slane %v5155_v42, 5 }
  0x6b   : > { %6106 = vst [vmem:[#allocation22_spill] sm:$0xff] %v5442_v60  ;;  %4177 = vmatmul.mubr.msk.bf16.gmra.mrb[24].mxu1 %vm862_vm2, %v5442_v60  ;;  %v759_v51 = vor.u32 %v758_v32, %v754_v14  ;;  %v764_v61 = vrot.slane %v762_v31, 5  ;;  %v5454_v38 = vmax.bf16 %v6097_v15, %v268_v28  ;;  %v5457_v3 = vmax.bf16 %v6097_v15, %v269_v56 }
  0x6c   : > { %v750_v52 = vrot.slane %v749_v10, 4  ;;  %v1456_v22 = vsel %vm5203_vm6, %v3628_v36, %v1455_v35  ;;  %v1457_v37 = vrot.slane %v1455_v35, 4  ;;  %v5462_v58 = vmax.bf16 %v6097_v15, %v270_v5 }
  0x6d   : > { %v760_v42 = vrot.slane %v759_v51, 4  ;;  %v767_v0 = vshrl.u32 %v5454_v38, 16  ;;  %v770_v62 = vshll.u32 %v5454_v38, 16  ;;  %v776_v32 = vshll.u32 %v5457_v3, 16 }
  0x6e   : > { %v755_v28 = vsel %vm4976_vm3, %v750_v52, %v754_v14  ;;  %v1459_v56 = vsel %vm5203_vm6, %v1457_v37, %v1458_v19  ;;  %v780_v31 = vshrl.u32 %v5457_v3, 16  ;;  %v786_v36 = vshll.u32 %v5462_v58, 16 }
  0x6f   : > { %v765_v5 = vsel %vm4976_vm3, %v760_v42, %v764_v61  ;;  %v5475_v10 = vcombine.low %v1456_v22, %v1459_v56  ;;  %v769_v35 = vrot.slane %v767_v0, 4  ;;  %v772_v51 = vrot.slane %v770_v62, 5 }
  0x70   : > { %v5477_v60 = vcombine.low %v755_v28, %v765_v5  ;;  %v778_v44 = vrot.slane %v776_v32, 5  ;;  %v782_v21 = vrot.slane %v780_v31, 4  ;;  %v3629_v19 = vrot.slane %v5172_v2, 9 }
  0x71   : > { %4364 = vmatprep.mubr.msk.bf16.mxu0 %vm862_vm2, %v5475_v10  ;;  %v773_v14 = vor.u32 %v772_v51, %v769_v35  ;;  %v1462_v52 = vrot.slane %v5179_v8, 5  ;;  %v1465_v37 = vrot.slane %v5182_v17, 5  ;;  %v788_v22 = vrot.slane %v786_v36, 5 }
  0x72   : > { %4180 = vmatprep.mubr.msk.bf16.mxu1 %vm862_vm2, %v5477_v60  ;;  %v783_v61 = vor.u32 %v782_v21, %v778_v44  ;;  %v3630_v42 = vrot.slane %v5211_v9, 9  ;;  %v1469_v0 = vrot.slane %v5216_v20, 5  ;;  %v1472_v56 = vrot.slane %v5219_v26, 5 }
  0x73   : > { %v774_v62 = vrot.slane %v773_v14, 4  ;;  %v1463_v32 = vsel %vm5203_vm6, %v3629_v19, %v1462_v52  ;;  %v1464_v28 = vrot.slane %v1462_v52, 4  ;;  %v3585_v17 = vcombine.low %v4933_v12, %v4936_v13 }
  0x74   : > { %v784_v31 = vrot.slane %v783_v61, 4  ;;  %v1470_v5 = vsel %vm5203_vm6, %v3630_v42, %v1469_v0  ;;  %v1471_v21 = vrot.slane %v1469_v0, 4  ;;  %v3631_v51 = vrot.slane %v5250_v39, 9 }
  0x75   : > { %v779_v36 = vsel %vm4976_vm3, %v774_v62, %v778_v44  ;;  %v1466_v35 = vsel %vm5203_vm6, %v1464_v28, %v1465_v37  ;;  %v1476_v14 = vrot.slane %v5253_v4, 5  ;;  %v1479_v61 = vrot.slane %v5260_v6, 5 }
  0x76   : > { %v789_v26 = vsel %vm4976_vm3, %v784_v31, %v788_v22  ;;  %v5503_v19 = vcombine.low %v1463_v32, %v1466_v35  ;;  %v1473_v52 = vsel %vm5203_vm6, %v1471_v21, %v1472_v56  ;;  %v3632_v37 = vrot.slane %v5292_v45, 9 }
  0x77   : > { %v5508_v42 = vcombine.low %v779_v36, %v789_v26  ;;  %v5510_v44 = vcombine.low %v1470_v5, %v1473_v52  ;;  %v1478_v0 = vrot.slane %v1476_v14, 4  ;;  %v1483_v62 = vrot.slane %v5300_v11, 5 }
  0x78   : > { %4365 = vmatmul.mubr.msk.bf16.gmra.mrb[12].mxu0 %vm862_vm2, %v5503_v19  ;;  %v1486_v22 = vrot.slane %v5303_v30, 5  ;;  %v1477_v6 = vsel %vm5203_vm6, %v3631_v51, %v1476_v14  ;;  %v1490_v28 = vrot.slane %v5345_v43, 5  ;;  %v3633_v31 = vrot.slane %v5337_v59, 9 }
  0x79   : > { %4181 = vmatmul.mubr.msk.bf16.gmra.mrb[28].mxu1 %vm862_vm2, %v5508_v42  ;;  %4368 = vmatprep.mubr.msk.bf16.mxu0 %vm862_vm2, %v5510_v44  ;;  %v1480_v32 = vsel %vm5203_vm6, %v1478_v0, %v1479_v61  ;;  %v1484_v56 = vsel %vm5203_vm6, %v3632_v37, %v1483_v62  ;;  %v1485_v30 = vrot.slane %v1483_v62, 4  ;;  %v1493_v21 = vrot.slane %v5348_v63, 5 }
  0x7a   : > { %4192 = vmatprep.mubr.msk.bf16.mxu1 %vm862_vm2, %v3585_v17  ;;  %v1492_v5 = vrot.slane %v1490_v28, 4  ;;  %v5531_v36 = vcombine.low %v1477_v6, %v1480_v32  ;;  %v1497_v51 = vrot.slane %v5386_v47, 5  ;;  %v5538_v17 = vcombine.low %v4955_v24, %v4958_v25  ;;  %v4814_v24 = vld [vmem:[%s6044_s1 + $0x48] sm:$0xff]  }
  0x7b   : > { %v1487_v35 = vsel %vm5203_vm6, %v1485_v30, %v1486_v22  ;;  %v5544_v26 = vcombine.low %v4986_v53, %v4989_v54  ;;  %v3634_v63 = vrot.slane %v5379_v57, 9  ;;  %v1500_v61 = vrot.slane %v5389_v48, 5  ;;  %v272_v48 = vld [vmem:[%s4924_s6 + $0xc4] sm:$0xf] }
  0x7c   : > { %v5540_v14 = vcombine.low %v1484_v56, %v1487_v35  ;;  %v1499_v52 = vrot.slane %v1497_v51, 4  ;;  %v1491_v0 = vsel %vm5203_vm6, %v3633_v31, %v1490_v28  ;;  %v1494_v37 = vsel %vm5203_vm6, %v1492_v5, %v1493_v21  ;;  %v4816_v28 = vld [vmem:[%s6044_s1 + $0x50] sm:$0xff]  }
  0x7d   : > { %v1504_v25 = vrot.slane %v5423_v50, 5  ;;  %v5564_v53 = vcombine.low %v5015_v23, %v5018_v27  ;;  %v1511_v54 = vrot.slane %v5457_v3, 5  ;;  %v5571_v62 = vcombine.low %v1491_v0, %v1494_v37 }
  0x7e   : > { %v1498_v22 = vsel %vm5203_vm6, %v3634_v63, %v1497_v51  ;;  %v1501_v6 = vsel %vm5203_vm6, %v1499_v52, %v1500_v61  ;;  %v3635_v23 = vrot.slane %v5416_v16, 9  ;;  %v1507_v32 = vrot.slane %v5426_v29, 5  ;;  %v271_v51 = vld [vmem:[%s4924_s6 + $0xc0] sm:$0xf]  ;;  %v273_v63 = vld [vmem:[%s4924_s6 + $0xc8] sm:$0x1] }
  0x7f   : > { %v1506_v27 = vrot.slane %v1504_v25, 4  ;;  %v5585_v56 = vcombine.low %v5211_v9, %v5216_v20  ;;  %v1514_v30 = vrot.slane %v5462_v58, 5  ;;  %v5589_v31 = vmax.bf16 %v6097_v15, %v272_v48 }
  0x80   : > { %4369 = vmatmul.mubr.msk.bf16.gmra.mrb[16].mxu0 %vm862_vm2, %v5531_v36  ;;  %v5593_v5 = vcombine.low %v5250_v39, %v5253_v4  ;;  %v5597_v29 = vcombine.low %v5292_v45, %v5300_v11  ;;  %v5599_v21 = vcombine.low %v1498_v22, %v1501_v6  ;;  %v1513_v35 = vrot.slane %v1511_v54, 4 }
  0x81   : > { %4193 = vmatmul.mubr.msk.bf16.vlgmr.msra.gmra.mrb[0].mxu1 %vm862_vm2, %v5538_v17  ;;  %4372 = vmatprep.mubr.msk.bf16.mxu0 %vm862_vm2, %v5540_v14  ;;  %v5605_v9 = vcombine.low %v5337_v59, %v5345_v43  ;;  %v5609_v20 = vcombine.low %v5379_v57, %v5386_v47  ;;  %v5613_v4 = vcombine.low %v5028_v33, %v5031_v34  ;;  %v4818_v59 = vld [vmem:[%s6044_s1 + $0x58] sm:$0xff]   ;;  %v2304_v57 = vrot.slane %v5589_v31, 5 }
  0x82   : > { %4225 = vmatpush3.bf16.msra.mxu1 %v5100_v46  ;;  %4196 = vmatprep.mubr.msk.bf16.mxu1 %vm862_vm2, %v5544_v26  ;;  %v3636_v46 = vrot.slane %v5454_v38, 9  ;;  %v5617_v39 = vcombine.low %v5416_v16, %v5423_v50  ;;  %v5621_v45 = vcombine.low %v5454_v38, %v5457_v3  ;;  %v1505_v11 = vsel %vm5203_vm6, %v3635_v23, %v1504_v25  ;;  %v5656_v3 = vld [vmem:[%s6044_s1 + $0x60] sm:$0xff]  }
  0x83   : > { %4226 = vmatprep.subr.bf16.mxu1 %v4814_v24  ;;  %v1508_v33 = vsel %vm5203_vm6, %v1506_v27, %v1507_v32  ;;  %v5633_v34 = vmax.bf16 %v6097_v15, %v271_v51  ;;  %v327_v43 = vmax.bf16 %v6097_v15, %v273_v63  ;;  %v1515_v16 = vsel %vm5203_vm6, %v1513_v35, %v1514_v30  ;;  %v6107_v51 = vld [vmem:[#allocation6_spill] sm:$0xff] }
  0x84   : > { %v1512_v47 = vsel %vm5203_vm6, %v3636_v46, %v1511_v54  ;;  %v5649_v50 = vcombine.low %v5069_v7, %v5076_v18  ;;  %v5651_v38 = vcombine.low %v1505_v11, %v1508_v33  ;;  %v2306_v61 = vrot.slane %v2304_v57, 4 }
  0x85   : > { %v5658_v58 = vcombine.low %v1512_v47, %v1515_v16  ;;  %v3715_v52 = vrot.slane %v5633_v34, 9  ;;  %v2307_v0 = vrot.slane %v327_v43, 5  ;;  %v2055_v37 = vshrl.u32 %v5633_v34, 16  ;;  %v4825_v16 = vld [vmem:[%s6044_s1 + $0x100] sm:$0xff]  }
  0x86   : > { %4227 = vmatpush3.bf16.msra.mxu1 %v4814_v24  ;;  %v2058_v24 = vshll.u32 %v5633_v34, 16  ;;  %v2064_v7 = vshll.u32 %v5589_v31, 16  ;;  %v2068_v18 = vshrl.u32 %v5589_v31, 16  ;;  %v5667_v25 = vcombine.low %v5110_v55, %v5113_v49 }
  0x87   : > { %4228 = vmatprep.subr.bf16.mxu1 %v4816_v28  ;;  %v2057_v54 = vrot.slane %v2055_v37, 4  ;;  %v2305_v23 = vsel %vm5203_vm6, %v3715_v52, %v2304_v57  ;;  %v2308_v55 = vsel %vm5203_vm6, %v2306_v61, %v2307_v0  ;;  %v2074_v32 = vshll.u32 %v327_v43, 16  ;;  %v4823_v57 = vld [vmem:[%s6044_s1 + $0xf8] sm:$0xff]   ;;  %v6109_v52 = vld [vmem:[#allocation2_spill] sm:$0xff] }
  0x88   : > { %4373 = vmatmul.mubr.msk.bf16.gmra.mrb[20].mxu0 %vm862_vm2, %v5571_v62  ;;  %v2060_v48 = vrot.slane %v2058_v24, 5  ;;  %v2066_v22 = vrot.slane %v2064_v7, 5  ;;  %v2070_v6 = vrot.slane %v2068_v18, 4  ;;  %v5682_v35 = vcombine.low %v2305_v23, %v2308_v55  ;;  %v4822_v7 = vld [vmem:[%s6044_s1 + $0x68] sm:$0xff]   ;;  %v6110_v18 = vld [vmem:[#allocation10_spill] sm:$0xff] }
  0x89   : > { %4197 = vmatmul.mubr.msk.bf16.gmra.mrb[4].mxu1 %vm862_vm2, %v5564_v53  ;;  %4376 = vmatprep.mubr.msk.bf16.mxu0 %vm862_vm2, %v5599_v21  ;;  %v2076_v30 = vrot.slane %v2074_v32, 5  ;;  %v5686_v63 = vcombine.low %v6107_v51, %v5152_v40  ;;  %v5694_v33 = vcombine.low %v5172_v2, %v5179_v8  ;;  %v4819_v40 = vld [vmem:[%s6044_s1 + $0xe8] sm:$0xff]   ;;  %v6108_v2 = vld [vmem:[#allocation18_spill] sm:$0xff]  ;;  %v4821_v8 = vld [vmem:[%s6044_s1 + $0xf0] sm:$0xff]   ;;  %v1406_v47 = vrot.slane %v4936_v13, 5 }
  0x8a   : > { %4200 = vmatprep.mubr.msk.bf16.mxu1 %vm862_vm2, %v5613_v4  ;;  %4229 = vmatpush3.bf16.msra.mxu1 %v4816_v28  ;;  %v2061_v49 = vor.u32 %v2060_v48, %v2057_v54  ;;  %v2071_v27 = vor.u32 %v2070_v6, %v2066_v22  ;;  %v1409_v61 = vrot.slane %v6109_v52, 5  ;;  %v3621_v0 = vrot.slane %v4933_v12, 9  ;;  %v6111_v54 = vld [vmem:[#allocation12_spill] sm:$0xff]  ;;  %v6112_v6 = vld [vmem:[#allocation14_spill] sm:$0xff]  ;;  %v274_v55 = vld [vmem:[%s4924_s6 + $0xcc] sm:$0xf] }
  0x8b   : > { %4230 = vmatprep.subr.bf16.mxu1 %v4818_v59  ;;  %v1408_v37 = vrot.slane %v1406_v47, 4  ;;  %v4824_v48 = vld [vmem:[%s6044_s1 + $0x70] sm:$0xff]   ;;  %v5785_v23 = vcombine.low %v5633_v34, %v5589_v31  ;;  %v5795_v32 = vmax.bf16 %v6097_v15, %v274_v55  ;;  %v6115_v31 = vld [vmem:[#allocation21_spill] sm:$0xff]  ;;  %v4827_v51 = vld [vmem:[%s6044_s1 + $0x108] sm:$0xff]  }
  0x8c   : > { %v2062_v46 = vrot.slane %v2061_v49, 4  ;;  %v2072_v28 = vrot.slane %v2071_v27, 4  ;;  %v1407_v13 = vsel %vm5203_vm6, %v3621_v0, %v1406_v47  ;;  %v275_v49 = vld [vmem:[%s4924_s6 + $0xd0] sm:$0xf]  ;;  %v4830_v27 = vld [vmem:[%s6044_s1 + $0x80] sm:$0xff]   ;;  %v6121_v47 = vld [vmem:[#allocation9_spill] sm:$0xff] }
  0x8d   : > { %v1410_v12 = vsel %vm5203_vm6, %v1408_v37, %v1409_v61  ;;  %v6123_v52 = vld [vmem:[#allocation13_spill] sm:$0xff]  ;;  %v6124_v61 = vld [vmem:[#allocation15_spill] sm:$0xff]  ;;  %v6126_v37 = vld [vmem:[#allocation20_spill] sm:$0xff] }
  0x8e   : > { %4231 = vmatpush3.bf16.msra.mxu1 %v4818_v59  ;;  %v2067_v11 = vsel %vm4976_vm3, %v2062_v46, %v2066_v22  ;;  %v2077_v59 = vsel %vm4976_vm3, %v2072_v28, %v2076_v30  ;;  %v3637_v24 = vcombine.low %v1407_v13, %v1410_v12  ;;  %v4826_v22 = vld [vmem:[%s6044_s1 + $0x78] sm:$0xff]   ;;  %v5798_v46 = vmax.bf16 %v6097_v15, %v275_v49  ;;  %v6114_v28 = vld [vmem:[#allocation19_spill] sm:$0xff]  ;;  %v276_v13 = vld [vmem:[%s4924_s6 + $0xd4] sm:$0x1] }
  0x8f   : > { %4264 = vmatprep.subr.bf16.mxu1 %v5656_v3  ;;  %v5696_v43 = vcombine.low %v2067_v11, %v2077_v59  ;;  %v6116_v30 = vld [vmem:[#allocation3_spill] sm:$0xff]  ;;  %v6117_v11 = vld [vmem:[#allocation4_spill] sm:$0xff]  ;;  %v6118_v59 = vld [vmem:[#allocation5_spill] sm:$0xff]  ;;  %v2758_v12 = vshrl.u32 %v5795_v32, 16 }
  0x90   : > { %4377 = vmatmul.mubr.msk.bf16.gmra.mrb[24].mxu0 %vm862_vm2, %v5651_v38  ;;  %v3737_v34 = vcombine.low %v5795_v32, %v5798_v46  ;;  %v6125_v0 = vld [vmem:[#allocation17_spill] sm:$0xff]  ;;  %v3007_v41 = vrot.slane %v5798_v46, 5 }
  0x91   : > { %4201 = vmatmul.mubr.msk.bf16.gmra.mrb[8].mxu1 %vm862_vm2, %v5649_v50  ;;  %4380 = vmatprep.mubr.msk.bf16.mxu0 %vm862_vm2, %v5658_v58 }
  0x92   : > { %4204 = vmatprep.mubr.msk.bf16.mxu1 %vm862_vm2, %v5667_v25 }
  0x98   : > { %4381 = vmatmul.mubr.msk.bf16.gmra.mrb[28].mxu0 %vm862_vm2, %v5682_v35 }
  0x99   : > { %4205 = vmatmul.mubr.msk.bf16.gmra.mrb[12].mxu1 %vm862_vm2, %v5686_v63  ;;  %4392 = vmatprep.mubr.msk.bf16.mxu0 %vm862_vm2, %v5544_v26 }
  0x9a   : > { %4208 = vmatprep.mubr.msk.bf16.mxu1 %vm862_vm2, %v5694_v33 }
  0xa0   : > { %4393 = vmatmul.mubr.msk.bf16.vlgmr.msra.gmra.mrb[0].mxu0 %vm862_vm2, %v5564_v53 }
  0xa1   : > { %4209 = vmatmul.mubr.msk.bf16.gmra.mrb[16].mxu1 %vm862_vm2, %v5585_v56  ;;  %4425 = vmatpush3.bf16.msra.mxu0 %v6108_v2  ;;  %v4829_v2 = vld [vmem:[%s6044_s1 + $0x118] sm:$0xff]  }
  0xa2   : > { %4212 = vmatprep.mubr.msk.bf16.mxu1 %vm862_vm2, %v5593_v5  ;;  %4396 = vmatprep.mubr.msk.bf16.mxu0 %vm862_vm2, %v5613_v4 }
  0xa3   : > { %4426 = vmatprep.subr.bf16.mxu0 %v4819_v40 }
  0xa5   : > { %4427 = vmatpush3.bf16.msra.mxu0 %v4819_v40  ;;  %v4828_v40 = vld [vmem:[%s6044_s1 + $0x110] sm:$0xff]  }
  0xa6   : > { %4428 = vmatprep.subr.bf16.mxu0 %v4821_v8 }
  0xa8   : > { %4397 = vmatmul.mubr.msk.bf16.gmra.mrb[4].mxu0 %vm862_vm2, %v5649_v50 }
  0xa9   : > { %4213 = vmatmul.mubr.msk.bf16.gmra.mrb[20].mxu1 %vm862_vm2, %v5597_v29  ;;  %4400 = vmatprep.mubr.msk.bf16.mxu0 %vm862_vm2, %v5667_v25 }
  0xaa   : > { %4216 = vmatprep.mubr.msk.bf16.mxu1 %vm862_vm2, %v5605_v9  ;;  %4429 = vmatpush3.bf16.msra.mxu0 %v4821_v8  ;;  %v6119_v8 = vld [vmem:[#allocation7_spill] sm:$0xff] }
  0xab   : > { %4430 = vmatprep.subr.bf16.mxu0 %v4823_v57 }
  0xae   : > { %4431 = vmatpush3.bf16.msra.mxu0 %v4823_v57  ;;  %v6120_v57 = vld [vmem:[#allocation8_spill] sm:$0xff] }
  0xaf   : > { %4464 = vmatprep.subr.bf16.mxu0 %v4825_v16 }
  0xb0   : > { %4401 = vmatmul.mubr.msk.bf16.gmra.mrb[8].mxu0 %vm862_vm2, %v5686_v63 }
  0xb1   : > { %4217 = vmatmul.mubr.msk.bf16.gmra.mrb[24].mxu1 %vm862_vm2, %v5609_v20  ;;  %4404 = vmatprep.mubr.msk.bf16.mxu0 %vm862_vm2, %v5694_v33 }
  0xb2   : > { %4220 = vmatprep.mubr.msk.bf16.mxu1 %vm862_vm2, %v5617_v39 }
  0xb8   : > { %4405 = vmatmul.mubr.msk.bf16.gmra.mrb[12].mxu0 %vm862_vm2, %v5585_v56 }
  0xb9   : > { %4221 = vmatmul.mubr.msk.bf16.gmra.mrb[28].mxu1 %vm862_vm2, %v5621_v45  ;;  %4408 = vmatprep.mubr.msk.bf16.mxu0 %vm862_vm2, %v5593_v5 }
  0xba   : > { %4232 = vmatprep.mubr.msk.bf16.mxu1 %vm862_vm2, %v3637_v24  ;;  %v2761_v24 = vshll.u32 %v5795_v32, 16 }
  0xc0   : > { %4409 = vmatmul.mubr.msk.bf16.gmra.mrb[16].mxu0 %vm862_vm2, %v5597_v29 }
  0xc1   : > { %4233 = vmatmul.mubr.msk.bf16.vlgmr.msra.gmra.mrb[0].mxu1 %vm862_vm2, %v6110_v18  ;;  %4412 = vmatprep.mubr.msk.bf16.mxu0 %vm862_vm2, %v5605_v9  ;;  %v2771_v18 = vshrl.u32 %v5798_v46, 16 }
  0xc2   : > { %4265 = vmatpush3.bf16.msra.mxu1 %v5656_v3  ;;  %4236 = vmatprep.mubr.msk.bf16.mxu1 %vm862_vm2, %v6111_v54  ;;  %v6113_v3 = vld [vmem:[#allocation16_spill] sm:$0xff] }
  0xc3   : > { %4266 = vmatprep.subr.bf16.mxu1 %v4822_v7  ;;  %v2773_v49 = vrot.slane %v2771_v18, 4 }
  0xc6   : > { %4267 = vmatpush3.bf16.msra.mxu1 %v4822_v7  ;;  %v2767_v7 = vshll.u32 %v5798_v46, 16 }
  0xc7   : > { %4268 = vmatprep.subr.bf16.mxu1 %v4824_v48 }
  0xc8   : > { %4413 = vmatmul.mubr.msk.bf16.gmra.mrb[20].mxu0 %vm862_vm2, %v5609_v20  ;;  %v2769_v55 = vrot.slane %v2767_v7, 5 }
  0xc9   : > { %4237 = vmatmul.mubr.msk.bf16.gmra.mrb[4].mxu1 %vm862_vm2, %v6112_v6  ;;  %4416 = vmatprep.mubr.msk.bf16.mxu0 %vm862_vm2, %v5617_v39 }
  0xca   : > { %4240 = vmatprep.mubr.msk.bf16.mxu1 %vm862_vm2, %v6113_v3  ;;  %4269 = vmatpush3.bf16.msra.mxu1 %v4824_v48  ;;  %v2760_v48 = vrot.slane %v2758_v12, 4 }
  0xcb   : > { %4270 = vmatprep.subr.bf16.mxu1 %v4826_v22 }
  0xce   : > { %4271 = vmatpush3.bf16.msra.mxu1 %v4826_v22  ;;  %v2763_v22 = vrot.slane %v2761_v24, 5 }
  0xcf   : > { %4504 = vmatprep.subr.bf16.mxu1 %v4830_v27 }
  0xd0   : > { %4417 = vmatmul.mubr.msk.bf16.gmra.mrb[24].mxu0 %vm862_vm2, %v5621_v45 }
  0xd1   : > { %4241 = vmatmul.mubr.msk.bf16.gmra.mrb[8].mxu1 %vm862_vm2, %v6114_v28  ;;  %4420 = vmatprep.mubr.msk.bf16.mxu0 %vm862_vm2, %v5785_v23 }
  0xd2   : > { %4244 = vmatprep.mubr.msk.bf16.mxu1 %vm862_vm2, %v6115_v31 }
  0xd8   : > { %4421 = vmatmul.mubr.msk.bf16.gmra.mrb[28].mxu0 %vm862_vm2, %v3737_v34  ;;  %v6127_v34 = vld [vmem:[#allocation22_spill] sm:$0xff] }
  0xd9   : > { %4245 = vmatmul.mubr.msk.bf16.gmra.mrb[12].mxu1 %vm862_vm2, %v5475_v10  ;;  %4432 = vmatprep.mubr.msk.bf16.mxu0 %vm862_vm2, %v6116_v30 }
  0xda   : > { %4248 = vmatprep.mubr.msk.bf16.mxu1 %vm862_vm2, %v5503_v19 }
  0xe0   : > { %4433 = vmatmul.mubr.msk.bf16.vlgmr.msra.gmra.mrb[0].mxu0 %vm862_vm2, %v6117_v11 }
  0xe1   : > { %4249 = vmatmul.mubr.msk.bf16.gmra.mrb[16].mxu1 %vm862_vm2, %v5510_v44  ;;  %4465 = vmatpush3.bf16.msra.mxu0 %v4825_v16  ;;  %v6122_v16 = vld [vmem:[#allocation11_spill] sm:$0xff] }
  0xe2   : > { %4252 = vmatprep.mubr.msk.bf16.mxu1 %vm862_vm2, %v5531_v36  ;;  %4436 = vmatprep.mubr.msk.bf16.mxu0 %vm862_vm2, %v6118_v59 }
  0xe3   : > { %4466 = vmatprep.subr.bf16.mxu0 %v4827_v51 }
  0xe5   : > { %4467 = vmatpush3.bf16.msra.mxu0 %v4827_v51  ;;  %v4833_v51 = vld [vmem:[%s6044_s1 + $0x98] sm:$0xff]  }
  0xe6   : > { %4468 = vmatprep.subr.bf16.mxu0 %v4828_v40 }
  0xe8   : > { %4437 = vmatmul.mubr.msk.bf16.gmra.mrb[4].mxu0 %vm862_vm2, %v6119_v8 }
  0xe9   : > { %4253 = vmatmul.mubr.msk.bf16.gmra.mrb[20].mxu1 %vm862_vm2, %v5540_v14  ;;  %4440 = vmatprep.mubr.msk.bf16.mxu0 %vm862_vm2, %v6120_v57 }
  0xea   : > { %4256 = vmatprep.mubr.msk.bf16.mxu1 %vm862_vm2, %v5571_v62  ;;  %4469 = vmatpush3.bf16.msra.mxu0 %v4828_v40 }
  0xeb   : > { %4470 = vmatprep.subr.bf16.mxu0 %v4829_v2 }
  0xee   : > { %4471 = vmatpush3.bf16.msra.mxu0 %v4829_v2 }
  0xf0   : > { %4441 = vmatmul.mubr.msk.bf16.gmra.mrb[8].mxu0 %vm862_vm2, %v6121_v47 }
  0xf1   : > { %4257 = vmatmul.mubr.msk.bf16.gmra.mrb[24].mxu1 %vm862_vm2, %v5599_v21  ;;  %4444 = vmatprep.mubr.msk.bf16.mxu0 %vm862_vm2, %v6122_v16 }
  0xf2   : > { %4260 = vmatprep.mubr.msk.bf16.mxu1 %vm862_vm2, %v5651_v38 }
  0xf8   : > { %4445 = vmatmul.mubr.msk.bf16.gmra.mrb[12].mxu0 %vm862_vm2, %v6123_v52 }
  0xf9   : > { %4261 = vmatmul.mubr.msk.bf16.gmra.mrb[28].mxu1 %vm862_vm2, %v5658_v58  ;;  %4448 = vmatprep.mubr.msk.bf16.mxu0 %vm862_vm2, %v6124_v61 }
  0xfa   : > { %4272 = vmatprep.mubr.msk.bf16.mxu1 %vm862_vm2, %v5538_v17  ;;  %v4831_v17 = vld [vmem:[%s6044_s1 + $0x88] sm:$0xff]  }
 0x100   : > { %4449 = vmatmul.mubr.msk.bf16.gmra.mrb[16].mxu0 %vm862_vm2, %v6125_v0 }
 0x101   : > { %4273 = vmatmul.mubr.msk.bf16.vlgmr.msra.gmra.mrb[0].mxu1 %vm862_vm2, %v5544_v26  ;;  %4452 = vmatprep.mubr.msk.bf16.mxu0 %vm862_vm2, %v6126_v37  ;;  %v5873_v26 = vmax.bf16 %v6097_v15, %v276_v13  ;;  %v2764_v15 = vor.u32 %v2763_v22, %v2760_v48 }
 0x102   : > { %4508 = vmatpush3.bf16.msra.mxu1 %v4830_v27  ;;  %4276 = vmatprep.mubr.msk.bf16.mxu1 %vm862_vm2, %v5564_v53  ;;  %v4832_v27 = vld [vmem:[%s6044_s1 + $0x90] sm:$0xff]   ;;  %v2774_v53 = vor.u32 %v2773_v49, %v2769_v55 }
 0x103   : > { %4505 = vmatprep.subr.bf16.mxu1 %v4831_v17  ;;  %v2777_v30 = vshll.u32 %v5873_v26, 16  ;;  %v2765_v11 = vrot.slane %v2764_v15, 4 }
 0x104   : > { %v2775_v59 = vrot.slane %v2774_v53, 4 }
 0x105   : > { %v2779_v40 = vrot.slane %v2777_v30, 5 }
 0x106   : > { %4509 = vmatpush3.bf16.msra.mxu1 %v4831_v17 }
 0x107   : > { %4506 = vmatprep.subr.bf16.mxu1 %v4832_v27 }
 0x108   : > { %4453 = vmatmul.mubr.msk.bf16.gmra.mrb[20].mxu0 %vm862_vm2, %v6127_v34 }
 0x109   : > { %4277 = vmatmul.mubr.msk.bf16.gmra.mrb[4].mxu1 %vm862_vm2, %v5613_v4  ;;  %4456 = vmatprep.mubr.msk.bf16.mxu0 %vm862_vm2, %v5477_v60  ;;  %v2770_v4 = vsel %vm4976_vm3, %v2765_v11, %v2769_v55 }
 0x10a   : > { %4280 = vmatprep.mubr.msk.bf16.mxu1 %vm862_vm2, %v5649_v50  ;;  %4510 = vmatpush3.bf16.msra.mxu1 %v4832_v27  ;;  %v2780_v50 = vsel %vm4976_vm3, %v2775_v59, %v2779_v40 }
 0x10b   : > { %4507 = vmatprep.subr.bf16.mxu1 %v4833_v51  ;;  %v3758_v2 = vcombine.low %v2770_v4, %v2780_v50 }
 0x10e   : > { %4511 = vmatpush3.bf16.msra.mxu1 %v4833_v51 }
 0x110   : > { %4457 = vmatmul.mubr.msk.bf16.gmra.mrb[24].mxu0 %vm862_vm2, %v5508_v42 }
 0x111   : > { %4281 = vmatmul.mubr.msk.bf16.gmra.mrb[8].mxu1 %vm862_vm2, %v5667_v25  ;;  %4460 = vmatprep.mubr.msk.bf16.mxu0 %vm862_vm2, %v5696_v43 }
 0x112   : > { %4284 = vmatprep.mubr.msk.bf16.mxu1 %vm862_vm2, %v5686_v63 }
 0x118   : > { %4461 = vmatmul.mubr.msk.bf16.gmra.mrb[28].mxu0 %vm862_vm2, %v3758_v2 }
 0x119   : > { %4285 = vmatmul.mubr.msk.bf16.gmra.mrb[12].mxu1 %vm862_vm2, %v5694_v33  ;;  %4472 = vmatprep.mubr.msk.bf16.mxu0 %vm862_vm2, %v6111_v54 }
 0x11a   : > { %4288 = vmatprep.mubr.msk.bf16.mxu1 %vm862_vm2, %v5585_v56 }
 0x120   : > { %4473 = vmatmul.mubr.msk.bf16.vlgmr.msra.gmra.mrb[0].mxu0 %vm862_vm2, %v6112_v6  ;;  %v5978_v6 = vld [vmem:[%s6045_s2] ss:$0 sm:$0xff] }
 0x121   : > { %4289 = vmatmul.mubr.msk.bf16.gmra.mrb[16].mxu1 %vm862_vm2, %v5593_v5  ;;  %4476 = vmatprep.mubr.msk.bf16.mxu0 %vm862_vm2, %v6113_v3 }
 0x122   : > { %4292 = vmatprep.mubr.msk.bf16.mxu1 %vm862_vm2, %v5597_v29 }
 0x128   : > { %4477 = vmatmul.mubr.msk.bf16.gmra.mrb[4].mxu0 %vm862_vm2, %v6114_v28 }
 0x129   : > { %4293 = vmatmul.mubr.msk.bf16.gmra.mrb[20].mxu1 %vm862_vm2, %v5605_v9  ;;  %4480 = vmatprep.mubr.msk.bf16.mxu0 %vm862_vm2, %v6115_v31 }
 0x12a   : > { %4296 = vmatprep.mubr.msk.bf16.mxu1 %vm862_vm2, %v5609_v20 }
 0x130   : > { %4481 = vmatmul.mubr.msk.bf16.gmra.mrb[8].mxu0 %vm862_vm2, %v5475_v10  ;;  %v3779_v10 = vrot.slane %v5795_v32, 9 }
 0x131   : > { %4297 = vmatmul.mubr.msk.bf16.gmra.mrb[24].mxu1 %vm862_vm2, %v5617_v39  ;;  %4484 = vmatprep.mubr.msk.bf16.mxu0 %vm862_vm2, %v5503_v19  ;;  %v3009_v19 = vrot.slane %v3007_v41, 4 }
 0x132   : > { %4300 = vmatprep.mubr.msk.bf16.mxu1 %vm862_vm2, %v5621_v45 }
 0x138   : > { %4485 = vmatmul.mubr.msk.bf16.gmra.mrb[12].mxu0 %vm862_vm2, %v5510_v44  ;;  %v3010_v44 = vrot.slane %v5873_v26, 5 }
 0x139   : > { %4301 = vmatmul.mubr.msk.bf16.gmra.mrb[28].mxu1 %vm862_vm2, %v5785_v23  ;;  %4488 = vmatprep.mubr.msk.bf16.mxu0 %vm862_vm2, %v5531_v36  ;;  %v3008_v36 = vsel %vm5203_vm6, %v3779_v10, %v3007_v41 }
 0x13a   : > { %4328 = vmatprep.mubr.msk.bf16.mxu1 %vm862_vm2, %v6123_v52 }
 0x140   : > { %4489 = vmatmul.mubr.msk.bf16.gmra.mrb[16].mxu0 %vm862_vm2, %v5540_v14  ;;  %v3011_v14 = vsel %vm5203_vm6, %v3009_v19, %v3010_v44 }
 0x141   : > { %4329 = vmatmul.mubr.msk.bf16.vlgmr.msra.gmra.mrb[16].mxu1 %vm862_vm2, %v6124_v61  ;;  %4492 = vmatprep.mubr.msk.bf16.mxu0 %vm862_vm2, %v5571_v62  ;;  %v3780_v62 = vcombine.low %v3008_v36, %v3011_v14 }
 0x142   : > { %4332 = vmatprep.mubr.msk.bf16.mxu1 %vm862_vm2, %v6125_v0 }
 0x148   : > { %4493 = vmatmul.mubr.msk.bf16.gmra.mrb[20].mxu0 %vm862_vm2, %v5599_v21 }
 0x149   : > { %4333 = vmatmul.mubr.msk.bf16.gmra.mrb[20].mxu1 %vm862_vm2, %v6126_v37  ;;  %4496 = vmatprep.mubr.msk.bf16.mxu0 %vm862_vm2, %v5651_v38 }
 0x14a   : > { %4336 = vmatprep.mubr.msk.bf16.mxu1 %vm862_vm2, %v6127_v34 }
 0x150   : > { %4497 = vmatmul.mubr.msk.bf16.gmra.mrb[24].mxu0 %vm862_vm2, %v5658_v58 }
 0x151   : > { %4337 = vmatmul.mubr.msk.bf16.gmra.mrb[24].mxu1 %vm862_vm2, %v5477_v60  ;;  %4500 = vmatprep.mubr.msk.bf16.mxu0 %vm862_vm2, %v5682_v35 }
 0x152   : > { %4340 = vmatprep.mubr.msk.bf16.mxu1 %vm862_vm2, %v5508_v42 }
 0x158   : > { %4501 = vmatmul.mubr.msk.bf16.gmra.mrb[28].mxu0 %vm862_vm2, %v3780_v62 }
 0x159   : > { %4341 = vmatmul.mubr.msk.bf16.gmra.mrb[28].mxu1 %vm862_vm2, %v5696_v43 }
 0x1d4   : > { %v4274_v56 = vpop.f32.mrb[0].mxu1 }
 0x1d5   : > { %v1895_v60 = vpop.f32.mrb[1].mxu1 }
 0x1d6   : > { %v4275_v5 = vpop.f32.mrb[2].mxu1 }
 0x1d7   : > { %v1898_v29 = vpop.f32.mrb[3].mxu1 }
 0x1dc   : > { %v4278_v21 = vpop.f32.mrb[4].mxu1 }
 0x1dd   : > { %v1911_v9 = vpop.f32.mrb[5].mxu1 }
 0x1de   : > { %v4279_v20 = vpop.f32.mrb[6].mxu1 }
 0x1df   : > { %v1914_v39 = vpop.f32.mrb[7].mxu1 }
 0x1e4   : > { %v4282_v1 = vpop.f32.mrb[8].mxu1 }
 0x1e5   : > { %v1927_v45 = vpop.f32.mrb[9].mxu1 }
 0x1e6   : > { %v4283_v38 = vpop.f32.mrb[10].mxu1 }
 0x1e7   : > { %v1930_v58 = vpop.f32.mrb[11].mxu1 }
 0x1ec   : > { %v4286_v42 = vpop.f32.mrb[12].mxu1 }
 0x1ed   : > { %v1943_v25 = vpop.f32.mrb[13].mxu1 }
 0x1ee   : > { %v4287_v35 = vpop.f32.mrb[14].mxu1 }
 0x1ef   : > { %v1946_v63 = vpop.f32.mrb[15].mxu1 }
 0x1f3   : > { %v4474_v33 = vpop.f32.mrb[0].mxu0 }
 0x1f4   : > { %v4512_v54 = vadd.f32 %v4474_v33, %v4274_v56  ;;  %v3076_v43 = vpop.f32.mrb[1].mxu0 }
 0x1f5   : > { %v4513_v3 = vadd.f32 %v3076_v43, %v1895_v60  ;;  %v4475_v23 = vpop.f32.mrb[2].mxu0 }
 0x1f6   : > { %v4514_v32 = vadd.f32 %v4475_v23, %v4275_v5  ;;  %v3079_v46 = vpop.f32.mrb[3].mxu0  ;;  %v3244_v31 = vadd.f32 %v4512_v54, %v5978_v6 }
 0x1f7   : > { %v4515_v28 = vadd.f32 %v3079_v46, %v1898_v29  ;;  %v3242_v57 = vadd.f32 %v4513_v3, %v5978_v6 }
 0x1f8   : > { %v3245_v8 = vadd.f32 %v4514_v32, %v5978_v6 }
 0x1f9   : > { %v3243_v47 = vadd.f32 %v4515_v28, %v5978_v6 }
 0x1fa   : > { %v3877_v16 = vpack.c.bf16 %v3245_v8, %v3244_v31 }
 0x1fb   : > { %v3872_v52 = vpack.c.bf16 %v3243_v47, %v3242_v57  ;;  %v4478_v61 = vpop.f32.mrb[4].mxu0 }
 0x1fc   : > { %3949 = vst [vmem:[%s5987_s11 + $0x8] sm:$0xff] %v3877_v16   ;;  %v4516_v0 = vadd.f32 %v4478_v61, %v4278_v21  ;;  %v3092_v37 = vpop.f32.mrb[5].mxu0 }
 0x1fd   : > { %3873 = vst [vmem:[%s5987_s11] sm:$0xff] %v3872_v52   ;;  %v4517_v13 = vadd.f32 %v3092_v37, %v1911_v9  ;;  %v4479_v12 = vpop.f32.mrb[6].mxu0 }
 0x1fe   : > { %v4518_v24 = vadd.f32 %v4479_v12, %v4279_v20  ;;  %v3095_v7 = vpop.f32.mrb[7].mxu0  ;;  %v3248_v17 = vadd.f32 %v4516_v0, %v5978_v6 }
 0x1ff   : > { %v4519_v18 = vadd.f32 %v3095_v7, %v1914_v39  ;;  %v3246_v48 = vadd.f32 %v4517_v13, %v5978_v6 }
 0x200   : > { %v3249_v26 = vadd.f32 %v4518_v24, %v5978_v6 }
 0x201   : > { %v3247_v22 = vadd.f32 %v4519_v18, %v5978_v6 }
 0x202   : > { %v3887_v55 = vpack.c.bf16 %v3249_v26, %v3248_v17 }
 0x203   : > { %v3882_v49 = vpack.c.bf16 %v3247_v22, %v3246_v48  ;;  %v4482_v27 = vpop.f32.mrb[8].mxu0 }
 0x204   : > { %3951 = vst [vmem:[%s5987_s11 + $0x18] sm:$0xff] %v3887_v55   ;;  %v4520_v34 = vadd.f32 %v4482_v27, %v4282_v1  ;;  %v3108_v15 = vpop.f32.mrb[9].mxu0 }
 0x205   : > { %3950 = vst [vmem:[%s5987_s11 + $0x10] sm:$0xff] %v3882_v49   ;;  %v4521_v53 = vadd.f32 %v3108_v15, %v1927_v45  ;;  %v4483_v30 = vpop.f32.mrb[10].mxu0 }
 0x206   : > { %v4522_v51 = vadd.f32 %v4483_v30, %v4283_v38  ;;  %v3111_v11 = vpop.f32.mrb[11].mxu0  ;;  %v3252_v40 = vadd.f32 %v4520_v34, %v5978_v6 }
 0x207   : > { %v4523_v59 = vadd.f32 %v3111_v11, %v1930_v58  ;;  %v3250_v50 = vadd.f32 %v4521_v53, %v5978_v6 }
 0x208   : > { %v3253_v4 = vadd.f32 %v4522_v51, %v5978_v6 }
 0x209   : > { %v3251_v2 = vadd.f32 %v4523_v59, %v5978_v6 }
 0x20a   : > { %v3897_v41 = vpack.c.bf16 %v3253_v4, %v3252_v40 }
 0x20b   : > { %v3892_v10 = vpack.c.bf16 %v3251_v2, %v3250_v50  ;;  %v4486_v19 = vpop.f32.mrb[12].mxu0 }
 0x20c   : > { %3953 = vst [vmem:[%s5987_s11 + $0x28] sm:$0xff] %v3897_v41   ;;  %v4524_v44 = vadd.f32 %v4486_v19, %v4286_v42  ;;  %v3124_v36 = vpop.f32.mrb[13].mxu0 }
 0x20d   : > { %3952 = vst [vmem:[%s5987_s11 + $0x20] sm:$0xff] %v3892_v10   ;;  %v4525_v14 = vadd.f32 %v3124_v36, %v1943_v25  ;;  %v4487_v62 = vpop.f32.mrb[14].mxu0 }
 0x20e   : > { %v4526_v56 = vadd.f32 %v4487_v62, %v4287_v35  ;;  %v3127_v60 = vpop.f32.mrb[15].mxu0  ;;  %v3256_v29 = vadd.f32 %v4524_v44, %v5978_v6 }
 0x20f   : > { %v4527_v5 = vadd.f32 %v3127_v60, %v1946_v63  ;;  %v3254_v9 = vadd.f32 %v4525_v14, %v5978_v6 }
 0x210   : > { %v3257_v21 = vadd.f32 %v4526_v56, %v5978_v6 }
 0x211   : > { %v3255_v20 = vadd.f32 %v4527_v5, %v5978_v6 }
 0x212   : > { %v3907_v39 = vpack.c.bf16 %v3257_v21, %v3256_v29 }
 0x213   : > { %v3902_v1 = vpack.c.bf16 %v3255_v20, %v3254_v9  ;;  %v4490_v45 = vpop.f32.mrb[16].mxu0 }
 0x214   : > { %3955 = vst [vmem:[%s5987_s11 + $0x38] sm:$0xff] %v3907_v39   ;;  %v4330_v38 = vpop.f32.mrb[16].mxu1  ;;  %v3140_v58 = vpop.f32.mrb[17].mxu0 }
 0x215   : > { %3954 = vst [vmem:[%s5987_s11 + $0x30] sm:$0xff] %v3902_v1   ;;  %v4528_v42 = vadd.f32 %v4490_v45, %v4330_v38  ;;  %v2206_v25 = vpop.f32.mrb[17].mxu1  ;;  %v4491_v35 = vpop.f32.mrb[18].mxu0 }
 0x216   : > { %v4529_v63 = vadd.f32 %v3140_v58, %v2206_v25  ;;  %v4331_v33 = vpop.f32.mrb[18].mxu1  ;;  %v3143_v54 = vpop.f32.mrb[19].mxu0 }
 0x217   : > { %v4530_v43 = vadd.f32 %v4491_v35, %v4331_v33  ;;  %v2209_v3 = vpop.f32.mrb[19].mxu1  ;;  %v3260_v32 = vadd.f32 %v4528_v42, %v5978_v6 }
 0x218   : > { %v4531_v23 = vadd.f32 %v3143_v54, %v2209_v3  ;;  %v3258_v28 = vadd.f32 %v4529_v63, %v5978_v6 }
 0x219   : > { %v3261_v46 = vadd.f32 %v4530_v43, %v5978_v6 }
 0x21a   : > { %v3259_v31 = vadd.f32 %v4531_v23, %v5978_v6 }
 0x21b   : > { %v3917_v8 = vpack.c.bf16 %v3261_v46, %v3260_v32  ;;  %v4494_v57 = vpop.f32.mrb[20].mxu0 }
 0x21c   : > { %v3912_v47 = vpack.c.bf16 %v3259_v31, %v3258_v28  ;;  %v4334_v16 = vpop.f32.mrb[20].mxu1  ;;  %v3156_v52 = vpop.f32.mrb[21].mxu0 }
 0x21d   : > { %3957 = vst [vmem:[%s5987_s11 + $0x48] sm:$0xff] %v3917_v8   ;;  %v4532_v61 = vadd.f32 %v4494_v57, %v4334_v16  ;;  %v2222_v0 = vpop.f32.mrb[21].mxu1  ;;  %v4495_v37 = vpop.f32.mrb[22].mxu0 }
 0x21e   : > { %3956 = vst [vmem:[%s5987_s11 + $0x40] sm:$0xff] %v3912_v47   ;;  %v4533_v13 = vadd.f32 %v3156_v52, %v2222_v0  ;;  %v4335_v12 = vpop.f32.mrb[22].mxu1  ;;  %v3159_v24 = vpop.f32.mrb[23].mxu0 }
 0x21f   : > { %v4534_v7 = vadd.f32 %v4495_v37, %v4335_v12  ;;  %v2225_v18 = vpop.f32.mrb[23].mxu1  ;;  %v3264_v26 = vadd.f32 %v4532_v61, %v5978_v6 }
 0x220   : > { %v4535_v17 = vadd.f32 %v3159_v24, %v2225_v18  ;;  %v3262_v22 = vadd.f32 %v4533_v13, %v5978_v6 }
 0x221   : > { %v3265_v48 = vadd.f32 %v4534_v7, %v5978_v6 }
 0x222   : > { %v3263_v55 = vadd.f32 %v4535_v17, %v5978_v6 }
 0x223   : > { %v3927_v49 = vpack.c.bf16 %v3265_v48, %v3264_v26  ;;  %v4498_v27 = vpop.f32.mrb[24].mxu0 }
 0x224   : > { %v3922_v34 = vpack.c.bf16 %v3263_v55, %v3262_v22  ;;  %v4338_v15 = vpop.f32.mrb[24].mxu1  ;;  %v3172_v53 = vpop.f32.mrb[25].mxu0 }
 0x225   : > { %3959 = vst [vmem:[%s5987_s11 + $0x58] sm:$0xff] %v3927_v49   ;;  %v4536_v30 = vadd.f32 %v4498_v27, %v4338_v15  ;;  %v2238_v51 = vpop.f32.mrb[25].mxu1  ;;  %v4499_v11 = vpop.f32.mrb[26].mxu0 }
 0x226   : > { %3958 = vst [vmem:[%s5987_s11 + $0x50] sm:$0xff] %v3922_v34   ;;  %v4537_v59 = vadd.f32 %v3172_v53, %v2238_v51  ;;  %v4339_v40 = vpop.f32.mrb[26].mxu1  ;;  %v3175_v4 = vpop.f32.mrb[27].mxu0 }
 0x227   : > { %v4538_v50 = vadd.f32 %v4499_v11, %v4339_v40  ;;  %v2241_v2 = vpop.f32.mrb[27].mxu1  ;;  %v3268_v10 = vadd.f32 %v4536_v30, %v5978_v6 }
 0x228   : > { %v4539_v41 = vadd.f32 %v3175_v4, %v2241_v2  ;;  %v3266_v44 = vadd.f32 %v4537_v59, %v5978_v6 }
 0x229   : > { %v3269_v19 = vadd.f32 %v4538_v50, %v5978_v6 }
 0x22a   : > { %v3267_v36 = vadd.f32 %v4539_v41, %v5978_v6 }
 0x22b   : > { %v3937_v14 = vpack.c.bf16 %v3269_v19, %v3268_v10  ;;  %v4502_v62 = vpop.f32.mrb[28].mxu0 }
 0x22c   : > { %v3932_v56 = vpack.c.bf16 %v3267_v36, %v3266_v44  ;;  %v4342_v60 = vpop.f32.mrb[28].mxu1  ;;  %v3188_v5 = vpop.f32.mrb[29].mxu0 }
 0x22d   : > { %3961 = vst [vmem:[%s5987_s11 + $0x68] sm:$0xff] %v3937_v14   ;;  %v4540_v29 = vadd.f32 %v4502_v62, %v4342_v60  ;;  %v2254_v21 = vpop.f32.mrb[29].mxu1  ;;  %v4503_v9 = vpop.f32.mrb[30].mxu0 }
 0x22e   : > { %3960 = vst [vmem:[%s5987_s11 + $0x60] sm:$0xff] %v3932_v56   ;;  %v4541_v20 = vadd.f32 %v3188_v5, %v2254_v21  ;;  %v4343_v39 = vpop.f32.mrb[30].mxu1  ;;  %v3191_v1 = vpop.f32.mrb[31].mxu0 }
 0x22f   : > { %v4542_v45 = vadd.f32 %v4503_v9, %v4343_v39  ;;  %v2257_v38 = vpop.f32.mrb[31].mxu1  ;;  %v3272_v42 = vadd.f32 %v4540_v29, %v5978_v6 }
 0x230   : > { %v4543_v58 = vadd.f32 %v3191_v1, %v2257_v38  ;;  %v3270_v35 = vadd.f32 %v4541_v20, %v5978_v6 }
 0x231   : > { %v3273_v25 = vadd.f32 %v4542_v45, %v5978_v6 }
 0x232   : > { %v3271_v63 = vadd.f32 %v4543_v58, %v5978_v6 }
 0x233   : > { %v3947_v33 = vpack.c.bf16 %v3273_v25, %v3272_v42 }
 0x234   : > { %v3942_v54 = vpack.c.bf16 %v3271_v63, %v3270_v35 }
 0x235   : > { %3963 = vst [vmem:[%s5987_s11 + $0x78] sm:$0xff] %v3947_v33  }
 0x236   : > { %3962 = vst [vmem:[%s5987_s11 + $0x70] sm:$0xff] %v3942_v54  }
 0x237 PF: > { %s13_s14 = sadd.s32 1, %s4856_s14   ;;  %s6128_s12 = smov %s4852_s13 }
 0x238   : > { %p10_p5 = scmp.ge.s32.totalorder %s13_s14, 4   ;;  %s6129_s13 = smov %s6131_s15 }
 0x23a   :  { %12 = sbr.rel (!%p10_p5) target bundleno = 2 (0x2), region = 68 }

// kernel: res_block_forward.5
= control target key start
LH: loop header
LB: loop body
LE: loop exit
PB: predicated region body
PF: predicated region fallthrough
CT: control target
= control target key end

     0   :  { %s7084_s15 = smov 0   ;;  %s7086_s16 = smov 0   ;;  %s8787_s0 = inlined_call_operand.vmem [shape: bf16[2,18,18,128], index: 0, kind: input, shape index: {}]   ;;  %s8788_s1 = inlined_call_operand.vmem [shape: bf16[9,128,128], index: 1, kind: input, shape index: {}]   ;;  %s8789_s2 = inlined_call_operand.vmem [shape: f32[1,128], index: 2, kind: input, shape index: {}]   ;;  %s8790_s3 = inlined_call_operand.vmem [shape: bf16[2,64,128], index: 3, kind: input, shape index: {}]   ;;  %s8791_s4 = inlined_call_operand.vmem [shape: f32[2,64,128], index: 4, kind: output, shape index: {}]  }
   0x1   :  { %s7088_s17 = smov 0  }
   0x2 LB: > { %s26_s18 = sadd.s32 1, %s7051_s16  ;;  %p5703_p0 = scmp.ge.s32.totalorder %s7055_s17, 1  ;;  %s7055_s17 = sphi %s7088_s17, %s14_s17   ;;  %s7051_s16 = sphi %s7086_s16, %s8968_s16   ;;  %s7047_s15 = sphi %s7084_s15, %s8967_s15  }
   0x3   : > { %p28_p1 = scmp.ge.s32.totalorder %s26_s18, 2  ;;  %p208_p2 = scmp.lt.s32.totalorder %s7055_s17, 3 }
   0x5   : > { %s8970_s18 = smov (%p28_p1, %s26_s18), 0  ;;  %p209_p3 = pnand %p5703_p0, %p208_p2 }
   0x7   : > { %212 = sbr.rel (%p209_p3) target bundleno = 727 (0x2d7), region = 36 }
   0xe   : > { %v6952_v0 = vld [vmem:[%s8788_s1 + $0x40] sm:$0xff]   ;;  %p252_p4 = scmp.lt.s32.totalorder %s7047_s15, 1  ;;  %v6954_v2 = vld [vmem:[%s8788_s1 + $0x48] sm:$0xff]   ;;  %v6956_v4 = vld [vmem:[%s8788_s1 + $0x50] sm:$0xff]   ;;  %v8792_v15 = vmov 0   ;;  %vm1514_vm3 = vcmask 1042432  }
   0xf   : > { %v6953_v1 = vld [vmem:[%s8788_s1 + $0x100] sm:$0xff]   ;;  %6221 = vmatprep.subr.bf16.mxu1 %v6952_v0  ;;  %v6955_v3 = vld [vmem:[%s8788_s1 + $0x108] sm:$0xff]   ;;  %v6957_v5 = vld [vmem:[%s8788_s1 + $0x110] sm:$0xff]   ;;  %vm533_vm0 = vsmask.f32 3328  ;;  %vm1515_vm4 = vcmask 1046532  }
  0x10   : > { %6413 = vmatprep.subr.bf16.mxu0 %v6953_v1  ;;  %6222 = vmatpush3.bf16.msra.mxu1 %v6952_v0  ;;  %s8972_s15 = smov (!%p252_p4, %s7047_s15), 1  ;;  %v6958_v6 = vld [vmem:[%s8788_s1 + $0x58] sm:$0xff]   ;;  %v6960_v8 = vld [vmem:[%s8788_s1 + $0x60] sm:$0xff]   ;;  %v6962_v10 = vld [vmem:[%s8788_s1 + $0x68] sm:$0xff]   ;;  %vm534_vm1 = vsmask.f32 7440 }
  0x11   : > { %6414 = vmatpush3.bf16.msra.mxu0 %v6953_v1  ;;  %6223 = vmatprep.subr.bf16.mxu1 %v6954_v2  ;;  %v6959_v7 = vld [vmem:[%s8788_s1 + $0x118] sm:$0xff]   ;;  %s6925_s9 = smul.u32 216, %s8972_s15  ;;  %v6961_v9 = vld [vmem:[%s8788_s1 + $0x120] sm:$0xff]   ;;  %v6963_v11 = vld [vmem:[%s8788_s1 + $0x128] sm:$0xff]   ;;  %s5984_s8 = sshll.u32 %s8972_s15, 5  ;;  %vm5495_vm6 = vcmask 1041409  }
  0x12   : > { %6415 = vmatprep.subr.bf16.mxu0 %v6955_v3  ;;  %v6964_v21 = vld [vmem:[%s8788_s1 + $0x70] sm:$0xff]   ;;  %v6966_v40 = vld [vmem:[%s8788_s1 + $0x78] sm:$0xff]   ;;  %vm7194_vm2 = vmor %vm533_vm0, %vm534_vm1  ;;  %s8158_s11 = scalar_lea.vmem %s8790_s3, %s5984_s8  ;;  %vm5497_vm7 = vcmask 1042434   ;;  %vm5499_vm8 = vcmask 1043459   ;;  %vm5501_vm9 = vcmask 1044484   ;;  %vm5503_vm10 = vcmask 1045509  }
  0x13   : > { %s7138_s20 = scalar_lea.vmem %s8787_s0, %s6925_s9  ;;  %v6965_v29 = vld [vmem:[%s8788_s1 + $0x130] sm:$0xff]   ;;  %v6967_v55 = vld [vmem:[%s8788_s1 + $0x138] sm:$0xff]   ;;  %vm7418_vm5 = vmor %vm1514_vm3, %vm1515_vm4  ;;  %vm5505_vm11 = vcmask 1046534   ;;  %vm5507_vm12 = vcmask 1047559   ;;  %s5985_s14 = sshll.u32 %s8972_s15, 6 }
  0x14   : > { %6224 = vmatpush3.bf16.msra.mxu1 %v6954_v2  ;;  %v281_v12 = vld [vmem:[%s7138_s20] sm:$0xf]  ;;  %v282_v13 = vld [vmem:[%s7138_s20 + $0x4] sm:$0xf]  ;;  %v283_v14 = vld [vmem:[%s7138_s20 + $0x8] sm:$0x1]  ;;  %s8375_s21 = scalar_lea.vmem %s8791_s4, %s5985_s14 }
  0x15   : > { %6416 = vmatpush3.bf16.msra.mxu0 %v6955_v3  ;;  %6225 = vmatprep.subr.bf16.mxu1 %v6956_v4  ;;  %v7150_v16 = vmax.bf16 %v8792_v15, %v281_v12  ;;  %v7153_v17 = vmax.bf16 %v8792_v15, %v282_v13  ;;  %v7156_v18 = vmax.bf16 %v8792_v15, %v283_v14  ;;  %v284_v19 = vld [vmem:[%s7138_s20 + $0xc] sm:$0xf]  ;;  %v285_v20 = vld [vmem:[%s7138_s20 + $0x10] sm:$0xf]  ;;  %v286_v22 = vld [vmem:[%s7138_s20 + $0x14] sm:$0x1] }
  0x16   : > { %6417 = vmatprep.subr.bf16.mxu0 %v6957_v5  ;;  %v7165_v23 = vmax.bf16 %v8792_v15, %v284_v19  ;;  %v7168_v24 = vmax.bf16 %v8792_v15, %v285_v20  ;;  %v7179_v31 = vmax.bf16 %v8792_v15, %v286_v22  ;;  %v287_v34 = vld [vmem:[%s7138_s20 + $0x18] sm:$0xf]  ;;  %v288_v39 = vld [vmem:[%s7138_s20 + $0x1c] sm:$0xf]  ;;  %v289_v45 = vld [vmem:[%s7138_s20 + $0x20] sm:$0x1] }
  0x17   : > { %8845 = vst [vmem:[#allocation2_spill] sm:$0xff] %v7156_v18  ;;  %v537_v25 = vshrl.u32 %v7150_v16, 16  ;;  %v540_v26 = vshll.u32 %v7150_v16, 16  ;;  %v546_v27 = vshll.u32 %v7153_v17, 16  ;;  %v550_v28 = vshrl.u32 %v7153_v17, 16  ;;  %v7230_v20 = vld [vmem:[%s8788_s1 + $0x140] sm:$0xff]  }
  0x18   : > { %6226 = vmatpush3.bf16.msra.mxu1 %v6956_v4  ;;  %v556_v30 = vshll.u32 %v7156_v18, 16  ;;  %v561_v32 = vshrl.u32 %v7165_v23, 16  ;;  %v564_v33 = vshll.u32 %v7165_v23, 16  ;;  %v570_v44 = vshll.u32 %v7168_v24, 16  ;;  %v290_v0 = vld [vmem:[%s7138_s20 + $0x24] sm:$0xf] }
  0x19   : > { %6418 = vmatpush3.bf16.msra.mxu0 %v6957_v5  ;;  %6227 = vmatprep.subr.bf16.mxu1 %v6958_v6  ;;  %v539_v35 = vrot.slane %v537_v25, 4  ;;  %v542_v36 = vrot.slane %v540_v26, 5  ;;  %v548_v37 = vrot.slane %v546_v27, 5  ;;  %v552_v38 = vrot.slane %v550_v28, 4  ;;  %v6968_v4 = vld [vmem:[%s8788_s1] sm:$0xff]   ;;  %v7031_v50 = vld [vmem:[%s8788_s1 + $0x138] sm:$0xff]  }
  0x1a   : > { %6419 = vmatprep.subr.bf16.mxu0 %v6959_v7  ;;  %v558_v41 = vrot.slane %v556_v30, 5  ;;  %v563_v42 = vrot.slane %v561_v32, 4  ;;  %v566_v43 = vrot.slane %v564_v33, 5  ;;  %v574_v48 = vshrl.u32 %v7168_v24, 16  ;;  %v293_v27 = vld [vmem:[%s7138_s20 + $0x30] sm:$0xf] }
  0x1b   : > { %v543_v46 = vor.u32 %v542_v36, %v539_v35  ;;  %v553_v47 = vor.u32 %v552_v38, %v548_v37  ;;  %v580_v49 = vshll.u32 %v7179_v31, 16  ;;  %v572_v52 = vrot.slane %v570_v44, 5  ;;  %v294_v33 = vld [vmem:[%s7138_s20 + $0x34] sm:$0xf] }
  0x1c   : > { %6228 = vmatpush3.bf16.msra.mxu1 %v6958_v6  ;;  %v567_v51 = vor.u32 %v566_v43, %v563_v42  ;;  %v7199_v53 = vmax.bf16 %v8792_v15, %v287_v34  ;;  %v7202_v54 = vmax.bf16 %v8792_v15, %v288_v39  ;;  %v576_v58 = vrot.slane %v574_v48, 4  ;;  %v291_v6 = vld [vmem:[%s7138_s20 + $0x28] sm:$0xf]  ;;  %v295_v34 = vld [vmem:[%s7138_s20 + $0x38] sm:$0x1] }
  0x1d   : > { %6420 = vmatpush3.bf16.msra.mxu0 %v6959_v7  ;;  %6229 = vmatprep.subr.bf16.mxu1 %v6960_v8  ;;  %v544_v56 = vrot.slane %v543_v46, 4  ;;  %v554_v57 = vrot.slane %v553_v47, 4  ;;  %v582_v59 = vrot.slane %v580_v49, 5  ;;  %v7208_v61 = vmax.bf16 %v8792_v15, %v289_v45  ;;  %v292_v7 = vld [vmem:[%s7138_s20 + $0x2c] sm:$0x1] }
  0x1e   : > { %6421 = vmatprep.subr.bf16.mxu0 %v6961_v9  ;;  %v568_v60 = vrot.slane %v567_v51, 4  ;;  %v585_v62 = vshrl.u32 %v7199_v53, 16  ;;  %v588_v63 = vshll.u32 %v7199_v53, 16  ;;  %v577_v3 = vor.u32 %v576_v58, %v572_v52  ;;  %v6971_v39 = vld [vmem:[%s8788_s1 + $0x8] sm:$0xff]   ;;  %v296_v48 = vld [vmem:[%s7138_s20 + $0x3c] sm:$0xf] }
  0x1f   : > { %v549_v1 = vsel %vm7194_vm2, %v544_v56, %v548_v37  ;;  %v559_v2 = vsel %vm7194_vm2, %v554_v57, %v558_v41  ;;  %v594_v5 = vshll.u32 %v7202_v54, 16  ;;  %v598_v14 = vshrl.u32 %v7202_v54, 16 }
  0x20   : > { %6230 = vmatpush3.bf16.msra.mxu1 %v6960_v8  ;;  %v5709_v8 = vcombine.low %v549_v1, %v559_v2  ;;  %v578_v12 = vrot.slane %v577_v3, 4  ;;  %v604_v19 = vshll.u32 %v7208_v61, 16  ;;  %v7234_v25 = vmax.bf16 %v8792_v15, %v290_v0  ;;  %v297_v0 = vld [vmem:[%s7138_s20 + $0x40] sm:$0xf]  ;;  %v298_v1 = vld [vmem:[%s7138_s20 + $0x44] sm:$0x1] }
  0x21   : > { %6422 = vmatpush3.bf16.msra.mxu0 %v6961_v9  ;;  %6231 = vmatprep.subr.bf16.mxu1 %v6962_v10  ;;  %v573_v9 = vsel %vm7194_vm2, %v568_v60, %v572_v52  ;;  %v596_v13 = vrot.slane %v594_v5, 5  ;;  %v7237_v26 = vmax.bf16 %v8792_v15, %v291_v6  ;;  %v7243_v32 = vmax.bf16 %v8792_v15, %v292_v7  ;;  %v6974_v3 = vld [vmem:[%s8788_s1 + $0x10] sm:$0xff]   ;;  %v6970_v5 = vld [vmem:[%s8788_s1 + $0x148] sm:$0xff]  }
  0x22   : > { %6423 = vmatprep.subr.bf16.mxu0 %v6963_v11  ;;  %6237 = vmatprep.mubr.bf16.mxu1 %v5709_v8  ;;  %v583_v28 = vsel %vm7194_vm2, %v578_v12, %v582_v59  ;;  %v606_v30 = vrot.slane %v604_v19, 5  ;;  %v609_v37 = vshrl.u32 %v7234_v25, 16  ;;  %v612_v38 = vshll.u32 %v7234_v25, 16 }
  0x23   : > { %v5710_v35 = vcombine.low %v573_v9, %v583_v28  ;;  %v618_v41 = vshll.u32 %v7237_v26, 16  ;;  %v622_v42 = vshrl.u32 %v7237_v26, 16  ;;  %v628_v43 = vshll.u32 %v7243_v32, 16  ;;  %v6977_v28 = vld [vmem:[%s8788_s1 + $0x18] sm:$0xff]  }
  0x24   : > { %6232 = vmatpush3.bf16.msra.mxu1 %v6962_v10  ;;  %v587_v10 = vrot.slane %v585_v62, 4  ;;  %v611_v45 = vrot.slane %v609_v37, 4  ;;  %v614_v46 = vrot.slane %v612_v38, 5  ;;  %v7259_v47 = vmax.bf16 %v8792_v15, %v293_v27  ;;  %v6972_v37 = vld [vmem:[%s8788_s1 + $0x150] sm:$0xff]  }
  0x25   : > { %6424 = vmatpush3.bf16.msra.mxu0 %v6963_v11  ;;  %6233 = vmatprep.subr.bf16.mxu1 %v6964_v21  ;;  %v590_v11 = vrot.slane %v588_v63, 5  ;;  %v620_v51 = vrot.slane %v618_v41, 5  ;;  %v624_v52 = vrot.slane %v622_v42, 4  ;;  %v7263_v57 = vmax.bf16 %v8792_v15, %v294_v33 }
  0x26   : > { %6425 = vmatprep.subr.bf16.mxu0 %v6965_v29  ;;  %6429 = vmatprep.mubr.bf16.mxu0 %v5710_v35  ;;  %v615_v56 = vor.u32 %v614_v46, %v611_v45  ;;  %v7266_v58 = vmax.bf16 %v8792_v15, %v295_v34  ;;  %v633_v59 = vshrl.u32 %v7259_v47, 16  ;;  %v636_v63 = vshll.u32 %v7259_v47, 16  ;;  %v302_v45 = vld [vmem:[%s7138_s20 + $0x54] sm:$0xf] }
  0x27   : > { %v625_v62 = vor.u32 %v624_v52, %v620_v51  ;;  %v7275_v2 = vmax.bf16 %v8792_v15, %v296_v48  ;;  %v642_v8 = vshll.u32 %v7263_v57, 16  ;;  %v7297_v27 = vmax.bf16 %v8792_v15, %v298_v1  ;;  %v6980_v52 = vld [vmem:[%s8788_s1 + $0x20] sm:$0xff]  }
  0x28   : > { %6234 = vmatpush3.bf16.msra.mxu1 %v6964_v21  ;;  %v591_v21 = vor.u32 %v590_v11, %v587_v10  ;;  %v616_v6 = vrot.slane %v615_v56, 4  ;;  %v635_v7 = vrot.slane %v633_v59, 4  ;;  %v638_v10 = vrot.slane %v636_v63, 5 }
  0x29   : > { %6426 = vmatpush3.bf16.msra.mxu0 %v6965_v29  ;;  %6235 = vmatprep.subr.bf16.mxu1 %v6966_v40  ;;  %v600_v29 = vrot.slane %v598_v14, 4  ;;  %8848 = vst [vmem:[#allocation3_spill] sm:$0xff] %v7275_v2  ;;  %v626_v9 = vrot.slane %v625_v62, 4  ;;  %v646_v11 = vshrl.u32 %v7263_v57, 16  ;;  %v652_v12 = vshll.u32 %v7266_v58, 16  ;;  %v6973_v62 = vld [vmem:[%s8788_s1 + $0x158] sm:$0xff]  }
  0x2a   : > { %6427 = vmatprep.subr.bf16.mxu0 %v6967_v55  ;;  %v592_v36 = vrot.slane %v591_v21, 4  ;;  %v621_v14 = vsel %vm7194_vm2, %v616_v6, %v620_v51  ;;  %v644_v19 = vrot.slane %v642_v8, 5  ;;  %v7294_v21 = vmax.bf16 %v8792_v15, %v297_v0 }
  0x2b   : > { %v648_v33 = vrot.slane %v646_v11, 4  ;;  %v654_v34 = vrot.slane %v652_v12, 5  ;;  %v657_v38 = vshrl.u32 %v7275_v2, 16 }
  0x2c   : > { %6236 = vmatpush3.bf16.msra.mxu1 %v6966_v40  ;;  %v601_v40 = vor.u32 %v600_v29, %v596_v13  ;;  %v597_v44 = vsel %vm7194_vm2, %v592_v36, %v596_v13  ;;  %v299_v13 = vld [vmem:[%s7138_s20 + $0x48] sm:$0xf]  ;;  %8850 = vst [vmem:[#allocation5_spill] sm:$0xff] %v7294_v21 }
  0x2d   : > { %6428 = vmatpush3.bf16.msra.mxu0 %v6967_v55  ;;  %6269 = vmatprep.subr.bf16.mxu1 %v6968_v4  ;;  %v630_v55 = vrot.slane %v628_v43, 5  ;;  %v649_v42 = vor.u32 %v648_v33, %v644_v19  ;;  %v670_v43 = vshrl.u32 %v7294_v21, 16  ;;  %v659_v46 = vrot.slane %v657_v38, 4  ;;  %v6975_v38 = vld [vmem:[%s8788_s1 + $0x160] sm:$0xff]  }
  0x2e   : > { %6461 = vmatprep.subr.bf16.mxu0 %v7230_v20  ;;  %v602_v49 = vrot.slane %v601_v40, 4  ;;  %v301_v40 = vld [vmem:[%s7138_s20 + $0x50] sm:$0x1]  ;;  %v7321_v51 = vmax.bf16 %v8792_v15, %v299_v13 }
  0x2f   : > { %6238 = vmatmul.mubr.bf16.vlgmr.msra.gmra.mrb[0].mxu1 %v5710_v35  ;;  %v631_v29 = vsel %vm7194_vm2, %v626_v9, %v630_v55  ;;  %v300_v35 = vld [vmem:[%s7138_s20 + $0x4c] sm:$0xf]  ;;  %v650_v56 = vrot.slane %v649_v42, 4  ;;  %v672_v59 = vrot.slane %v670_v43, 4  ;;  %v7335_v1 = vmax.bf16 %v8792_v15, %v301_v40  ;;  %v304_v9 = vld [vmem:[%s7138_s20 + $0x5c] sm:$0x1] }
  0x30   : > { %6270 = vmatpush3.bf16.msra.mxu1 %v6968_v4  ;;  %v607_v60 = vsel %vm7194_vm2, %v602_v49, %v606_v30  ;;  %v639_v30 = vor.u32 %v638_v10, %v635_v7  ;;  %v7306_v36 = vcombine.low %v621_v14, %v631_v29  ;;  %8852 = vst [vmem:[#allocation7_spill] sm:$0xff] %v7321_v51  ;;  %v684_v8 = vshll.u32 %v7321_v51, 16 }
  0x31   : > { %6271 = vmatprep.subr.bf16.mxu1 %v6971_v39  ;;  %v7280_v4 = vcombine.low %v597_v44, %v607_v60  ;;  %v676_v44 = vshll.u32 %v7297_v27, 16  ;;  %v7332_v0 = vmax.bf16 %v8792_v15, %v300_v35  ;;  %v655_v6 = vsel %vm7194_vm2, %v650_v56, %v654_v34  ;;  %v6984_v56 = vld [vmem:[%s8788_s1 + $0x30] sm:$0xff]  }
  0x32   : > { %8851 = vst [vmem:[#allocation6_spill] sm:$0xff] %v7306_v36  ;;  %v640_v41 = vrot.slane %v639_v30, 4  ;;  %v7344_v10 = vmax.bf16 %v8792_v15, %v302_v45  ;;  %v686_v30 = vrot.slane %v684_v8, 5  ;;  %v700_v33 = vshll.u32 %v7335_v1, 16  ;;  %v307_v45 = vld [vmem:[%s7138_s20 + $0x68] sm:$0x1] }
  0x33   : > { %8849 = vst [vmem:[#allocation4_spill] sm:$0xff] %v7280_v4  ;;  %6430 = vmatmul.mubr.bf16.vlgmr.msra.gmra.mrb[0].mxu0 %v7280_v4  ;;  %6241 = vmatprep.mubr.bf16.mxu1 %v7280_v4  ;;  %v678_v60 = vrot.slane %v676_v44, 5  ;;  %8853 = vst [vmem:[#allocation8_spill] sm:$0xff] %v7332_v0  ;;  %v690_v14 = vshll.u32 %v7332_v0, 16  ;;  %v306_v44 = vld [vmem:[%s7138_s20 + $0x64] sm:$0xf] }
  0x34   : > { %6272 = vmatpush3.bf16.msra.mxu1 %v6971_v39  ;;  %6462 = vmatpush3.bf16.msra.mxu0 %v7230_v20  ;;  %v660_v20 = vshll.u32 %v7275_v2, 16  ;;  %v666_v39 = vshll.u32 %v7294_v21, 16  ;;  %v645_v55 = vsel %vm7194_vm2, %v640_v41, %v644_v19  ;;  %v6982_v19 = vld [vmem:[%s8788_s1 + $0x28] sm:$0xff]   ;;  %v702_v43 = vrot.slane %v700_v33, 5  ;;  %v6985_v4 = vld [vmem:[%s8788_s1 + $0x190] sm:$0xff]  }
  0x35   : > { %6273 = vmatprep.subr.bf16.mxu1 %v6974_v3  ;;  %6463 = vmatprep.subr.bf16.mxu0 %v6970_v5  ;;  %v7346_v11 = vcombine.low %v645_v55, %v655_v6  ;;  %v692_v35 = vrot.slane %v690_v14, 5 }
  0x36   : > { %6433 = vmatprep.mubr.bf16.mxu0 %v7306_v36  ;;  %v662_v48 = vrot.slane %v660_v20, 5  ;;  %v668_v49 = vrot.slane %v666_v39, 5  ;;  %v7364_v20 = vmax.bf16 %v8792_v15, %v304_v9  ;;  %v305_v39 = vld [vmem:[%s7138_s20 + $0x60] sm:$0xf] }
  0x37   : > { %6242 = vmatmul.mubr.bf16.gmra.mrb[4].mxu1 %v7306_v36  ;;  %8854 = vst [vmem:[#allocation9_spill] sm:$0xff] %v7346_v11  ;;  %v7388_v8 = vmax.bf16 %v8792_v15, %v305_v39  ;;  %v308_v39 = vld [vmem:[%s7138_s20 + $0x6c] sm:$0xf] }
  0x38   : > { %6274 = vmatpush3.bf16.msra.mxu1 %v6974_v3  ;;  %6464 = vmatpush3.bf16.msra.mxu0 %v6970_v5  ;;  %v663_v63 = vor.u32 %v662_v48, %v659_v46  ;;  %v681_v3 = vshrl.u32 %v7321_v51, 16  ;;  %v303_v5 = vld [vmem:[%s7138_s20 + $0x58] sm:$0xf]  ;;  %v673_v7 = vor.u32 %v672_v59, %v668_v49  ;;  %v705_v48 = vshrl.u32 %v7344_v10, 16 }
  0x39   : > { %6275 = vmatprep.subr.bf16.mxu1 %v6977_v28  ;;  %6465 = vmatprep.subr.bf16.mxu0 %v6972_v37  ;;  %8856 = vst [vmem:[#allocation11_spill] sm:$0xff] %v7388_v8 }
  0x3a   : > { %v664_v12 = vrot.slane %v663_v63, 4  ;;  %v683_v13 = vrot.slane %v681_v3, 4  ;;  %v674_v29 = vrot.slane %v673_v7, 4  ;;  %6245 = vmatprep.mubr.bf16.mxu1 %v7346_v11  ;;  %v6976_v3 = vld [vmem:[%s8788_s1 + $0x168] sm:$0xff]  }
  0x3b   : > { %6434 = vmatmul.mubr.bf16.gmra.mrb[4].mxu0 %v7346_v11  ;;  %v1543_v11 = vrot.slane %v7243_v32, 5  ;;  %v6983_v32 = vld [vmem:[%s8788_s1 + $0x188] sm:$0xff]  }
  0x3c   : > { %6276 = vmatpush3.bf16.msra.mxu1 %v6977_v28  ;;  %6466 = vmatpush3.bf16.msra.mxu0 %v6972_v37  ;;  %v694_v28 = vshrl.u32 %v7332_v0, 16  ;;  %v669_v34 = vsel %vm7194_vm2, %v664_v12, %v668_v49  ;;  %v7361_v37 = vmax.bf16 %v8792_v15, %v303_v5  ;;  %v679_v40 = vsel %vm7194_vm2, %v674_v29, %v678_v60 }
  0x3d   : > { %6277 = vmatprep.subr.bf16.mxu1 %v6980_v52  ;;  %6467 = vmatprep.subr.bf16.mxu0 %v6973_v62  ;;  %v687_v41 = vor.u32 %v686_v30, %v683_v13  ;;  %v7372_v46 = vcombine.low %v669_v34, %v679_v40  ;;  %v708_v49 = vshll.u32 %v7344_v10, 16  ;;  %v707_v5 = vrot.slane %v705_v48, 4  ;;  %v6986_v40 = vld [vmem:[%s8788_s1 + $0x38] sm:$0xff]  }
  0x3e   : > { %v696_v42 = vrot.slane %v694_v28, 4  ;;  %v714_v55 = vshll.u32 %v7361_v37, 16  ;;  %v718_v63 = vshrl.u32 %v7361_v37, 16  ;;  %v7393_v29 = vmax.bf16 %v8792_v15, %v306_v44 }
  0x3f   : > { %8855 = vst [vmem:[#allocation10_spill] sm:$0xff] %v7372_v46  ;;  %v688_v59 = vrot.slane %v687_v41, 4  ;;  %6437 = vmatprep.mubr.bf16.mxu0 %v7372_v46  ;;  %6246 = vmatmul.mubr.bf16.gmra.mrb[8].mxu1 %v7372_v46  ;;  %v710_v6 = vrot.slane %v708_v49, 5  ;;  %v7396_v30 = vmax.bf16 %v8792_v15, %v307_v45  ;;  %v729_v28 = vshrl.u32 %v7388_v8, 16 }
  0x40   : > { %6278 = vmatpush3.bf16.msra.mxu1 %v6980_v52  ;;  %6468 = vmatpush3.bf16.msra.mxu0 %v6973_v62  ;;  %v697_v60 = vor.u32 %v696_v42, %v692_v35  ;;  %v724_v52 = vshll.u32 %v7364_v20, 16  ;;  %v716_v7 = vrot.slane %v714_v55, 5  ;;  %v720_v12 = vrot.slane %v718_v63, 4  ;;  %v310_v63 = vld [vmem:[%s7138_s20 + $0x74] sm:$0x1] }
  0x41   : > { %6279 = vmatprep.subr.bf16.mxu1 %v6982_v19  ;;  %v693_v62 = vsel %vm7194_vm2, %v688_v59, %v692_v35  ;;  %6469 = vmatprep.subr.bf16.mxu0 %v6975_v38  ;;  %v711_v14 = vor.u32 %v710_v6, %v707_v5  ;;  %v732_v35 = vshll.u32 %v7388_v8, 16  ;;  %v731_v44 = vrot.slane %v729_v28, 4 }
  0x42   : > { %v698_v9 = vrot.slane %v697_v60, 4  ;;  %v726_v13 = vrot.slane %v724_v52, 5  ;;  %v721_v34 = vor.u32 %v720_v12, %v716_v7  ;;  %v738_v45 = vshll.u32 %v7393_v29, 16 }
  0x43   : > { %v712_v42 = vrot.slane %v711_v14, 4  ;;  %v734_v49 = vrot.slane %v732_v35, 5  ;;  %v742_v55 = vshrl.u32 %v7393_v29, 16  ;;  %v748_v59 = vshll.u32 %v7396_v30, 16 }
  0x44   : > { %6280 = vmatpush3.bf16.msra.mxu1 %v6982_v19  ;;  %v703_v33 = vsel %vm7194_vm2, %v698_v9, %v702_v43  ;;  %6470 = vmatpush3.bf16.msra.mxu0 %v6975_v38  ;;  %v5758_v19 = vrot.slane %v7165_v23, 9  ;;  %v6978_v38 = vld [vmem:[%s8788_s1 + $0x170] sm:$0xff]   ;;  %v722_v48 = vrot.slane %v721_v34, 4  ;;  %v740_v5 = vrot.slane %v738_v45, 5  ;;  %v7432_v9 = vld [vmem:[%s8788_s1 + $0x80] sm:$0xff]  }
  0x45   : > { %6281 = vmatprep.subr.bf16.mxu1 %v6984_v56  ;;  %v7407_v41 = vcombine.low %v693_v62, %v703_v33  ;;  %6471 = vmatprep.subr.bf16.mxu0 %v6976_v3  ;;  %v309_v43 = vld [vmem:[%s7138_s20 + $0x70] sm:$0xf]  ;;  %v717_v52 = vsel %vm7194_vm2, %v712_v42, %v716_v7  ;;  %v1526_v6 = vrot.slane %v7168_v24, 5  ;;  %v1529_v62 = vrot.slane %v7179_v31, 5  ;;  %v6979_v31 = vld [vmem:[%s8788_s1 + $0x178] sm:$0xff]  }
  0x46   : > { %v735_v12 = vor.u32 %v734_v49, %v731_v44  ;;  %v744_v14 = vrot.slane %v742_v55, 4  ;;  %v750_v28 = vrot.slane %v748_v59, 5  ;;  %v7447_v42 = vmax.bf16 %v8792_v15, %v309_v43 }
  0x47   : > { %8857 = vst [vmem:[#allocation12_spill] sm:$0xff] %v7407_v41  ;;  %6438 = vmatmul.mubr.bf16.gmra.mrb[8].mxu0 %v7407_v41  ;;  %6249 = vmatprep.mubr.bf16.mxu1 %v7407_v41  ;;  %v1527_v7 = vsel %vm7418_vm5, %v5758_v19, %v1526_v6  ;;  %v1528_v34 = vrot.slane %v1526_v6, 4  ;;  %v7450_v44 = vmax.bf16 %v8792_v15, %v310_v63  ;;  %v5759_v43 = vrot.slane %v7199_v53, 9  ;;  %v7468_v63 = vld [vmem:[%s8788_s1 + $0x180] sm:$0xff]  }
  0x48   : > { %6282 = vmatpush3.bf16.msra.mxu1 %v6984_v56  ;;  %6472 = vmatpush3.bf16.msra.mxu0 %v6976_v3  ;;  %v727_v56 = vsel %vm7194_vm2, %v722_v48, %v726_v13  ;;  %v7444_v3 = vmax.bf16 %v8792_v15, %v308_v39  ;;  %v736_v13 = vrot.slane %v735_v12, 4  ;;  %v745_v35 = vor.u32 %v744_v14, %v740_v5  ;;  %v311_v48 = vld [vmem:[%s7138_s20 + $0x78] sm:$0xf]  ;;  %v313_v6 = vld [vmem:[%s7138_s20 + $0x80] sm:$0x1] }
  0x49   : > { %6283 = vmatprep.subr.bf16.mxu1 %v6986_v40  ;;  %v7436_v33 = vcombine.low %v717_v52, %v727_v56  ;;  %6473 = vmatprep.subr.bf16.mxu0 %v6978_v38  ;;  %v1530_v19 = vsel %vm7418_vm5, %v1528_v34, %v1529_v62  ;;  %v762_v59 = vshll.u32 %v7447_v42, 16  ;;  %v312_v52 = vld [vmem:[%s7138_s20 + $0x7c] sm:$0xf]  ;;  %v7479_v34 = vmax.bf16 %v8792_v15, %v311_v48 }
  0x4a   : > { %v753_v39 = vshrl.u32 %v7444_v3, 16  ;;  %v756_v45 = vshll.u32 %v7444_v3, 16  ;;  %v741_v49 = vsel %vm7194_vm2, %v736_v13, %v740_v5  ;;  %v746_v55 = vrot.slane %v745_v35, 4 }
  0x4b   : > { %8860 = vst [vmem:[#allocation13_spill] sm:$0xff] %v7436_v33  ;;  %6441 = vmatprep.mubr.bf16.mxu0 %v7436_v33  ;;  %6250 = vmatmul.mubr.bf16.gmra.mrb[12].mxu1 %v7436_v33  ;;  %v766_v5 = vshrl.u32 %v7447_v42, 16  ;;  %v764_v14 = vrot.slane %v762_v59, 5  ;;  %v780_v59 = vshll.u32 %v7479_v34, 16  ;;  %v5760_v41 = vrot.slane %v7234_v25, 9 }
  0x4c   : > { %6284 = vmatpush3.bf16.msra.mxu1 %v6986_v40  ;;  %6474 = vmatpush3.bf16.msra.mxu0 %v6978_v38  ;;  %v7462_v40 = vcombine.low %v1527_v7, %v1530_v19  ;;  %v755_v62 = vrot.slane %v753_v39, 4  ;;  %v758_v56 = vrot.slane %v756_v45, 5  ;;  %v772_v38 = vshll.u32 %v7450_v44, 16 }
  0x4d   : > { %6317 = vmatprep.subr.bf16.mxu1 %v7432_v9  ;;  %6475 = vmatprep.subr.bf16.mxu0 %v6979_v31  ;;  %v751_v12 = vsel %vm7194_vm2, %v746_v55, %v750_v28  ;;  %v1533_v7 = vrot.slane %v7202_v54, 5  ;;  %v768_v19 = vrot.slane %v766_v5, 4  ;;  %v7486_v28 = vmax.bf16 %v8792_v15, %v312_v52 }
  0x4e   : > { %8861 = vst [vmem:[#allocation14_spill] sm:$0xff] %v7462_v40  ;;  %v7481_v13 = vcombine.low %v741_v49, %v751_v12  ;;  %v759_v35 = vor.u32 %v758_v56, %v755_v62  ;;  %v774_v39 = vrot.slane %v772_v38, 5  ;;  %v7489_v55 = vmax.bf16 %v8792_v15, %v313_v6  ;;  %v315_v38 = vld [vmem:[%s7138_s20 + $0x88] sm:$0xf] }
  0x4f   : > { %v1534_v45 = vsel %vm7418_vm5, %v5759_v43, %v1533_v7  ;;  %v1535_v22 = vrot.slane %v1533_v7, 4  ;;  %v769_v49 = vor.u32 %v768_v19, %v764_v14  ;;  %v314_v43 = vld [vmem:[%s7138_s20 + $0x84] sm:$0xf]  ;;  %v8863_v52 = vrot.slane %v7208_v61, 5  ;;  %v316_v61 = vld [vmem:[%s7138_s20 + $0x8c] sm:$0x1] }
  0x50   : > { %8862 = vst [vmem:[#allocation15_spill] sm:$0xff] %v7481_v13  ;;  %6476 = vmatpush3.bf16.msra.mxu0 %v6979_v31  ;;  %6253 = vmatprep.mubr.bf16.mxu1 %v7481_v13  ;;  %v760_v48 = vrot.slane %v759_v35, 4  ;;  %v777_v31 = vshrl.u32 %v7479_v34, 16  ;;  %v786_v62 = vshll.u32 %v7486_v28, 16  ;;  %v790_v56 = vshrl.u32 %v7486_v28, 16 }
  0x51   : > { %6442 = vmatmul.mubr.bf16.gmra.mrb[12].mxu0 %v7481_v13  ;;  %v1537_v6 = vsel %vm7418_vm5, %v1535_v22, %v8863_v52  ;;  %6509 = vmatprep.subr.bf16.mxu0 %v7468_v63  ;;  %v796_v5 = vshll.u32 %v7489_v55, 16  ;;  %v770_v7 = vrot.slane %v769_v49, 4  ;;  %v782_v15 = vrot.slane %v780_v59, 5 }
  0x52   : > { %6477 = vmatprep.mubr.bf16.mxu0 %v7462_v40  ;;  %v765_v12 = vsel %vm7194_vm2, %v760_v48, %v764_v14  ;;  %v7508_v35 = vcombine.low %v1534_v45, %v1537_v6  ;;  %v779_v19 = vrot.slane %v777_v31, 4  ;;  %v788_v13 = vrot.slane %v786_v62, 5 }
  0x53   : > { %v792_v22 = vrot.slane %v790_v56, 4  ;;  %v798_v52 = vrot.slane %v796_v5, 5  ;;  %v775_v33 = vsel %vm7194_vm2, %v770_v7, %v774_v39  ;;  %v1540_v46 = vrot.slane %v7237_v26, 5  ;;  %v318_v56 = vld [vmem:[%s7138_s20 + $0x94] sm:$0xf] }
  0x54   : > { %8864 = vst [vmem:[#allocation16_spill] sm:$0xff] %v7508_v35  ;;  %v7516_v14 = vcombine.low %v765_v12, %v775_v33  ;;  %v783_v45 = vor.u32 %v782_v15, %v779_v19  ;;  %v8866_v49 = vmov 0   ;;  %v319_v19 = vld [vmem:[%s7138_s20 + $0x98] sm:$0x1] }
  0x55   : > { %v793_v48 = vor.u32 %v792_v22, %v788_v13  ;;  %v7519_v31 = vmax.bf16 %v8866_v49, %v314_v43  ;;  %v1541_v59 = vsel %vm7418_vm5, %v5760_v41, %v1540_v46  ;;  %v1542_v6 = vrot.slane %v1540_v46, 4  ;;  %v317_v46 = vld [vmem:[%s7138_s20 + $0x90] sm:$0xf] }
  0x56   : > { %8865 = vst [vmem:[#allocation17_spill] sm:$0xff] %v7516_v14  ;;  %v7524_v39 = vmax.bf16 %v8866_v49, %v315_v38  ;;  %v7527_v62 = vmax.bf16 %v8866_v49, %v316_v61  ;;  %6254 = vmatmul.mubr.bf16.gmra.mrb[16].mxu1 %v7516_v14  ;;  %v784_v15 = vrot.slane %v783_v45, 4 }
  0x57   : > { %v794_v33 = vrot.slane %v793_v48, 4  ;;  %v801_v43 = vshrl.u32 %v7519_v31, 16  ;;  %v804_v41 = vshll.u32 %v7519_v31, 16  ;;  %v1544_v5 = vsel %vm7418_vm5, %v1542_v6, %v1543_v11 }
  0x58   : > { %v810_v38 = vshll.u32 %v7524_v39, 16  ;;  %v814_v12 = vshrl.u32 %v7524_v39, 16  ;;  %v820_v7 = vshll.u32 %v7527_v62, 16  ;;  %v789_v61 = vsel %vm7194_vm2, %v784_v15, %v788_v13 }
  0x59   : > { %6478 = vmatmul.mubr.bf16.vlgmr.msra.gmra.mrb[0].mxu0 %v7508_v35  ;;  %v799_v22 = vsel %vm7194_vm2, %v794_v33, %v798_v52  ;;  %v7549_v45 = vcombine.low %v1541_v59, %v1544_v5  ;;  %v803_v48 = vrot.slane %v801_v43, 4  ;;  %v806_v11 = vrot.slane %v804_v41, 5  ;;  %v6987_v5 = vld [vmem:[%s8788_s1 + $0x198] sm:$0xff]  }
  0x5a   : > { %6510 = vmatpush3.bf16.msra.mxu0 %v7468_v63  ;;  %v7551_v14 = vcombine.low %v789_v61, %v799_v22  ;;  %v812_v6 = vrot.slane %v810_v38, 5  ;;  %v816_v36 = vrot.slane %v814_v12, 4  ;;  %v822_v63 = vrot.slane %v820_v7, 5 }
  0x5b   : > { %8867 = vst [vmem:[#allocation18_spill] sm:$0xff] %v7549_v45  ;;  %6511 = vmatprep.subr.bf16.mxu0 %v6983_v32  ;;  %6481 = vmatprep.mubr.bf16.mxu0 %v7549_v45  ;;  %v5761_v13 = vrot.slane %v7259_v47, 9  ;;  %v1547_v52 = vrot.slane %v7263_v57, 5  ;;  %v1550_v59 = vrot.slane %v7266_v58, 5  ;;  %v807_v15 = vor.u32 %v806_v11, %v803_v48  ;;  %v321_v48 = vld [vmem:[%s7138_s20 + $0xa0] sm:$0xf] }
  0x5c   : > { %8868 = vst [vmem:[#allocation19_spill] sm:$0xff] %v7551_v14  ;;  %6257 = vmatprep.mubr.bf16.mxu1 %v7551_v14  ;;  %v817_v33 = vor.u32 %v816_v36, %v812_v6  ;;  %v7562_v43 = vmax.bf16 %v8866_v49, %v317_v46  ;;  %v7565_v41 = vmax.bf16 %v8866_v49, %v318_v56  ;;  %v5762_v36 = vrot.slane %v7275_v2, 9  ;;  %v320_v46 = vld [vmem:[%s7138_s20 + $0x9c] sm:$0xf] }
  0x5d   : > { %v1548_v38 = vsel %vm7418_vm5, %v5761_v13, %v1547_v52  ;;  %v1549_v58 = vrot.slane %v1547_v52, 4  ;;  %v7573_v12 = vmax.bf16 %v8866_v49, %v319_v19  ;;  %v808_v7 = vrot.slane %v807_v15, 4  ;;  %v322_v52 = vld [vmem:[%s7138_s20 + $0xa4] sm:$0x1] }
  0x5e   : > { %6512 = vmatpush3.bf16.msra.mxu0 %v6983_v32  ;;  %v818_v61 = vrot.slane %v817_v33, 4  ;;  %v825_v56 = vshrl.u32 %v7562_v43, 16  ;;  %v828_v22 = vshll.u32 %v7562_v43, 16  ;;  %v834_v13 = vshll.u32 %v7565_v41, 16 }
  0x5f   : > { %6513 = vmatprep.subr.bf16.mxu0 %v6985_v4  ;;  %v1551_v11 = vsel %vm7418_vm5, %v1549_v58, %v1550_v59  ;;  %v838_v32 = vshrl.u32 %v7565_v41, 16  ;;  %v844_v19 = vshll.u32 %v7573_v12, 16  ;;  %v813_v15 = vsel %vm7194_vm2, %v808_v7, %v812_v6 }
  0x60   : > { %v823_v33 = vsel %vm7194_vm2, %v818_v61, %v822_v63  ;;  %v7590_v14 = vcombine.low %v1548_v38, %v1551_v11  ;;  %v827_v45 = vrot.slane %v825_v56, 4  ;;  %v830_v40 = vrot.slane %v828_v22, 5  ;;  %v6989_v63 = vld [vmem:[%s8788_s1 + $0x1a0] sm:$0xff]  }
  0x61   : > { %v7592_v35 = vcombine.low %v813_v15, %v823_v33  ;;  %v836_v59 = vrot.slane %v834_v13, 5  ;;  %v840_v58 = vrot.slane %v838_v32, 4  ;;  %v846_v18 = vrot.slane %v844_v19, 5  ;;  %v323_v13 = vld [vmem:[%s7138_s20 + $0xa8] sm:$0xf] }
  0x62   : > { %8869 = vst [vmem:[#allocation20_spill] sm:$0xff] %v7590_v14  ;;  %6514 = vmatpush3.bf16.msra.mxu0 %v6985_v4  ;;  %v1554_v2 = vrot.slane %v7294_v21, 5  ;;  %v1557_v6 = vrot.slane %v7297_v27, 5  ;;  %v7598_v7 = vmax.bf16 %v8866_v49, %v320_v46  ;;  %v831_v4 = vor.u32 %v830_v40, %v827_v45  ;;  %v325_v15 = vld [vmem:[%s7138_s20 + $0xb0] sm:$0x1] }
  0x63   : > { %8870 = vst [vmem:[#allocation21_spill] sm:$0xff] %v7592_v35  ;;  %6482 = vmatmul.mubr.bf16.gmra.mrb[4].mxu0 %v7590_v14  ;;  %6515 = vmatprep.subr.bf16.mxu0 %v6987_v5  ;;  %v841_v38 = vor.u32 %v840_v58, %v836_v59  ;;  %v7605_v61 = vmax.bf16 %v8866_v49, %v321_v48  ;;  %v324_v48 = vld [vmem:[%s7138_s20 + $0xac] sm:$0xf]  ;;  %v1561_v21 = vrot.slane %v7332_v0, 5  ;;  %v1571_v0 = vrot.slane %v7364_v20, 5 }
  0x64   : > { %6258 = vmatmul.mubr.bf16.gmra.mrb[20].mxu1 %v7592_v35  ;;  %v7608_v56 = vmax.bf16 %v8866_v49, %v322_v52  ;;  %v1555_v27 = vsel %vm7418_vm5, %v5762_v36, %v1554_v2  ;;  %v1556_v46 = vrot.slane %v1554_v2, 4  ;;  %v849_v22 = vshrl.u32 %v7598_v7, 16  ;;  %v6991_v58 = vld [vmem:[%s8788_s1 + $0x1a8] sm:$0xff]  }
  0x65   : > { %v852_v11 = vshll.u32 %v7598_v7, 16  ;;  %v832_v32 = vrot.slane %v831_v4, 4  ;;  %v842_v19 = vrot.slane %v841_v38, 4  ;;  %v858_v40 = vshll.u32 %v7605_v61, 16 }
  0x66   : > { %v862_v45 = vshrl.u32 %v7605_v61, 16  ;;  %6516 = vmatpush3.bf16.msra.mxu0 %v6987_v5  ;;  %v1558_v52 = vsel %vm7418_vm5, %v1556_v46, %v1557_v6  ;;  %v851_v33 = vrot.slane %v849_v22, 4  ;;  %v868_v2 = vshll.u32 %v7608_v56, 16 }
  0x67   : > { %v854_v36 = vrot.slane %v852_v11, 5  ;;  %6517 = vmatprep.subr.bf16.mxu0 %v6989_v63  ;;  %v837_v4 = vsel %vm7194_vm2, %v832_v32, %v836_v59  ;;  %v847_v38 = vsel %vm7194_vm2, %v842_v19, %v846_v18  ;;  %v7629_v35 = vcombine.low %v1555_v27, %v1558_v52 }
  0x68   : > { %v860_v5 = vrot.slane %v858_v40, 5  ;;  %v7631_v14 = vcombine.low %v837_v4, %v847_v38  ;;  %v864_v46 = vrot.slane %v862_v45, 4  ;;  %v870_v22 = vrot.slane %v868_v2, 5  ;;  %v327_v4 = vld [vmem:[%s7138_s20 + $0xb8] sm:$0xf] }
  0x69   : > { %8871 = vst [vmem:[#allocation22_spill] sm:$0xff] %v7629_v35  ;;  %v855_v6 = vor.u32 %v854_v36, %v851_v33  ;;  %6485 = vmatprep.mubr.bf16.mxu0 %v7629_v35  ;;  %v5763_v11 = vrot.slane %v7321_v51, 9  ;;  %v1564_v59 = vrot.slane %v7335_v1, 5  ;;  %v7638_v32 = vmax.bf16 %v8866_v49, %v323_v13  ;;  %v6993_v1 = vld [vmem:[%s8788_s1 + $0x1b0] sm:$0xff]   ;;  %v328_v38 = vld [vmem:[%s7138_s20 + $0xbc] sm:$0x1] }
  0x6a   : > { %8872 = vst [vmem:[#allocation23_spill] sm:$0xff] %v7631_v14  ;;  %6518 = vmatpush3.bf16.msra.mxu0 %v6989_v63  ;;  %6261 = vmatprep.mubr.bf16.mxu1 %v7631_v14  ;;  %v865_v27 = vor.u32 %v864_v46, %v860_v5  ;;  %v7642_v19 = vmax.bf16 %v8866_v49, %v324_v48  ;;  %v1563_v13 = vrot.slane %v1561_v21, 4  ;;  %v326_v33 = vld [vmem:[%s7138_s20 + $0xb4] sm:$0xf]  ;;  %v6995_v14 = vld [vmem:[%s8788_s1 + $0x1b8] sm:$0xff]  }
  0x6b   : > { %v856_v18 = vrot.slane %v855_v6, 4  ;;  %v7645_v40 = vmax.bf16 %v8866_v49, %v325_v15  ;;  %6519 = vmatprep.subr.bf16.mxu0 %v6991_v58  ;;  %v1562_v63 = vsel %vm7418_vm5, %v5763_v11, %v1561_v21  ;;  %v873_v45 = vshrl.u32 %v7638_v32, 16 }
  0x6c   : > { %v876_v52 = vshll.u32 %v7638_v32, 16  ;;  %v866_v36 = vrot.slane %v865_v27, 4  ;;  %v882_v15 = vshll.u32 %v7642_v19, 16  ;;  %v886_v2 = vshrl.u32 %v7642_v19, 16 }
  0x6d   : > { %v861_v48 = vsel %vm7194_vm2, %v856_v18, %v860_v5  ;;  %v1565_v6 = vsel %vm7418_vm5, %v1563_v13, %v1564_v59  ;;  %v875_v46 = vrot.slane %v873_v45, 4  ;;  %v892_v11 = vshll.u32 %v7645_v40, 16 }
  0x6e   : > { %v878_v21 = vrot.slane %v876_v52, 5  ;;  %6520 = vmatpush3.bf16.msra.mxu0 %v6991_v58  ;;  %v871_v5 = vsel %vm7194_vm2, %v866_v36, %v870_v22  ;;  %v7669_v18 = vcombine.low %v1562_v63, %v1565_v6  ;;  %v884_v27 = vrot.slane %v882_v15, 5  ;;  %v7694_v6 = vld [vmem:[%s8788_s1 + $0x1c0] sm:$0xff]  }
  0x6f   : > { %v888_v35 = vrot.slane %v886_v2, 4  ;;  %6521 = vmatprep.subr.bf16.mxu0 %v6993_v1  ;;  %v7671_v51 = vcombine.low %v861_v48, %v871_v5  ;;  %v894_v13 = vrot.slane %v892_v11, 5  ;;  %v5764_v45 = vrot.slane %v7344_v10, 9 }
  0x70   : > { %8873 = vst [vmem:[#allocation24_spill] sm:$0xff] %v7669_v18  ;;  %v879_v59 = vor.u32 %v878_v21, %v875_v46  ;;  %6486 = vmatmul.mubr.bf16.gmra.mrb[8].mxu0 %v7669_v18  ;;  %v1568_v52 = vrot.slane %v7361_v37, 5  ;;  %v7678_v22 = vmax.bf16 %v8866_v49, %v326_v33  ;;  %v7682_v48 = vmax.bf16 %v8866_v49, %v327_v4 }
  0x71   : > { %8874 = vst [vmem:[#allocation25_spill] sm:$0xff] %v7671_v51  ;;  %v889_v58 = vor.u32 %v888_v35, %v884_v27  ;;  %6262 = vmatmul.mubr.bf16.gmra.mrb[24].mxu1 %v7671_v51  ;;  %v7685_v36 = vmax.bf16 %v8866_v49, %v328_v38  ;;  %v5765_v15 = vrot.slane %v7388_v8, 9  ;;  %v1575_v18 = vrot.slane %v7393_v29, 5 }
  0x72   : > { %v880_v63 = vrot.slane %v879_v59, 4  ;;  %6522 = vmatpush3.bf16.msra.mxu0 %v6993_v1  ;;  %v1569_v2 = vsel %vm7418_vm5, %v5764_v45, %v1568_v52  ;;  %v1570_v20 = vrot.slane %v1568_v52, 4  ;;  %v897_v33 = vshrl.u32 %v7678_v22, 16 }
  0x73   : > { %v890_v35 = vrot.slane %v889_v58, 4  ;;  %6523 = vmatprep.subr.bf16.mxu0 %v6995_v14  ;;  %v900_v38 = vshll.u32 %v7678_v22, 16  ;;  %v906_v1 = vshll.u32 %v7682_v48, 16  ;;  %v910_v46 = vshrl.u32 %v7682_v48, 16 }
  0x74   : > { %v885_v4 = vsel %vm7194_vm2, %v880_v63, %v884_v27  ;;  %v1572_v11 = vsel %vm7418_vm5, %v1570_v20, %v1571_v0  ;;  %v899_v5 = vrot.slane %v897_v33, 4  ;;  %v916_v59 = vshll.u32 %v7685_v36, 16 }
  0x75   : > { %v895_v21 = vsel %vm7194_vm2, %v890_v35, %v894_v13  ;;  %v7708_v58 = vcombine.low %v1569_v2, %v1572_v11  ;;  %v902_v27 = vrot.slane %v900_v38, 5  ;;  %v908_v52 = vrot.slane %v906_v1, 5 }
  0x76   : > { %v7706_v45 = vcombine.low %v885_v4, %v895_v21  ;;  %6524 = vmatpush3.bf16.msra.mxu0 %v6995_v14  ;;  %v912_v63 = vrot.slane %v910_v46, 4  ;;  %v918_v51 = vrot.slane %v916_v59, 5  ;;  %v1578_v8 = vrot.slane %v7396_v30, 5 }
  0x77   : > { %6557 = vmatprep.subr.bf16.mxu0 %v7694_v6  ;;  %6489 = vmatprep.mubr.bf16.mxu0 %v7708_v58  ;;  %v903_v0 = vor.u32 %v902_v27, %v899_v5  ;;  %v5766_v13 = vrot.slane %v7444_v3, 9  ;;  %v1582_v35 = vrot.slane %v7447_v42, 5  ;;  %v1576_v14 = vsel %vm7418_vm5, %v5765_v15, %v1575_v18 }
  0x78   : > { %6265 = vmatprep.mubr.bf16.mxu1 %v7706_v45  ;;  %v913_v2 = vor.u32 %v912_v63, %v908_v52  ;;  %v1577_v20 = vrot.slane %v1575_v18, 4  ;;  %v1585_v33 = vrot.slane %v7450_v44, 5  ;;  %v5767_v21 = vrot.slane %v7479_v34, 9 }
  0x79   : > { %v904_v4 = vrot.slane %v903_v0, 4  ;;  %v1583_v30 = vsel %vm7418_vm5, %v5766_v13, %v1582_v35  ;;  %v1584_v38 = vrot.slane %v1582_v35, 4  ;;  %v1589_v11 = vrot.slane %v7486_v28, 5 }
  0x7a   : > { %v914_v1 = vrot.slane %v913_v2, 4  ;;  %v1579_v46 = vsel %vm7418_vm5, %v1577_v20, %v1578_v8  ;;  %v1592_v18 = vrot.slane %v7489_v55, 5  ;;  %v5733_v8 = vcombine.low %v7150_v16, %v7153_v17 }
  0x7b   : > { %v909_v5 = vsel %vm7194_vm2, %v904_v4, %v908_v52  ;;  %v7728_v15 = vcombine.low %v1576_v14, %v1579_v46  ;;  %v1586_v44 = vsel %vm7418_vm5, %v1584_v38, %v1585_v33  ;;  %v1591_v63 = vrot.slane %v1589_v11, 4 }
  0x7c   : > { %v919_v59 = vsel %vm7194_vm2, %v914_v1, %v918_v51  ;;  %v7737_v27 = vcombine.low %v1583_v30, %v1586_v44  ;;  %v5768_v52 = vrot.slane %v7519_v31, 9  ;;  %v1596_v13 = vrot.slane %v7524_v39, 5 }
  0x7d   : > { %v7739_v0 = vcombine.low %v909_v5, %v919_v59  ;;  %6490 = vmatmul.mubr.bf16.gmra.mrb[12].mxu0 %v7728_v15  ;;  %v1590_v55 = vsel %vm7418_vm5, %v5767_v21, %v1589_v11  ;;  %v1593_v51 = vsel %vm7418_vm5, %v1591_v63, %v1592_v18  ;;  %v1599_v35 = vrot.slane %v7527_v62, 5  ;;  %v6990_v18 = vld [vmem:[%s8788_s1 + $0x88] sm:$0xff]   ;;  %v330_v63 = vld [vmem:[%s7138_s20 + $0xc4] sm:$0xf] }
  0x7e   : > { %6493 = vmatprep.mubr.bf16.mxu0 %v7737_v27  ;;  %v1597_v2 = vsel %vm7418_vm5, %v5768_v52, %v1596_v13  ;;  %v1598_v14 = vrot.slane %v1596_v13, 4  ;;  %v1603_v20 = vrot.slane %v7565_v41, 5  ;;  %v5769_v33 = vrot.slane %v7562_v43, 9 }
  0x7f   : > { %6266 = vmatmul.mubr.bf16.gmra.mrb[28].mxu1 %v7739_v0  ;;  %v1606_v4 = vrot.slane %v7573_v12, 5  ;;  %v1610_v30 = vrot.slane %v7605_v61, 5  ;;  %v7757_v38 = vcombine.low %v1590_v55, %v1593_v51  ;;  %v5770_v46 = vrot.slane %v7598_v7, 9 }
  0x80   : > { %6285 = vmatprep.mubr.bf16.mxu1 %v5733_v8  ;;  %v1600_v62 = vsel %vm7418_vm5, %v1598_v14, %v1599_v35  ;;  %v1605_v1 = vrot.slane %v1603_v20, 4  ;;  %v1613_v5 = vrot.slane %v7608_v56, 5  ;;  %v7767_v44 = vcombine.low %v7165_v23, %v7168_v24 }
  0x81   : > { %v7762_v21 = vcombine.low %v1597_v2, %v1600_v62  ;;  %v1612_v11 = vrot.slane %v1610_v30, 4  ;;  %v7771_v12 = vcombine.low %v7199_v53, %v7202_v54  ;;  %v1604_v59 = vsel %vm7418_vm5, %v5769_v33, %v1603_v20  ;;  %v6996_v62 = vld [vmem:[%s8788_s1 + $0xa0] sm:$0xff]  }
  0x82   : > { %v1607_v56 = vsel %vm7418_vm5, %v1605_v1, %v1606_v4  ;;  %v1617_v8 = vrot.slane %v7642_v19, 5  ;;  %v1611_v23 = vsel %vm7418_vm5, %v5770_v46, %v1610_v30  ;;  %v1624_v53 = vrot.slane %v7682_v48, 5  ;;  %v329_v4 = vld [vmem:[%s7138_s20 + $0xc0] sm:$0xf]  ;;  %v331_v30 = vld [vmem:[%s7138_s20 + $0xc8] sm:$0x1] }
  0x83   : > { %v1614_v24 = vsel %vm7418_vm5, %v1612_v11, %v1613_v5  ;;  %v7791_v54 = vcombine.low %v7234_v25, %v7237_v26  ;;  %v7796_v52 = vcombine.low %v1604_v59, %v1607_v56  ;;  %v5771_v13 = vrot.slane %v7638_v32, 9  ;;  %v6992_v25 = vld [vmem:[%s8788_s1 + $0x90] sm:$0xff]  }
  0x84   : > { %v1620_v55 = vrot.slane %v7645_v40, 5  ;;  %v5772_v51 = vrot.slane %v7678_v22, 9  ;;  %v7801_v35 = vcombine.low %v1611_v23, %v1614_v24  ;;  %v1619_v26 = vrot.slane %v1617_v8, 4  ;;  %v8877_v23 = vld [vmem:[#allocation8_spill] sm:$0xff]  ;;  %v8878_v24 = vld [vmem:[#allocation7_spill] sm:$0xff] }
  0x85   : > { %6494 = vmatmul.mubr.bf16.gmra.mrb[16].mxu0 %v7757_v38  ;;  %v7812_v2 = vcombine.low %v7479_v34, %v7486_v28  ;;  %v1626_v14 = vrot.slane %v1624_v53, 4  ;;  %v1627_v40 = vrot.slane %v7685_v36, 5  ;;  %v7816_v20 = vmax.bf16 %v8866_v49, %v330_v63  ;;  %v6998_v63 = vld [vmem:[%s8788_s1 + $0xa8] sm:$0xff]  }
  0x86   : > { %6497 = vmatprep.mubr.bf16.mxu0 %v7762_v21  ;;  %v7820_v33 = vcombine.low %v7519_v31, %v7524_v39  ;;  %v7834_v34 = vcombine.low %v7638_v32, %v7642_v19  ;;  %v7838_v28 = vcombine.low %v7678_v22, %v7682_v48  ;;  %v7842_v31 = vcombine.low %v7259_v47, %v7263_v57  ;;  %v8875_v19 = vld [vmem:[#allocation5_spill] sm:$0xff]  ;;  %v8876_v22 = vld [vmem:[#allocation3_spill] sm:$0xff] }
  0x87   : > { %6286 = vmatmul.mubr.bf16.vlgmr.msra.gmra.mrb[0].mxu1 %v7767_v44  ;;  %v1618_v39 = vsel %vm7418_vm5, %v5771_v13, %v1617_v8  ;;  %v385_v47 = vmax.bf16 %v8866_v49, %v331_v30  ;;  %v2453_v57 = vrot.slane %v7816_v20, 5  ;;  %v1628_v32 = vsel %vm7418_vm5, %v1626_v14, %v1627_v40 }
  0x88   : > { %6318 = vmatpush3.bf16.msra.mxu1 %v7432_v9  ;;  %6289 = vmatprep.mubr.bf16.mxu1 %v7771_v12  ;;  %v7808_v9 = vcombine.low %v7444_v3, %v7447_v42  ;;  %v7826_v3 = vcombine.low %v7562_v43, %v7565_v41  ;;  %v7830_v42 = vcombine.low %v7598_v7, %v7605_v61  ;;  %v6994_v43 = vld [vmem:[%s8788_s1 + $0x98] sm:$0xff]   ;;  %v2191_v56 = vshll.u32 %v7816_v20, 16 }
  0x89   : > { %6319 = vmatprep.subr.bf16.mxu1 %v6990_v18  ;;  %v1621_v41 = vsel %vm7418_vm5, %v1619_v26, %v1620_v55  ;;  %v7854_v7 = vmax.bf16 %v8866_v49, %v329_v4  ;;  %v1625_v61 = vsel %vm7418_vm5, %v5772_v51, %v1624_v53  ;;  %v7866_v48 = vcombine.low %v8876_v22, %v8875_v19  ;;  %v8879_v22 = vld [vmem:[#allocation11_spill] sm:$0xff] }
  0x8a   : > { %v7868_v36 = vcombine.low %v1618_v39, %v1621_v41  ;;  %v7873_v1 = vcombine.low %v1625_v61, %v1628_v32  ;;  %v2455_v11 = vrot.slane %v2453_v57, 4  ;;  %v2456_v5 = vrot.slane %v385_v47, 5 }
  0x8b   : > { %v5815_v46 = vrot.slane %v7854_v7, 9  ;;  %v2185_v59 = vshll.u32 %v7854_v7, 16  ;;  %v2195_v8 = vshrl.u32 %v7816_v20, 16  ;;  %v7882_v53 = vcombine.low %v8878_v24, %v8877_v23  ;;  %v8880_v23 = vld [vmem:[#allocation2_spill] sm:$0xff] }
  0x8c   : > { %6320 = vmatpush3.bf16.msra.mxu1 %v6990_v18  ;;  %v2182_v18 = vshrl.u32 %v7854_v7, 16  ;;  %v2193_v51 = vrot.slane %v2191_v56, 5  ;;  %v2457_v14 = vsel %vm7418_vm5, %v2455_v11, %v2456_v5  ;;  %v2201_v30 = vshll.u32 %v385_v47, 16  ;;  %v7001_v11 = vld [vmem:[%s8788_s1 + $0x1d0] sm:$0xff]   ;;  %v7003_v5 = vld [vmem:[%s8788_s1 + $0x1d8] sm:$0xff]  }
  0x8d   : > { %6498 = vmatmul.mubr.bf16.gmra.mrb[20].mxu0 %v7796_v52  ;;  %6321 = vmatprep.subr.bf16.mxu1 %v6992_v25  ;;  %v2187_v55 = vrot.slane %v2185_v59, 5  ;;  %v2454_v26 = vsel %vm7418_vm5, %v5815_v46, %v2453_v57  ;;  %v7902_v32 = vcombine.low %v7344_v10, %v7361_v37  ;;  %v7002_v10 = vld [vmem:[%s8788_s1 + $0xb8] sm:$0xff]   ;;  %v7004_v37 = vld [vmem:[%s8788_s1 + $0xc0] sm:$0xff]   ;;  %v7007_v59 = vld [vmem:[%s8788_s1 + $0x1e8] sm:$0xff]   ;;  %v5757_v56 = vrot.slane %v7150_v16, 9 }
  0x8e   : > { %6501 = vmatprep.mubr.bf16.mxu0 %v7801_v35  ;;  %v2184_v13 = vrot.slane %v2182_v18, 4  ;;  %v7895_v39 = vcombine.low %v2454_v26, %v2457_v14  ;;  %v2203_v61 = vrot.slane %v2201_v30, 5  ;;  %v1519_v18 = vrot.slane %v7153_v17, 5  ;;  %v7009_v17 = vld [vmem:[%s8788_s1 + $0x1f0] sm:$0xff]   ;;  %v8881_v26 = vld [vmem:[#allocation14_spill] sm:$0xff] }
  0x8f   : > { %6290 = vmatmul.mubr.bf16.gmra.mrb[4].mxu1 %v7791_v54  ;;  %v1522_v24 = vrot.slane %v8880_v23, 5  ;;  %v8882_v14 = vld [vmem:[#allocation16_spill] sm:$0xff]  ;;  %v8883_v30 = vld [vmem:[#allocation18_spill] sm:$0xff]  ;;  %v7019_v23 = vld [vmem:[%s8788_s1 + $0x218] sm:$0xff]  }
  0x90   : > { %6293 = vmatprep.mubr.bf16.mxu1 %v7842_v31  ;;  %6322 = vmatpush3.bf16.msra.mxu1 %v6992_v25  ;;  %v2197_v25 = vrot.slane %v2195_v8, 4  ;;  %v2188_v40 = vor.u32 %v2187_v55, %v2184_v13  ;;  %v1521_v8 = vrot.slane %v1519_v18, 4  ;;  %v7011_v13 = vld [vmem:[%s8788_s1 + $0x1f8] sm:$0xff]  }
  0x91   : > { %6323 = vmatprep.subr.bf16.mxu1 %v6994_v43 }
  0x92   : > { %v2198_v4 = vor.u32 %v2197_v25, %v2193_v51  ;;  %v2189_v41 = vrot.slane %v2188_v40, 4  ;;  %v1523_v16 = vsel %vm7418_vm5, %v1521_v8, %v1522_v24  ;;  %v7006_v25 = vld [vmem:[%s8788_s1 + $0xc8] sm:$0xff]   ;;  %v7008_v40 = vld [vmem:[%s8788_s1 + $0xd0] sm:$0xff]   ;;  %v8890_v24 = vld [vmem:[#allocation10_spill] sm:$0xff] }
  0x93   : > { %v7017_v8 = vld [vmem:[%s8788_s1 + $0x210] sm:$0xff]  }
  0x94   : > { %6324 = vmatpush3.bf16.msra.mxu1 %v6994_v43  ;;  %v7000_v43 = vld [vmem:[%s8788_s1 + $0xb0] sm:$0xff]   ;;  %v2199_v57 = vrot.slane %v2198_v4, 4  ;;  %v2194_v47 = vsel %vm7194_vm2, %v2189_v41, %v2193_v51  ;;  %v7013_v51 = vld [vmem:[%s8788_s1 + $0x200] sm:$0xff]   ;;  %v7010_v4 = vld [vmem:[%s8788_s1 + $0xd8] sm:$0xff]  }
  0x95   : > { %6502 = vmatmul.mubr.bf16.gmra.mrb[24].mxu0 %v7868_v36  ;;  %6325 = vmatprep.subr.bf16.mxu1 %v6996_v62  ;;  %v7012_v41 = vld [vmem:[%s8788_s1 + $0xe0] sm:$0xff]  }
  0x96   : > { %6505 = vmatprep.mubr.bf16.mxu0 %v7873_v1  ;;  %v2204_v19 = vsel %vm7194_vm2, %v2199_v57, %v2203_v61  ;;  %v7993_v57 = vcombine.low %v7854_v7, %v7816_v20  ;;  %v332_v61 = vld [vmem:[%s7138_s20 + $0xcc] sm:$0xf]  ;;  %v8885_v20 = vld [vmem:[#allocation22_spill] sm:$0xff]  ;;  %v8886_v7 = vld [vmem:[#allocation24_spill] sm:$0xff] }
  0x97   : > { %6294 = vmatmul.mubr.bf16.gmra.mrb[8].mxu1 %v7866_v48  ;;  %v7912_v46 = vcombine.low %v2194_v47, %v2204_v19  ;;  %v333_v47 = vld [vmem:[%s7138_s20 + $0xd0] sm:$0xf]  ;;  %v7999_v19 = vmax.bf16 %v8866_v49, %v332_v61  ;;  %v334_v61 = vld [vmem:[%s7138_s20 + $0xd4] sm:$0x1] }
  0x98   : > { %6297 = vmatprep.mubr.bf16.mxu1 %v7882_v53  ;;  %6326 = vmatpush3.bf16.msra.mxu1 %v6996_v62  ;;  %v7910_v62 = vcombine.low %v8879_v22, %v7393_v29  ;;  %v6999_v29 = vld [vmem:[%s8788_s1 + $0x1c8] sm:$0xff]   ;;  %v8002_v22 = vmax.bf16 %v8866_v49, %v333_v47 }
  0x99   : > { %6327 = vmatprep.subr.bf16.mxu1 %v6998_v63  ;;  %v2951_v47 = vshrl.u32 %v7999_v19, 16 }
  0x9c   : > { %6328 = vmatpush3.bf16.msra.mxu1 %v6998_v63  ;;  %v1520_v63 = vsel %vm7418_vm5, %v5757_v56, %v1519_v18  ;;  %v8888_v18 = vld [vmem:[#allocation6_spill] sm:$0xff]  ;;  %v8889_v56 = vld [vmem:[#allocation9_spill] sm:$0xff] }
  0x9d   : > { %6506 = vmatmul.mubr.bf16.gmra.mrb[28].mxu0 %v7895_v39  ;;  %6329 = vmatprep.subr.bf16.mxu1 %v7000_v43  ;;  %v5773_v55 = vcombine.low %v1520_v63, %v1523_v16  ;;  %v7020_v63 = vld [vmem:[%s8788_s1 + $0x220] sm:$0xff]   ;;  %v7021_v16 = vld [vmem:[%s8788_s1 + $0x228] sm:$0xff]  }
  0x9e   : > { %6525 = vmatprep.mubr.bf16.mxu0 %v7771_v12 }
  0x9f   : > { %6298 = vmatmul.mubr.bf16.gmra.mrb[12].mxu1 %v7902_v32 }
  0xa0   : > { %6301 = vmatprep.mubr.bf16.mxu1 %v7910_v62  ;;  %6330 = vmatpush3.bf16.msra.mxu1 %v7000_v43  ;;  %v8884_v43 = vld [vmem:[#allocation20_spill] sm:$0xff] }
  0xa1   : > { %6331 = vmatprep.subr.bf16.mxu1 %v7002_v10 }
  0xa4   : > { %6332 = vmatpush3.bf16.msra.mxu1 %v7002_v10  ;;  %v7014_v10 = vld [vmem:[%s8788_s1 + $0xe8] sm:$0xff]  }
  0xa5   : > { %6526 = vmatmul.mubr.bf16.vlgmr.msra.gmra.mrb[0].mxu0 %v7791_v54  ;;  %6365 = vmatprep.subr.bf16.mxu1 %v7004_v37 }
  0xa6   : > { %6558 = vmatpush3.bf16.msra.mxu0 %v7694_v6  ;;  %6529 = vmatprep.mubr.bf16.mxu0 %v7842_v31  ;;  %v7005_v6 = vld [vmem:[%s8788_s1 + $0x1e0] sm:$0xff]  }
  0xa7   : > { %6302 = vmatmul.mubr.bf16.gmra.mrb[16].mxu1 %v7808_v9  ;;  %6559 = vmatprep.subr.bf16.mxu0 %v6999_v29 }
  0xa8   : > { %6305 = vmatprep.mubr.bf16.mxu1 %v7812_v2 }
  0xaa   : > { %6560 = vmatpush3.bf16.msra.mxu0 %v6999_v29  ;;  %v7016_v29 = vld [vmem:[%s8788_s1 + $0xf0] sm:$0xff]  }
  0xab   : > { %6561 = vmatprep.subr.bf16.mxu0 %v7001_v11 }
  0xad   : > { %6530 = vmatmul.mubr.bf16.gmra.mrb[4].mxu0 %v7866_v48 }
  0xae   : > { %6533 = vmatprep.mubr.bf16.mxu0 %v7882_v53  ;;  %6562 = vmatpush3.bf16.msra.mxu0 %v7001_v11  ;;  %v7018_v11 = vld [vmem:[%s8788_s1 + $0xf8] sm:$0xff]  }
  0xaf   : > { %6306 = vmatmul.mubr.bf16.gmra.mrb[20].mxu1 %v7820_v33  ;;  %6563 = vmatprep.subr.bf16.mxu0 %v7003_v5 }
  0xb0   : > { %6309 = vmatprep.mubr.bf16.mxu1 %v7826_v3 }
  0xb2   : > { %6564 = vmatpush3.bf16.msra.mxu0 %v7003_v5  ;;  %v8887_v5 = vld [vmem:[#allocation4_spill] sm:$0xff] }
  0xb3   : > { %6565 = vmatprep.subr.bf16.mxu0 %v7005_v6 }
  0xb5   : > { %6534 = vmatmul.mubr.bf16.gmra.mrb[8].mxu0 %v7902_v32 }
  0xb6   : > { %6537 = vmatprep.mubr.bf16.mxu0 %v7910_v62  ;;  %6566 = vmatpush3.bf16.msra.mxu0 %v7005_v6  ;;  %v7015_v6 = vld [vmem:[%s8788_s1 + $0x208] sm:$0xff]  }
  0xb7   : > { %6310 = vmatmul.mubr.bf16.gmra.mrb[24].mxu1 %v7830_v42  ;;  %6567 = vmatprep.subr.bf16.mxu0 %v7007_v59 }
  0xb8   : > { %6313 = vmatprep.mubr.bf16.mxu1 %v7834_v34 }
  0xba   : > { %6568 = vmatpush3.bf16.msra.mxu0 %v7007_v59  ;;  %v7024_v59 = vld [vmem:[%s8788_s1 + $0x100] sm:$0xff]  }
  0xbb   : > { %6569 = vmatprep.subr.bf16.mxu0 %v7009_v17 }
  0xbd   : > { %6538 = vmatmul.mubr.bf16.gmra.mrb[12].mxu0 %v7808_v9 }
  0xbe   : > { %6541 = vmatprep.mubr.bf16.mxu0 %v7812_v2  ;;  %6570 = vmatpush3.bf16.msra.mxu0 %v7009_v17  ;;  %v8891_v17 = vld [vmem:[#allocation12_spill] sm:$0xff] }
  0xbf   : > { %6314 = vmatmul.mubr.bf16.gmra.mrb[28].mxu1 %v7838_v28  ;;  %6571 = vmatprep.subr.bf16.mxu0 %v7011_v13 }
  0xc0   : > { %6333 = vmatprep.mubr.bf16.mxu1 %v5773_v55  ;;  %v8893_v55 = vld [vmem:[#allocation15_spill] sm:$0xff] }
  0xc2   : > { %6572 = vmatpush3.bf16.msra.mxu0 %v7011_v13  ;;  %v8892_v13 = vld [vmem:[#allocation13_spill] sm:$0xff] }
  0xc3   : > { %6605 = vmatprep.subr.bf16.mxu0 %v7013_v51 }
  0xc5   : > { %6542 = vmatmul.mubr.bf16.gmra.mrb[16].mxu0 %v7820_v33 }
  0xc6   : > { %6545 = vmatprep.mubr.bf16.mxu0 %v7826_v3 }
  0xc7   : > { %6334 = vmatmul.mubr.bf16.vlgmr.msra.gmra.mrb[0].mxu1 %v8881_v26  ;;  %v8894_v26 = vld [vmem:[#allocation17_spill] sm:$0xff] }
  0xc8   : > { %6366 = vmatpush3.bf16.msra.mxu1 %v7004_v37  ;;  %6337 = vmatprep.mubr.bf16.mxu1 %v8882_v14  ;;  %v5825_v37 = vcombine.low %v7999_v19, %v8002_v22 }
  0xc9   : > { %6367 = vmatprep.subr.bf16.mxu1 %v7006_v25 }
  0xcc   : > { %6368 = vmatpush3.bf16.msra.mxu1 %v7006_v25  ;;  %v7023_v25 = vld [vmem:[%s8788_s1 + $0x238] sm:$0xff]  }
  0xcd   : > { %6546 = vmatmul.mubr.bf16.gmra.mrb[20].mxu0 %v7830_v42  ;;  %6369 = vmatprep.subr.bf16.mxu1 %v7008_v40 }
  0xce   : > { %6549 = vmatprep.mubr.bf16.mxu0 %v7834_v34 }
  0xcf   : > { %6338 = vmatmul.mubr.bf16.gmra.mrb[4].mxu1 %v8883_v30 }
  0xd0   : > { %6341 = vmatprep.mubr.bf16.mxu1 %v8884_v43  ;;  %6370 = vmatpush3.bf16.msra.mxu1 %v7008_v40  ;;  %v8895_v40 = vld [vmem:[#allocation19_spill] sm:$0xff] }
  0xd1   : > { %6371 = vmatprep.subr.bf16.mxu1 %v7010_v4 }
  0xd4   : > { %6372 = vmatpush3.bf16.msra.mxu1 %v7010_v4  ;;  %v8896_v4 = vld [vmem:[#allocation21_spill] sm:$0xff] }
  0xd5   : > { %6550 = vmatmul.mubr.bf16.gmra.mrb[24].mxu0 %v7838_v28  ;;  %6373 = vmatprep.subr.bf16.mxu1 %v7012_v41 }
  0xd6   : > { %6553 = vmatprep.mubr.bf16.mxu0 %v7993_v57 }
  0xd7   : > { %6342 = vmatmul.mubr.bf16.gmra.mrb[8].mxu1 %v8885_v20 }
  0xd8   : > { %6345 = vmatprep.mubr.bf16.mxu1 %v8886_v7  ;;  %6374 = vmatpush3.bf16.msra.mxu1 %v7012_v41  ;;  %v8897_v41 = vld [vmem:[#allocation23_spill] sm:$0xff] }
  0xd9   : > { %6375 = vmatprep.subr.bf16.mxu1 %v7014_v10 }
  0xdc   : > { %6376 = vmatpush3.bf16.msra.mxu1 %v7014_v10  ;;  %v2954_v10 = vshll.u32 %v7999_v19, 16 }
  0xdd   : > { %6554 = vmatmul.mubr.bf16.gmra.mrb[28].mxu0 %v5825_v37  ;;  %6377 = vmatprep.subr.bf16.mxu1 %v7016_v29  ;;  %v2960_v37 = vshll.u32 %v8002_v22, 16 }
  0xde   : > { %6573 = vmatprep.mubr.bf16.mxu0 %v8887_v5  ;;  %v2953_v5 = vrot.slane %v2951_v47, 4 }
  0xdf   : > { %6346 = vmatmul.mubr.bf16.gmra.mrb[12].mxu1 %v7708_v58 }
  0xe0   : > { %6349 = vmatprep.mubr.bf16.mxu1 %v7728_v15  ;;  %6378 = vmatpush3.bf16.msra.mxu1 %v7016_v29  ;;  %v2964_v29 = vshrl.u32 %v8002_v22, 16 }
  0xe1   : > { %6379 = vmatprep.subr.bf16.mxu1 %v7018_v11 }
  0xe4   : > { %6380 = vmatpush3.bf16.msra.mxu1 %v7018_v11  ;;  %v8074_v11 = vmax.bf16 %v8866_v49, %v334_v61  ;;  %v7027_v49 = vld [vmem:[%s8788_s1 + $0x118] sm:$0xff]  }
  0xe5   : > { %6574 = vmatmul.mubr.bf16.vlgmr.msra.gmra.mrb[0].mxu0 %v8888_v18  ;;  %6653 = vmatprep.subr.bf16.mxu1 %v7024_v59  ;;  %v2962_v18 = vrot.slane %v2960_v37, 5 }
  0xe6   : > { %6606 = vmatpush3.bf16.msra.mxu0 %v7013_v51  ;;  %6577 = vmatprep.mubr.bf16.mxu0 %v8889_v56  ;;  %v7022_v51 = vld [vmem:[%s8788_s1 + $0x230] sm:$0xff]   ;;  %v2966_v56 = vrot.slane %v2964_v29, 4 }
  0xe7   : > { %6350 = vmatmul.mubr.bf16.gmra.mrb[16].mxu1 %v7737_v27  ;;  %6607 = vmatprep.subr.bf16.mxu0 %v7015_v6 }
  0xe8   : > { %6353 = vmatprep.mubr.bf16.mxu1 %v7757_v38 }
  0xea   : > { %6608 = vmatpush3.bf16.msra.mxu0 %v7015_v6  ;;  %v2956_v6 = vrot.slane %v2954_v10, 5 }
  0xeb   : > { %6609 = vmatprep.subr.bf16.mxu0 %v7017_v8 }
  0xed   : > { %6578 = vmatmul.mubr.bf16.gmra.mrb[4].mxu0 %v8890_v24 }
  0xee   : > { %6581 = vmatprep.mubr.bf16.mxu0 %v8891_v17  ;;  %6610 = vmatpush3.bf16.msra.mxu0 %v7017_v8  ;;  %v8898_v8 = vld [vmem:[#allocation25_spill] sm:$0xff] }
  0xef   : > { %6354 = vmatmul.mubr.bf16.gmra.mrb[20].mxu1 %v7762_v21  ;;  %6611 = vmatprep.subr.bf16.mxu0 %v7019_v23 }
  0xf0   : > { %6357 = vmatprep.mubr.bf16.mxu1 %v7796_v52 }
  0xf2   : > { %6612 = vmatpush3.bf16.msra.mxu0 %v7019_v23  ;;  %v2970_v23 = vshll.u32 %v8074_v11, 16 }
  0xf3   : > { %6613 = vmatprep.subr.bf16.mxu0 %v7020_v63 }
  0xf5   : > { %6582 = vmatmul.mubr.bf16.gmra.mrb[8].mxu0 %v8892_v13 }
  0xf6   : > { %6585 = vmatprep.mubr.bf16.mxu0 %v8893_v55  ;;  %6614 = vmatpush3.bf16.msra.mxu0 %v7020_v63  ;;  %v2972_v63 = vrot.slane %v2970_v23, 5  ;;  %v7029_v55 = vld [vmem:[%s8788_s1 + $0x128] sm:$0xff]  }
  0xf7   : > { %6358 = vmatmul.mubr.bf16.gmra.mrb[24].mxu1 %v7801_v35  ;;  %6615 = vmatprep.subr.bf16.mxu0 %v7021_v16 }
  0xf8   : > { %6361 = vmatprep.mubr.bf16.mxu1 %v7868_v36 }
  0xfa   : > { %6616 = vmatpush3.bf16.msra.mxu0 %v7021_v16  ;;  %v7028_v16 = vld [vmem:[%s8788_s1 + $0x120] sm:$0xff]  }
  0xfb   : > { %6617 = vmatprep.subr.bf16.mxu0 %v7022_v51 }
  0xfd   : > { %6586 = vmatmul.mubr.bf16.gmra.mrb[12].mxu0 %v8894_v26 }
  0xfe   : > { %6589 = vmatprep.mubr.bf16.mxu0 %v8895_v40  ;;  %6618 = vmatpush3.bf16.msra.mxu0 %v7022_v51  ;;  %v7030_v51 = vld [vmem:[%s8788_s1 + $0x130] sm:$0xff]  }
  0xff   : > { %6362 = vmatmul.mubr.bf16.gmra.mrb[28].mxu1 %v7873_v1  ;;  %6619 = vmatprep.subr.bf16.mxu0 %v7023_v25 }
 0x100   : > { %6381 = vmatprep.mubr.bf16.mxu1 %v7767_v44  ;;  %v7025_v44 = vld [vmem:[%s8788_s1 + $0x108] sm:$0xff]  }
 0x102   : > { %6620 = vmatpush3.bf16.msra.mxu0 %v7023_v25 }
 0x105   : > { %6590 = vmatmul.mubr.bf16.gmra.mrb[16].mxu0 %v8896_v4 }
 0x106   : > { %6593 = vmatprep.mubr.bf16.mxu0 %v8897_v41 }
 0x107   : > { %6382 = vmatmul.mubr.bf16.vlgmr.msra.gmra.mrb[0].mxu1 %v7771_v12  ;;  %v7026_v12 = vld [vmem:[%s8788_s1 + $0x110] sm:$0xff]  }
 0x108   : > { %6661 = vmatpush3.bf16.msra.mxu1 %v7024_v59  ;;  %6385 = vmatprep.mubr.bf16.mxu1 %v7791_v54  ;;  %v2957_v54 = vor.u32 %v2956_v6, %v2953_v5  ;;  %v2967_v59 = vor.u32 %v2966_v56, %v2962_v18 }
 0x109   : > { %6654 = vmatprep.subr.bf16.mxu1 %v7025_v44 }
 0x10a   : > { %v2958_v24 = vrot.slane %v2957_v54, 4  ;;  %v2968_v17 = vrot.slane %v2967_v59, 4 }
 0x10c   : > { %6662 = vmatpush3.bf16.msra.mxu1 %v7025_v44 }
 0x10d   : > { %6594 = vmatmul.mubr.bf16.gmra.mrb[20].mxu0 %v8898_v8  ;;  %6655 = vmatprep.subr.bf16.mxu1 %v7026_v12 }
 0x10e   : > { %6597 = vmatprep.mubr.bf16.mxu0 %v7706_v45 }
 0x10f   : > { %6386 = vmatmul.mubr.bf16.gmra.mrb[4].mxu1 %v7842_v31  ;;  %v2963_v31 = vsel %vm7194_vm2, %v2958_v24, %v2962_v18 }
 0x110   : > { %6389 = vmatprep.mubr.bf16.mxu1 %v7866_v48  ;;  %6663 = vmatpush3.bf16.msra.mxu1 %v7026_v12  ;;  %v2973_v48 = vsel %vm7194_vm2, %v2968_v17, %v2972_v63 }
 0x111   : > { %6656 = vmatprep.subr.bf16.mxu1 %v7027_v49  ;;  %v5834_v13 = vcombine.low %v2963_v31, %v2973_v48 }
 0x114   : > { %6664 = vmatpush3.bf16.msra.mxu1 %v7027_v49 }
 0x115   : > { %6598 = vmatmul.mubr.bf16.gmra.mrb[24].mxu0 %v7739_v0  ;;  %6657 = vmatprep.subr.bf16.mxu1 %v7028_v16 }
 0x116   : > { %6601 = vmatprep.mubr.bf16.mxu0 %v7912_v46 }
 0x117   : > { %6390 = vmatmul.mubr.bf16.gmra.mrb[8].mxu1 %v7882_v53 }
 0x118   : > { %6393 = vmatprep.mubr.bf16.mxu1 %v7902_v32  ;;  %6665 = vmatpush3.bf16.msra.mxu1 %v7028_v16 }
 0x119   : > { %6658 = vmatprep.subr.bf16.mxu1 %v7029_v55 }
 0x11c   : > { %6666 = vmatpush3.bf16.msra.mxu1 %v7029_v55 }
 0x11d   : > { %6602 = vmatmul.mubr.bf16.gmra.mrb[28].mxu0 %v5834_v13  ;;  %6659 = vmatprep.subr.bf16.mxu1 %v7030_v51 }
 0x11e   : > { %6621 = vmatprep.mubr.bf16.mxu0 %v8882_v14 }
 0x11f   : > { %6394 = vmatmul.mubr.bf16.gmra.mrb[12].mxu1 %v7910_v62 }
 0x120   : > { %6397 = vmatprep.mubr.bf16.mxu1 %v7808_v9  ;;  %6667 = vmatpush3.bf16.msra.mxu1 %v7030_v51 }
 0x121   : > { %6660 = vmatprep.subr.bf16.mxu1 %v7031_v50 }
 0x124   : > { %6668 = vmatpush3.bf16.msra.mxu1 %v7031_v50 }
 0x125   : > { %6622 = vmatmul.mubr.bf16.vlgmr.msra.gmra.mrb[0].mxu0 %v8883_v30 }
 0x126   : > { %6625 = vmatprep.mubr.bf16.mxu0 %v8884_v43 }
 0x127   : > { %6398 = vmatmul.mubr.bf16.gmra.mrb[16].mxu1 %v7812_v2 }
 0x128   : > { %6401 = vmatprep.mubr.bf16.mxu1 %v7820_v33 }
 0x12d   : > { %6626 = vmatmul.mubr.bf16.gmra.mrb[4].mxu0 %v8885_v20 }
 0x12e   : > { %6629 = vmatprep.mubr.bf16.mxu0 %v8886_v7 }
 0x12f   : > { %6402 = vmatmul.mubr.bf16.gmra.mrb[20].mxu1 %v7826_v3 }
 0x130   : > { %6405 = vmatprep.mubr.bf16.mxu1 %v7830_v42 }
 0x135   : > { %6630 = vmatmul.mubr.bf16.gmra.mrb[8].mxu0 %v7708_v58  ;;  %v3222_v58 = vrot.slane %v8002_v22, 5 }
 0x136   : > { %6633 = vmatprep.mubr.bf16.mxu0 %v7728_v15  ;;  %v5843_v15 = vrot.slane %v7999_v19, 9 }
 0x137   : > { %6406 = vmatmul.mubr.bf16.gmra.mrb[24].mxu1 %v7834_v34  ;;  %v3547_v34 = vlaneseq }
 0x138   : > { %6409 = vmatprep.mubr.bf16.mxu1 %v7838_v28  ;;  %v5987_v28 = vld [vmem:[%s8158_s11] sm:$0xff]  }
 0x139   : > { %v5988_v53 = vunpack.c.l.bf16 %v5987_v28  ;;  %v3548_v62 = vshrl.u32 %v3547_v34, 7 }
 0x13b   : > { %v4879_v43 = vcombine.high %v5988_v53, %v5988_v53  ;;  %v8241_v16 = vsub.s32 0, %v3548_v62 }
 0x13d   : > { %6634 = vmatmul.mubr.bf16.gmra.mrb[12].mxu0 %v7737_v27  ;;  %v3224_v27 = vrot.slane %v3222_v58, 4 }
 0x13e   : > { %6637 = vmatprep.mubr.bf16.mxu0 %v7757_v38  ;;  %v3225_v38 = vrot.slane %v8074_v11, 5 }
 0x13f   : > { %6410 = vmatmul.mubr.bf16.gmra.mrb[28].mxu1 %v7993_v57 }
 0x140   : > { %6445 = vmatprep.mubr.bf16.mxu1 %v8894_v26 }
 0x145   : > { %6638 = vmatmul.mubr.bf16.gmra.mrb[16].mxu0 %v7762_v21  ;;  %v3223_v21 = vsel %vm7418_vm5, %v5843_v15, %v3222_v58 }
 0x146   : > { %6641 = vmatprep.mubr.bf16.mxu0 %v7796_v52  ;;  %v3226_v52 = vsel %vm7418_vm5, %v3224_v27, %v3225_v38 }
 0x147   : > { %6446 = vmatmul.mubr.bf16.vlgmr.msra.gmra.mrb[16].mxu1 %v8895_v40 }
 0x148   : > { %6449 = vmatprep.mubr.bf16.mxu1 %v8896_v4  ;;  %v8184_v4 = vld [vmem:[%s8158_s11 + $0x10] sm:$0xff]  }
 0x149   : > { %v5996_v29 = vunpack.c.l.bf16 %v8184_v4 }
 0x14b   : > { %v4947_v50 = vcombine.high %v5996_v29, %v5996_v29 }
 0x14d   : > { %6642 = vmatmul.mubr.bf16.gmra.mrb[20].mxu0 %v7801_v35  ;;  %v5844_v35 = vcombine.low %v3223_v21, %v3226_v52  ;;  %v8264_v52 = vld [vmem:[%s8789_s2] ss:$0 sm:$0xff] }
 0x14e   : > { %6645 = vmatprep.mubr.bf16.mxu0 %v7868_v36 }
 0x14f   : > { %6450 = vmatmul.mubr.bf16.gmra.mrb[20].mxu1 %v8897_v41 }
 0x150   : > { %6453 = vmatprep.mubr.bf16.mxu1 %v8898_v8 }
 0x155   : > { %6646 = vmatmul.mubr.bf16.gmra.mrb[24].mxu0 %v7873_v1 }
 0x156   : > { %6649 = vmatprep.mubr.bf16.mxu0 %v7895_v39  ;;  %v6002_v39 = vld [vmem:[%s8158_s11 + $0x8] sm:$0xff]  }
 0x157   : > { %6454 = vmatmul.mubr.bf16.gmra.mrb[24].mxu1 %v7706_v45  ;;  %v5992_v14 = vunpack.c.l.bf16 %v6002_v39  ;;  %v5993_v20 = vunpack.c.h.bf16 %v6002_v39 }
 0x158   : > { %6457 = vmatprep.mubr.bf16.mxu1 %v7739_v0  ;;  %v7058_v0 = vmov 1983009808  }
 0x159   : > { %v3545_v42 = vunpack.c.l.s4 %v7058_v0  ;;  %v4913_v40 = vcombine.high %v5992_v14, %v5992_v14  ;;  %v4930_v10 = vcombine.high %v5993_v20, %v5993_v20 }
 0x15b   : > { %v3546_v32 = vunpack.c.0.s8 %v3545_v42 }
 0x15d   : > { %6650 = vmatmul.mubr.bf16.gmra.mrb[28].mxu0 %v5844_v35  ;;  %v8174_v19 = vsub.s32 %v3546_v32, %v3548_v62 }
 0x15f   : > { %6458 = vmatmul.mubr.bf16.gmra.mrb[28].mxu1 %v7912_v46  ;;  %v5989_v46 = vunpack.c.h.bf16 %v5987_v28  ;;  %v8181_v26 = vrot.slane %v5988_v53, %v8174_v19  ;;  %v8187_v41 = vrot.slane %v4879_v43, %v8174_v19  ;;  %v8196_v37 = vrot.slane %v5992_v14, %v8174_v19 }
 0x160   : > { %v8204_v11 = vrot.slane %v4913_v40, %v8174_v19  ;;  %v8213_v18 = vrot.slane %v5993_v20, %v8174_v19  ;;  %v8226_v54 = vrot.slane %v4930_v10, %v8174_v19  ;;  %v8236_v24 = vrot.slane %v5996_v29, %v8174_v19 }
 0x161   : > { %v4896_v22 = vcombine.high %v5989_v46, %v5989_v46  ;;  %v8190_v61 = vrot.slane %v5989_v46, %v8174_v19  ;;  %v8201_v44 = vcombine.high %v8181_v26, %v8181_v26  ;;  %v8210_v6 = vcombine.high %v8187_v41, %v8187_v41 }
 0x162   : > { %8899 = vst [vmem:[#allocation5_spill] sm:$0xff] %v8213_v18  ;;  %8900 = vst [vmem:[#allocation3_spill] sm:$0xff] %v8226_v54  ;;  %v8233_v49 = vcombine.high %v8196_v37, %v8196_v37  ;;  %v8246_v48 = vcombine.high %v8204_v11, %v8204_v11  ;;  %v8252_v51 = vcombine.high %v8213_v18, %v8213_v18 }
 0x163   : > { %v8193_v47 = vrot.slane %v4896_v22, %v8174_v19  ;;  %v8219_v8 = vcombine.high %v8190_v61, %v8190_v61  ;;  %8901 = vst [vmem:[#allocation8_spill] sm:$0xff] %v8236_v24  ;;  %v8259_v38 = vcombine.high %v8226_v54, %v8226_v54  ;;  %v8270_v42 = vcombine.high %v8236_v24, %v8236_v24 }
 0x164   : > { %8902 = vst [vmem:[#allocation7_spill] sm:$0xff] %v8252_v51  ;;  %v8273_v34 = vrot.slane %v4947_v50, %v8174_v19 }
 0x165   : > { %v8223_v12 = vcombine.high %v8193_v47, %v8193_v47  ;;  %8903 = vst [vmem:[#allocation11_spill] sm:$0xff] %v8259_v38  ;;  %8904 = vst [vmem:[#allocation2_spill] sm:$0xff] %v8270_v42 }
 0x166   : > { %8905 = vst [vmem:[#allocation14_spill] sm:$0xff] %v8273_v34  ;;  %v8284_v20 = vcombine.high %v8273_v34, %v8273_v34 }
 0x168   : > { %8906 = vst [vmem:[#allocation16_spill] sm:$0xff] %v8284_v20 }
 0x1da   : > { %v8146_v9 = vpop.f32.mrb[0].mxu1 }
 0x1db   : > { %v8148_v2 = vpop.f32.mrb[1].mxu1 }
 0x1dc   : > { %v8150_v33 = vpop.f32.mrb[2].mxu1 }
 0x1dd   : > { %v8152_v3 = vpop.f32.mrb[3].mxu1 }
 0x1e2   : > { %v8160_v60 = vpop.f32.mrb[4].mxu1 }
 0x1e3   : > { %v8162_v45 = vpop.f32.mrb[5].mxu1 }
 0x1e4   : > { %v8165_v36 = vpop.f32.mrb[6].mxu1 }
 0x1e5   : > { %v8167_v1 = vpop.f32.mrb[7].mxu1 }
 0x1ea   : > { %v8170_v30 = vpop.f32.mrb[8].mxu1 }
 0x1eb   : > { %v8172_v57 = vpop.f32.mrb[9].mxu1 }
 0x1ec   : > { %v8176_v7 = vpop.f32.mrb[10].mxu1 }
 0x1ed   : > { %v8178_v25 = vpop.f32.mrb[11].mxu1 }
 0x1f2   : > { %v8206_v5 = vpop.f32.mrb[12].mxu1 }
 0x1f3   : > { %v8215_v56 = vpop.f32.mrb[13].mxu1 }
 0x1f4   : > { %v8228_v59 = vpop.f32.mrb[14].mxu1 }
 0x1f5   : > { %v8238_v17 = vpop.f32.mrb[15].mxu1 }
 0x1f8   : > { %v6623_v21 = vpop.f32.mrb[0].mxu0 }
 0x1f9   : > { %v6669_v28 = vadd.f32 %v6623_v21, %v8146_v9  ;;  %v3313_v53 = vpop.f32.mrb[1].mxu0 }
 0x1fa   : > { %v6670_v46 = vadd.f32 %v3313_v53, %v8148_v2  ;;  %v6624_v14 = vpop.f32.mrb[2].mxu0 }
 0x1fb   : > { %v3481_v9 = vadd.f32 %v6669_v28, %v8264_v52  ;;  %v6671_v40 = vadd.f32 %v6624_v14, %v8150_v33  ;;  %v3316_v10 = vpop.f32.mrb[3].mxu0 }
 0x1fc   : > { %v3479_v2 = vadd.f32 %v6670_v46, %v8264_v52  ;;  %v6672_v21 = vadd.f32 %v3316_v10, %v8152_v3  ;;  %v8300_v46 = vunpack.c.h.bf16 %v8184_v4 }
 0x1fd   : > { %v3577_v43 = vcombine.high %v3481_v9, %v3481_v9  ;;  %v3584_v62 = vrot.slane %v3481_v9, %v8174_v19  ;;  %v3482_v28 = vadd.f32 %v6671_v40, %v8264_v52 }
 0x1fe   : > { %v3543_v14 = vcombine.high %v3479_v2, %v3479_v2  ;;  %v3550_v29 = vrot.slane %v3479_v2, %v8174_v19  ;;  %v3480_v50 = vadd.f32 %v6672_v21, %v8264_v52  ;;  %8907 = vst [vmem:[#allocation18_spill] sm:$0xff] %v8300_v46 }
 0x1ff   : > { %v3591_v3 = vrot.slane %v3577_v43, %v8174_v19  ;;  %v3592_v10 = vcombine.high %v3584_v62, %v3584_v62  ;;  %v5862_v53 = vrot.slane %v3584_v62, 9  ;;  %v3594_v22 = vcombine.high %v3482_v28, %v3482_v28 }
 0x200   : > { %v3557_v32 = vrot.slane %v3543_v14, %v8174_v19  ;;  %v3558_v9 = vcombine.high %v3550_v29, %v3550_v29  ;;  %v5854_v39 = vrot.slane %v3550_v29, 9  ;;  %v3601_v40 = vrot.slane %v3482_v28, %v8174_v19  ;;  %v6627_v33 = vpop.f32.mrb[4].mxu0 }
 0x201   : > { %v3593_v0 = vcombine.high %v3591_v3, %v3591_v3  ;;  %v5863_v35 = vrot.slane %v3592_v10, 9  ;;  %v5864_v2 = vrot.slane %v3591_v3, 9  ;;  %v4607_v27 = vadd.f32 %v5862_v53, %v3584_v62  ;;  %v3329_v21 = vpop.f32.mrb[5].mxu0 }
 0x202   : > { %v3559_v15 = vcombine.high %v3557_v32, %v3557_v32  ;;  %v5855_v4 = vrot.slane %v3558_v9, 9  ;;  %v5856_v58 = vrot.slane %v3557_v32, 9  ;;  %v4599_v55 = vadd.f32 %v5854_v39, %v3550_v29  ;;  %v6628_v43 = vpop.f32.mrb[6].mxu0 }
 0x203   : > { %v5865_v13 = vrot.slane %v3593_v0, 9  ;;  %v4608_v31 = vadd.f32 %v5863_v35, %v3592_v10  ;;  %v4609_v63 = vadd.f32 %v5864_v2, %v3591_v3  ;;  %v3608_v14 = vrot.slane %v3594_v22, %v8174_v19  ;;  %v8306_v23 = vpop.f32.mrb[7].mxu0 }
 0x204   : > { %v5857_v28 = vrot.slane %v3559_v15, 9  ;;  %v4600_v20 = vadd.f32 %v5855_v4, %v3558_v9  ;;  %v4601_v34 = vadd.f32 %v5856_v58, %v3557_v32  ;;  %v4727_v46 = vadd.f32 %v4607_v27, %v4599_v55 }
 0x205   : > { %v4610_v62 = vadd.f32 %v5865_v13, %v3593_v0  ;;  %v3609_v53 = vcombine.high %v3601_v40, %v3601_v40  ;;  %v3610_v42 = vcombine.high %v3608_v14, %v3608_v14  ;;  %v5866_v24 = vrot.slane %v3601_v40, 9 }
 0x206   : > { %v4602_v39 = vadd.f32 %v5857_v28, %v3559_v15  ;;  %v4728_v29 = vadd.f32 %v4608_v31, %v4600_v20  ;;  %v4729_v38 = vadd.f32 %v4609_v63, %v4601_v34  ;;  %v4791_v35 = vmul.f32 0.25, %v4727_v46 }
 0x207   : > { %v5867_v3 = vrot.slane %v3609_v53, 9  ;;  %v5868_v10 = vrot.slane %v3608_v14, 9  ;;  %v5869_v2 = vrot.slane %v3610_v42, 9  ;;  %v4611_v22 = vadd.f32 %v5866_v24, %v3601_v40 }
 0x208   : > { %v4730_v54 = vadd.f32 %v4610_v62, %v4602_v39  ;;  %v4792_v51 = vmul.f32 0.25, %v4728_v29  ;;  %v4793_v18 = vmul.f32 0.25, %v4729_v38  ;;  %v5111_v58 = vadd.f32 %v8181_v26, %v4791_v35  ;;  %v8309_v55 = vpop.f32.mrb[8].mxu0 }
 0x209   : > { %v4612_v13 = vadd.f32 %v5867_v3, %v3609_v53  ;;  %v4613_v27 = vadd.f32 %v5868_v10, %v3608_v14  ;;  %v4614_v0 = vadd.f32 %v5869_v2, %v3610_v42  ;;  %v3560_v32 = vcombine.high %v3480_v50, %v3480_v50  ;;  %v8311_v9 = vpop.f32.mrb[9].mxu0 }
 0x20a   : > { %v4794_v31 = vmul.f32 0.25, %v4730_v54  ;;  %v8908_v63 = vrot.slane %v8181_v26, 1  ;;  %v5113_v34 = vadd.f32 %v8201_v44, %v4793_v18  ;;  %v5242_v24 = vrot.slane %v5111_v58, %v8241_v16  ;;  %v8317_v20 = vpop.f32.mrb[10].mxu0 }
 0x20b   : > { %v3567_v38 = vrot.slane %v3480_v50, %v8174_v19  ;;  %v3574_v46 = vrot.slane %v3560_v32, %v8174_v19  ;;  %v6673_v40 = vadd.f32 %v6627_v33, %v8160_v60  ;;  %v6674_v42 = vadd.f32 %v3329_v21, %v8162_v45  ;;  %v8323_v4 = vpop.f32.mrb[11].mxu0 }
 0x20c   : > { %v5112_v15 = vadd.f32 %v8908_v63, %v4792_v51  ;;  %v8909_v54 = vrot.slane %v8201_v44, 1  ;;  %v5250_v18 = vrot.slane %v5113_v34, %v8241_v16  ;;  %v8330_v14 = vadd.f32 %v6628_v43, %v8165_v36 }
 0x20d   : > { %v3575_v28 = vcombine.high %v3567_v38, %v3567_v38  ;;  %v3576_v50 = vcombine.high %v3574_v46, %v3574_v46  ;;  %v5858_v62 = vrot.slane %v3567_v38, 9  ;;  %v5860_v53 = vrot.slane %v3574_v46, 9 }
 0x20e   : > { %v5114_v26 = vadd.f32 %v8909_v54, %v4794_v31  ;;  %v5246_v51 = vrot.slane %v5112_v15, %v8241_v16  ;;  %v3485_v33 = vadd.f32 %v6673_v40, %v8264_v52  ;;  %v3483_v44 = vadd.f32 %v6674_v42, %v8264_v52 }
 0x20f   : > { %v5859_v39 = vrot.slane %v3575_v28, 9  ;;  %v5861_v29 = vrot.slane %v3576_v50, 9  ;;  %v4603_v35 = vadd.f32 %v5858_v62, %v3567_v38  ;;  %v4605_v36 = vadd.f32 %v5860_v53, %v3574_v46 }
 0x210   : > { %v5254_v60 = vrot.slane %v5114_v26, %v8241_v16  ;;  %v5496_v45 = vsel %vm5495_vm6, %v5246_v51, %v5242_v24  ;;  %v3645_v3 = vcombine.high %v3485_v33, %v3485_v33  ;;  %v3652_v10 = vrot.slane %v3485_v33, %v8174_v19  ;;  %v8339_v2 = vpop.f32.mrb[12].mxu0 }
 0x211   : > { %v5498_v21 = vsel %vm5497_vm7, %v5250_v18, %v5496_v45  ;;  %v4604_v58 = vadd.f32 %v5859_v39, %v3575_v28  ;;  %v4606_v32 = vadd.f32 %v5861_v29, %v3576_v50  ;;  %v4731_v31 = vadd.f32 %v4611_v22, %v4603_v35  ;;  %v8341_v15 = vpop.f32.mrb[13].mxu0 }
 0x212   : > { %v5500_v43 = vsel %vm5499_vm8, %v5254_v60, %v5498_v21  ;;  %v3611_v63 = vcombine.high %v3483_v44, %v3483_v44  ;;  %v4733_v34 = vadd.f32 %v4613_v27, %v4605_v36  ;;  %v3659_v24 = vrot.slane %v3645_v3, %v8174_v19  ;;  %v8344_v40 = vpop.f32.mrb[14].mxu0 }
 0x213   : > { %v3660_v38 = vcombine.high %v3652_v10, %v3652_v10  ;;  %v5878_v46 = vrot.slane %v3652_v10, 9  ;;  %v4732_v42 = vadd.f32 %v4612_v13, %v4604_v58  ;;  %v4734_v54 = vadd.f32 %v4614_v0, %v4606_v32  ;;  %v8347_v18 = vpop.f32.mrb[15].mxu0 }
 0x214   : > { %v4795_v26 = vmul.f32 0.25, %v4731_v31  ;;  %v3618_v51 = vrot.slane %v3483_v44, %v8174_v19  ;;  %v4797_v22 = vmul.f32 0.25, %v4733_v34  ;;  %v3661_v28 = vcombine.high %v3659_v24, %v3659_v24 }
 0x215   : > { %v5879_v50 = vrot.slane %v3660_v38, 9  ;;  %v5880_v62 = vrot.slane %v3659_v24, 9  ;;  %v4796_v27 = vmul.f32 0.25, %v4732_v42  ;;  %v4798_v53 = vmul.f32 0.25, %v4734_v54 }
 0x216   : > { %v5115_v60 = vadd.f32 %v8187_v41, %v4795_v26  ;;  %v4623_v45 = vadd.f32 %v5878_v46, %v3652_v10  ;;  %v5117_v33 = vadd.f32 %v8210_v6, %v4797_v22  ;;  %v5881_v21 = vrot.slane %v3661_v28, 9 }
 0x217   : > { %v4624_v13 = vadd.f32 %v5879_v50, %v3660_v38  ;;  %v4625_v0 = vadd.f32 %v5880_v62, %v3659_v24  ;;  %v8910_v39 = vrot.slane %v8187_v41, 1  ;;  %v8911_v29 = vrot.slane %v8210_v6, 1 }
 0x218   : > { %v5258_v36 = vrot.slane %v5115_v60, %v8241_v16  ;;  %v3625_v3 = vrot.slane %v3611_v63, %v8174_v19  ;;  %v5266_v58 = vrot.slane %v5117_v33, %v8241_v16  ;;  %v4626_v32 = vadd.f32 %v5881_v21, %v3661_v28  ;;  %v8359_v34 = vpop.f32.mrb[16].mxu0 }
 0x219   : > { %v5116_v44 = vadd.f32 %v8910_v39, %v4796_v27  ;;  %v5118_v35 = vadd.f32 %v8911_v29, %v4798_v53  ;;  %v3626_v10 = vcombine.high %v3618_v51, %v3618_v51  ;;  %v5870_v31 = vrot.slane %v3618_v51, 9  ;;  %v8364_v46 = vpop.f32.mrb[17].mxu0 }
 0x21a   : > { %v5502_v38 = vsel %vm5501_vm9, %v5258_v36, %v5500_v43  ;;  %v3627_v6 = vcombine.high %v3625_v3, %v3625_v3  ;;  %v5872_v54 = vrot.slane %v3625_v3, 9  ;;  %v3486_v26 = vadd.f32 %v8330_v14, %v8264_v52  ;;  %v8368_v22 = vpop.f32.mrb[16].mxu1  ;;  %v8370_v28 = vpop.f32.mrb[18].mxu0 }
 0x21b   : > { %v5262_v24 = vrot.slane %v5116_v44, %v8241_v16  ;;  %v5270_v41 = vrot.slane %v5118_v35, %v8241_v16  ;;  %v5871_v42 = vrot.slane %v3626_v10, 9  ;;  %v4615_v63 = vadd.f32 %v5870_v31, %v3618_v51  ;;  %v8382_v14 = vpop.f32.mrb[17].mxu1  ;;  %v8384_v27 = vpop.f32.mrb[19].mxu0 }
 0x21c   : > { %v5873_v50 = vrot.slane %v3627_v6, 9  ;;  %v6676_v62 = vadd.f32 %v8306_v23, %v8167_v1  ;;  %v6677_v51 = vadd.f32 %v8309_v55, %v8170_v30  ;;  %v4617_v33 = vadd.f32 %v5872_v54, %v3625_v3  ;;  %v8387_v39 = vpop.f32.mrb[18].mxu1 }
 0x21d   : > { %v5504_v43 = vsel %vm5503_vm10, %v5262_v24, %v5502_v38  ;;  %v4616_v60 = vadd.f32 %v5871_v42, %v3626_v10  ;;  %v4735_v21 = vadd.f32 %v4623_v45, %v4615_v63  ;;  %v3662_v35 = vcombine.high %v3486_v26, %v3486_v26  ;;  %v8391_v23 = vpop.f32.mrb[19].mxu1 }
 0x21e   : > { %v5506_v53 = vsel %vm5505_vm11, %v5266_v58, %v5504_v43  ;;  %v4618_v29 = vadd.f32 %v5873_v50, %v3627_v6  ;;  %v3669_v1 = vrot.slane %v3486_v26, %v8174_v19  ;;  %v4737_v55 = vadd.f32 %v4625_v0, %v4617_v33 }
 0x21f   : > { %v5508_v44 = vsel %vm5507_vm12, %v5270_v41, %v5506_v53  ;;  %v4736_v30 = vadd.f32 %v4624_v13, %v4616_v60  ;;  %v4799_v36 = vmul.f32 0.25, %v4735_v21  ;;  %v3484_v31 = vadd.f32 %v6676_v62, %v8264_v52 }
 0x220   : > { %5566 = vst [vmem:[%s8375_s21] sm:$0xff] %v5508_v44  ;;  %v4738_v58 = vadd.f32 %v4626_v32, %v4618_v29  ;;  %v3676_v3 = vrot.slane %v3662_v35, %v8174_v19  ;;  %v3677_v45 = vcombine.high %v3669_v1, %v3669_v1  ;;  %v5882_v10 = vrot.slane %v3669_v1, 9  ;;  %v8397_v42 = vpop.f32.mrb[20].mxu0 }
 0x221   : > { %v4800_v24 = vmul.f32 0.25, %v4736_v30  ;;  %v4801_v38 = vmul.f32 0.25, %v4737_v55  ;;  %v5119_v41 = vadd.f32 %v8190_v61, %v4799_v36  ;;  %v3628_v6 = vcombine.high %v3484_v31, %v3484_v31  ;;  %v8399_v0 = vpop.f32.mrb[21].mxu0 }
 0x222   : > { %v4802_v54 = vmul.f32 0.25, %v4738_v58  ;;  %v3678_v63 = vcombine.high %v3676_v3, %v3676_v3  ;;  %v5883_v26 = vrot.slane %v3677_v45, 9  ;;  %v5884_v13 = vrot.slane %v3676_v3, 9  ;;  %v8405_v60 = vpop.f32.mrb[20].mxu1  ;;  %v8407_v33 = vpop.f32.mrb[22].mxu0 }
 0x223   : > { %v8912_v43 = vrot.slane %v8190_v61, 1  ;;  %v5121_v50 = vadd.f32 %v8219_v8, %v4801_v38  ;;  %v5274_v62 = vrot.slane %v5119_v41, %v8241_v16  ;;  %v4627_v53 = vadd.f32 %v5882_v10, %v3669_v1  ;;  %8913 = vst [vmem:[#allocation20_spill] sm:$0xff] %v8407_v33  ;;  %v8411_v55 = vpop.f32.mrb[21].mxu1  ;;  %v8413_v36 = vpop.f32.mrb[23].mxu0 }
 0x224   : > { %v8914_v21 = vrot.slane %v8219_v8, 1  ;;  %v5885_v29 = vrot.slane %v3678_v63, 9  ;;  %v4628_v35 = vadd.f32 %v5883_v26, %v3677_v45  ;;  %v4629_v30 = vadd.f32 %v5884_v13, %v3676_v3  ;;  %8915 = vst [vmem:[#allocation22_spill] sm:$0xff] %v8413_v36 }
 0x225   : > { %v5120_v32 = vadd.f32 %v8912_v43, %v4800_v24  ;;  %v5282_v58 = vrot.slane %v5121_v50, %v8241_v16  ;;  %v3635_v1 = vrot.slane %v3484_v31, %v8174_v19  ;;  %v3642_v10 = vrot.slane %v3628_v6, %v8174_v19  ;;  %v8419_v24 = vpop.f32.mrb[22].mxu1 }
 0x226   : > { %v5122_v44 = vadd.f32 %v8914_v21, %v4802_v54  ;;  %8916 = vst [vmem:[#allocation24_spill] sm:$0xff] %v8419_v24  ;;  %v4630_v38 = vadd.f32 %v5885_v29, %v3678_v63  ;;  %v3489_v45 = vadd.f32 %v6677_v51, %v8264_v52  ;;  %v6678_v3 = vadd.f32 %v8311_v9, %v8172_v57  ;;  %v8425_v41 = vpop.f32.mrb[23].mxu1 }
 0x227   : > { %v5278_v61 = vrot.slane %v5120_v32, %v8241_v16  ;;  %8917 = vst [vmem:[#allocation4_spill] sm:$0xff] %v8425_v41  ;;  %v3643_v26 = vcombine.high %v3635_v1, %v3635_v1  ;;  %v3644_v13 = vcombine.high %v3642_v10, %v3642_v10  ;;  %v5874_v43 = vrot.slane %v3635_v1, 9 }
 0x228   : > { %v5286_v8 = vrot.slane %v5122_v44, %v8241_v16  ;;  %v5876_v6 = vrot.slane %v3642_v10, 9  ;;  %v3713_v32 = vcombine.high %v3489_v45, %v3489_v45  ;;  %v3720_v50 = vrot.slane %v3489_v45, %v8174_v19  ;;  %v8431_v29 = vpop.f32.mrb[24].mxu0 }
 0x229   : > { %v5509_v54 = vsel %vm5495_vm6, %v5278_v61, %v5274_v62  ;;  %v5875_v21 = vrot.slane %v3643_v26, 9  ;;  %v5877_v63 = vrot.slane %v3644_v13, 9  ;;  %v4619_v44 = vadd.f32 %v5874_v43, %v3635_v1  ;;  %8918 = vst [vmem:[#allocation6_spill] sm:$0xff] %v8431_v29  ;;  %v8434_v36 = vpop.f32.mrb[25].mxu0 }
 0x22a   : > { %v5510_v31 = vsel %vm5497_vm7, %v5282_v58, %v5509_v54  ;;  %v4621_v57 = vadd.f32 %v5876_v6, %v3642_v10  ;;  %v3727_v9 = vrot.slane %v3713_v32, %v8174_v19  ;;  %v3728_v62 = vcombine.high %v3720_v50, %v3720_v50  ;;  %8919 = vst [vmem:[#allocation9_spill] sm:$0xff] %v8434_v36  ;;  %v8437_v45 = vpop.f32.mrb[24].mxu1  ;;  %v8439_v24 = vpop.f32.mrb[26].mxu0 }
 0x22b   : > { %v5511_v51 = vsel %vm5499_vm8, %v5286_v8, %v5510_v31  ;;  %v5894_v61 = vrot.slane %v3720_v50, 9  ;;  %v4620_v41 = vadd.f32 %v5875_v21, %v3643_v26  ;;  %v4622_v58 = vadd.f32 %v5877_v63, %v3644_v13  ;;  %8920 = vst [vmem:[#allocation10_spill] sm:$0xff] %v8437_v45  ;;  %8921 = vst [vmem:[#allocation12_spill] sm:$0xff] %v8439_v24  ;;  %v8441_v10 = vpop.f32.mrb[25].mxu1  ;;  %v8443_v6 = vpop.f32.mrb[27].mxu0 }
 0x22c   : > { %v4739_v54 = vadd.f32 %v4627_v53, %v4619_v44  ;;  %v3487_v33 = vadd.f32 %v6678_v3, %v8264_v52  ;;  %v4741_v1 = vadd.f32 %v4629_v30, %v4621_v57  ;;  %v3729_v8 = vcombine.high %v3727_v9, %v3727_v9  ;;  %8922 = vst [vmem:[#allocation13_spill] sm:$0xff] %v8441_v10  ;;  %v8445_v13 = vpop.f32.mrb[26].mxu1 }
 0x22d   : > { %v5895_v43 = vrot.slane %v3728_v62, 9  ;;  %v5896_v31 = vrot.slane %v3727_v9, 9  ;;  %8923 = vst [vmem:[#allocation15_spill] sm:$0xff] %v8443_v6  ;;  %v4740_v32 = vadd.f32 %v4628_v35, %v4620_v41  ;;  %v4742_v29 = vadd.f32 %v4630_v38, %v4622_v58  ;;  %v8447_v44 = vpop.f32.mrb[27].mxu1 }
 0x22e   : > { %v4803_v36 = vmul.f32 0.25, %v4739_v54  ;;  %v4639_v26 = vadd.f32 %v5894_v61, %v3720_v50  ;;  %v4805_v53 = vmul.f32 0.25, %v4741_v1  ;;  %v5897_v3 = vrot.slane %v3729_v8, 9 }
 0x22f   : > { %v4640_v21 = vadd.f32 %v5895_v43, %v3728_v62  ;;  %v4641_v63 = vadd.f32 %v5896_v31, %v3727_v9  ;;  %v4804_v30 = vmul.f32 0.25, %v4740_v32  ;;  %v4806_v57 = vmul.f32 0.25, %v4742_v29 }
 0x230   : > { %v5123_v24 = vadd.f32 %v8193_v47, %v4803_v36  ;;  %v3679_v45 = vcombine.high %v3487_v33, %v3487_v33  ;;  %v5125_v10 = vadd.f32 %v8223_v12, %v4805_v53  ;;  %v4642_v6 = vadd.f32 %v5897_v3, %v3729_v8  ;;  %v8460_v36 = vpop.f32.mrb[28].mxu0 }
 0x231   : > { %v3686_v35 = vrot.slane %v3487_v33, %v8174_v19  ;;  %v6679_v38 = vadd.f32 %v8317_v20, %v8176_v7  ;;  %v8924_v41 = vrot.slane %v8193_v47, 1  ;;  %v8925_v9 = vrot.slane %v8223_v12, 1  ;;  %v8464_v8 = vpop.f32.mrb[29].mxu0 }
 0x232   : > { %v5290_v61 = vrot.slane %v5123_v24, %v8241_v16  ;;  %v3693_v29 = vrot.slane %v3679_v45, %v8174_v19  ;;  %v5298_v58 = vrot.slane %v5125_v10, %v8241_v16  ;;  %8926 = vst [vmem:[#allocation17_spill] sm:$0xff] %v8464_v8  ;;  %v8469_v24 = vpop.f32.mrb[28].mxu1  ;;  %v8471_v45 = vpop.f32.mrb[30].mxu0 }
 0x233   : > { %v5124_v50 = vadd.f32 %v8924_v41, %v4804_v30  ;;  %v5126_v62 = vadd.f32 %v8925_v9, %v4806_v57  ;;  %v3694_v54 = vcombine.high %v3686_v35, %v3686_v35  ;;  %v5886_v1 = vrot.slane %v3686_v35, 9  ;;  %8927 = vst [vmem:[#allocation19_spill] sm:$0xff] %v8471_v45  ;;  %v8473_v53 = vpop.f32.mrb[29].mxu1  ;;  %v8481_v41 = vpop.f32.mrb[31].mxu0 }
 0x234   : > { %v3490_v33 = vadd.f32 %v6679_v38, %v8264_v52  ;;  %v5512_v12 = vsel %vm5501_vm9, %v5290_v61, %v5511_v51  ;;  %v3695_v20 = vcombine.high %v3693_v29, %v3693_v29  ;;  %v5888_v31 = vrot.slane %v3693_v29, 9  ;;  %8928 = vst [vmem:[#allocation21_spill] sm:$0xff] %v8473_v53  ;;  %v8479_v38 = vpop.f32.mrb[30].mxu1  ;;  %8930 = vst [vmem:[#allocation25_spill] sm:$0xff] %v8481_v41 }
 0x235   : > { %v5294_v7 = vrot.slane %v5124_v50, %v8241_v16  ;;  %v5302_v47 = vrot.slane %v5126_v62, %v8241_v16  ;;  %v5887_v43 = vrot.slane %v3694_v54, 9  ;;  %v4631_v10 = vadd.f32 %v5886_v1, %v3686_v35  ;;  %8929 = vst [vmem:[#allocation23_spill] sm:$0xff] %v8479_v38  ;;  %v8484_v61 = vpop.f32.mrb[31].mxu1 }
 0x236   : > { %v3730_v32 = vcombine.high %v3490_v33, %v3490_v33  ;;  %v5889_v30 = vrot.slane %v3695_v20, 9  ;;  %v3737_v57 = vrot.slane %v3490_v33, %v8174_v19  ;;  %v6680_v51 = vadd.f32 %v8323_v4, %v8178_v25 }
 0x237   : > { %v5513_v3 = vsel %vm5503_vm10, %v5294_v7, %v5512_v12  ;;  %v4632_v9 = vadd.f32 %v5887_v43, %v3694_v54  ;;  %v4633_v35 = vadd.f32 %v5888_v31, %v3693_v29  ;;  %v4743_v62 = vadd.f32 %v4639_v26, %v4631_v10 }
 0x238   : > { %v5514_v50 = vsel %vm5505_vm11, %v5298_v58, %v5513_v3  ;;  %v4634_v7 = vadd.f32 %v5889_v30, %v3695_v20  ;;  %v3744_v12 = vrot.slane %v3730_v32, %v8174_v19  ;;  %v3745_v33 = vcombine.high %v3737_v57, %v3737_v57 }
 0x239   : > { %v5515_v1 = vsel %vm5507_vm12, %v5302_v47, %v5514_v50  ;;  %v4744_v45 = vadd.f32 %v4640_v21, %v4632_v9  ;;  %v4745_v25 = vadd.f32 %v4641_v63, %v4633_v35  ;;  %v4807_v4 = vmul.f32 0.25, %v4743_v62 }
 0x23a   : > { %5567 = vst [vmem:[%s8375_s21 + $0x8] sm:$0xff] %v5515_v1  ;;  %v5898_v38 = vrot.slane %v3737_v57, 9  ;;  %v4746_v8 = vadd.f32 %v4642_v6, %v4634_v7  ;;  %v3746_v41 = vcombine.high %v3744_v12, %v3744_v12  ;;  %v5899_v53 = vrot.slane %v3745_v33, 9 }
 0x23b   : > { %v5900_v58 = vrot.slane %v3744_v12, 9  ;;  %v4808_v54 = vmul.f32 0.25, %v4744_v45  ;;  %v4809_v29 = vmul.f32 0.25, %v4745_v25  ;;  %v5127_v26 = vadd.f32 %v8196_v37, %v4807_v4 }
 0x23c   : > { %v4643_v43 = vadd.f32 %v5898_v38, %v3737_v57  ;;  %v4810_v31 = vmul.f32 0.25, %v4746_v8  ;;  %v5901_v47 = vrot.slane %v3746_v41, 9  ;;  %v4644_v20 = vadd.f32 %v5899_v53, %v3745_v33 }
 0x23d   : > { %v4645_v10 = vadd.f32 %v5900_v58, %v3744_v12  ;;  %v8931_v32 = vrot.slane %v8196_v37, 1  ;;  %v5129_v21 = vadd.f32 %v8233_v49, %v4809_v29  ;;  %v5306_v63 = vrot.slane %v5127_v26, %v8241_v16 }
 0x23e   : > { %v3488_v6 = vadd.f32 %v6680_v51, %v8264_v52  ;;  %v8932_v30 = vrot.slane %v8233_v49, 1  ;;  %v4646_v50 = vadd.f32 %v5901_v47, %v3746_v41  ;;  %v6681_v57 = vadd.f32 %v8339_v2, %v8206_v5 }
 0x23f   : > { %v5128_v3 = vadd.f32 %v8931_v32, %v4808_v54  ;;  %v6682_v8 = vadd.f32 %v8341_v15, %v8215_v56  ;;  %v5314_v37 = vrot.slane %v5129_v21, %v8241_v16  ;;  %v6683_v41 = vadd.f32 %v8344_v40, %v8228_v59 }
 0x240   : > { %v5130_v45 = vadd.f32 %v8932_v30, %v4810_v31  ;;  %v3696_v38 = vcombine.high %v3488_v6, %v3488_v6  ;;  %v3703_v9 = vrot.slane %v3488_v6, %v8174_v19  ;;  %v3493_v51 = vadd.f32 %v6681_v57, %v8264_v52 }
 0x241   : > { %v5310_v53 = vrot.slane %v5128_v3, %v8241_v16  ;;  %v3491_v49 = vadd.f32 %v6682_v8, %v8264_v52 }
 0x242   : > { %v5318_v35 = vrot.slane %v5130_v45, %v8241_v16  ;;  %v3710_v56 = vrot.slane %v3696_v38, %v8174_v19  ;;  %v3711_v2 = vcombine.high %v3703_v9, %v3703_v9  ;;  %v5890_v15 = vrot.slane %v3703_v9, 9 }
 0x243   : > { %v5516_v5 = vsel %vm5495_vm6, %v5310_v53, %v5306_v63  ;;  %v3781_v1 = vcombine.high %v3493_v51, %v3493_v51  ;;  %v3788_v7 = vrot.slane %v3493_v51, %v8174_v19  ;;  %v3747_v12 = vcombine.high %v3491_v49, %v3491_v49 }
 0x244   : > { %v5517_v62 = vsel %vm5497_vm7, %v5314_v37, %v5516_v5  ;;  %v3712_v33 = vcombine.high %v3710_v56, %v3710_v56  ;;  %v5891_v25 = vrot.slane %v3711_v2, 9  ;;  %v5892_v4 = vrot.slane %v3710_v56, 9 }
 0x245   : > { %v4635_v58 = vadd.f32 %v5890_v15, %v3703_v9  ;;  %v5518_v54 = vsel %vm5499_vm8, %v5318_v35, %v5517_v62  ;;  %v3795_v59 = vrot.slane %v3781_v1, %v8174_v19  ;;  %v3796_v40 = vcombine.high %v3788_v7, %v3788_v7 }
 0x246   : > { %v5910_v29 = vrot.slane %v3788_v7, 9  ;;  %v5893_v26 = vrot.slane %v3712_v33, 9  ;;  %v4636_v31 = vadd.f32 %v5891_v25, %v3711_v2  ;;  %v4637_v47 = vadd.f32 %v5892_v4, %v3710_v56 }
 0x247   : > { %v4747_v32 = vadd.f32 %v4643_v43, %v4635_v58  ;;  %v3797_v3 = vcombine.high %v3795_v59, %v3795_v59  ;;  %v5911_v21 = vrot.slane %v3796_v40, 9  ;;  %v5912_v63 = vrot.slane %v3795_v59, 9 }
 0x248   : > { %v4655_v6 = vadd.f32 %v5910_v29, %v3788_v7  ;;  %v4638_v30 = vadd.f32 %v5893_v26, %v3712_v33  ;;  %v4748_v45 = vadd.f32 %v4644_v20, %v4636_v31  ;;  %v4749_v57 = vadd.f32 %v4645_v10, %v4637_v47 }
 0x249   : > { %v4811_v8 = vmul.f32 0.25, %v4747_v32  ;;  %v5913_v53 = vrot.slane %v3797_v3, 9  ;;  %v4656_v37 = vadd.f32 %v5911_v21, %v3796_v40  ;;  %v4657_v38 = vadd.f32 %v5912_v63, %v3795_v59 }
 0x24a   : > { %v3754_v9 = vrot.slane %v3491_v49, %v8174_v19  ;;  %v4750_v35 = vadd.f32 %v4646_v50, %v4638_v30  ;;  %v4812_v51 = vmul.f32 0.25, %v4748_v45  ;;  %v4813_v5 = vmul.f32 0.25, %v4749_v57 }
 0x24b   : > { %v5131_v2 = vadd.f32 %v8204_v11, %v4811_v8  ;;  %v4658_v56 = vadd.f32 %v5913_v53, %v3797_v3  ;;  %v3761_v43 = vrot.slane %v3747_v12, %v8174_v19  ;;  %v8933_v20 = vrot.slane %v8204_v11, 1 }
 0x24c   : > { %v3762_v15 = vcombine.high %v3754_v9, %v3754_v9  ;;  %v5902_v62 = vrot.slane %v3754_v9, 9  ;;  %v4814_v1 = vmul.f32 0.25, %v4750_v35  ;;  %v5133_v7 = vadd.f32 %v8246_v48, %v4813_v5  ;;  %v8935_v5 = vld [vmem:[#allocation5_spill] sm:$0xff] }
 0x24d   : > { %v5132_v10 = vadd.f32 %v8933_v20, %v4812_v51  ;;  %v5322_v33 = vrot.slane %v5131_v2, %v8241_v16  ;;  %v3763_v25 = vcombine.high %v3761_v43, %v3761_v43  ;;  %v5904_v50 = vrot.slane %v3761_v43, 9 }
 0x24e   : > { %v5903_v49 = vrot.slane %v3762_v15, 9  ;;  %v4647_v4 = vadd.f32 %v5902_v62, %v3754_v9  ;;  %v8934_v58 = vrot.slane %v8246_v48, 1  ;;  %v5330_v12 = vrot.slane %v5133_v7, %v8241_v16  ;;  %v8937_v62 = vld [vmem:[#allocation7_spill] sm:$0xff] }
 0x24f   : > { %v5326_v40 = vrot.slane %v5132_v10, %v8241_v16  ;;  %v5519_v29 = vsel %vm5501_vm9, %v5322_v33, %v5518_v54  ;;  %v5905_v26 = vrot.slane %v3763_v25, 9  ;;  %v4649_v31 = vadd.f32 %v5904_v50, %v3761_v43 }
 0x250   : > { %v5134_v59 = vadd.f32 %v8934_v58, %v4814_v1  ;;  %v4648_v11 = vadd.f32 %v5903_v49, %v3762_v15  ;;  %v4751_v47 = vadd.f32 %v4655_v6, %v4647_v4  ;;  %v3494_v21 = vadd.f32 %v6683_v41, %v8264_v52 }
 0x251   : > { %v5520_v3 = vsel %vm5503_vm10, %v5326_v40, %v5519_v29  ;;  %v6684_v48 = vadd.f32 %v8347_v18, %v8238_v17  ;;  %v4650_v30 = vadd.f32 %v5905_v26, %v3763_v25  ;;  %v4753_v57 = vadd.f32 %v4657_v38, %v4649_v31 }
 0x252   : > { %v5334_v32 = vrot.slane %v5134_v59, %v8241_v16  ;;  %v5521_v63 = vsel %vm5505_vm11, %v5330_v12, %v5520_v3  ;;  %v4752_v45 = vadd.f32 %v4656_v37, %v4648_v11  ;;  %v4815_v8 = vmul.f32 0.25, %v4751_v47 }
 0x253   : > { %v3798_v53 = vcombine.high %v3494_v21, %v3494_v21  ;;  %v3805_v6 = vrot.slane %v3494_v21, %v8174_v19  ;;  %v4754_v9 = vadd.f32 %v4658_v56, %v4650_v30  ;;  %v4817_v51 = vmul.f32 0.25, %v4753_v57 }
 0x254   : > { %v5522_v54 = vsel %vm5507_vm12, %v5334_v32, %v5521_v63  ;;  %v4816_v35 = vmul.f32 0.25, %v4752_v45  ;;  %v3492_v41 = vadd.f32 %v6684_v48, %v8264_v52  ;;  %v5135_v2 = vadd.f32 %v8935_v5, %v4815_v8 }
 0x255   : > { %5568 = vst [vmem:[%s8375_s21 + $0x10] sm:$0xff] %v5522_v54  ;;  %v3812_v17 = vrot.slane %v3798_v53, %v8174_v19  ;;  %v3813_v18 = vcombine.high %v3805_v6, %v3805_v6  ;;  %v5914_v43 = vrot.slane %v3805_v6, 9  ;;  %v4818_v37 = vmul.f32 0.25, %v4754_v9 }
 0x256   : > { %v8936_v38 = vrot.slane %v8935_v5, 1  ;;  %v5137_v1 = vadd.f32 %v8937_v62, %v4817_v51  ;;  %v3764_v20 = vcombine.high %v3492_v41, %v3492_v41  ;;  %v5338_v10 = vrot.slane %v5135_v2, %v8241_v16 }
 0x257   : > { %v3814_v56 = vcombine.high %v3812_v17, %v3812_v17  ;;  %v5915_v7 = vrot.slane %v3813_v18, 9  ;;  %v5916_v33 = vrot.slane %v3812_v17, 9  ;;  %v8938_v25 = vrot.slane %v8937_v62, 1 }
 0x258   : > { %v5136_v15 = vadd.f32 %v8936_v38, %v4816_v35  ;;  %v5346_v4 = vrot.slane %v5137_v1, %v8241_v16  ;;  %v4659_v58 = vadd.f32 %v5914_v43, %v3805_v6  ;;  %v3771_v29 = vrot.slane %v3492_v41, %v8174_v19 }
 0x259   : > { %v5138_v49 = vadd.f32 %v8938_v25, %v4818_v37  ;;  %v5917_v59 = vrot.slane %v3814_v56, 9  ;;  %v4660_v40 = vadd.f32 %v5915_v7, %v3813_v18  ;;  %v4661_v12 = vadd.f32 %v5916_v33, %v3812_v17 }
 0x25a   : > { %v5342_v50 = vrot.slane %v5136_v15, %v8241_v16  ;;  %v3778_v31 = vrot.slane %v3764_v20, %v8174_v19  ;;  %v6685_v47 = vadd.f32 %v8359_v34, %v8368_v22  ;;  %v3779_v21 = vcombine.high %v3771_v29, %v3771_v29 }
 0x25b   : > { %v5350_v26 = vrot.slane %v5138_v49, %v8241_v16  ;;  %v4662_v3 = vadd.f32 %v5917_v59, %v3814_v56  ;;  %v5906_v48 = vrot.slane %v3771_v29, 9  ;;  %v6686_v53 = vadd.f32 %v8364_v46, %v8382_v14 }
 0x25c   : > { %v5523_v11 = vsel %vm5495_vm6, %v5342_v50, %v5338_v10  ;;  %v3780_v63 = vcombine.high %v3778_v31, %v3778_v31  ;;  %v5908_v30 = vrot.slane %v3778_v31, 9  ;;  %v3497_v57 = vadd.f32 %v6685_v47, %v8264_v52  ;;  %v8939_v10 = vld [vmem:[#allocation3_spill] sm:$0xff] }
 0x25d   : > { %v5524_v32 = vsel %vm5497_vm7, %v5346_v4, %v5523_v11  ;;  %v5907_v54 = vrot.slane %v3779_v21, 9  ;;  %v4651_v8 = vadd.f32 %v5906_v48, %v3771_v29  ;;  %v6687_v6 = vadd.f32 %v8370_v28, %v8387_v39 }
 0x25e   : > { %v5525_v45 = vsel %vm5499_vm8, %v5350_v26, %v5524_v32  ;;  %v5909_v34 = vrot.slane %v3780_v63, 9  ;;  %v4653_v22 = vadd.f32 %v5908_v30, %v3778_v31  ;;  %v3849_v9 = vcombine.high %v3497_v57, %v3497_v57 }
 0x25f   : > { %v3856_v35 = vrot.slane %v3497_v57, %v8174_v19  ;;  %v4652_v51 = vadd.f32 %v5907_v54, %v3779_v21  ;;  %v4755_v41 = vadd.f32 %v4659_v58, %v4651_v8  ;;  %v3495_v5 = vadd.f32 %v6686_v53, %v8264_v52 }
 0x260   : > { %v3498_v2 = vadd.f32 %v6687_v6, %v8264_v52  ;;  %v4654_v17 = vadd.f32 %v5909_v34, %v3780_v63  ;;  %v4757_v18 = vadd.f32 %v4661_v12, %v4653_v22  ;;  %v3863_v43 = vrot.slane %v3849_v9, %v8174_v19  ;;  %v8940_v52 = vld [vmem:[#allocation11_spill] sm:$0xff] }
 0x261   : > { %v3864_v37 = vcombine.high %v3856_v35, %v3856_v35  ;;  %v4756_v46 = vadd.f32 %v4660_v40, %v4652_v51  ;;  %v4819_v14 = vmul.f32 0.25, %v4755_v41  ;;  %v5926_v38 = vrot.slane %v3856_v35, 9 }
 0x262   : > { %v3815_v28 = vcombine.high %v3495_v5, %v3495_v5  ;;  %v4758_v39 = vadd.f32 %v4662_v3, %v4654_v17  ;;  %v4821_v15 = vmul.f32 0.25, %v4757_v18  ;;  %v3865_v62 = vcombine.high %v3863_v43, %v3863_v43 }
 0x263   : > { %v5927_v1 = vrot.slane %v3864_v37, 9  ;;  %v4820_v20 = vmul.f32 0.25, %v4756_v46  ;;  %v5139_v56 = vadd.f32 %v8939_v10, %v4819_v14  ;;  %v5928_v7 = vrot.slane %v3863_v43, 9 }
 0x264   : > { %v4671_v33 = vadd.f32 %v5926_v38, %v3856_v35  ;;  %v4822_v25 = vmul.f32 0.25, %v4758_v39  ;;  %v5141_v49 = vadd.f32 %v8940_v52, %v4821_v15  ;;  %v5929_v50 = vrot.slane %v3865_v62, 9 }
 0x265   : > { %v4672_v4 = vadd.f32 %v5927_v1, %v3864_v37  ;;  %v8941_v58 = vrot.slane %v8939_v10, 1  ;;  %v5354_v40 = vrot.slane %v5139_v56, %v8241_v16  ;;  %v4673_v12 = vadd.f32 %v5928_v7, %v3863_v43  ;;  %v8943_v56 = vld [vmem:[#allocation8_spill] sm:$0xff] }
 0x266   : > { %v3822_v29 = vrot.slane %v3495_v5, %v8174_v19  ;;  %v8942_v26 = vrot.slane %v8940_v52, 1  ;;  %v5362_v31 = vrot.slane %v5141_v49, %v8241_v16  ;;  %v4674_v47 = vadd.f32 %v5929_v50, %v3865_v62  ;;  %v8944_v49 = vld [vmem:[#allocation2_spill] sm:$0xff] }
 0x267   : > { %v5140_v59 = vadd.f32 %v8941_v58, %v4820_v20  ;;  %v3829_v32 = vrot.slane %v3815_v28, %v8174_v19  ;;  %v5526_v21 = vsel %vm5501_vm9, %v5354_v40, %v5525_v45  ;;  %v3866_v8 = vcombine.high %v3498_v2, %v3498_v2 }
 0x268   : > { %v5142_v11 = vadd.f32 %v8942_v26, %v4822_v25  ;;  %v3830_v48 = vcombine.high %v3822_v29, %v3822_v29  ;;  %v5918_v63 = vrot.slane %v3822_v29, 9  ;;  %v3873_v22 = vrot.slane %v3498_v2, %v8174_v19 }
 0x269   : > { %v5358_v3 = vrot.slane %v5140_v59, %v8241_v16  ;;  %v3831_v57 = vcombine.high %v3829_v32, %v3829_v32  ;;  %v5920_v54 = vrot.slane %v3829_v32, 9  ;;  %v3880_v45 = vrot.slane %v3866_v8, %v8174_v19 }
 0x26a   : > { %v5366_v30 = vrot.slane %v5142_v11, %v8241_v16  ;;  %v5919_v6 = vrot.slane %v3830_v48, 9  ;;  %v4663_v34 = vadd.f32 %v5918_v63, %v3822_v29  ;;  %v3881_v18 = vcombine.high %v3873_v22, %v3873_v22 }
 0x26b   : > { %v5527_v53 = vsel %vm5503_vm10, %v5358_v3, %v5526_v21  ;;  %v5921_v35 = vrot.slane %v3831_v57, 9  ;;  %v4665_v51 = vadd.f32 %v5920_v54, %v3829_v32  ;;  %v3882_v46 = vcombine.high %v3880_v45, %v3880_v45  ;;  %v8947_v32 = vld [vmem:[#allocation18_spill] sm:$0xff]  ;;  %v8949_v21 = vld [vmem:[#allocation20_spill] sm:$0xff] }
 0x26c   : > { %v5528_v9 = vsel %vm5505_vm11, %v5362_v31, %v5527_v53  ;;  %v4664_v5 = vadd.f32 %v5919_v6, %v3830_v48  ;;  %v4759_v17 = vadd.f32 %v4671_v33, %v4663_v34  ;;  %v5930_v14 = vrot.slane %v3873_v22, 9 }
 0x26d   : > { %v5529_v41 = vsel %vm5507_vm12, %v5366_v30, %v5528_v9  ;;  %v4666_v43 = vadd.f32 %v5921_v35, %v3831_v57  ;;  %v4761_v37 = vadd.f32 %v4673_v12, %v4665_v51  ;;  %v5931_v39 = vrot.slane %v3881_v18, 9 }
 0x26e   : > { %5569 = vst [vmem:[%s8375_s21 + $0x18] sm:$0xff] %v5529_v41  ;;  %v4760_v38 = vadd.f32 %v4672_v4, %v4664_v5  ;;  %v4823_v28 = vmul.f32 0.25, %v4759_v17  ;;  %v5932_v2 = vrot.slane %v3880_v45, 9  ;;  %v5933_v1 = vrot.slane %v3882_v46, 9 }
 0x26f   : > { %v4762_v15 = vadd.f32 %v4674_v47, %v4666_v43  ;;  %v4825_v62 = vmul.f32 0.25, %v4761_v37  ;;  %v4675_v20 = vadd.f32 %v5930_v14, %v3873_v22  ;;  %v4676_v25 = vadd.f32 %v5931_v39, %v3881_v18 }
 0x270   : > { %v4824_v10 = vmul.f32 0.25, %v4760_v38  ;;  %v5143_v7 = vadd.f32 %v8943_v56, %v4823_v28  ;;  %v4677_v52 = vadd.f32 %v5932_v2, %v3880_v45  ;;  %v4678_v58 = vadd.f32 %v5933_v1, %v3882_v46 }
 0x271   : > { %v4826_v33 = vmul.f32 0.25, %v4762_v15  ;;  %v5145_v50 = vadd.f32 %v8944_v49, %v4825_v62  ;;  %v6688_v59 = vadd.f32 %v8384_v27, %v8391_v23  ;;  %v8945_v4 = vrot.slane %v8943_v56, 1  ;;  %v8600_v27 = vld [vmem:[%s8789_s2] ss:$0 sm:$0xff] }
 0x272   : > { %v5370_v12 = vrot.slane %v5143_v7, %v8241_v16  ;;  %v6689_v29 = vadd.f32 %v8397_v42, %v8405_v60  ;;  %v6690_v26 = vadd.f32 %v8399_v0, %v8411_v55  ;;  %v8946_v11 = vrot.slane %v8944_v49, 1  ;;  %v8948_v55 = vld [vmem:[#allocation24_spill] sm:$0xff] }
 0x273   : > { %v5144_v40 = vadd.f32 %v8945_v4, %v4824_v10  ;;  %v5378_v47 = vrot.slane %v5145_v50, %v8241_v16  ;;  %v3496_v23 = vadd.f32 %v8600_v27, %v6688_v59  ;;  %v8605_v3 = vrot.slane %v8947_v32, %v8174_v19 }
 0x274   : > { %v5146_v31 = vadd.f32 %v8946_v11, %v4826_v33  ;;  %v3501_v0 = vadd.f32 %v8600_v27, %v6689_v29  ;;  %v3499_v60 = vadd.f32 %v8600_v27, %v6690_v26  ;;  %v8612_v48 = vadd.f32 %v8949_v21, %v8948_v55 }
 0x275   : > { %v5374_v42 = vrot.slane %v5144_v40, %v8241_v16  ;;  %v3832_v30 = vcombine.high %v3496_v23, %v3496_v23  ;;  %v3839_v57 = vrot.slane %v3496_v23, %v8174_v19  ;;  %v8618_v54 = vcombine.high %v8605_v3, %v8605_v3  ;;  %v8950_v23 = vld [vmem:[#allocation14_spill] sm:$0xff] }
 0x276   : > { %v5382_v63 = vrot.slane %v5146_v31, %v8241_v16  ;;  %v3917_v53 = vcombine.high %v3501_v0, %v3501_v0  ;;  %v3924_v6 = vrot.slane %v3501_v0, %v8174_v19  ;;  %v3883_v34 = vcombine.high %v3499_v60, %v3499_v60 }
 0x277   : > { %v5530_v8 = vsel %vm5495_vm6, %v5374_v42, %v5370_v12  ;;  %v3846_v9 = vrot.slane %v3832_v30, %v8174_v19  ;;  %v3847_v35 = vcombine.high %v3839_v57, %v3839_v57  ;;  %v5922_v51 = vrot.slane %v3839_v57, 9 }
 0x278   : > { %v5531_v22 = vsel %vm5497_vm7, %v5378_v47, %v5530_v8  ;;  %v3931_v41 = vrot.slane %v3917_v53, %v8174_v19  ;;  %v3932_v5 = vcombine.high %v3924_v6, %v3924_v6  ;;  %v5942_v17 = vrot.slane %v3924_v6, 9 }
 0x279   : > { %v5532_v45 = vsel %vm5499_vm8, %v5382_v63, %v5531_v22  ;;  %v3848_v18 = vcombine.high %v3846_v9, %v3846_v9  ;;  %v5923_v43 = vrot.slane %v3847_v35, 9  ;;  %v5924_v37 = vrot.slane %v3846_v9, 9 }
 0x27a   : > { %v4667_v46 = vadd.f32 %v5922_v51, %v3839_v57  ;;  %v3933_v14 = vcombine.high %v3931_v41, %v3931_v41  ;;  %v5943_v38 = vrot.slane %v3932_v5, 9  ;;  %v5944_v28 = vrot.slane %v3931_v41, 9 }
 0x27b   : > { %v4687_v39 = vadd.f32 %v5942_v17, %v3924_v6  ;;  %v5925_v2 = vrot.slane %v3848_v18, 9  ;;  %v4668_v15 = vadd.f32 %v5923_v43, %v3847_v35  ;;  %v4669_v62 = vadd.f32 %v5924_v37, %v3846_v9 }
 0x27c   : > { %v4763_v1 = vadd.f32 %v4675_v20, %v4667_v46  ;;  %v5945_v10 = vrot.slane %v3933_v14, 9  ;;  %v4688_v56 = vadd.f32 %v5943_v38, %v3932_v5  ;;  %v4689_v7 = vadd.f32 %v5944_v28, %v3931_v41 }
 0x27d   : > { %v3890_v33 = vrot.slane %v3499_v60, %v8174_v19  ;;  %v4670_v49 = vadd.f32 %v5925_v2, %v3848_v18  ;;  %v4764_v50 = vadd.f32 %v4676_v25, %v4668_v15  ;;  %v4765_v59 = vadd.f32 %v4677_v52, %v4669_v62  ;;  %v8952_v52 = vld [vmem:[#allocation16_spill] sm:$0xff] }
 0x27e   : > { %v4827_v4 = vmul.f32 0.25, %v4763_v1  ;;  %v4690_v40 = vadd.f32 %v5945_v10, %v3933_v14  ;;  %v3897_v12 = vrot.slane %v3883_v34, %v8174_v19  ;;  %v8951_v60 = vrot.slane %v8950_v23, 1  ;;  %v8954_v1 = vld [vmem:[#allocation4_spill] sm:$0xff]  ;;  %v8955_v10 = vld [vmem:[#allocation22_spill] sm:$0xff] }
 0x27f   : > { %v3898_v29 = vcombine.high %v3890_v33, %v3890_v33  ;;  %v5934_v26 = vrot.slane %v3890_v33, 9  ;;  %v4766_v11 = vadd.f32 %v4678_v58, %v4670_v49  ;;  %v4828_v31 = vmul.f32 0.25, %v4764_v50 }
 0x280   : > { %v4829_v47 = vmul.f32 0.25, %v4765_v59  ;;  %v5147_v42 = vadd.f32 %v8950_v23, %v4827_v4  ;;  %v3899_v20 = vcombine.high %v3897_v12, %v3897_v12  ;;  %v5936_v55 = vrot.slane %v3897_v12, 9 }
 0x281   : > { %v5935_v0 = vrot.slane %v3898_v29, 9  ;;  %v4679_v21 = vadd.f32 %v5934_v26, %v3890_v33  ;;  %v4830_v63 = vmul.f32 0.25, %v4766_v11  ;;  %v5148_v25 = vadd.f32 %v8951_v60, %v4828_v31 }
 0x282   : > { %v5149_v30 = vadd.f32 %v8952_v52, %v4829_v47  ;;  %v5386_v57 = vrot.slane %v5147_v42, %v8241_v16  ;;  %v5937_v8 = vrot.slane %v3899_v20, 9  ;;  %v4681_v6 = vadd.f32 %v5936_v55, %v3897_v12 }
 0x283   : > { %v4680_v53 = vadd.f32 %v5935_v0, %v3898_v29  ;;  %v4767_v58 = vadd.f32 %v4687_v39, %v4679_v21  ;;  %v8953_v34 = vrot.slane %v8952_v52, 1  ;;  %v5390_v9 = vrot.slane %v5148_v25, %v8241_v16 }
 0x284   : > { %v5394_v35 = vrot.slane %v5149_v30, %v8241_v16  ;;  %v5533_v51 = vsel %vm5501_vm9, %v5386_v57, %v5532_v45  ;;  %v4682_v41 = vadd.f32 %v5937_v8, %v3899_v20  ;;  %v4769_v17 = vadd.f32 %v4689_v7, %v4681_v6 }
 0x285   : > { %v5150_v22 = vadd.f32 %v8953_v34, %v4830_v63  ;;  %v4768_v5 = vadd.f32 %v4688_v56, %v4680_v53  ;;  %v4831_v18 = vmul.f32 0.25, %v4767_v58  ;;  %v5534_v37 = vsel %vm5503_vm10, %v5390_v9, %v5533_v51 }
 0x286   : > { %v5035_v46 = vrot.slane %v8605_v3, 1  ;;  %v5036_v14 = vrot.slane %v8618_v54, 1  ;;  %v5535_v38 = vsel %vm5505_vm11, %v5394_v35, %v5534_v37  ;;  %v4770_v28 = vadd.f32 %v4690_v40, %v4682_v41  ;;  %v8666_v35 = vld [vmem:[%s8158_s11 + $0x18] sm:$0xff]  }
 0x287   : > { %v5398_v43 = vrot.slane %v5150_v22, %v8241_v16  ;;  %v4832_v39 = vmul.f32 0.25, %v4768_v5  ;;  %v4833_v2 = vmul.f32 0.25, %v4769_v17  ;;  %v5151_v15 = vadd.f32 %v8605_v3, %v4831_v18  ;;  %v8956_v17 = vld [vmem:[#allocation10_spill] sm:$0xff] }
 0x288   : > { %v3502_v62 = vadd.f32 %v8600_v27, %v8612_v48  ;;  %v6692_v56 = vadd.f32 %v8955_v10, %v8954_v1  ;;  %v4834_v7 = vmul.f32 0.25, %v4770_v28  ;;  %v4964_v50 = vcombine.high %v8947_v32, %v8947_v32  ;;  %v8957_v18 = vld [vmem:[#allocation6_spill] sm:$0xff] }
 0x289   : > { %v5536_v45 = vsel %vm5507_vm12, %v5398_v43, %v5535_v38  ;;  %v5152_v33 = vadd.f32 %v5035_v46, %v4832_v39  ;;  %v5153_v49 = vadd.f32 %v8618_v54, %v4833_v2  ;;  %v5402_v59 = vrot.slane %v5151_v15, %v8241_v16  ;;  %v8958_v39 = vld [vmem:[#allocation13_spill] sm:$0xff] }
 0x28a   : > { %5570 = vst [vmem:[%s8375_s21 + $0x20] sm:$0xff] %v5536_v45  ;;  %v3934_v4 = vcombine.high %v3502_v62, %v3502_v62  ;;  %v3941_v40 = vrot.slane %v3502_v62, %v8174_v19  ;;  %v3500_v3 = vadd.f32 %v8600_v27, %v6692_v56  ;;  %v5154_v12 = vadd.f32 %v5036_v14, %v4834_v7  ;;  %v8959_v2 = vld [vmem:[#allocation9_spill] sm:$0xff]  ;;  %v8960_v62 = vld [vmem:[#allocation12_spill] sm:$0xff] }
 0x28b   : > { %v5406_v48 = vrot.slane %v5152_v33, %v8241_v16  ;;  %v5410_v29 = vrot.slane %v5153_v49, %v8241_v16  ;;  %v4978_v26 = vrot.slane %v4964_v50, %v8174_v19  ;;  %v6693_v43 = vadd.f32 %v8957_v18, %v8956_v17 }
 0x28c   : > { %v3948_v11 = vrot.slane %v3934_v4, %v8174_v19  ;;  %v3949_v54 = vcombine.high %v3941_v40, %v3941_v40  ;;  %v5946_v31 = vrot.slane %v3941_v40, 9  ;;  %v3900_v47 = vcombine.high %v3500_v3, %v3500_v3 }
 0x28d   : > { %v5414_v32 = vrot.slane %v5154_v12, %v8241_v16  ;;  %v5537_v23 = vsel %vm5495_vm6, %v5406_v48, %v5402_v59  ;;  %v3907_v42 = vrot.slane %v3500_v3, %v8174_v19  ;;  %v4980_v20 = vcombine.high %v4978_v26, %v4978_v26 }
 0x28e   : > { %v5538_v0 = vsel %vm5497_vm7, %v5410_v29, %v5537_v23  ;;  %v3950_v55 = vcombine.high %v3948_v11, %v3948_v11  ;;  %v5947_v21 = vrot.slane %v3949_v54, 9  ;;  %v5948_v63 = vrot.slane %v3948_v11, 9 }
 0x28f   : > { %v4691_v60 = vadd.f32 %v5946_v31, %v3941_v40  ;;  %v3914_v25 = vrot.slane %v3900_v47, %v8174_v19  ;;  %v3915_v52 = vcombine.high %v3907_v42, %v3907_v42  ;;  %v5938_v30 = vrot.slane %v3907_v42, 9 }
 0x290   : > { %v5949_v57 = vrot.slane %v3950_v55, 9  ;;  %v4692_v8 = vadd.f32 %v5947_v21, %v3949_v54  ;;  %v4693_v53 = vadd.f32 %v5948_v63, %v3948_v11  ;;  %v5037_v6 = vrot.slane %v4978_v26, 1 }
 0x291   : > { %v3916_v58 = vcombine.high %v3914_v25, %v3914_v25  ;;  %v5939_v34 = vrot.slane %v3915_v52, 9  ;;  %v5940_v22 = vrot.slane %v3914_v25, 9  ;;  %v4683_v9 = vadd.f32 %v5938_v30, %v3907_v42 }
 0x292   : > { %v4694_v51 = vadd.f32 %v5949_v57, %v3950_v55  ;;  %v5038_v41 = vrot.slane %v4980_v20, 1  ;;  %v5539_v5 = vsel %vm5499_vm8, %v5414_v32, %v5538_v0  ;;  %v3505_v28 = vadd.f32 %v8600_v27, %v6693_v43 }
 0x293   : > { %v5941_v37 = vrot.slane %v3916_v58, 9  ;;  %v4684_v46 = vadd.f32 %v5939_v34, %v3915_v52  ;;  %v4685_v14 = vadd.f32 %v5940_v22, %v3914_v25  ;;  %v4771_v38 = vadd.f32 %v4691_v60, %v4683_v9 }
 0x294   : > { %v6694_v45 = vadd.f32 %v8959_v2, %v8958_v39  ;;  %v8675_v15 = vunpack.c.l.bf16 %v8666_v35  ;;  %v6695_v1 = vadd.f32 %v8960_v62, %v8445_v13  ;;  %v3985_v49 = vcombine.high %v3505_v28, %v3505_v28  ;;  %v8961_v39 = vld [vmem:[#allocation15_spill] sm:$0xff] }
 0x295   : > { %v4686_v10 = vadd.f32 %v5941_v37, %v3916_v58  ;;  %v4772_v56 = vadd.f32 %v4692_v8, %v4684_v46  ;;  %v4773_v7 = vadd.f32 %v4693_v53, %v4685_v14  ;;  %v4835_v33 = vmul.f32 0.25, %v4771_v38 }
 0x296   : > { %v3992_v50 = vrot.slane %v3505_v28, %v8174_v19  ;;  %v3503_v59 = vadd.f32 %v8600_v27, %v6694_v45  ;;  %v8683_v4 = vrot.slane %v8675_v15, %v8174_v19  ;;  %v3999_v29 = vrot.slane %v3985_v49, %v8174_v19 }
 0x297   : > { %v4774_v40 = vadd.f32 %v4694_v51, %v4686_v10  ;;  %v4836_v3 = vmul.f32 0.25, %v4772_v56  ;;  %v4837_v12 = vmul.f32 0.25, %v4773_v7  ;;  %v5155_v48 = vadd.f32 %v4978_v26, %v4835_v33 }
 0x298   : > { %v4000_v13 = vcombine.high %v3992_v50, %v3992_v50  ;;  %v5958_v11 = vrot.slane %v3992_v50, 9  ;;  %v3951_v54 = vcombine.high %v3503_v59, %v3503_v59  ;;  %v4001_v42 = vcombine.high %v3999_v29, %v3999_v29 }
 0x299   : > { %v4838_v31 = vmul.f32 0.25, %v4774_v40  ;;  %v5156_v47 = vadd.f32 %v5037_v6, %v4836_v3  ;;  %v5157_v32 = vadd.f32 %v4980_v20, %v4837_v12  ;;  %v5418_v23 = vrot.slane %v5155_v48, %v8241_v16 }
 0x29a   : > { %v5959_v0 = vrot.slane %v4000_v13, 9  ;;  %v5960_v55 = vrot.slane %v3999_v29, 9  ;;  %v4703_v21 = vadd.f32 %v5958_v11, %v3992_v50  ;;  %v5961_v52 = vrot.slane %v4001_v42, 9 }
 0x29b   : > { %v5158_v63 = vadd.f32 %v5038_v41, %v4838_v31  ;;  %v5422_v60 = vrot.slane %v5156_v47, %v8241_v16  ;;  %v5426_v25 = vrot.slane %v5157_v32, %v8241_v16  ;;  %v5540_v26 = vsel %vm5501_vm9, %v5418_v23, %v5539_v5 }
 0x29c   : > { %v4704_v30 = vadd.f32 %v5959_v0, %v4000_v13  ;;  %v4705_v57 = vadd.f32 %v5960_v55, %v3999_v29  ;;  %v3958_v8 = vrot.slane %v3503_v59, %v8174_v19  ;;  %v3965_v6 = vrot.slane %v3951_v54, %v8174_v19 }
 0x29d   : > { %v5430_v20 = vrot.slane %v5158_v63, %v8241_v16  ;;  %v5541_v53 = vsel %vm5503_vm10, %v5422_v60, %v5540_v26  ;;  %v4996_v58 = vcombine.high %v8683_v4, %v8683_v4  ;;  %v4706_v22 = vadd.f32 %v5961_v52, %v4001_v42 }
 0x29e   : > { %v5542_v34 = vsel %vm5505_vm11, %v5426_v25, %v5541_v53  ;;  %v3966_v9 = vcombine.high %v3958_v8, %v3958_v8  ;;  %v5950_v51 = vrot.slane %v3958_v8, 9  ;;  %v3967_v5 = vcombine.high %v3965_v6, %v3965_v6 }
 0x29f   : > { %v5543_v41 = vsel %vm5507_vm12, %v5430_v20, %v5542_v34  ;;  %v5952_v17 = vrot.slane %v3965_v6, 9  ;;  %v5039_v18 = vrot.slane %v8683_v4, 1  ;;  %v5040_v46 = vrot.slane %v4996_v58, 1 }
 0x2a0   : > { %5571 = vst [vmem:[%s8375_s21 + $0x28] sm:$0xff] %v5543_v41  ;;  %v5951_v43 = vrot.slane %v3966_v9, 9  ;;  %v4695_v37 = vadd.f32 %v5950_v51, %v3958_v8  ;;  %v3506_v14 = vadd.f32 %v8600_v27, %v6695_v1  ;;  %v5953_v38 = vrot.slane %v3967_v5, 9 }
 0x2a1   : > { %v4697_v28 = vadd.f32 %v5952_v17, %v3965_v6  ;;  %v6696_v2 = vadd.f32 %v8961_v39, %v8447_v44  ;;  %v4981_v45 = vcombine.high %v8675_v15, %v8675_v15 }
 0x2a2   : > { %v4696_v62 = vadd.f32 %v5951_v43, %v3966_v9  ;;  %v4775_v10 = vadd.f32 %v4703_v21, %v4695_v37  ;;  %v4002_v56 = vcombine.high %v3506_v14, %v3506_v14  ;;  %v4009_v7 = vrot.slane %v3506_v14, %v8174_v19  ;;  %v8962_v14 = vld [vmem:[#allocation21_spill] sm:$0xff] }
 0x2a3   : > { %v4698_v33 = vadd.f32 %v5953_v38, %v3967_v5  ;;  %v4777_v49 = vadd.f32 %v4705_v57, %v4697_v28  ;;  %v3504_v50 = vadd.f32 %v8600_v27, %v6696_v2  ;;  %v8708_v59 = vrot.slane %v4981_v45, %v8174_v19  ;;  %v8963_v38 = vld [vmem:[#allocation17_spill] sm:$0xff] }
 0x2a4   : > { %v4776_v1 = vadd.f32 %v4704_v30, %v4696_v62  ;;  %v4839_v40 = vmul.f32 0.25, %v4775_v10  ;;  %v4016_v3 = vrot.slane %v4002_v56, %v8174_v19  ;;  %v4017_v44 = vcombine.high %v4009_v7, %v4009_v7 }
 0x2a5   : > { %v4778_v12 = vadd.f32 %v4706_v22, %v4698_v33  ;;  %v4841_v48 = vmul.f32 0.25, %v4777_v49  ;;  %v5962_v15 = vrot.slane %v4009_v7, 9  ;;  %v3968_v29 = vcombine.high %v3504_v50, %v3504_v50  ;;  %v8964_v33 = vld [vmem:[#allocation23_spill] sm:$0xff] }
 0x2a6   : > { %v4840_v13 = vmul.f32 0.25, %v4776_v1  ;;  %v5159_v11 = vadd.f32 %v8683_v4, %v4839_v40  ;;  %v4018_v54 = vcombine.high %v4016_v3, %v4016_v3  ;;  %v5963_v31 = vrot.slane %v4017_v44, 9 }
 0x2a7   : > { %v4842_v47 = vmul.f32 0.25, %v4778_v12  ;;  %v5161_v32 = vadd.f32 %v4996_v58, %v4841_v48  ;;  %v5964_v23 = vrot.slane %v4016_v3, 9  ;;  %v4707_v42 = vadd.f32 %v5962_v15, %v4009_v7 }
 0x2a8   : > { %v5160_v0 = vadd.f32 %v5039_v18, %v4840_v13  ;;  %v5434_v55 = vrot.slane %v5159_v11, %v8241_v16  ;;  %v5965_v21 = vrot.slane %v4018_v54, 9  ;;  %v4708_v63 = vadd.f32 %v5963_v31, %v4017_v44 }
 0x2a9   : > { %v5162_v60 = vadd.f32 %v5040_v46, %v4842_v47  ;;  %v5442_v25 = vrot.slane %v5161_v32, %v8241_v16  ;;  %v4709_v26 = vadd.f32 %v5964_v23, %v4016_v3  ;;  %v3975_v52 = vrot.slane %v3504_v50, %v8174_v19 }
 0x2aa   : > { %v5438_v30 = vrot.slane %v5160_v0, %v8241_v16  ;;  %v4710_v4 = vadd.f32 %v5965_v21, %v4018_v54  ;;  %v3982_v57 = vrot.slane %v3968_v29, %v8174_v19  ;;  %v4997_v8 = vcombine.high %v8708_v59, %v8708_v59 }
 0x2ab   : > { %v5446_v20 = vrot.slane %v5162_v60, %v8241_v16  ;;  %v3983_v53 = vcombine.high %v3975_v52, %v3975_v52  ;;  %v5954_v6 = vrot.slane %v3975_v52, 9  ;;  %v5041_v58 = vrot.slane %v8708_v59, 1 }
 0x2ac   : > { %v5544_v34 = vsel %vm5495_vm6, %v5438_v30, %v5434_v55  ;;  %v3984_v22 = vcombine.high %v3982_v57, %v3982_v57  ;;  %v5956_v9 = vrot.slane %v3982_v57, 9  ;;  %v5042_v51 = vrot.slane %v4997_v8, 1 }
 0x2ad   : > { %v5545_v41 = vsel %vm5497_vm7, %v5442_v25, %v5544_v34  ;;  %v5955_v5 = vrot.slane %v3983_v53, 9  ;;  %v4699_v17 = vadd.f32 %v5954_v6, %v3975_v52  ;;  %v6697_v18 = vadd.f32 %v8460_v36, %v8469_v24  ;;  %v8965_v36 = vld [vmem:[#allocation19_spill] sm:$0xff] }
 0x2ae   : > { %v5957_v43 = vrot.slane %v3984_v22, 9  ;;  %v4701_v37 = vadd.f32 %v5956_v9, %v3982_v57  ;;  %v5546_v46 = vsel %vm5499_vm8, %v5446_v20, %v5545_v41  ;;  %v6698_v28 = vadd.f32 %v8963_v38, %v8962_v14 }
 0x2af   : > { %v4700_v39 = vadd.f32 %v5955_v5, %v3983_v53  ;;  %v4779_v2 = vadd.f32 %v4707_v42, %v4699_v17  ;;  %v3509_v45 = vadd.f32 %v8600_v27, %v6697_v18  ;;  %v8730_v62 = vunpack.c.h.bf16 %v8666_v35 }
 0x2b0   : > { %v4702_v10 = vadd.f32 %v5957_v43, %v3984_v22  ;;  %v4781_v56 = vadd.f32 %v4709_v26, %v4701_v37  ;;  %v3507_v7 = vadd.f32 %v8600_v27, %v6698_v28  ;;  %v6699_v24 = vadd.f32 %v8965_v36, %v8964_v33 }
 0x2b1   : > { %v4780_v49 = vadd.f32 %v4708_v63, %v4700_v39  ;;  %v4843_v50 = vmul.f32 0.25, %v4779_v2  ;;  %v4053_v1 = vcombine.high %v3509_v45, %v3509_v45  ;;  %v4060_v40 = vrot.slane %v3509_v45, %v8174_v19 }
 0x2b2   : > { %v4782_v3 = vadd.f32 %v4710_v4, %v4702_v10  ;;  %v4845_v44 = vmul.f32 0.25, %v4781_v56  ;;  %v4019_v12 = vcombine.high %v3507_v7, %v3507_v7  ;;  %v4026_v48 = vrot.slane %v3507_v7, %v8174_v19  ;;  %v8966_v7 = vld [vmem:[#allocation25_spill] sm:$0xff] }
 0x2b3   : > { %v4844_v15 = vmul.f32 0.25, %v4780_v49  ;;  %v5163_v35 = vadd.f32 %v8708_v59, %v4843_v50  ;;  %v4067_v29 = vrot.slane %v4053_v1, %v8174_v19  ;;  %v4068_v13 = vcombine.high %v4060_v40, %v4060_v40 }
 0x2b4   : > { %v4846_v11 = vmul.f32 0.25, %v4782_v3  ;;  %v5165_v54 = vadd.f32 %v4997_v8, %v4845_v44  ;;  %v5974_v31 = vrot.slane %v4060_v40, 9  ;;  %v4033_v47 = vrot.slane %v4019_v12, %v8174_v19 }
 0x2b5   : > { %v5164_v32 = vadd.f32 %v5041_v58, %v4844_v15  ;;  %v5450_v23 = vrot.slane %v5163_v35, %v8241_v16  ;;  %v4069_v42 = vcombine.high %v4067_v29, %v4067_v29  ;;  %v5975_v0 = vrot.slane %v4068_v13, 9 }
 0x2b6   : > { %v5166_v55 = vadd.f32 %v5042_v51, %v4846_v11  ;;  %v5458_v21 = vrot.slane %v5165_v54, %v8241_v16  ;;  %v5976_v63 = vrot.slane %v4067_v29, 9  ;;  %v4719_v60 = vadd.f32 %v5974_v31, %v4060_v40 }
 0x2b7   : > { %v5454_v59 = vrot.slane %v5164_v32, %v8241_v16  ;;  %v5547_v25 = vsel %vm5501_vm9, %v5450_v23, %v5546_v46  ;;  %v5977_v26 = vrot.slane %v4069_v42, 9  ;;  %v4720_v52 = vadd.f32 %v5975_v0, %v4068_v13 }
 0x2b8   : > { %v5462_v30 = vrot.slane %v5166_v55, %v8241_v16  ;;  %v4721_v4 = vadd.f32 %v5976_v63, %v4067_v29  ;;  %v4034_v57 = vcombine.high %v4026_v48, %v4026_v48  ;;  %v4035_v8 = vcombine.high %v4033_v47, %v4033_v47 }
 0x2b9   : > { %v5548_v20 = vsel %vm5503_vm10, %v5454_v59, %v5547_v25  ;;  %v4722_v53 = vadd.f32 %v5977_v26, %v4069_v42  ;;  %v5966_v6 = vrot.slane %v4026_v48, 9  ;;  %v5968_v58 = vrot.slane %v4033_v47, 9 }
 0x2ba   : > { %v5549_v34 = vsel %vm5505_vm11, %v5458_v21, %v5548_v20  ;;  %v5967_v22 = vrot.slane %v4034_v57, 9  ;;  %v5969_v9 = vrot.slane %v4035_v8, 9  ;;  %v5005_v51 = vrot.slane %v8730_v62, %v8174_v19 }
 0x2bb   : > { %v5550_v41 = vsel %vm5507_vm12, %v5462_v30, %v5549_v34  ;;  %v4711_v5 = vadd.f32 %v5966_v6, %v4026_v48  ;;  %v4713_v17 = vadd.f32 %v5968_v58, %v4033_v47  ;;  %v3510_v18 = vadd.f32 %v8600_v27, %v6699_v24 }
 0x2bc   : > { %5572 = vst [vmem:[%s8375_s21 + $0x30] sm:$0xff] %v5550_v41  ;;  %v4712_v43 = vadd.f32 %v5967_v22, %v4034_v57  ;;  %v4714_v37 = vadd.f32 %v5969_v9, %v4035_v8  ;;  %v5013_v46 = vcombine.high %v5005_v51, %v5005_v51  ;;  %v5043_v14 = vrot.slane %v5005_v51, 1 }
 0x2bd   : > { %v4783_v38 = vadd.f32 %v4719_v60, %v4711_v5  ;;  %v4785_v28 = vadd.f32 %v4721_v4, %v4713_v17  ;;  %v4070_v39 = vcombine.high %v3510_v18, %v3510_v18  ;;  %v4077_v2 = vrot.slane %v3510_v18, %v8174_v19 }
 0x2be   : > { %v4784_v45 = vadd.f32 %v4720_v52, %v4712_v43  ;;  %v4786_v10 = vadd.f32 %v4722_v53, %v4714_v37  ;;  %v5044_v56 = vrot.slane %v5013_v46, 1  ;;  %v6700_v33 = vadd.f32 %v8966_v7, %v8484_v61 }
 0x2bf   : > { %v4847_v36 = vmul.f32 0.25, %v4783_v38  ;;  %v4849_v49 = vmul.f32 0.25, %v4785_v28  ;;  %v4084_v24 = vrot.slane %v4070_v39, %v8174_v19  ;;  %v4085_v12 = vcombine.high %v4077_v2, %v4077_v2 }
 0x2c0   : > { %v4848_v50 = vmul.f32 0.25, %v4784_v45  ;;  %v4850_v1 = vmul.f32 0.25, %v4786_v10  ;;  %v3508_v40 = vadd.f32 %v8600_v27, %v6700_v33  ;;  %v5978_v29 = vrot.slane %v4077_v2, 9 }
 0x2c1   : > { %v5167_v3 = vadd.f32 %v5005_v51, %v4847_v36  ;;  %v5169_v44 = vadd.f32 %v5013_v46, %v4849_v49  ;;  %v4086_v35 = vcombine.high %v4084_v24, %v4084_v24  ;;  %v5980_v11 = vrot.slane %v4084_v24, 9 }
 0x2c2   : > { %v5168_v48 = vadd.f32 %v5043_v14, %v4848_v50  ;;  %v5170_v15 = vadd.f32 %v5044_v56, %v4850_v1  ;;  %v4036_v47 = vcombine.high %v3508_v40, %v3508_v40  ;;  %v5979_v32 = vrot.slane %v4085_v12, 9 }
 0x2c3   : > { %v5474_v13 = vrot.slane %v5169_v44, %v8241_v16  ;;  %v5466_v61 = vrot.slane %v5167_v3, %v8241_v16  ;;  %v4043_v27 = vrot.slane %v3508_v40, %v8174_v19  ;;  %v4998_v23 = vcombine.high %v8730_v62, %v8730_v62 }
 0x2c4   : > { %v5470_v54 = vrot.slane %v5168_v48, %v8241_v16  ;;  %v5478_v31 = vrot.slane %v5170_v15, %v8241_v16  ;;  %v5981_v0 = vrot.slane %v4086_v35, 9  ;;  %v4723_v55 = vadd.f32 %v5978_v29, %v4077_v2 }
 0x2c5   : > { %v4050_v21 = vrot.slane %v4036_v47, %v8174_v19  ;;  %v4051_v60 = vcombine.high %v4043_v27, %v4043_v27  ;;  %v5970_v59 = vrot.slane %v4043_v27, 9  ;;  %v5012_v25 = vrot.slane %v4998_v23, %v8174_v19 }
 0x2c6   : > { %v5551_v42 = vsel %vm5495_vm6, %v5470_v54, %v5466_v61  ;;  %v4725_v26 = vadd.f32 %v5980_v11, %v4084_v24  ;;  %v4724_v57 = vadd.f32 %v5979_v32, %v4085_v12  ;;  %v4726_v20 = vadd.f32 %v5981_v0, %v4086_v35 }
 0x2c7   : > { %v5552_v63 = vsel %vm5497_vm7, %v5474_v13, %v5551_v42  ;;  %v4052_v52 = vcombine.high %v4050_v21, %v4050_v21  ;;  %v5972_v30 = vrot.slane %v4050_v21, 9  ;;  %v5971_v8 = vrot.slane %v4051_v60, 9 }
 0x2c8   : > { %v5553_v4 = vsel %vm5499_vm8, %v5478_v31, %v5552_v63  ;;  %v4715_v62 = vadd.f32 %v5970_v59, %v4043_v27  ;;  %v5014_v58 = vcombine.high %v5012_v25, %v5012_v25  ;;  %v5045_v17 = vrot.slane %v5012_v25, 1 }
 0x2c9   : > { %v5973_v53 = vrot.slane %v4052_v52, 9  ;;  %v4717_v6 = vadd.f32 %v5972_v30, %v4050_v21  ;;  %v4716_v34 = vadd.f32 %v5971_v8, %v4051_v60 }
 0x2ca   : > { %v4787_v22 = vadd.f32 %v4723_v55, %v4715_v62  ;;  %v5046_v43 = vrot.slane %v5014_v58, 1 }
 0x2cb   : > { %v4718_v9 = vadd.f32 %v5973_v53, %v4052_v52  ;;  %v4789_v51 = vadd.f32 %v4725_v26, %v4717_v6  ;;  %v4788_v41 = vadd.f32 %v4724_v57, %v4716_v34 }
 0x2cc   : > { %v4851_v5 = vmul.f32 0.25, %v4787_v22 }
 0x2cd   : > { %v4790_v19 = vadd.f32 %v4726_v20, %v4718_v9  ;;  %v4853_v18 = vmul.f32 0.25, %v4789_v51  ;;  %v4852_v37 = vmul.f32 0.25, %v4788_v41 }
 0x2ce   : > { %v5171_v46 = vadd.f32 %v5012_v25, %v4851_v5 }
 0x2cf   : > { %v4854_v14 = vmul.f32 0.25, %v4790_v19  ;;  %v5173_v38 = vadd.f32 %v5014_v58, %v4853_v18  ;;  %v5172_v28 = vadd.f32 %v5045_v17, %v4852_v37 }
 0x2d0   : > { %v5482_v39 = vrot.slane %v5171_v46, %v8241_v16 }
 0x2d1   : > { %v5174_v2 = vadd.f32 %v5046_v43, %v4854_v14  ;;  %v5486_v45 = vrot.slane %v5172_v28, %v8241_v16  ;;  %v5490_v56 = vrot.slane %v5173_v38, %v8241_v16 }
 0x2d2   : > { %v5554_v10 = vsel %vm5501_vm9, %v5482_v39, %v5553_v4 }
 0x2d3   : > { %v5494_v7 = vrot.slane %v5174_v2, %v8241_v16  ;;  %v5555_v33 = vsel %vm5503_vm10, %v5486_v45, %v5554_v10 }
 0x2d4   : > { %v5556_v36 = vsel %vm5505_vm11, %v5490_v56, %v5555_v33 }
 0x2d5   : > { %v5557_v49 = vsel %vm5507_vm12, %v5494_v7, %v5556_v36 }
 0x2d6   : > { %5573 = vst [vmem:[%s8375_s21 + $0x38] sm:$0xff] %v5557_v49 }
 0x2d7 PF: > { %s14_s17 = sadd.s32 1, %s7055_s17   ;;  %s8967_s15 = smov %s7051_s16 }
 0x2d8   : > { %p11_p5 = scmp.ge.s32.totalorder %s14_s17, 4   ;;  %s8968_s16 = smov %s8970_s18 }
 0x2da   :  { %13 = sbr.rel (!%p11_p5) target bundleno = 2 (0x2), region = 75 }

</bundles_post_ra>
